<compile_context>
chip_gen: v6e
topology: v6e:2x2x1
jax: 0.10.0
libtpu: 0.0.40
codegen_flags: <defaults>
</compile_context>

<pallas_src>
import functools

import jax
import jax.numpy as jnp
from jax.experimental import pallas as pl
from jax.experimental.pallas import tpu as pltpu

_VMEM = pl.BlockSpec(memory_space=pltpu.MemorySpace.VMEM)

# rows of the packed per-layer vector tensor (padded to 4*C lanes, sliced [:C] / [:4C] in-kernel)
NUM_VEC = 10
(ROW_LN1_G, ROW_LN1_B, ROW_Q_B, ROW_K_B, ROW_V_B,
 ROW_PROJ_B, ROW_LN2_G, ROW_LN2_B, ROW_FC1_B, ROW_FC2_B) = range(NUM_VEC)


# ----------------------------------------------------------------------------- in-kernel helpers
def _ln(x, g, b, eps=1e-5):
    """Row-wise LayerNorm (PyTorch nn.LayerNorm default eps=1e-5)."""
    mu = jnp.mean(x, axis=-1, keepdims=True)
    c = x - mu
    var = jnp.mean(c * c, axis=-1, keepdims=True)
    return c * jax.lax.rsqrt(var + eps) * g + b


def _erf(x):
    # Abramowitz & Stegun 7.1.26, |err| <= 1.5e-7 (VPU mul/add + one EUP exp only).
    a1, a2, a3, a4, a5 = 0.254829592, -0.284496736, 1.421413741, -1.453152027, 1.061405429
    p = 0.3275911
    sgn = jnp.where(x >= 0.0, 1.0, -1.0)
    ax = jnp.abs(x)
    t = 1.0 / (1.0 + p * ax)
    poly = ((((a5 * t + a4) * t + a3) * t + a2) * t + a1) * t
    return sgn * (1.0 - poly * jnp.exp(-ax * ax))


def _gelu(x):
    # Exact (erf) GELU, matching timm's nn.GELU default (within the erf approx tolerance).
    return 0.5 * x * (1.0 + _erf(x * 0.7071067811865476))


# ----------------------------------------------------------------------------- fused stack kernel
def _stack_kernel(*refs, B, T, H, add_pos):
    """grid=(num_layers,): one grid step == one full timm Block
    (LN1 -> per-batch/per-head attention -> proj residual, LN2 -> MLP(4x, erf-GELU) residual).
    The residual stream lives in the resident output block across layers."""
    if add_pos:
        (x_ref, pos_ref, qw_ref, kw_ref, vw_ref, pw_ref,
         f1_ref, f2_ref, vec_ref, o_ref) = refs
    else:
        (x_ref, qw_ref, kw_ref, vw_ref, pw_ref,
         f1_ref, f2_ref, vec_ref, o_ref) = refs
        pos_ref = None

    C = x_ref.shape[-1]
    Dh = C // H
    scale = float(Dh) ** -0.5
    N = B * T
    layer = pl.program_id(0)

    @pl.when(layer == 0)
    def _():
        if add_pos:
            # dec_pos add folded into the first decoder block (review opt #9)
            o_ref[...] = x_ref[...] + pos_ref[...]
        else:
            o_ref[...] = x_ref[...]

    x = o_ref[...]                                   # (N, C) residual stream (VMEM-resident)
    vec = vec_ref[0]                                 # (NUM_VEC, 4C)
    qw, kw, vw, pw = qw_ref[0], kw_ref[0], vw_ref[0], pw_ref[0]
    f1w, f2w = f1_ref[0], f2_ref[0]

    ln1_g = vec[ROW_LN1_G:ROW_LN1_G + 1, :C]
    ln1_b = vec[ROW_LN1_B:ROW_LN1_B + 1, :C]
    q_b = vec[ROW_Q_B:ROW_Q_B + 1, :C]
    k_b = vec[ROW_K_B:ROW_K_B + 1, :C]
    v_b = vec[ROW_V_B:ROW_V_B + 1, :C]
    proj_b = vec[ROW_PROJ_B:ROW_PROJ_B + 1, :C]
    ln2_g = vec[ROW_LN2_G:ROW_LN2_G + 1, :C]
    ln2_b = vec[ROW_LN2_B:ROW_LN2_B + 1, :C]
    fc1_b = vec[ROW_FC1_B:ROW_FC1_B + 1, :]          # (1, 4C)
    fc2_b = vec[ROW_FC2_B:ROW_FC2_B + 1, :C]

    # ---- attention branch (no dense (B*T)^2 bias: per-batch batched contractions)
    h = _ln(x, ln1_g, ln1_b)
    q = jnp.dot(h, qw, preferred_element_type=jnp.float32) + q_b     # (N, C)
    k = jnp.dot(h, kw, preferred_element_type=jnp.float32) + k_b
    v = jnp.dot(h, vw, preferred_element_type=jnp.float32) + v_b

    attn = None
    for hh in range(H):                              # static unroll over heads
        c0 = hh * Dh
        q_h = q[:, c0:c0 + Dh].reshape(B, T, Dh)
        k_h = k[:, c0:c0 + Dh].reshape(B, T, Dh)
        v_h = v[:, c0:c0 + Dh].reshape(B, T, Dh)
        s = jnp.einsum('bqd,bkd->bqk', q_h, k_h,
                       preferred_element_type=jnp.float32) * scale   # (B, T, T)
        s = s - jnp.max(s, axis=-1, keepdims=True)
        p = jnp.exp(s)
        p = p * pl.reciprocal(jnp.sum(p, axis=-1, keepdims=True), approx=True)
        o_h = jnp.einsum('bqk,bkd->bqd', p, v_h,
                         preferred_element_type=jnp.float32)          # (B, T, Dh)
        # accumulate head contributions through the row-sliced projection weight
        contrib = jnp.dot(o_h.reshape(N, Dh), pw[c0:c0 + Dh, :],
                          preferred_element_type=jnp.float32)         # (N, C)
        attn = contrib if attn is None else attn + contrib
    x = x + attn + proj_b

    # ---- MLP branch
    h = _ln(x, ln2_g, ln2_b)
    h = jnp.dot(h, f1w, preferred_element_type=jnp.float32) + fc1_b
    h = _gelu(h)
    h = jnp.dot(h, f2w, preferred_element_type=jnp.float32) + fc2_b
    o_ref[...] = x + h


def vit_stack(x, stack, num_heads, pos=None):
    """Run an entire transformer stack in ONE pallas_call. x: (B, T, C); pos optional (B, T, C)."""
    B, T, C = x.shape
    N = B * T
    L = stack["q_w"].shape[0]
    F = stack["fc1_w"].shape[-1]
    add_pos = pos is not None
    xf = x.reshape(N, C)

    act_spec = pl.BlockSpec((N, C), lambda l: (0, 0))
    in_specs = [act_spec]
    args = [xf]
    if add_pos:
        in_specs.append(pl.BlockSpec((N, C), lambda l: (0, 0)))
        args.append(pos.reshape(N, C))
    for name, blk in (("q_w", (1, C, C)), ("k_w", (1, C, C)), ("v_w", (1, C, C)),
                      ("proj_w", (1, C, C)), ("fc1_w", (1, C, F)), ("fc2_w", (1, F, C)),
                      ("vecs", (1, NUM_VEC, F))):
        in_specs.append(pl.BlockSpec(blk, lambda l: (l, 0, 0)))
        args.append(stack[name])

    Dh = C // num_heads
    flops_layer = (2 * N * C * C * 4 + 2 * B * num_heads * T * T * Dh * 2 + 2 * N * C * F * 2)
    transc_layer = B * num_heads * T * T + N * F
    bytes_layer = 4 * (4 * C * C + 2 * C * F + NUM_VEC * F)
    cost = pl.CostEstimate(
        flops=int(L * flops_layer),
        transcendentals=int(L * transc_layer),
        bytes_accessed=int(L * bytes_layer + 4 * N * C * (3 if add_pos else 2)))

    out = pl.pallas_call(
        functools.partial(_stack_kernel, B=B, T=T, H=num_heads, add_pos=add_pos),
        grid=(L,),
        out_shape=jax.ShapeDtypeStruct((N, C), jnp.float32),
        in_specs=in_specs,
        out_specs=pl.BlockSpec((N, C), lambda l: (0, 0)),   # resident across the layer axis
        compiler_params=pltpu.CompilerParams(dimension_semantics=("arbitrary",)),
        cost_estimate=cost,
    )(*args)
    return out.reshape(B, T, C)


# ----------------------------------------------------------------------------- small fused kernels
def _proj_pos_kernel(x_ref, w_ref, b_ref, pos_ref, o_ref):
    """Patchify 'conv' (stride == kernel -> linear projection) + bias + positional embedding."""
    o_ref[...] = (jnp.dot(x_ref[...], w_ref[...], preferred_element_type=jnp.float32)
                  + b_ref[...] + pos_ref[...])


def _ln_linear_ln_kernel(x_ref, g1, b1, w_ref, b_ref, g2, b2, o_ref):
    """Encoder final LayerNorm + decoder projection + projection_norm fused ("bridge")."""
    h = _ln(x_ref[...], g1[...], b1[...])
    h = jnp.dot(h, w_ref[...], preferred_element_type=jnp.float32) + b_ref[...]
    o_ref[...] = _ln(h, g2[...], b2[...])


def _linear_ln_kernel(x_ref, w_ref, b_ref, g_ref, b2_ref, o_ref):
    """Decoder head + head_norm fused."""
    h = jnp.dot(x_ref[...], w_ref[...], preferred_element_type=jnp.float32) + b_ref[...]
    o_ref[...] = _ln(h, g_ref[...], b2_ref[...])


def patchify_project(x, w, b, pos):
    M = x.shape[0]
    N = w.shape[1]
    return pl.pallas_call(
        _proj_pos_kernel,
        out_shape=jax.ShapeDtypeStruct((M, N), jnp.float32),
        in_specs=[_VMEM] * 4, out_specs=_VMEM,
    )(x, w, b.reshape(1, N), pos)


def ln_linear_ln(x, g1, b1, w, b, g2, b2):
    M, K = x.shape
    N = w.shape[1]
    return pl.pallas_call(
        _ln_linear_ln_kernel,
        out_shape=jax.ShapeDtypeStruct((M, N), jnp.float32),
        in_specs=[_VMEM] * 7, out_specs=_VMEM,
    )(x, g1.reshape(1, K), b1.reshape(1, K), w, b.reshape(1, N),
      g2.reshape(1, N), b2.reshape(1, N))


def linear_ln(x, w, b, g, b2):
    M = x.shape[0]
    N = w.shape[1]
    return pl.pallas_call(
        _linear_ln_kernel,
        out_shape=jax.ShapeDtypeStruct((M, N), jnp.float32),
        in_specs=[_VMEM] * 5, out_specs=_VMEM,
    )(x, w, b.reshape(1, N), g.reshape(1, N), b2.reshape(1, N))


# ----------------------------------------------------------------------------- model glue (XLA)
def take_indexes_bt(seq, idx):
    """seq: (B, T, C), idx: (B, T') -> out[b, t, :] = seq[b, idx[b, t], :]."""
    return jnp.take_along_axis(seq, idx[:, :, None], axis=1)


def random_indexes(key, B, T):
    keys = jax.random.split(key, B)
    fwd = jnp.stack([jax.random.permutation(keys[i], T) for i in range(B)], axis=0)
    fwd = fwd.astype(jnp.int32)                       # (B, T)
    bwd = jnp.argsort(fwd, axis=1).astype(jnp.int32)  # (B, T)
    return fwd, bwd


def build_mask(backward_indexes, n_visible, num_patches, patch_size):
    # TODO(synk): mask polarity follows cyto_dl Patchify.get_mask (visible patches = 1),
    # nearest-upsampled one value per patch — verify before trusting reconstruction losses.
    B, T = backward_indexes.shape
    vis = jnp.broadcast_to((jnp.arange(T)[None, :] < n_visible).astype(jnp.float32), (B, T))
    mask = jnp.take_along_axis(vis[:, :, None], backward_indexes[:, :, None], axis=1)  # (B, T, 1)
    nz, ny, nx = num_patches
    pz, py, px = patch_size
    m = mask.reshape(B, nz, ny, nx, 1).transpose(0, 4, 1, 2, 3)   # (B, 1, nz, ny, nx)
    m = jnp.repeat(m, pz, axis=2)
    m = jnp.repeat(m, py, axis=3)
    m = jnp.repeat(m, px, axis=4)
    return m


def encoder_forward(img, params, cfg, rng):
    nz, ny, nx = cfg["num_patches"]
    pz, py, px = cfg["base_patch_size"]
    T = nz * ny * nx
    B, C_in = img.shape[0], img.shape[1]
    emb = cfg["emb_dim"]
    K = C_in * pz * py * px

    # patch extraction: Conv3d(kernel=stride=patch) == per-patch linear projection.
    # TODO(synk): at production image sizes, replace this XLA 8-D transpose with a
    # BlockSpec/index_map-driven gather.
    x = img.reshape(B, C_in, nz, pz, ny, py, nx, px)
    x = x.transpose(0, 2, 4, 6, 1, 3, 5, 7).reshape(B * T, K)      # (b, t) b-major rows

    pos = jnp.broadcast_to(params["enc_pos"].reshape(1, T, emb), (B, T, emb)).reshape(B * T, emb)
    tokens = patchify_project(x, params["patch_w"], params["patch_b"], pos)   # proj+bias+pos fused
    tokens = tokens.reshape(B, T, emb)

    n_vis = int(T * (1.0 - cfg["mask_ratio"]))
    fwd, bwd = random_indexes(rng, B, T)
    tokens = take_indexes_bt(tokens, fwd)[:, :n_vis]               # (B, n_vis, emb) visible only
    mask = build_mask(bwd, n_vis, cfg["num_patches"], cfg["base_patch_size"])

    cls = jnp.broadcast_to(params["cls_token"].reshape(1, 1, emb), (B, 1, emb))
    xx = jnp.concatenate([cls, tokens], axis=1)                    # (B, n_vis+1, emb)

    # whole encoder stack = ONE pallas_call
    feats = vit_stack(xx, params["enc_stack"], cfg["encoder_head"])
    # NOTE: the encoder's final LayerNorm is fused into the decoder "bridge" kernel below
    # (MAE_ViT only consumes features through the decoder, so end-to-end semantics match).
    return feats, mask, fwd, bwd


def decoder_forward(enc_x, backward_indexes, params, cfg):
    B, Tp, enc_dim = enc_x.shape
    dec = cfg["decoder_dim"]

    # fused: encoder layer_norm + decoder projection + projection_norm
    f = ln_linear_ln(enc_x.reshape(B * Tp, enc_dim),
                     params["enc_ln_g"], params["enc_ln_b"],
                     params["proj_w"], params["proj_b"],
                     params["proj_ln_g"], params["proj_ln_b"]).reshape(B, Tp, dec)

    bwd = jnp.concatenate([jnp.zeros((B, 1), jnp.int32), backward_indexes + 1], axis=1)  # (B, T+1)
    Ttot = bwd.shape[1]
    mask_tok = jnp.broadcast_to(params["mask_token"].reshape(1, 1, dec), (B, Ttot - Tp, dec))
    f = jnp.concatenate([f, mask_tok], axis=1)                     # (B, T+1, dec)
    f = take_indexes_bt(f, bwd)

    pos = jnp.broadcast_to(params["dec_pos"].reshape(1, Ttot, dec), (B, Ttot, dec))
    # whole decoder stack = ONE pallas_call; dec_pos added inside layer 0 of the kernel
    x = vit_stack(f, params["dec_stack"], cfg["decoder_head"], pos=pos)

    x = x[:, 1:]                                                   # drop cls -> (B, T, dec)
    T = x.shape[1]
    # fused: head linear + head_norm
    p = linear_ln(x.reshape(B * T, dec), params["head_w"], params["head_b"],
                  params["head_ln_g"], params["head_ln_b"])        # (B*T, out_dim)

    nz, ny, nx = cfg["num_patches"]
    pz, py, px = cfg["base_patch_size"]
    c = 1                                                          # out_dim == pz*py*px
    p = p.reshape(B, nz, ny, nx, c, pz, py, px)
    img = p.transpose(0, 4, 1, 5, 2, 6, 3, 7).reshape(B, c, nz * pz, ny * py, nx * px)
    return img


def mae_vit_forward(img, params, cfg, rng):
    enc_x, mask, fwd, bwd = encoder_forward(img, params, cfg, rng)
    pred = decoder_forward(enc_x, bwd, params, cfg)
    return pred, mask


# ----------------------------------------------------------------------------- params
def _init_stack(key, L, dim):
    f32 = jnp.float32
    F = 4 * dim
    ks = jax.random.split(key, 6)
    vecs = jnp.zeros((L, NUM_VEC, F), f32)
    vecs = vecs.at[:, ROW_LN1_G, :dim].set(1.0)   # LN gammas = 1, every bias = 0
    vecs = vecs.at[:, ROW_LN2_G, :dim].set(1.0)   # (timm Block default qkv_bias=False)
    return {
        "q_w": jax.random.normal(ks[0], (L, dim, dim), f32) * 0.02,
        "k_w": jax.random.normal(ks[1], (L, dim, dim), f32) * 0.02,
        "v_w": jax.random.normal(ks[2], (L, dim, dim), f32) * 0.02,
        "proj_w": jax.random.normal(ks[3], (L, dim, dim), f32) * 0.02,
        "fc1_w": jax.random.normal(ks[4], (L, dim, F), f32) * 0.02,
        "fc2_w": jax.random.normal(ks[5], (L, F, dim), f32) * 0.02,
        "vecs": vecs,
    }


def init_params(key, cfg):
    f32 = jnp.float32
    emb, dec = cfg["emb_dim"], cfg["decoder_dim"]
    nz, ny, nx = cfg["num_patches"]
    pz, py, px = cfg["base_patch_size"]
    T = nz * ny * nx
    K = cfg["input_channels"] * pz * py * px
    out_dim = pz * py * px

    ks = iter(jax.random.split(key, 16))
    p = {}
    # encoder / Patchify (Conv3d weight (emb, C, pz, py, px) flattened -> (K, emb))
    p["patch_w"] = jax.random.normal(next(ks), (K, emb), f32) * 0.02
    p["patch_b"] = jnp.zeros((emb,), f32)
    p["enc_pos"] = jax.random.normal(next(ks), (T, 1, emb), f32) * 0.02
    p["cls_token"] = jax.random.normal(next(ks), (1, 1, emb), f32) * 0.02
    p["enc_stack"] = _init_stack(next(ks), cfg["encoder_layer"], emb)
    p["enc_ln_g"] = jnp.ones((emb,), f32)
    p["enc_ln_b"] = jnp.zeros((emb,), f32)
    # decoder
    p["proj_w"] = jax.random.normal(next(ks), (emb, dec), f32) * 0.02
    p["proj_b"] = jnp.zeros((dec,), f32)
    p["proj_ln_g"] = jnp.ones((dec,), f32)
    p["proj_ln_b"] = jnp.zeros((dec,), f32)
    p["mask_token"] = jax.random.normal(next(ks), (1, 1, dec), f32) * 0.02
    p["dec_pos"] = jax.random.normal(next(ks), (T + 1, 1, dec), f32) * 0.02
    p["dec_stack"] = _init_stack(next(ks), cfg["decoder_layer"], dec)
    p["head_w"] = jax.random.normal(next(ks), (dec, out_dim), f32) * 0.02
    p["head_b"] = jnp.zeros((out_dim,), f32)
    p["head_ln_g"] = jnp.ones((out_dim,), f32)
    p["head_ln_b"] = jnp.zeros((out_dim,), f32)
    return p


# ----------------------------------------------------------------------------- main
CFG = dict(
    spatial_dims=3,
    num_patches=(2, 4, 4),       # ZYX
    base_patch_size=(2, 4, 4),   # ZYX
    emb_dim=64,
    encoder_layer=2,
    encoder_head=4,
    decoder_layer=1,
    decoder_head=4,
    decoder_dim=32,
    mask_ratio=0.75,
    input_channels=1,
)

if __name__ == "__main__":
    key = jax.random.PRNGKey(0)
    pkey, ikey, mkey = jax.random.split(key, 3)

    params = init_params(pkey, CFG)
    Z = CFG["num_patches"][0] * CFG["base_patch_size"][0]
    Y = CFG["num_patches"][1] * CFG["base_patch_size"][1]
    X = CFG["num_patches"][2] * CFG["base_patch_size"][2]
    img = jax.random.normal(ikey, (2, CFG["input_channels"], Z, Y, X), jnp.float32)  # NCDHW

    fwd_fn = jax.jit(functools.partial(mae_vit_forward, cfg=CFG))
    pred, mask = fwd_fn(img, params, rng=mkey)
    (pred, mask) = jax.block_until_ready((pred, mask))

    assert pred.shape == (2, 1, Z, Y, X), pred.shape
    assert mask.shape == (2, 1, Z, Y, X), mask.shape
    assert bool(jnp.all(jnp.isfinite(pred)))
    print("KERNEL_OK")
</pallas_src>

<mosaic_0001>
module attributes {stable_mosaic.version = 11 : i64} {
  func.func @_proj_pos_kernel(%arg0: memref<64x32xf32, #tpu.memory_space<vmem>>, %arg1: memref<32x64xf32, #tpu.memory_space<vmem>>, %arg2: memref<1x64xf32, #tpu.memory_space<vmem>>, %arg3: memref<64x64xf32, #tpu.memory_space<vmem>>, %arg4: memref<64x64xf32, #tpu.memory_space<vmem>>) attributes {dimension_semantics = [], scalar_prefetch = 0 : i64, scratch_operands = 0 : i64, tpu.core_type = #tpu.core_type<tc>} {
    %c0 = arith.constant 0 : index
    %c0_0 = arith.constant 0 : index
    %0 = vector.load %arg0[%c0, %c0_0] : memref<64x32xf32, #tpu.memory_space<vmem>>, vector<64x32xf32>
    %c0_1 = arith.constant 0 : index
    %c0_2 = arith.constant 0 : index
    %1 = vector.load %arg1[%c0_1, %c0_2] : memref<32x64xf32, #tpu.memory_space<vmem>>, vector<32x64xf32>
    %cst = arith.constant dense<0.000000e+00> : vector<64x64xf32>
    %2 = tpu.matmul %0, %1, %cst {dimension_numbers = #tpu.dot_dimension_numbers<[1], [0], [0], [1], [0, 0, 1, 1], [], []>} : vector<64x32xf32>, vector<32x64xf32>, vector<64x64xf32> -> vector<64x64xf32>
    %c0_3 = arith.constant 0 : index
    %c0_4 = arith.constant 0 : index
    %3 = vector.load %arg2[%c0_3, %c0_4] : memref<1x64xf32, #tpu.memory_space<vmem>>, vector<1x64xf32>
    %4 = vector.broadcast %3 : vector<1x64xf32> to vector<64x64xf32>
    %5 = arith.addf %2, %4 : vector<64x64xf32>
    %c0_5 = arith.constant 0 : index
    %c0_6 = arith.constant 0 : index
    %6 = vector.load %arg3[%c0_5, %c0_6] : memref<64x64xf32, #tpu.memory_space<vmem>>, vector<64x64xf32>
    %7 = arith.addf %5, %6 : vector<64x64xf32>
    %c0_7 = arith.constant 0 : index
    %c0_8 = arith.constant 0 : index
    %8 = vector.load %arg4[%c0_7, %c0_8] : memref<64x64xf32, #tpu.memory_space<vmem>>, vector<64x64xf32>
    tpu.vector_store %arg4[%c0_7, %c0_8], %7 {strides = array<i32>} : memref<64x64xf32, #tpu.memory_space<vmem>>, vector<64x64xf32>,
    return
  }
}

module attributes {stable_mosaic.version = 11 : i64} {
  func.func @_ln_linear_ln_kernel(%arg0: memref<18x64xf32, #tpu.memory_space<vmem>>, %arg1: memref<1x64xf32, #tpu.memory_space<vmem>>, %arg2: memref<1x64xf32, #tpu.memory_space<vmem>>, %arg3: memref<64x32xf32, #tpu.memory_space<vmem>>, %arg4: memref<1x32xf32, #tpu.memory_space<vmem>>, %arg5: memref<1x32xf32, #tpu.memory_space<vmem>>, %arg6: memref<1x32xf32, #tpu.memory_space<vmem>>, %arg7: memref<18x32xf32, #tpu.memory_space<vmem>>) attributes {dimension_semantics = [], scalar_prefetch = 0 : i64, scratch_operands = 0 : i64, tpu.core_type = #tpu.core_type<tc>} {
    %c0 = arith.constant 0 : index
    %c0_0 = arith.constant 0 : index
    %0 = vector.load %arg0[%c0, %c0_0] : memref<18x64xf32, #tpu.memory_space<vmem>>, vector<18x64xf32>
    %c0_1 = arith.constant 0 : index
    %c0_2 = arith.constant 0 : index
    %1 = vector.load %arg1[%c0_1, %c0_2] : memref<1x64xf32, #tpu.memory_space<vmem>>, vector<1x64xf32>
    %c0_3 = arith.constant 0 : index
    %c0_4 = arith.constant 0 : index
    %2 = vector.load %arg2[%c0_3, %c0_4] : memref<1x64xf32, #tpu.memory_space<vmem>>, vector<1x64xf32>
    %cst = arith.constant dense<0.000000e+00> : vector<18xf32>
    %3 = vector.multi_reduction <add>, %0, %cst [1] : vector<18x64xf32> to vector<18xf32>
    %4 = vector.shape_cast %3 : vector<18xf32> to vector<18x1xf32>
    %cst_5 = arith.constant 6.400000e+01 : f32
    %5 = vector.broadcast %cst_5 : f32 to vector<18x1xf32>
    %6 = arith.divf %4, %5 : vector<18x1xf32>
    %7 = vector.broadcast %6 : vector<18x1xf32> to vector<18x64xf32>
    %8 = arith.subf %0, %7 : vector<18x64xf32>
    %9 = arith.mulf %8, %8 : vector<18x64xf32>
    %cst_6 = arith.constant dense<0.000000e+00> : vector<18xf32>
    %10 = vector.multi_reduction <add>, %9, %cst_6 [1] : vector<18x64xf32> to vector<18xf32>
    %11 = vector.shape_cast %10 : vector<18xf32> to vector<18x1xf32>
    %cst_7 = arith.constant 6.400000e+01 : f32
    %12 = vector.broadcast %cst_7 : f32 to vector<18x1xf32>
    %13 = arith.divf %11, %12 : vector<18x1xf32>
    %cst_8 = arith.constant 9.99999974E-6 : f32
    %14 = vector.broadcast %cst_8 : f32 to vector<18x1xf32>
    %15 = arith.addf %13, %14 : vector<18x1xf32>
    %16 = math.rsqrt %15 : vector<18x1xf32>
    %17 = vector.broadcast %16 : vector<18x1xf32> to vector<18x64xf32>
    %18 = arith.mulf %8, %17 : vector<18x64xf32>
    %19 = vector.broadcast %1 : vector<1x64xf32> to vector<18x64xf32>
    %20 = arith.mulf %18, %19 : vector<18x64xf32>
    %21 = vector.broadcast %2 : vector<1x64xf32> to vector<18x64xf32>
    %22 = arith.addf %20, %21 : vector<18x64xf32>
    %c0_9 = arith.constant 0 : index
    %c0_10 = arith.constant 0 : index
    %23 = vector.load %arg3[%c0_9, %c0_10] : memref<64x32xf32, #tpu.memory_space<vmem>>, vector<64x32xf32>
    %cst_11 = arith.constant dense<0.000000e+00> : vector<18x32xf32>
    %24 = tpu.matmul %22, %23, %cst_11 {dimension_numbers = #tpu.dot_dimension_numbers<[1], [0], [0], [1], [0, 0, 1, 1], [], []>} : vector<18x64xf32>, vector<64x32xf32>, vector<18x32xf32> -> vector<18x32xf32>
    %c0_12 = arith.constant 0 : index
    %c0_13 = arith.constant 0 : index
    %25 = vector.load %arg4[%c0_12, %c0_13] : memref<1x32xf32, #tpu.memory_space<vmem>>, vector<1x32xf32>
    %26 = vector.broadcast %25 : vector<1x32xf32> to vector<18x32xf32>
    %27 = arith.addf %24, %26 : vector<18x32xf32>
    %c0_14 = arith.constant 0 : index
    %c0_15 = arith.constant 0 : index
    %28 = vector.load %arg5[%c0_14, %c0_15] : memref<1x32xf32, #tpu.memory_space<vmem>>, vector<1x32xf32>
    %c0_16 = arith.constant 0 : index
    %c0_17 = arith.constant 0 : index
    %29 = vector.load %arg6[%c0_16, %c0_17] : memref<1x32xf32, #tpu.memory_space<vmem>>, vector<1x32xf32>
    %cst_18 = arith.constant dense<0.000000e+00> : vector<18xf32>
    %30 = vector.multi_reduction <add>, %27, %cst_18 [1] : vector<18x32xf32> to vector<18xf32>
    %31 = vector.shape_cast %30 : vector<18xf32> to vector<18x1xf32>
    %cst_19 = arith.constant 3.200000e+01 : f32
    %32 = vector.broadcast %cst_19 : f32 to vector<18x1xf32>
    %33 = arith.divf %31, %32 : vector<18x1xf32>
    %34 = vector.broadcast %33 : vector<18x1xf32> to vector<18x32xf32>
    %35 = arith.subf %27, %34 : vector<18x32xf32>
    %36 = arith.mulf %35, %35 : vector<18x32xf32>
    %cst_20 = arith.constant dense<0.000000e+00> : vector<18xf32>
    %37 = vector.multi_reduction <add>, %36, %cst_20 [1] : vector<18x32xf32> to vector<18xf32>
    %38 = vector.shape_cast %37 : vector<18xf32> to vector<18x1xf32>
    %cst_21 = arith.constant 3.200000e+01 : f32
    %39 = vector.broadcast %cst_21 : f32 to vector<18x1xf32>
    %40 = arith.divf %38, %39 : vector<18x1xf32>
    %cst_22 = arith.constant 9.99999974E-6 : f32
    %41 = vector.broadcast %cst_22 : f32 to vector<18x1xf32>
    %42 = arith.addf %40, %41 : vector<18x1xf32>
    %43 = math.rsqrt %42 : vector<18x1xf32>
    %44 = vector.broadcast %43 : vector<18x1xf32> to vector<18x32xf32>
    %45 = arith.mulf %35, %44 : vector<18x32xf32>
    %46 = vector.broadcast %28 : vector<1x32xf32> to vector<18x32xf32>
    %47 = arith.mulf %45, %46 : vector<18x32xf32>
    %48 = vector.broadcast %29 : vector<1x32xf32> to vector<18x32xf32>
    %49 = arith.addf %47, %48 : vector<18x32xf32>
    %c0_23 = arith.constant 0 : index
    %c0_24 = arith.constant 0 : index
    %50 = vector.load %arg7[%c0_23, %c0_24] : memref<18x32xf32, #tpu.memory_space<vmem>>, vector<18x32xf32>
    tpu.vector_store %arg7[%c0_23, %c0_24], %49 {strides = array<i32>} : memref<18x32xf32, #tpu.memory_space<vmem>>, vector<18x32xf32>,
    return
  }
}

module attributes {stable_mosaic.version = 11 : i64} {
  func.func @_stack_kernel(%arg0: i32, %arg1: memref<18x64xf32, #tpu.memory_space<vmem>>, %arg2: memref<1x64x64xf32, #tpu.memory_space<vmem>>, %arg3: memref<1x64x64xf32, #tpu.memory_space<vmem>>, %arg4: memref<1x64x64xf32, #tpu.memory_space<vmem>>, %arg5: memref<1x64x64xf32, #tpu.memory_space<vmem>>, %arg6: memref<1x64x256xf32, #tpu.memory_space<vmem>>, %arg7: memref<1x256x64xf32, #tpu.memory_space<vmem>>, %arg8: memref<1x10x256xf32, #tpu.memory_space<vmem>>, %arg9: memref<18x64xf32, #tpu.memory_space<vmem>>) attributes {dimension_semantics = [#tpu.dimension_semantics<arbitrary>], iteration_bounds = array<i64: 2>, scalar_prefetch = 0 : i64, scratch_operands = 0 : i64, tpu.core_type = #tpu.core_type<tc>, window_params = [{pipeline_mode = #tpu.pipeline_mode<synchronous>, transform_indices = @transform_0, window_bounds = array<i64: 18, 64>}, {transform_indices = @transform_1, window_bounds = array<i64: 1, 64, 64>}, {transform_indices = @transform_2, window_bounds = array<i64: 1, 64, 64>}, {transform_indices = @transform_3, window_bounds = array<i64: 1, 64, 64>}, {transform_indices = @transform_4, window_bounds = array<i64: 1, 64, 64>}, {transform_indices = @transform_5, window_bounds = array<i64: 1, 64, 256>}, {transform_indices = @transform_6, window_bounds = array<i64: 1, 256, 64>}, {transform_indices = @transform_7, window_bounds = array<i64: 1, 10, 256>}, {pipeline_mode = #tpu.pipeline_mode<synchronous>, transform_indices = @transform_8, window_bounds = array<i64: 18, 64>}]} {
    %c0_i32 = arith.constant 0 : i32
    %0 = arith.cmpi eq, %arg0, %c0_i32 : i32
    %1 = arith.extui %0 : i1 to i32
    %c0_i32_0 = arith.constant 0 : i32
    %2 = arith.cmpi ne, %1, %c0_i32_0 : i32
    scf.if %2 {
      %c0_79 = arith.constant 0 : index
      %c0_80 = arith.constant 0 : index
      %224 = vector.load %arg1[%c0_79, %c0_80] : memref<18x64xf32, #tpu.memory_space<vmem>>, vector<18x64xf32>
      %c0_81 = arith.constant 0 : index
      %c0_82 = arith.constant 0 : index
      %225 = vector.load %arg9[%c0_81, %c0_82] : memref<18x64xf32, #tpu.memory_space<vmem>>, vector<18x64xf32>
      tpu.vector_store %arg9[%c0_81, %c0_82], %224 {strides = array<i32>} : memref<18x64xf32, #tpu.memory_space<vmem>>, vector<18x64xf32>,
    } else {
    }
    %c0 = arith.constant 0 : index
    %c0_1 = arith.constant 0 : index
    %3 = vector.load %arg9[%c0, %c0_1] : memref<18x64xf32, #tpu.memory_space<vmem>>, vector<18x64xf32>
    %c0_2 = arith.constant 0 : index
    %c0_3 = arith.constant 0 : index
    %c0_4 = arith.constant 0 : index
    %4 = vector.load %arg8[%c0_2, %c0_3, %c0_4] : memref<1x10x256xf32, #tpu.memory_space<vmem>>, vector<1x10x256xf32>
    %5 = vector.shape_cast %4 : vector<1x10x256xf32> to vector<10x256xf32>
    %c0_5 = arith.constant 0 : index
    %c0_6 = arith.constant 0 : index
    %c0_7 = arith.constant 0 : index
    %6 = vector.load %arg2[%c0_5, %c0_6, %c0_7] : memref<1x64x64xf32, #tpu.memory_space<vmem>>, vector<1x64x64xf32>
    %7 = vector.shape_cast %6 : vector<1x64x64xf32> to vector<64x64xf32>
    %c0_8 = arith.constant 0 : index
    %c0_9 = arith.constant 0 : index
    %c0_10 = arith.constant 0 : index
    %8 = vector.load %arg3[%c0_8, %c0_9, %c0_10] : memref<1x64x64xf32, #tpu.memory_space<vmem>>, vector<1x64x64xf32>
    %9 = vector.shape_cast %8 : vector<1x64x64xf32> to vector<64x64xf32>
    %c0_11 = arith.constant 0 : index
    %c0_12 = arith.constant 0 : index
    %c0_13 = arith.constant 0 : index
    %10 = vector.load %arg4[%c0_11, %c0_12, %c0_13] : memref<1x64x64xf32, #tpu.memory_space<vmem>>, vector<1x64x64xf32>
    %11 = vector.shape_cast %10 : vector<1x64x64xf32> to vector<64x64xf32>
    %c0_14 = arith.constant 0 : index
    %c0_15 = arith.constant 0 : index
    %c0_16 = arith.constant 0 : index
    %12 = vector.load %arg5[%c0_14, %c0_15, %c0_16] : memref<1x64x64xf32, #tpu.memory_space<vmem>>, vector<1x64x64xf32>
    %13 = vector.shape_cast %12 : vector<1x64x64xf32> to vector<64x64xf32>
    %c0_17 = arith.constant 0 : index
    %c0_18 = arith.constant 0 : index
    %c0_19 = arith.constant 0 : index
    %14 = vector.load %arg6[%c0_17, %c0_18, %c0_19] : memref<1x64x256xf32, #tpu.memory_space<vmem>>, vector<1x64x256xf32>
    %15 = vector.shape_cast %14 : vector<1x64x256xf32> to vector<64x256xf32>
    %c0_20 = arith.constant 0 : index
    %c0_21 = arith.constant 0 : index
    %c0_22 = arith.constant 0 : index
    %16 = vector.load %arg7[%c0_20, %c0_21, %c0_22] : memref<1x256x64xf32, #tpu.memory_space<vmem>>, vector<1x256x64xf32>
    %17 = vector.shape_cast %16 : vector<1x256x64xf32> to vector<256x64xf32>
    %18 = vector.extract_strided_slice %5 {offsets = [0, 0], sizes = [1, 64], strides = [1, 1]} : vector<10x256xf32> to vector<1x64xf32>
    %19 = vector.extract_strided_slice %5 {offsets = [1, 0], sizes = [1, 64], strides = [1, 1]} : vector<10x256xf32> to vector<1x64xf32>
    %20 = vector.extract_strided_slice %5 {offsets = [2, 0], sizes = [1, 64], strides = [1, 1]} : vector<10x256xf32> to vector<1x64xf32>
    %21 = vector.extract_strided_slice %5 {offsets = [3, 0], sizes = [1, 64], strides = [1, 1]} : vector<10x256xf32> to vector<1x64xf32>
    %22 = vector.extract_strided_slice %5 {offsets = [4, 0], sizes = [1, 64], strides = [1, 1]} : vector<10x256xf32> to vector<1x64xf32>
    %23 = vector.extract_strided_slice %5 {offsets = [5, 0], sizes = [1, 64], strides = [1, 1]} : vector<10x256xf32> to vector<1x64xf32>
    %24 = vector.extract_strided_slice %5 {offsets = [6, 0], sizes = [1, 64], strides = [1, 1]} : vector<10x256xf32> to vector<1x64xf32>
    %25 = vector.extract_strided_slice %5 {offsets = [7, 0], sizes = [1, 64], strides = [1, 1]} : vector<10x256xf32> to vector<1x64xf32>
    %26 = vector.extract_strided_slice %5 {offsets = [8, 0], sizes = [1, 256], strides = [1, 1]} : vector<10x256xf32> to vector<1x256xf32>
    %27 = vector.extract_strided_slice %5 {offsets = [9, 0], sizes = [1, 64], strides = [1, 1]} : vector<10x256xf32> to vector<1x64xf32>
    %cst = arith.constant dense<0.000000e+00> : vector<18xf32>
    %28 = vector.multi_reduction <add>, %3, %cst [1] : vector<18x64xf32> to vector<18xf32>
    %29 = vector.shape_cast %28 : vector<18xf32> to vector<18x1xf32>
    %cst_23 = arith.constant 6.400000e+01 : f32
    %30 = vector.broadcast %cst_23 : f32 to vector<18x1xf32>
    %31 = arith.divf %29, %30 : vector<18x1xf32>
    %32 = vector.broadcast %31 : vector<18x1xf32> to vector<18x64xf32>
    %33 = arith.subf %3, %32 : vector<18x64xf32>
    %34 = arith.mulf %33, %33 : vector<18x64xf32>
    %cst_24 = arith.constant dense<0.000000e+00> : vector<18xf32>
    %35 = vector.multi_reduction <add>, %34, %cst_24 [1] : vector<18x64xf32> to vector<18xf32>
    %36 = vector.shape_cast %35 : vector<18xf32> to vector<18x1xf32>
    %cst_25 = arith.constant 6.400000e+01 : f32
    %37 = vector.broadcast %cst_25 : f32 to vector<18x1xf32>
    %38 = arith.divf %36, %37 : vector<18x1xf32>
    %cst_26 = arith.constant 9.99999974E-6 : f32
    %39 = vector.broadcast %cst_26 : f32 to vector<18x1xf32>
    %40 = arith.addf %38, %39 : vector<18x1xf32>
    %41 = math.rsqrt %40 : vector<18x1xf32>
    %42 = vector.broadcast %41 : vector<18x1xf32> to vector<18x64xf32>
    %43 = arith.mulf %33, %42 : vector<18x64xf32>
    %44 = vector.broadcast %18 : vector<1x64xf32> to vector<18x64xf32>
    %45 = arith.mulf %43, %44 : vector<18x64xf32>
    %46 = vector.broadcast %19 : vector<1x64xf32> to vector<18x64xf32>
    %47 = arith.addf %45, %46 : vector<18x64xf32>
    %cst_27 = arith.constant dense<0.000000e+00> : vector<18x64xf32>
    %48 = tpu.matmul %47, %7, %cst_27 {dimension_numbers = #tpu.dot_dimension_numbers<[1], [0], [0], [1], [0, 0, 1, 1], [], []>} : vector<18x64xf32>, vector<64x64xf32>, vector<18x64xf32> -> vector<18x64xf32>
    %49 = vector.broadcast %20 : vector<1x64xf32> to vector<18x64xf32>
    %50 = arith.addf %48, %49 : vector<18x64xf32>
    %cst_28 = arith.constant dense<0.000000e+00> : vector<18x64xf32>
    %51 = tpu.matmul %47, %9, %cst_28 {dimension_numbers = #tpu.dot_dimension_numbers<[1], [0], [0], [1], [0, 0, 1, 1], [], []>} : vector<18x64xf32>, vector<64x64xf32>, vector<18x64xf32> -> vector<18x64xf32>
    %52 = vector.broadcast %21 : vector<1x64xf32> to vector<18x64xf32>
    %53 = arith.addf %51, %52 : vector<18x64xf32>
    %cst_29 = arith.constant dense<0.000000e+00> : vector<18x64xf32>
    %54 = tpu.matmul %47, %11, %cst_29 {dimension_numbers = #tpu.dot_dimension_numbers<[1], [0], [0], [1], [0, 0, 1, 1], [], []>} : vector<18x64xf32>, vector<64x64xf32>, vector<18x64xf32> -> vector<18x64xf32>
    %55 = vector.broadcast %22 : vector<1x64xf32> to vector<18x64xf32>
    %56 = arith.addf %54, %55 : vector<18x64xf32>
    %57 = vector.extract_strided_slice %50 {offsets = [0, 0], sizes = [18, 16], strides = [1, 1]} : vector<18x64xf32> to vector<18x16xf32>
    %58 = vector.shape_cast %57 : vector<18x16xf32> to vector<2x9x16xf32>
    %59 = vector.extract_strided_slice %53 {offsets = [0, 0], sizes = [18, 16], strides = [1, 1]} : vector<18x64xf32> to vector<18x16xf32>
    %60 = vector.shape_cast %59 : vector<18x16xf32> to vector<2x9x16xf32>
    %61 = vector.extract_strided_slice %56 {offsets = [0, 0], sizes = [18, 16], strides = [1, 1]} : vector<18x64xf32> to vector<18x16xf32>
    %62 = vector.shape_cast %61 : vector<18x16xf32> to vector<2x9x16xf32>
    "tpu.trace_start"() <{level = 10 : i32, message = "bqd,bkd->bqk"}> : () -> ()
    %cst_30 = arith.constant dense<0.000000e+00> : vector<2x9x9xf32>
    %63 = tpu.matmul %58, %60, %cst_30 {dimension_numbers = #tpu.dot_dimension_numbers<[2], [2], [1], [1], [0, 0, 0, 1, 1, 1], [0], [0]>} : vector<2x9x16xf32>, vector<2x9x16xf32>, vector<2x9x9xf32> -> vector<2x9x9xf32>
    "tpu.trace_stop"() : () -> ()
    %cst_31 = arith.constant 2.500000e-01 : f32
    %64 = vector.broadcast %cst_31 : f32 to vector<2x9x9xf32>
    %65 = arith.mulf %63, %64 : vector<2x9x9xf32>
    %cst_32 = arith.constant dense<0xFF800000> : vector<2x9xf32>
    %66 = vector.multi_reduction <maximumf>, %65, %cst_32 [2] : vector<2x9x9xf32> to vector<2x9xf32>
    %67 = vector.shape_cast %66 : vector<2x9xf32> to vector<2x9x1xf32>
    %68 = vector.broadcast %67 : vector<2x9x1xf32> to vector<2x9x9xf32>
    %69 = arith.subf %65, %68 : vector<2x9x9xf32>
    %70 = math.exp %69 : vector<2x9x9xf32>
    %cst_33 = arith.constant dense<0.000000e+00> : vector<2x9xf32>
    %71 = vector.multi_reduction <add>, %70, %cst_33 [2] : vector<2x9x9xf32> to vector<2x9xf32>
    %72 = vector.shape_cast %71 : vector<2x9xf32> to vector<2x9x1xf32>
    %73 = tpu.reciprocal %72 {approx = true} : vector<2x9x1xf32> -> vector<2x9x1xf32>
    %74 = vector.broadcast %73 : vector<2x9x1xf32> to vector<2x9x9xf32>
    %75 = arith.mulf %70, %74 : vector<2x9x9xf32>
    "tpu.trace_start"() <{level = 10 : i32, message = "bqk,bkd->bqd"}> : () -> ()
    %cst_34 = arith.constant dense<0.000000e+00> : vector<2x9x16xf32>
    %76 = tpu.matmul %75, %62, %cst_34 {dimension_numbers = #tpu.dot_dimension_numbers<[2], [1], [1], [2], [0, 0, 0, 1, 1, 2], [0], [0]>} : vector<2x9x9xf32>, vector<2x9x16xf32>, vector<2x9x16xf32> -> vector<2x9x16xf32>
    "tpu.trace_stop"() : () -> ()
    %77 = vector.shape_cast %76 : vector<2x9x16xf32> to vector<18x16xf32>
    %78 = vector.extract_strided_slice %13 {offsets = [0, 0], sizes = [16, 64], strides = [1, 1]} : vector<64x64xf32> to vector<16x64xf32>
    %cst_35 = arith.constant dense<0.000000e+00> : vector<18x64xf32>
    %79 = tpu.matmul %77, %78, %cst_35 {dimension_numbers = #tpu.dot_dimension_numbers<[1], [0], [0], [1], [0, 0, 1, 1], [], []>} : vector<18x16xf32>, vector<16x64xf32>, vector<18x64xf32> -> vector<18x64xf32>
    %80 = vector.extract_strided_slice %50 {offsets = [0, 16], sizes = [18, 16], strides = [1, 1]} : vector<18x64xf32> to vector<18x16xf32>
    %81 = vector.shape_cast %80 : vector<18x16xf32> to vector<2x9x16xf32>
    %82 = vector.extract_strided_slice %53 {offsets = [0, 16], sizes = [18, 16], strides = [1, 1]} : vector<18x64xf32> to vector<18x16xf32>
    %83 = vector.shape_cast %82 : vector<18x16xf32> to vector<2x9x16xf32>
    %84 = vector.extract_strided_slice %56 {offsets = [0, 16], sizes = [18, 16], strides = [1, 1]} : vector<18x64xf32> to vector<18x16xf32>
    %85 = vector.shape_cast %84 : vector<18x16xf32> to vector<2x9x16xf32>
    "tpu.trace_start"() <{level = 10 : i32, message = "bqd,bkd->bqk"}> : () -> ()
    %cst_36 = arith.constant dense<0.000000e+00> : vector<2x9x9xf32>
    %86 = tpu.matmul %81, %83, %cst_36 {dimension_numbers = #tpu.dot_dimension_numbers<[2], [2], [1], [1], [0, 0, 0, 1, 1, 1], [0], [0]>} : vector<2x9x16xf32>, vector<2x9x16xf32>, vector<2x9x9xf32> -> vector<2x9x9xf32>
    "tpu.trace_stop"() : () -> ()
    %cst_37 = arith.constant 2.500000e-01 : f32
    %87 = vector.broadcast %cst_37 : f32 to vector<2x9x9xf32>
    %88 = arith.mulf %86, %87 : vector<2x9x9xf32>
    %cst_38 = arith.constant dense<0xFF800000> : vector<2x9xf32>
    %89 = vector.multi_reduction <maximumf>, %88, %cst_38 [2] : vector<2x9x9xf32> to vector<2x9xf32>
    %90 = vector.shape_cast %89 : vector<2x9xf32> to vector<2x9x1xf32>
    %91 = vector.broadcast %90 : vector<2x9x1xf32> to vector<2x9x9xf32>
    %92 = arith.subf %88, %91 : vector<2x9x9xf32>
    %93 = math.exp %92 : vector<2x9x9xf32>
    %cst_39 = arith.constant dense<0.000000e+00> : vector<2x9xf32>
    %94 = vector.multi_reduction <add>, %93, %cst_39 [2] : vector<2x9x9xf32> to vector<2x9xf32>
    %95 = vector.shape_cast %94 : vector<2x9xf32> to vector<2x9x1xf32>
    %96 = tpu.reciprocal %95 {approx = true} : vector<2x9x1xf32> -> vector<2x9x1xf32>
    %97 = vector.broadcast %96 : vector<2x9x1xf32> to vector<2x9x9xf32>
    %98 = arith.mulf %93, %97 : vector<2x9x9xf32>
    "tpu.trace_start"() <{level = 10 : i32, message = "bqk,bkd->bqd"}> : () -> ()
    %cst_40 = arith.constant dense<0.000000e+00> : vector<2x9x16xf32>
    %99 = tpu.matmul %98, %85, %cst_40 {dimension_numbers = #tpu.dot_dimension_numbers<[2], [1], [1], [2], [0, 0, 0, 1, 1, 2], [0], [0]>} : vector<2x9x9xf32>, vector<2x9x16xf32>, vector<2x9x16xf32> -> vector<2x9x16xf32>
    "tpu.trace_stop"() : () -> ()
    %100 = vector.shape_cast %99 : vector<2x9x16xf32> to vector<18x16xf32>
    %101 = vector.extract_strided_slice %13 {offsets = [16, 0], sizes = [16, 64], strides = [1, 1]} : vector<64x64xf32> to vector<16x64xf32>
    %cst_41 = arith.constant dense<0.000000e+00> : vector<18x64xf32>
    %102 = tpu.matmul %100, %101, %cst_41 {dimension_numbers = #tpu.dot_dimension_numbers<[1], [0], [0], [1], [0, 0, 1, 1], [], []>} : vector<18x16xf32>, vector<16x64xf32>, vector<18x64xf32> -> vector<18x64xf32>
    %103 = arith.addf %79, %102 : vector<18x64xf32>
    %104 = vector.extract_strided_slice %50 {offsets = [0, 32], sizes = [18, 16], strides = [1, 1]} : vector<18x64xf32> to vector<18x16xf32>
    %105 = vector.shape_cast %104 : vector<18x16xf32> to vector<2x9x16xf32>
    %106 = vector.extract_strided_slice %53 {offsets = [0, 32], sizes = [18, 16], strides = [1, 1]} : vector<18x64xf32> to vector<18x16xf32>
    %107 = vector.shape_cast %106 : vector<18x16xf32> to vector<2x9x16xf32>
    %108 = vector.extract_strided_slice %56 {offsets = [0, 32], sizes = [18, 16], strides = [1, 1]} : vector<18x64xf32> to vector<18x16xf32>
    %109 = vector.shape_cast %108 : vector<18x16xf32> to vector<2x9x16xf32>
    "tpu.trace_start"() <{level = 10 : i32, message = "bqd,bkd->bqk"}> : () -> ()
    %cst_42 = arith.constant dense<0.000000e+00> : vector<2x9x9xf32>
    %110 = tpu.matmul %105, %107, %cst_42 {dimension_numbers = #tpu.dot_dimension_numbers<[2], [2], [1], [1], [0, 0, 0, 1, 1, 1], [0], [0]>} : vector<2x9x16xf32>, vector<2x9x16xf32>, vector<2x9x9xf32> -> vector<2x9x9xf32>
    "tpu.trace_stop"() : () -> ()
    %cst_43 = arith.constant 2.500000e-01 : f32
    %111 = vector.broadcast %cst_43 : f32 to vector<2x9x9xf32>
    %112 = arith.mulf %110, %111 : vector<2x9x9xf32>
    %cst_44 = arith.constant dense<0xFF800000> : vector<2x9xf32>
    %113 = vector.multi_reduction <maximumf>, %112, %cst_44 [2] : vector<2x9x9xf32> to vector<2x9xf32>
    %114 = vector.shape_cast %113 : vector<2x9xf32> to vector<2x9x1xf32>
    %115 = vector.broadcast %114 : vector<2x9x1xf32> to vector<2x9x9xf32>
    %116 = arith.subf %112, %115 : vector<2x9x9xf32>
    %117 = math.exp %116 : vector<2x9x9xf32>
    %cst_45 = arith.constant dense<0.000000e+00> : vector<2x9xf32>
    %118 = vector.multi_reduction <add>, %117, %cst_45 [2] : vector<2x9x9xf32> to vector<2x9xf32>
    %119 = vector.shape_cast %118 : vector<2x9xf32> to vector<2x9x1xf32>
    %120 = tpu.reciprocal %119 {approx = true} : vector<2x9x1xf32> -> vector<2x9x1xf32>
    %121 = vector.broadcast %120 : vector<2x9x1xf32> to vector<2x9x9xf32>
    %122 = arith.mulf %117, %121 : vector<2x9x9xf32>
    "tpu.trace_start"() <{level = 10 : i32, message = "bqk,bkd->bqd"}> : () -> ()
    %cst_46 = arith.constant dense<0.000000e+00> : vector<2x9x16xf32>
    %123 = tpu.matmul %122, %109, %cst_46 {dimension_numbers = #tpu.dot_dimension_numbers<[2], [1], [1], [2], [0, 0, 0, 1, 1, 2], [0], [0]>} : vector<2x9x9xf32>, vector<2x9x16xf32>, vector<2x9x16xf32> -> vector<2x9x16xf32>
    "tpu.trace_stop"() : () -> ()
    %124 = vector.shape_cast %123 : vector<2x9x16xf32> to vector<18x16xf32>
    %125 = vector.extract_strided_slice %13 {offsets = [32, 0], sizes = [16, 64], strides = [1, 1]} : vector<64x64xf32> to vector<16x64xf32>
    %cst_47 = arith.constant dense<0.000000e+00> : vector<18x64xf32>
    %126 = tpu.matmul %124, %125, %cst_47 {dimension_numbers = #tpu.dot_dimension_numbers<[1], [0], [0], [1], [0, 0, 1, 1], [], []>} : vector<18x16xf32>, vector<16x64xf32>, vector<18x64xf32> -> vector<18x64xf32>
    %127 = arith.addf %103, %126 : vector<18x64xf32>
    %128 = vector.extract_strided_slice %50 {offsets = [0, 48], sizes = [18, 16], strides = [1, 1]} : vector<18x64xf32> to vector<18x16xf32>
    %129 = vector.shape_cast %128 : vector<18x16xf32> to vector<2x9x16xf32>
    %130 = vector.extract_strided_slice %53 {offsets = [0, 48], sizes = [18, 16], strides = [1, 1]} : vector<18x64xf32> to vector<18x16xf32>
    %131 = vector.shape_cast %130 : vector<18x16xf32> to vector<2x9x16xf32>
    %132 = vector.extract_strided_slice %56 {offsets = [0, 48], sizes = [18, 16], strides = [1, 1]} : vector<18x64xf32> to vector<18x16xf32>
    %133 = vector.shape_cast %132 : vector<18x16xf32> to vector<2x9x16xf32>
    "tpu.trace_start"() <{level = 10 : i32, message = "bqd,bkd->bqk"}> : () -> ()
    %cst_48 = arith.constant dense<0.000000e+00> : vector<2x9x9xf32>
    %134 = tpu.matmul %129, %131, %cst_48 {dimension_numbers = #tpu.dot_dimension_numbers<[2], [2], [1], [1], [0, 0, 0, 1, 1, 1], [0], [0]>} : vector<2x9x16xf32>, vector<2x9x16xf32>, vector<2x9x9xf32> -> vector<2x9x9xf32>
    "tpu.trace_stop"() : () -> ()
    %cst_49 = arith.constant 2.500000e-01 : f32
    %135 = vector.broadcast %cst_49 : f32 to vector<2x9x9xf32>
    %136 = arith.mulf %134, %135 : vector<2x9x9xf32>
    %cst_50 = arith.constant dense<0xFF800000> : vector<2x9xf32>
    %137 = vector.multi_reduction <maximumf>, %136, %cst_50 [2] : vector<2x9x9xf32> to vector<2x9xf32>
    %138 = vector.shape_cast %137 : vector<2x9xf32> to vector<2x9x1xf32>
    %139 = vector.broadcast %138 : vector<2x9x1xf32> to vector<2x9x9xf32>
    %140 = arith.subf %136, %139 : vector<2x9x9xf32>
    %141 = math.exp %140 : vector<2x9x9xf32>
    %cst_51 = arith.constant dense<0.000000e+00> : vector<2x9xf32>
    %142 = vector.multi_reduction <add>, %141, %cst_51 [2] : vector<2x9x9xf32> to vector<2x9xf32>
    %143 = vector.shape_cast %142 : vector<2x9xf32> to vector<2x9x1xf32>
    %144 = tpu.reciprocal %143 {approx = true} : vector<2x9x1xf32> -> vector<2x9x1xf32>
    %145 = vector.broadcast %144 : vector<2x9x1xf32> to vector<2x9x9xf32>
    %146 = arith.mulf %141, %145 : vector<2x9x9xf32>
    "tpu.trace_start"() <{level = 10 : i32, message = "bqk,bkd->bqd"}> : () -> ()
    %cst_52 = arith.constant dense<0.000000e+00> : vector<2x9x16xf32>
    %147 = tpu.matmul %146, %133, %cst_52 {dimension_numbers = #tpu.dot_dimension_numbers<[2], [1], [1], [2], [0, 0, 0, 1, 1, 2], [0], [0]>} : vector<2x9x9xf32>, vector<2x9x16xf32>, vector<2x9x16xf32> -> vector<2x9x16xf32>
    "tpu.trace_stop"() : () -> ()
    %148 = vector.shape_cast %147 : vector<2x9x16xf32> to vector<18x16xf32>
    %149 = vector.extract_strided_slice %13 {offsets = [48, 0], sizes = [16, 64], strides = [1, 1]} : vector<64x64xf32> to vector<16x64xf32>
    %cst_53 = arith.constant dense<0.000000e+00> : vector<18x64xf32>
    %150 = tpu.matmul %148, %149, %cst_53 {dimension_numbers = #tpu.dot_dimension_numbers<[1], [0], [0], [1], [0, 0, 1, 1], [], []>} : vector<18x16xf32>, vector<16x64xf32>, vector<18x64xf32> -> vector<18x64xf32>
    %151 = arith.addf %127, %150 : vector<18x64xf32>
    %152 = arith.addf %3, %151 : vector<18x64xf32>
    %153 = vector.broadcast %23 : vector<1x64xf32> to vector<18x64xf32>
    %154 = arith.addf %152, %153 : vector<18x64xf32>
    %cst_54 = arith.constant dense<0.000000e+00> : vector<18xf32>
    %155 = vector.multi_reduction <add>, %154, %cst_54 [1] : vector<18x64xf32> to vector<18xf32>
    %156 = vector.shape_cast %155 : vector<18xf32> to vector<18x1xf32>
    %cst_55 = arith.constant 6.400000e+01 : f32
    %157 = vector.broadcast %cst_55 : f32 to vector<18x1xf32>
    %158 = arith.divf %156, %157 : vector<18x1xf32>
    %159 = vector.broadcast %158 : vector<18x1xf32> to vector<18x64xf32>
    %160 = arith.subf %154, %159 : vector<18x64xf32>
    %161 = arith.mulf %160, %160 : vector<18x64xf32>
    %cst_56 = arith.constant dense<0.000000e+00> : vector<18xf32>
    %162 = vector.multi_reduction <add>, %161, %cst_56 [1] : vector<18x64xf32> to vector<18xf32>
    %163 = vector.shape_cast %162 : vector<18xf32> to vector<18x1xf32>
    %cst_57 = arith.constant 6.400000e+01 : f32
    %164 = vector.broadcast %cst_57 : f32 to vector<18x1xf32>
    %165 = arith.divf %163, %164 : vector<18x1xf32>
    %cst_58 = arith.constant 9.99999974E-6 : f32
    %166 = vector.broadcast %cst_58 : f32 to vector<18x1xf32>
    %167 = arith.addf %165, %166 : vector<18x1xf32>
    %168 = math.rsqrt %167 : vector<18x1xf32>
    %169 = vector.broadcast %168 : vector<18x1xf32> to vector<18x64xf32>
    %170 = arith.mulf %160, %169 : vector<18x64xf32>
    %171 = vector.broadcast %24 : vector<1x64xf32> to vector<18x64xf32>
    %172 = arith.mulf %170, %171 : vector<18x64xf32>
    %173 = vector.broadcast %25 : vector<1x64xf32> to vector<18x64xf32>
    %174 = arith.addf %172, %173 : vector<18x64xf32>
    %cst_59 = arith.constant dense<0.000000e+00> : vector<18x256xf32>
    %175 = tpu.matmul %174, %15, %cst_59 {dimension_numbers = #tpu.dot_dimension_numbers<[1], [0], [0], [1], [0, 0, 1, 1], [], []>} : vector<18x64xf32>, vector<64x256xf32>, vector<18x256xf32> -> vector<18x256xf32>
    %176 = vector.broadcast %26 : vector<1x256xf32> to vector<18x256xf32>
    %177 = arith.addf %175, %176 : vector<18x256xf32>
    %cst_60 = arith.constant 5.000000e-01 : f32
    %178 = vector.broadcast %cst_60 : f32 to vector<18x256xf32>
    %179 = arith.mulf %178, %177 : vector<18x256xf32>
    %cst_61 = arith.constant 0.707106769 : f32
    %180 = vector.broadcast %cst_61 : f32 to vector<18x256xf32>
    %181 = arith.mulf %177, %180 : vector<18x256xf32>
    %cst_62 = arith.constant 0.000000e+00 : f32
    %182 = vector.broadcast %cst_62 : f32 to vector<18x256xf32>
    %183 = arith.cmpf oge, %181, %182 : vector<18x256xf32>
    %cst_63 = arith.constant 1.000000e+00 : f32
    %cst_64 = arith.constant -1.000000e+00 : f32
    %184 = vector.broadcast %cst_63 : f32 to vector<18x256xf32>
    %185 = vector.broadcast %cst_64 : f32 to vector<18x256xf32>
    %186 = arith.select %183, %184, %185 : vector<18x256xi1>, vector<18x256xf32>
    %187 = math.absf %181 : vector<18x256xf32>
    %cst_65 = arith.constant 0.327591091 : f32
    %188 = vector.broadcast %cst_65 : f32 to vector<18x256xf32>
    %189 = arith.mulf %188, %187 : vector<18x256xf32>
    %cst_66 = arith.constant 1.000000e+00 : f32
    %190 = vector.broadcast %cst_66 : f32 to vector<18x256xf32>
    %191 = arith.addf %190, %189 : vector<18x256xf32>
    %cst_67 = arith.constant 1.000000e+00 : f32
    %192 = vector.broadcast %cst_67 : f32 to vector<18x256xf32>
    %193 = arith.divf %192, %191 : vector<18x256xf32>
    %cst_68 = arith.constant 1.06140542 : f32
    %194 = vector.broadcast %cst_68 : f32 to vector<18x256xf32>
    %195 = arith.mulf %194, %193 : vector<18x256xf32>
    %cst_69 = arith.constant -1.45315206 : f32
    %196 = vector.broadcast %cst_69 : f32 to vector<18x256xf32>
    %197 = arith.addf %195, %196 : vector<18x256xf32>
    %198 = arith.mulf %197, %193 : vector<18x256xf32>
    %cst_70 = arith.constant 1.42141378 : f32
    %199 = vector.broadcast %cst_70 : f32 to vector<18x256xf32>
    %200 = arith.addf %198, %199 : vector<18x256xf32>
    %201 = arith.mulf %200, %193 : vector<18x256xf32>
    %cst_71 = arith.constant -0.284496725 : f32
    %202 = vector.broadcast %cst_71 : f32 to vector<18x256xf32>
    %203 = arith.addf %201, %202 : vector<18x256xf32>
    %204 = arith.mulf %203, %193 : vector<18x256xf32>
    %cst_72 = arith.constant 0.254829586 : f32
    %205 = vector.broadcast %cst_72 : f32 to vector<18x256xf32>
    %206 = arith.addf %204, %205 : vector<18x256xf32>
    %207 = arith.mulf %206, %193 : vector<18x256xf32>
    %cst_73 = arith.constant 0.000000e+00 : f32
    %208 = vector.broadcast %cst_73 : f32 to vector<18x256xf32>
    %209 = arith.subf %208, %187 : vector<18x256xf32>
    %210 = arith.mulf %209, %187 : vector<18x256xf32>
    %211 = math.exp %210 : vector<18x256xf32>
    %212 = arith.mulf %207, %211 : vector<18x256xf32>
    %cst_74 = arith.constant 1.000000e+00 : f32
    %213 = vector.broadcast %cst_74 : f32 to vector<18x256xf32>
    %214 = arith.subf %213, %212 : vector<18x256xf32>
    %215 = arith.mulf %186, %214 : vector<18x256xf32>
    %cst_75 = arith.constant 1.000000e+00 : f32
    %216 = vector.broadcast %cst_75 : f32 to vector<18x256xf32>
    %217 = arith.addf %216, %215 : vector<18x256xf32>
    %218 = arith.mulf %179, %217 : vector<18x256xf32>
    %cst_76 = arith.constant dense<0.000000e+00> : vector<18x64xf32>
    %219 = tpu.matmul %218, %17, %cst_76 {dimension_numbers = #tpu.dot_dimension_numbers<[1], [0], [0], [1], [0, 0, 1, 1], [], []>} : vector<18x256xf32>, vector<256x64xf32>, vector<18x64xf32> -> vector<18x64xf32>
    %220 = vector.broadcast %27 : vector<1x64xf32> to vector<18x64xf32>
    %221 = arith.addf %219, %220 : vector<18x64xf32>
    %222 = arith.addf %154, %221 : vector<18x64xf32>
    %c0_77 = arith.constant 0 : index
    %c0_78 = arith.constant 0 : index
    %223 = vector.load %arg9[%c0_77, %c0_78] : memref<18x64xf32, #tpu.memory_space<vmem>>, vector<18x64xf32>
    tpu.vector_store %arg9[%c0_77, %c0_78], %222 {strides = array<i32>} : memref<18x64xf32, #tpu.memory_space<vmem>>, vector<18x64xf32>,
    return
  }
  func.func @transform_0(%arg0: i32) -> (i32, i32) {
    %c0_i32 = arith.constant 0 : i32
    %c0_i32_0 = arith.constant 0 : i32
    %c0_i32_1 = arith.constant 0 : i32
    return %c0_i32, %c0_i32_0 : i32, i32
  }
  func.func @transform_1(%arg0: i32) -> (i32, i32, i32) {
    %c0_i32 = arith.constant 0 : i32
    %c0_i32_0 = arith.constant 0 : i32
    %c0_i32_1 = arith.constant 0 : i32
    return %arg0, %c0_i32, %c0_i32_0 : i32, i32, i32
  }
  func.func @transform_2(%arg0: i32) -> (i32, i32, i32) {
    %c0_i32 = arith.constant 0 : i32
    %c0_i32_0 = arith.constant 0 : i32
    %c0_i32_1 = arith.constant 0 : i32
    return %arg0, %c0_i32, %c0_i32_0 : i32, i32, i32
  }
  func.func @transform_3(%arg0: i32) -> (i32, i32, i32) {
    %c0_i32 = arith.constant 0 : i32
    %c0_i32_0 = arith.constant 0 : i32
    %c0_i32_1 = arith.constant 0 : i32
    return %arg0, %c0_i32, %c0_i32_0 : i32, i32, i32
  }
  func.func @transform_4(%arg0: i32) -> (i32, i32, i32) {
    %c0_i32 = arith.constant 0 : i32
    %c0_i32_0 = arith.constant 0 : i32
    %c0_i32_1 = arith.constant 0 : i32
    return %arg0, %c0_i32, %c0_i32_0 : i32, i32, i32
  }
  func.func @transform_5(%arg0: i32) -> (i32, i32, i32) {
    %c0_i32 = arith.constant 0 : i32
    %c0_i32_0 = arith.constant 0 : i32
    %c0_i32_1 = arith.constant 0 : i32
    return %arg0, %c0_i32, %c0_i32_0 : i32, i32, i32
  }
  func.func @transform_6(%arg0: i32) -> (i32, i32, i32) {
    %c0_i32 = arith.constant 0 : i32
    %c0_i32_0 = arith.constant 0 : i32
    %c0_i32_1 = arith.constant 0 : i32
    return %arg0, %c0_i32, %c0_i32_0 : i32, i32, i32
  }
  func.func @transform_7(%arg0: i32) -> (i32, i32, i32) {
    %c0_i32 = arith.constant 0 : i32
    %c0_i32_0 = arith.constant 0 : i32
    %c0_i32_1 = arith.constant 0 : i32
    return %arg0, %c0_i32, %c0_i32_0 : i32, i32, i32
  }
  func.func @transform_8(%arg0: i32) -> (i32, i32) {
    %c0_i32 = arith.constant 0 : i32
    %c0_i32_0 = arith.constant 0 : i32
    %c0_i32_1 = arith.constant 0 : i32
    return %c0_i32, %c0_i32_0 : i32, i32
  }
}

module attributes {stable_mosaic.version = 11 : i64} {
  func.func @_stack_kernel(%arg0: i32, %arg1: memref<66x32xf32, #tpu.memory_space<vmem>>, %arg2: memref<66x32xf32, #tpu.memory_space<vmem>>, %arg3: memref<1x32x32xf32, #tpu.memory_space<vmem>>, %arg4: memref<1x32x32xf32, #tpu.memory_space<vmem>>, %arg5: memref<1x32x32xf32, #tpu.memory_space<vmem>>, %arg6: memref<1x32x32xf32, #tpu.memory_space<vmem>>, %arg7: memref<1x32x128xf32, #tpu.memory_space<vmem>>, %arg8: memref<1x128x32xf32, #tpu.memory_space<vmem>>, %arg9: memref<1x10x128xf32, #tpu.memory_space<vmem>>, %arg10: memref<66x32xf32, #tpu.memory_space<vmem>>) attributes {dimension_semantics = [#tpu.dimension_semantics<arbitrary>], iteration_bounds = array<i64: 1>, scalar_prefetch = 0 : i64, scratch_operands = 0 : i64, tpu.core_type = #tpu.core_type<tc>, window_params = [{pipeline_mode = #tpu.pipeline_mode<synchronous>, transform_indices = @transform_0, window_bounds = array<i64: 66, 32>}, {pipeline_mode = #tpu.pipeline_mode<synchronous>, transform_indices = @transform_1, window_bounds = array<i64: 66, 32>}, {transform_indices = @transform_2, window_bounds = array<i64: 1, 32, 32>}, {transform_indices = @transform_3, window_bounds = array<i64: 1, 32, 32>}, {transform_indices = @transform_4, window_bounds = array<i64: 1, 32, 32>}, {transform_indices = @transform_5, window_bounds = array<i64: 1, 32, 32>}, {transform_indices = @transform_6, window_bounds = array<i64: 1, 32, 128>}, {transform_indices = @transform_7, window_bounds = array<i64: 1, 128, 32>}, {transform_indices = @transform_8, window_bounds = array<i64: 1, 10, 128>}, {pipeline_mode = #tpu.pipeline_mode<synchronous>, transform_indices = @transform_9, window_bounds = array<i64: 66, 32>}]} {
    %c0_i32 = arith.constant 0 : i32
    %0 = arith.cmpi eq, %arg0, %c0_i32 : i32
    %1 = arith.extui %0 : i1 to i32
    %c0_i32_0 = arith.constant 0 : i32
    %2 = arith.cmpi ne, %1, %c0_i32_0 : i32
    scf.if %2 {
      %c0_79 = arith.constant 0 : index
      %c0_80 = arith.constant 0 : index
      %224 = vector.load %arg1[%c0_79, %c0_80] : memref<66x32xf32, #tpu.memory_space<vmem>>, vector<66x32xf32>
      %c0_81 = arith.constant 0 : index
      %c0_82 = arith.constant 0 : index
      %225 = vector.load %arg2[%c0_81, %c0_82] : memref<66x32xf32, #tpu.memory_space<vmem>>, vector<66x32xf32>
      %226 = arith.addf %224, %225 : vector<66x32xf32>
      %c0_83 = arith.constant 0 : index
      %c0_84 = arith.constant 0 : index
      %227 = vector.load %arg10[%c0_83, %c0_84] : memref<66x32xf32, #tpu.memory_space<vmem>>, vector<66x32xf32>
      tpu.vector_store %arg10[%c0_83, %c0_84], %226 {strides = array<i32>} : memref<66x32xf32, #tpu.memory_space<vmem>>, vector<66x32xf32>,
    } else {
    }
    %c0 = arith.constant 0 : index
    %c0_1 = arith.constant 0 : index
    %3 = vector.load %arg10[%c0, %c0_1] : memref<66x32xf32, #tpu.memory_space<vmem>>, vector<66x32xf32>
    %c0_2 = arith.constant 0 : index
    %c0_3 = arith.constant 0 : index
    %c0_4 = arith.constant 0 : index
    %4 = vector.load %arg9[%c0_2, %c0_3, %c0_4] : memref<1x10x128xf32, #tpu.memory_space<vmem>>, vector<1x10x128xf32>
    %5 = vector.shape_cast %4 : vector<1x10x128xf32> to vector<10x128xf32>
    %c0_5 = arith.constant 0 : index
    %c0_6 = arith.constant 0 : index
    %c0_7 = arith.constant 0 : index
    %6 = vector.load %arg3[%c0_5, %c0_6, %c0_7] : memref<1x32x32xf32, #tpu.memory_space<vmem>>, vector<1x32x32xf32>
    %7 = vector.shape_cast %6 : vector<1x32x32xf32> to vector<32x32xf32>
    %c0_8 = arith.constant 0 : index
    %c0_9 = arith.constant 0 : index
    %c0_10 = arith.constant 0 : index
    %8 = vector.load %arg4[%c0_8, %c0_9, %c0_10] : memref<1x32x32xf32, #tpu.memory_space<vmem>>, vector<1x32x32xf32>
    %9 = vector.shape_cast %8 : vector<1x32x32xf32> to vector<32x32xf32>
    %c0_11 = arith.constant 0 : index
    %c0_12 = arith.constant 0 : index
    %c0_13 = arith.constant 0 : index
    %10 = vector.load %arg5[%c0_11, %c0_12, %c0_13] : memref<1x32x32xf32, #tpu.memory_space<vmem>>, vector<1x32x32xf32>
    %11 = vector.shape_cast %10 : vector<1x32x32xf32> to vector<32x32xf32>
    %c0_14 = arith.constant 0 : index
    %c0_15 = arith.constant 0 : index
    %c0_16 = arith.constant 0 : index
    %12 = vector.load %arg6[%c0_14, %c0_15, %c0_16] : memref<1x32x32xf32, #tpu.memory_space<vmem>>, vector<1x32x32xf32>
    %13 = vector.shape_cast %12 : vector<1x32x32xf32> to vector<32x32xf32>
    %c0_17 = arith.constant 0 : index
    %c0_18 = arith.constant 0 : index
    %c0_19 = arith.constant 0 : index
    %14 = vector.load %arg7[%c0_17, %c0_18, %c0_19] : memref<1x32x128xf32, #tpu.memory_space<vmem>>, vector<1x32x128xf32>
    %15 = vector.shape_cast %14 : vector<1x32x128xf32> to vector<32x128xf32>
    %c0_20 = arith.constant 0 : index
    %c0_21 = arith.constant 0 : index
    %c0_22 = arith.constant 0 : index
    %16 = vector.load %arg8[%c0_20, %c0_21, %c0_22] : memref<1x128x32xf32, #tpu.memory_space<vmem>>, vector<1x128x32xf32>
    %17 = vector.shape_cast %16 : vector<1x128x32xf32> to vector<128x32xf32>
    %18 = vector.extract_strided_slice %5 {offsets = [0, 0], sizes = [1, 32], strides = [1, 1]} : vector<10x128xf32> to vector<1x32xf32>
    %19 = vector.extract_strided_slice %5 {offsets = [1, 0], sizes = [1, 32], strides = [1, 1]} : vector<10x128xf32> to vector<1x32xf32>
    %20 = vector.extract_strided_slice %5 {offsets = [2, 0], sizes = [1, 32], strides = [1, 1]} : vector<10x128xf32> to vector<1x32xf32>
    %21 = vector.extract_strided_slice %5 {offsets = [3, 0], sizes = [1, 32], strides = [1, 1]} : vector<10x128xf32> to vector<1x32xf32>
    %22 = vector.extract_strided_slice %5 {offsets = [4, 0], sizes = [1, 32], strides = [1, 1]} : vector<10x128xf32> to vector<1x32xf32>
    %23 = vector.extract_strided_slice %5 {offsets = [5, 0], sizes = [1, 32], strides = [1, 1]} : vector<10x128xf32> to vector<1x32xf32>
    %24 = vector.extract_strided_slice %5 {offsets = [6, 0], sizes = [1, 32], strides = [1, 1]} : vector<10x128xf32> to vector<1x32xf32>
    %25 = vector.extract_strided_slice %5 {offsets = [7, 0], sizes = [1, 32], strides = [1, 1]} : vector<10x128xf32> to vector<1x32xf32>
    %26 = vector.extract_strided_slice %5 {offsets = [8, 0], sizes = [1, 128], strides = [1, 1]} : vector<10x128xf32> to vector<1x128xf32>
    %27 = vector.extract_strided_slice %5 {offsets = [9, 0], sizes = [1, 32], strides = [1, 1]} : vector<10x128xf32> to vector<1x32xf32>
    %cst = arith.constant dense<0.000000e+00> : vector<66xf32>
    %28 = vector.multi_reduction <add>, %3, %cst [1] : vector<66x32xf32> to vector<66xf32>
    %29 = vector.shape_cast %28 : vector<66xf32> to vector<66x1xf32>
    %cst_23 = arith.constant 3.200000e+01 : f32
    %30 = vector.broadcast %cst_23 : f32 to vector<66x1xf32>
    %31 = arith.divf %29, %30 : vector<66x1xf32>
    %32 = vector.broadcast %31 : vector<66x1xf32> to vector<66x32xf32>
    %33 = arith.subf %3, %32 : vector<66x32xf32>
    %34 = arith.mulf %33, %33 : vector<66x32xf32>
    %cst_24 = arith.constant dense<0.000000e+00> : vector<66xf32>
    %35 = vector.multi_reduction <add>, %34, %cst_24 [1] : vector<66x32xf32> to vector<66xf32>
    %36 = vector.shape_cast %35 : vector<66xf32> to vector<66x1xf32>
    %cst_25 = arith.constant 3.200000e+01 : f32
    %37 = vector.broadcast %cst_25 : f32 to vector<66x1xf32>
    %38 = arith.divf %36, %37 : vector<66x1xf32>
    %cst_26 = arith.constant 9.99999974E-6 : f32
    %39 = vector.broadcast %cst_26 : f32 to vector<66x1xf32>
    %40 = arith.addf %38, %39 : vector<66x1xf32>
    %41 = math.rsqrt %40 : vector<66x1xf32>
    %42 = vector.broadcast %41 : vector<66x1xf32> to vector<66x32xf32>
    %43 = arith.mulf %33, %42 : vector<66x32xf32>
    %44 = vector.broadcast %18 : vector<1x32xf32> to vector<66x32xf32>
    %45 = arith.mulf %43, %44 : vector<66x32xf32>
    %46 = vector.broadcast %19 : vector<1x32xf32> to vector<66x32xf32>
    %47 = arith.addf %45, %46 : vector<66x32xf32>
    %cst_27 = arith.constant dense<0.000000e+00> : vector<66x32xf32>
    %48 = tpu.matmul %47, %7, %cst_27 {dimension_numbers = #tpu.dot_dimension_numbers<[1], [0], [0], [1], [0, 0, 1, 1], [], []>} : vector<66x32xf32>, vector<32x32xf32>, vector<66x32xf32> -> vector<66x32xf32>
    %49 = vector.broadcast %20 : vector<1x32xf32> to vector<66x32xf32>
    %50 = arith.addf %48, %49 : vector<66x32xf32>
    %cst_28 = arith.constant dense<0.000000e+00> : vector<66x32xf32>
    %51 = tpu.matmul %47, %9, %cst_28 {dimension_numbers = #tpu.dot_dimension_numbers<[1], [0], [0], [1], [0, 0, 1, 1], [], []>} : vector<66x32xf32>, vector<32x32xf32>, vector<66x32xf32> -> vector<66x32xf32>
    %52 = vector.broadcast %21 : vector<1x32xf32> to vector<66x32xf32>
    %53 = arith.addf %51, %52 : vector<66x32xf32>
    %cst_29 = arith.constant dense<0.000000e+00> : vector<66x32xf32>
    %54 = tpu.matmul %47, %11, %cst_29 {dimension_numbers = #tpu.dot_dimension_numbers<[1], [0], [0], [1], [0, 0, 1, 1], [], []>} : vector<66x32xf32>, vector<32x32xf32>, vector<66x32xf32> -> vector<66x32xf32>
    %55 = vector.broadcast %22 : vector<1x32xf32> to vector<66x32xf32>
    %56 = arith.addf %54, %55 : vector<66x32xf32>
    %57 = vector.extract_strided_slice %50 {offsets = [0, 0], sizes = [66, 8], strides = [1, 1]} : vector<66x32xf32> to vector<66x8xf32>
    %58 = vector.shape_cast %57 : vector<66x8xf32> to vector<2x33x8xf32>
    %59 = vector.extract_strided_slice %53 {offsets = [0, 0], sizes = [66, 8], strides = [1, 1]} : vector<66x32xf32> to vector<66x8xf32>
    %60 = vector.shape_cast %59 : vector<66x8xf32> to vector<2x33x8xf32>
    %61 = vector.extract_strided_slice %56 {offsets = [0, 0], sizes = [66, 8], strides = [1, 1]} : vector<66x32xf32> to vector<66x8xf32>
    %62 = vector.shape_cast %61 : vector<66x8xf32> to vector<2x33x8xf32>
    "tpu.trace_start"() <{level = 10 : i32, message = "bqd,bkd->bqk"}> : () -> ()
    %cst_30 = arith.constant dense<0.000000e+00> : vector<2x33x33xf32>
    %63 = tpu.matmul %58, %60, %cst_30 {dimension_numbers = #tpu.dot_dimension_numbers<[2], [2], [1], [1], [0, 0, 0, 1, 1, 1], [0], [0]>} : vector<2x33x8xf32>, vector<2x33x8xf32>, vector<2x33x33xf32> -> vector<2x33x33xf32>
    "tpu.trace_stop"() : () -> ()
    %cst_31 = arith.constant 0.353553385 : f32
    %64 = vector.broadcast %cst_31 : f32 to vector<2x33x33xf32>
    %65 = arith.mulf %63, %64 : vector<2x33x33xf32>
    %cst_32 = arith.constant dense<0xFF800000> : vector<2x33xf32>
    %66 = vector.multi_reduction <maximumf>, %65, %cst_32 [2] : vector<2x33x33xf32> to vector<2x33xf32>
    %67 = vector.shape_cast %66 : vector<2x33xf32> to vector<2x33x1xf32>
    %68 = vector.broadcast %67 : vector<2x33x1xf32> to vector<2x33x33xf32>
    %69 = arith.subf %65, %68 : vector<2x33x33xf32>
    %70 = math.exp %69 : vector<2x33x33xf32>
    %cst_33 = arith.constant dense<0.000000e+00> : vector<2x33xf32>
    %71 = vector.multi_reduction <add>, %70, %cst_33 [2] : vector<2x33x33xf32> to vector<2x33xf32>
    %72 = vector.shape_cast %71 : vector<2x33xf32> to vector<2x33x1xf32>
    %73 = tpu.reciprocal %72 {approx = true} : vector<2x33x1xf32> -> vector<2x33x1xf32>
    %74 = vector.broadcast %73 : vector<2x33x1xf32> to vector<2x33x33xf32>
    %75 = arith.mulf %70, %74 : vector<2x33x33xf32>
    "tpu.trace_start"() <{level = 10 : i32, message = "bqk,bkd->bqd"}> : () -> ()
    %cst_34 = arith.constant dense<0.000000e+00> : vector<2x33x8xf32>
    %76 = tpu.matmul %75, %62, %cst_34 {dimension_numbers = #tpu.dot_dimension_numbers<[2], [1], [1], [2], [0, 0, 0, 1, 1, 2], [0], [0]>} : vector<2x33x33xf32>, vector<2x33x8xf32>, vector<2x33x8xf32> -> vector<2x33x8xf32>
    "tpu.trace_stop"() : () -> ()
    %77 = vector.shape_cast %76 : vector<2x33x8xf32> to vector<66x8xf32>
    %78 = vector.extract_strided_slice %13 {offsets = [0, 0], sizes = [8, 32], strides = [1, 1]} : vector<32x32xf32> to vector<8x32xf32>
    %cst_35 = arith.constant dense<0.000000e+00> : vector<66x32xf32>
    %79 = tpu.matmul %77, %78, %cst_35 {dimension_numbers = #tpu.dot_dimension_numbers<[1], [0], [0], [1], [0, 0, 1, 1], [], []>} : vector<66x8xf32>, vector<8x32xf32>, vector<66x32xf32> -> vector<66x32xf32>
    %80 = vector.extract_strided_slice %50 {offsets = [0, 8], sizes = [66, 8], strides = [1, 1]} : vector<66x32xf32> to vector<66x8xf32>
    %81 = vector.shape_cast %80 : vector<66x8xf32> to vector<2x33x8xf32>
    %82 = vector.extract_strided_slice %53 {offsets = [0, 8], sizes = [66, 8], strides = [1, 1]} : vector<66x32xf32> to vector<66x8xf32>
    %83 = vector.shape_cast %82 : vector<66x8xf32> to vector<2x33x8xf32>
    %84 = vector.extract_strided_slice %56 {offsets = [0, 8], sizes = [66, 8], strides = [1, 1]} : vector<66x32xf32> to vector<66x8xf32>
    %85 = vector.shape_cast %84 : vector<66x8xf32> to vector<2x33x8xf32>
    "tpu.trace_start"() <{level = 10 : i32, message = "bqd,bkd->bqk"}> : () -> ()
    %cst_36 = arith.constant dense<0.000000e+00> : vector<2x33x33xf32>
    %86 = tpu.matmul %81, %83, %cst_36 {dimension_numbers = #tpu.dot_dimension_numbers<[2], [2], [1], [1], [0, 0, 0, 1, 1, 1], [0], [0]>} : vector<2x33x8xf32>, vector<2x33x8xf32>, vector<2x33x33xf32> -> vector<2x33x33xf32>
    "tpu.trace_stop"() : () -> ()
    %cst_37 = arith.constant 0.353553385 : f32
    %87 = vector.broadcast %cst_37 : f32 to vector<2x33x33xf32>
    %88 = arith.mulf %86, %87 : vector<2x33x33xf32>
    %cst_38 = arith.constant dense<0xFF800000> : vector<2x33xf32>
    %89 = vector.multi_reduction <maximumf>, %88, %cst_38 [2] : vector<2x33x33xf32> to vector<2x33xf32>
    %90 = vector.shape_cast %89 : vector<2x33xf32> to vector<2x33x1xf32>
    %91 = vector.broadcast %90 : vector<2x33x1xf32> to vector<2x33x33xf32>
    %92 = arith.subf %88, %91 : vector<2x33x33xf32>
    %93 = math.exp %92 : vector<2x33x33xf32>
    %cst_39 = arith.constant dense<0.000000e+00> : vector<2x33xf32>
    %94 = vector.multi_reduction <add>, %93, %cst_39 [2] : vector<2x33x33xf32> to vector<2x33xf32>
    %95 = vector.shape_cast %94 : vector<2x33xf32> to vector<2x33x1xf32>
    %96 = tpu.reciprocal %95 {approx = true} : vector<2x33x1xf32> -> vector<2x33x1xf32>
    %97 = vector.broadcast %96 : vector<2x33x1xf32> to vector<2x33x33xf32>
    %98 = arith.mulf %93, %97 : vector<2x33x33xf32>
    "tpu.trace_start"() <{level = 10 : i32, message = "bqk,bkd->bqd"}> : () -> ()
    %cst_40 = arith.constant dense<0.000000e+00> : vector<2x33x8xf32>
    %99 = tpu.matmul %98, %85, %cst_40 {dimension_numbers = #tpu.dot_dimension_numbers<[2], [1], [1], [2], [0, 0, 0, 1, 1, 2], [0], [0]>} : vector<2x33x33xf32>, vector<2x33x8xf32>, vector<2x33x8xf32> -> vector<2x33x8xf32>
    "tpu.trace_stop"() : () -> ()
    %100 = vector.shape_cast %99 : vector<2x33x8xf32> to vector<66x8xf32>
    %101 = vector.extract_strided_slice %13 {offsets = [8, 0], sizes = [8, 32], strides = [1, 1]} : vector<32x32xf32> to vector<8x32xf32>
    %cst_41 = arith.constant dense<0.000000e+00> : vector<66x32xf32>
    %102 = tpu.matmul %100, %101, %cst_41 {dimension_numbers = #tpu.dot_dimension_numbers<[1], [0], [0], [1], [0, 0, 1, 1], [], []>} : vector<66x8xf32>, vector<8x32xf32>, vector<66x32xf32> -> vector<66x32xf32>
    %103 = arith.addf %79, %102 : vector<66x32xf32>
    %104 = vector.extract_strided_slice %50 {offsets = [0, 16], sizes = [66, 8], strides = [1, 1]} : vector<66x32xf32> to vector<66x8xf32>
    %105 = vector.shape_cast %104 : vector<66x8xf32> to vector<2x33x8xf32>
    %106 = vector.extract_strided_slice %53 {offsets = [0, 16], sizes = [66, 8], strides = [1, 1]} : vector<66x32xf32> to vector<66x8xf32>
    %107 = vector.shape_cast %106 : vector<66x8xf32> to vector<2x33x8xf32>
    %108 = vector.extract_strided_slice %56 {offsets = [0, 16], sizes = [66, 8], strides = [1, 1]} : vector<66x32xf32> to vector<66x8xf32>
    %109 = vector.shape_cast %108 : vector<66x8xf32> to vector<2x33x8xf32>
    "tpu.trace_start"() <{level = 10 : i32, message = "bqd,bkd->bqk"}> : () -> ()
    %cst_42 = arith.constant dense<0.000000e+00> : vector<2x33x33xf32>
    %110 = tpu.matmul %105, %107, %cst_42 {dimension_numbers = #tpu.dot_dimension_numbers<[2], [2], [1], [1], [0, 0, 0, 1, 1, 1], [0], [0]>} : vector<2x33x8xf32>, vector<2x33x8xf32>, vector<2x33x33xf32> -> vector<2x33x33xf32>
    "tpu.trace_stop"() : () -> ()
    %cst_43 = arith.constant 0.353553385 : f32
    %111 = vector.broadcast %cst_43 : f32 to vector<2x33x33xf32>
    %112 = arith.mulf %110, %111 : vector<2x33x33xf32>
    %cst_44 = arith.constant dense<0xFF800000> : vector<2x33xf32>
    %113 = vector.multi_reduction <maximumf>, %112, %cst_44 [2] : vector<2x33x33xf32> to vector<2x33xf32>
    %114 = vector.shape_cast %113 : vector<2x33xf32> to vector<2x33x1xf32>
    %115 = vector.broadcast %114 : vector<2x33x1xf32> to vector<2x33x33xf32>
    %116 = arith.subf %112, %115 : vector<2x33x33xf32>
    %117 = math.exp %116 : vector<2x33x33xf32>
    %cst_45 = arith.constant dense<0.000000e+00> : vector<2x33xf32>
    %118 = vector.multi_reduction <add>, %117, %cst_45 [2] : vector<2x33x33xf32> to vector<2x33xf32>
    %119 = vector.shape_cast %118 : vector<2x33xf32> to vector<2x33x1xf32>
    %120 = tpu.reciprocal %119 {approx = true} : vector<2x33x1xf32> -> vector<2x33x1xf32>
    %121 = vector.broadcast %120 : vector<2x33x1xf32> to vector<2x33x33xf32>
    %122 = arith.mulf %117, %121 : vector<2x33x33xf32>
    "tpu.trace_start"() <{level = 10 : i32, message = "bqk,bkd->bqd"}> : () -> ()
    %cst_46 = arith.constant dense<0.000000e+00> : vector<2x33x8xf32>
    %123 = tpu.matmul %122, %109, %cst_46 {dimension_numbers = #tpu.dot_dimension_numbers<[2], [1], [1], [2], [0, 0, 0, 1, 1, 2], [0], [0]>} : vector<2x33x33xf32>, vector<2x33x8xf32>, vector<2x33x8xf32> -> vector<2x33x8xf32>
    "tpu.trace_stop"() : () -> ()
    %124 = vector.shape_cast %123 : vector<2x33x8xf32> to vector<66x8xf32>
    %125 = vector.extract_strided_slice %13 {offsets = [16, 0], sizes = [8, 32], strides = [1, 1]} : vector<32x32xf32> to vector<8x32xf32>
    %cst_47 = arith.constant dense<0.000000e+00> : vector<66x32xf32>
    %126 = tpu.matmul %124, %125, %cst_47 {dimension_numbers = #tpu.dot_dimension_numbers<[1], [0], [0], [1], [0, 0, 1, 1], [], []>} : vector<66x8xf32>, vector<8x32xf32>, vector<66x32xf32> -> vector<66x32xf32>
    %127 = arith.addf %103, %126 : vector<66x32xf32>
    %128 = vector.extract_strided_slice %50 {offsets = [0, 24], sizes = [66, 8], strides = [1, 1]} : vector<66x32xf32> to vector<66x8xf32>
    %129 = vector.shape_cast %128 : vector<66x8xf32> to vector<2x33x8xf32>
    %130 = vector.extract_strided_slice %53 {offsets = [0, 24], sizes = [66, 8], strides = [1, 1]} : vector<66x32xf32> to vector<66x8xf32>
    %131 = vector.shape_cast %130 : vector<66x8xf32> to vector<2x33x8xf32>
    %132 = vector.extract_strided_slice %56 {offsets = [0, 24], sizes = [66, 8], strides = [1, 1]} : vector<66x32xf32> to vector<66x8xf32>
    %133 = vector.shape_cast %132 : vector<66x8xf32> to vector<2x33x8xf32>
    "tpu.trace_start"() <{level = 10 : i32, message = "bqd,bkd->bqk"}> : () -> ()
    %cst_48 = arith.constant dense<0.000000e+00> : vector<2x33x33xf32>
    %134 = tpu.matmul %129, %131, %cst_48 {dimension_numbers = #tpu.dot_dimension_numbers<[2], [2], [1], [1], [0, 0, 0, 1, 1, 1], [0], [0]>} : vector<2x33x8xf32>, vector<2x33x8xf32>, vector<2x33x33xf32> -> vector<2x33x33xf32>
    "tpu.trace_stop"() : () -> ()
    %cst_49 = arith.constant 0.353553385 : f32
    %135 = vector.broadcast %cst_49 : f32 to vector<2x33x33xf32>
    %136 = arith.mulf %134, %135 : vector<2x33x33xf32>
    %cst_50 = arith.constant dense<0xFF800000> : vector<2x33xf32>
    %137 = vector.multi_reduction <maximumf>, %136, %cst_50 [2] : vector<2x33x33xf32> to vector<2x33xf32>
    %138 = vector.shape_cast %137 : vector<2x33xf32> to vector<2x33x1xf32>
    %139 = vector.broadcast %138 : vector<2x33x1xf32> to vector<2x33x33xf32>
    %140 = arith.subf %136, %139 : vector<2x33x33xf32>
    %141 = math.exp %140 : vector<2x33x33xf32>
    %cst_51 = arith.constant dense<0.000000e+00> : vector<2x33xf32>
    %142 = vector.multi_reduction <add>, %141, %cst_51 [2] : vector<2x33x33xf32> to vector<2x33xf32>
    %143 = vector.shape_cast %142 : vector<2x33xf32> to vector<2x33x1xf32>
    %144 = tpu.reciprocal %143 {approx = true} : vector<2x33x1xf32> -> vector<2x33x1xf32>
    %145 = vector.broadcast %144 : vector<2x33x1xf32> to vector<2x33x33xf32>
    %146 = arith.mulf %141, %145 : vector<2x33x33xf32>
    "tpu.trace_start"() <{level = 10 : i32, message = "bqk,bkd->bqd"}> : () -> ()
    %cst_52 = arith.constant dense<0.000000e+00> : vector<2x33x8xf32>
    %147 = tpu.matmul %146, %133, %cst_52 {dimension_numbers = #tpu.dot_dimension_numbers<[2], [1], [1], [2], [0, 0, 0, 1, 1, 2], [0], [0]>} : vector<2x33x33xf32>, vector<2x33x8xf32>, vector<2x33x8xf32> -> vector<2x33x8xf32>
    "tpu.trace_stop"() : () -> ()
    %148 = vector.shape_cast %147 : vector<2x33x8xf32> to vector<66x8xf32>
    %149 = vector.extract_strided_slice %13 {offsets = [24, 0], sizes = [8, 32], strides = [1, 1]} : vector<32x32xf32> to vector<8x32xf32>
    %cst_53 = arith.constant dense<0.000000e+00> : vector<66x32xf32>
    %150 = tpu.matmul %148, %149, %cst_53 {dimension_numbers = #tpu.dot_dimension_numbers<[1], [0], [0], [1], [0, 0, 1, 1], [], []>} : vector<66x8xf32>, vector<8x32xf32>, vector<66x32xf32> -> vector<66x32xf32>
    %151 = arith.addf %127, %150 : vector<66x32xf32>
    %152 = arith.addf %3, %151 : vector<66x32xf32>
    %153 = vector.broadcast %23 : vector<1x32xf32> to vector<66x32xf32>
    %154 = arith.addf %152, %153 : vector<66x32xf32>
    %cst_54 = arith.constant dense<0.000000e+00> : vector<66xf32>
    %155 = vector.multi_reduction <add>, %154, %cst_54 [1] : vector<66x32xf32> to vector<66xf32>
    %156 = vector.shape_cast %155 : vector<66xf32> to vector<66x1xf32>
    %cst_55 = arith.constant 3.200000e+01 : f32
    %157 = vector.broadcast %cst_55 : f32 to vector<66x1xf32>
    %158 = arith.divf %156, %157 : vector<66x1xf32>
    %159 = vector.broadcast %158 : vector<66x1xf32> to vector<66x32xf32>
    %160 = arith.subf %154, %159 : vector<66x32xf32>
    %161 = arith.mulf %160, %160 : vector<66x32xf32>
    %cst_56 = arith.constant dense<0.000000e+00> : vector<66xf32>
    %162 = vector.multi_reduction <add>, %161, %cst_56 [1] : vector<66x32xf32> to vector<66xf32>
    %163 = vector.shape_cast %162 : vector<66xf32> to vector<66x1xf32>
    %cst_57 = arith.constant 3.200000e+01 : f32
    %164 = vector.broadcast %cst_57 : f32 to vector<66x1xf32>
    %165 = arith.divf %163, %164 : vector<66x1xf32>
    %cst_58 = arith.constant 9.99999974E-6 : f32
    %166 = vector.broadcast %cst_58 : f32 to vector<66x1xf32>
    %167 = arith.addf %165, %166 : vector<66x1xf32>
    %168 = math.rsqrt %167 : vector<66x1xf32>
    %169 = vector.broadcast %168 : vector<66x1xf32> to vector<66x32xf32>
    %170 = arith.mulf %160, %169 : vector<66x32xf32>
    %171 = vector.broadcast %24 : vector<1x32xf32> to vector<66x32xf32>
    %172 = arith.mulf %170, %171 : vector<66x32xf32>
    %173 = vector.broadcast %25 : vector<1x32xf32> to vector<66x32xf32>
    %174 = arith.addf %172, %173 : vector<66x32xf32>
    %cst_59 = arith.constant dense<0.000000e+00> : vector<66x128xf32>
    %175 = tpu.matmul %174, %15, %cst_59 {dimension_numbers = #tpu.dot_dimension_numbers<[1], [0], [0], [1], [0, 0, 1, 1], [], []>} : vector<66x32xf32>, vector<32x128xf32>, vector<66x128xf32> -> vector<66x128xf32>
    %176 = vector.broadcast %26 : vector<1x128xf32> to vector<66x128xf32>
    %177 = arith.addf %175, %176 : vector<66x128xf32>
    %cst_60 = arith.constant 5.000000e-01 : f32
    %178 = vector.broadcast %cst_60 : f32 to vector<66x128xf32>
    %179 = arith.mulf %178, %177 : vector<66x128xf32>
    %cst_61 = arith.constant 0.707106769 : f32
    %180 = vector.broadcast %cst_61 : f32 to vector<66x128xf32>
    %181 = arith.mulf %177, %180 : vector<66x128xf32>
    %cst_62 = arith.constant 0.000000e+00 : f32
    %182 = vector.broadcast %cst_62 : f32 to vector<66x128xf32>
    %183 = arith.cmpf oge, %181, %182 : vector<66x128xf32>
    %cst_63 = arith.constant 1.000000e+00 : f32
    %cst_64 = arith.constant -1.000000e+00 : f32
    %184 = vector.broadcast %cst_63 : f32 to vector<66x128xf32>
    %185 = vector.broadcast %cst_64 : f32 to vector<66x128xf32>
    %186 = arith.select %183, %184, %185 : vector<66x128xi1>, vector<66x128xf32>
    %187 = math.absf %181 : vector<66x128xf32>
    %cst_65 = arith.constant 0.327591091 : f32
    %188 = vector.broadcast %cst_65 : f32 to vector<66x128xf32>
    %189 = arith.mulf %188, %187 : vector<66x128xf32>
    %cst_66 = arith.constant 1.000000e+00 : f32
    %190 = vector.broadcast %cst_66 : f32 to vector<66x128xf32>
    %191 = arith.addf %190, %189 : vector<66x128xf32>
    %cst_67 = arith.constant 1.000000e+00 : f32
    %192 = vector.broadcast %cst_67 : f32 to vector<66x128xf32>
    %193 = arith.divf %192, %191 : vector<66x128xf32>
    %cst_68 = arith.constant 1.06140542 : f32
    %194 = vector.broadcast %cst_68 : f32 to vector<66x128xf32>
    %195 = arith.mulf %194, %193 : vector<66x128xf32>
    %cst_69 = arith.constant -1.45315206 : f32
    %196 = vector.broadcast %cst_69 : f32 to vector<66x128xf32>
    %197 = arith.addf %195, %196 : vector<66x128xf32>
    %198 = arith.mulf %197, %193 : vector<66x128xf32>
    %cst_70 = arith.constant 1.42141378 : f32
    %199 = vector.broadcast %cst_70 : f32 to vector<66x128xf32>
    %200 = arith.addf %198, %199 : vector<66x128xf32>
    %201 = arith.mulf %200, %193 : vector<66x128xf32>
    %cst_71 = arith.constant -0.284496725 : f32
    %202 = vector.broadcast %cst_71 : f32 to vector<66x128xf32>
    %203 = arith.addf %201, %202 : vector<66x128xf32>
    %204 = arith.mulf %203, %193 : vector<66x128xf32>
    %cst_72 = arith.constant 0.254829586 : f32
    %205 = vector.broadcast %cst_72 : f32 to vector<66x128xf32>
    %206 = arith.addf %204, %205 : vector<66x128xf32>
    %207 = arith.mulf %206, %193 : vector<66x128xf32>
    %cst_73 = arith.constant 0.000000e+00 : f32
    %208 = vector.broadcast %cst_73 : f32 to vector<66x128xf32>
    %209 = arith.subf %208, %187 : vector<66x128xf32>
    %210 = arith.mulf %209, %187 : vector<66x128xf32>
    %211 = math.exp %210 : vector<66x128xf32>
    %212 = arith.mulf %207, %211 : vector<66x128xf32>
    %cst_74 = arith.constant 1.000000e+00 : f32
    %213 = vector.broadcast %cst_74 : f32 to vector<66x128xf32>
    %214 = arith.subf %213, %212 : vector<66x128xf32>
    %215 = arith.mulf %186, %214 : vector<66x128xf32>
    %cst_75 = arith.constant 1.000000e+00 : f32
    %216 = vector.broadcast %cst_75 : f32 to vector<66x128xf32>
    %217 = arith.addf %216, %215 : vector<66x128xf32>
    %218 = arith.mulf %179, %217 : vector<66x128xf32>
    %cst_76 = arith.constant dense<0.000000e+00> : vector<66x32xf32>
    %219 = tpu.matmul %218, %17, %cst_76 {dimension_numbers = #tpu.dot_dimension_numbers<[1], [0], [0], [1], [0, 0, 1, 1], [], []>} : vector<66x128xf32>, vector<128x32xf32>, vector<66x32xf32> -> vector<66x32xf32>
    %220 = vector.broadcast %27 : vector<1x32xf32> to vector<66x32xf32>
    %221 = arith.addf %219, %220 : vector<66x32xf32>
    %222 = arith.addf %154, %221 : vector<66x32xf32>
    %c0_77 = arith.constant 0 : index
    %c0_78 = arith.constant 0 : index
    %223 = vector.load %arg10[%c0_77, %c0_78] : memref<66x32xf32, #tpu.memory_space<vmem>>, vector<66x32xf32>
    tpu.vector_store %arg10[%c0_77, %c0_78], %222 {strides = array<i32>} : memref<66x32xf32, #tpu.memory_space<vmem>>, vector<66x32xf32>,
    return
  }
  func.func @transform_0(%arg0: i32) -> (i32, i32) {
    %c0_i32 = arith.constant 0 : i32
    %c0_i32_0 = arith.constant 0 : i32
    %c0_i32_1 = arith.constant 0 : i32
    return %c0_i32, %c0_i32_0 : i32, i32
  }
  func.func @transform_1(%arg0: i32) -> (i32, i32) {
    %c0_i32 = arith.constant 0 : i32
    %c0_i32_0 = arith.constant 0 : i32
    %c0_i32_1 = arith.constant 0 : i32
    return %c0_i32, %c0_i32_0 : i32, i32
  }
  func.func @transform_2(%arg0: i32) -> (i32, i32, i32) {
    %c0_i32 = arith.constant 0 : i32
    %c0_i32_0 = arith.constant 0 : i32
    %c0_i32_1 = arith.constant 0 : i32
    return %arg0, %c0_i32, %c0_i32_0 : i32, i32, i32
  }
  func.func @transform_3(%arg0: i32) -> (i32, i32, i32) {
    %c0_i32 = arith.constant 0 : i32
    %c0_i32_0 = arith.constant 0 : i32
    %c0_i32_1 = arith.constant 0 : i32
    return %arg0, %c0_i32, %c0_i32_0 : i32, i32, i32
  }
  func.func @transform_4(%arg0: i32) -> (i32, i32, i32) {
    %c0_i32 = arith.constant 0 : i32
    %c0_i32_0 = arith.constant 0 : i32
    %c0_i32_1 = arith.constant 0 : i32
    return %arg0, %c0_i32, %c0_i32_0 : i32, i32, i32
  }
  func.func @transform_5(%arg0: i32) -> (i32, i32, i32) {
    %c0_i32 = arith.constant 0 : i32
    %c0_i32_0 = arith.constant 0 : i32
    %c0_i32_1 = arith.constant 0 : i32
    return %arg0, %c0_i32, %c0_i32_0 : i32, i32, i32
  }
  func.func @transform_6(%arg0: i32) -> (i32, i32, i32) {
    %c0_i32 = arith.constant 0 : i32
    %c0_i32_0 = arith.constant 0 : i32
    %c0_i32_1 = arith.constant 0 : i32
    return %arg0, %c0_i32, %c0_i32_0 : i32, i32, i32
  }
  func.func @transform_7(%arg0: i32) -> (i32, i32, i32) {
    %c0_i32 = arith.constant 0 : i32
    %c0_i32_0 = arith.constant 0 : i32
    %c0_i32_1 = arith.constant 0 : i32
    return %arg0, %c0_i32, %c0_i32_0 : i32, i32, i32
  }
  func.func @transform_8(%arg0: i32) -> (i32, i32, i32) {
    %c0_i32 = arith.constant 0 : i32
    %c0_i32_0 = arith.constant 0 : i32
    %c0_i32_1 = arith.constant 0 : i32
    return %arg0, %c0_i32, %c0_i32_0 : i32, i32, i32
  }
  func.func @transform_9(%arg0: i32) -> (i32, i32) {
    %c0_i32 = arith.constant 0 : i32
    %c0_i32_0 = arith.constant 0 : i32
    %c0_i32_1 = arith.constant 0 : i32
    return %c0_i32, %c0_i32_0 : i32, i32
  }
}

module attributes {stable_mosaic.version = 11 : i64} {
  func.func @_linear_ln_kernel(%arg0: memref<64x32xf32, #tpu.memory_space<vmem>>, %arg1: memref<32x32xf32, #tpu.memory_space<vmem>>, %arg2: memref<1x32xf32, #tpu.memory_space<vmem>>, %arg3: memref<1x32xf32, #tpu.memory_space<vmem>>, %arg4: memref<1x32xf32, #tpu.memory_space<vmem>>, %arg5: memref<64x32xf32, #tpu.memory_space<vmem>>) attributes {dimension_semantics = [], scalar_prefetch = 0 : i64, scratch_operands = 0 : i64, tpu.core_type = #tpu.core_type<tc>} {
    %c0 = arith.constant 0 : index
    %c0_0 = arith.constant 0 : index
    %0 = vector.load %arg0[%c0, %c0_0] : memref<64x32xf32, #tpu.memory_space<vmem>>, vector<64x32xf32>
    %c0_1 = arith.constant 0 : index
    %c0_2 = arith.constant 0 : index
    %1 = vector.load %arg1[%c0_1, %c0_2] : memref<32x32xf32, #tpu.memory_space<vmem>>, vector<32x32xf32>
    %cst = arith.constant dense<0.000000e+00> : vector<64x32xf32>
    %2 = tpu.matmul %0, %1, %cst {dimension_numbers = #tpu.dot_dimension_numbers<[1], [0], [0], [1], [0, 0, 1, 1], [], []>} : vector<64x32xf32>, vector<32x32xf32>, vector<64x32xf32> -> vector<64x32xf32>
    %c0_3 = arith.constant 0 : index
    %c0_4 = arith.constant 0 : index
    %3 = vector.load %arg2[%c0_3, %c0_4] : memref<1x32xf32, #tpu.memory_space<vmem>>, vector<1x32xf32>
    %4 = vector.broadcast %3 : vector<1x32xf32> to vector<64x32xf32>
    %5 = arith.addf %2, %4 : vector<64x32xf32>
    %c0_5 = arith.constant 0 : index
    %c0_6 = arith.constant 0 : index
    %6 = vector.load %arg3[%c0_5, %c0_6] : memref<1x32xf32, #tpu.memory_space<vmem>>, vector<1x32xf32>
    %c0_7 = arith.constant 0 : index
    %c0_8 = arith.constant 0 : index
    %7 = vector.load %arg4[%c0_7, %c0_8] : memref<1x32xf32, #tpu.memory_space<vmem>>, vector<1x32xf32>
    %cst_9 = arith.constant dense<0.000000e+00> : vector<64xf32>
    %8 = vector.multi_reduction <add>, %5, %cst_9 [1] : vector<64x32xf32> to vector<64xf32>
    %9 = vector.shape_cast %8 : vector<64xf32> to vector<64x1xf32>
    %cst_10 = arith.constant 3.200000e+01 : f32
    %10 = vector.broadcast %cst_10 : f32 to vector<64x1xf32>
    %11 = arith.divf %9, %10 : vector<64x1xf32>
    %12 = vector.broadcast %11 : vector<64x1xf32> to vector<64x32xf32>
    %13 = arith.subf %5, %12 : vector<64x32xf32>
    %14 = arith.mulf %13, %13 : vector<64x32xf32>
    %cst_11 = arith.constant dense<0.000000e+00> : vector<64xf32>
    %15 = vector.multi_reduction <add>, %14, %cst_11 [1] : vector<64x32xf32> to vector<64xf32>
    %16 = vector.shape_cast %15 : vector<64xf32> to vector<64x1xf32>
    %cst_12 = arith.constant 3.200000e+01 : f32
    %17 = vector.broadcast %cst_12 : f32 to vector<64x1xf32>
    %18 = arith.divf %16, %17 : vector<64x1xf32>
    %cst_13 = arith.constant 9.99999974E-6 : f32
    %19 = vector.broadcast %cst_13 : f32 to vector<64x1xf32>
    %20 = arith.addf %18, %19 : vector<64x1xf32>
    %21 = math.rsqrt %20 : vector<64x1xf32>
    %22 = vector.broadcast %21 : vector<64x1xf32> to vector<64x32xf32>
    %23 = arith.mulf %13, %22 : vector<64x32xf32>
    %24 = vector.broadcast %6 : vector<1x32xf32> to vector<64x32xf32>
    %25 = arith.mulf %23, %24 : vector<64x32xf32>
    %26 = vector.broadcast %7 : vector<1x32xf32> to vector<64x32xf32>
    %27 = arith.addf %25, %26 : vector<64x32xf32>
    %c0_14 = arith.constant 0 : index
    %c0_15 = arith.constant 0 : index
    %28 = vector.load %arg5[%c0_14, %c0_15] : memref<64x32xf32, #tpu.memory_space<vmem>>, vector<64x32xf32>
    tpu.vector_store %arg5[%c0_14, %c0_15], %27 {strides = array<i32>} : memref<64x32xf32, #tpu.memory_space<vmem>>, vector<64x32xf32>,
    return
  }
}

</mosaic_0001>

<bundles_post_ra>
// kernel: mae_vit_forward.5
= control target key start
LH: loop header
LB: loop body
LE: loop exit
PB: predicated region body
PF: predicated region fallthrough
CT: control target
= control target key end

     0   :  { %vm36_vm0 = vcmask 261120   ;;  %vm182_vm1 = vcmask 523264   ;;  %s372_s1 = inlined_call_operand.vmem [shape: f32[32,64], index: 1, kind: input, shape index: {}]   ;;  %s373_s0 = inlined_call_operand.vmem [shape: f32[64,32], index: 0, kind: input, shape index: {}]   ;;  %s374_s2 = inlined_call_operand.vmem [shape: f32[1,64], index: 2, kind: input, shape index: {}]   ;;  %s375_s3 = inlined_call_operand.vmem [shape: f32[64,64], index: 3, kind: input, shape index: {}]   ;;  %s376_s4 = inlined_call_operand.vmem [shape: f32[64,64], index: 4, kind: output, shape index: {}]  }
   0x1   :  { %v28_v0 = vld [vmem:[%s372_s1 + $0x18] sm:$0xff]  ;;  %v27_v1 = vld [vmem:[%s372_s1 + $0x10] sm:$0xff]  ;;  %v26_v2 = vld [vmem:[%s372_s1 + $0x8] sm:$0xff] }
   0x2   :  { %216 = vmatprep.subr.mxu0 %v28_v0  ;;  %236 = vmatprep.subr.mxu1 %v28_v0  ;;  %v25_v3 = vld [vmem:[%s372_s1] sm:$0xff]  ;;  %v18_v6 = vld [vmem:[%s373_s0 + $0x8] sm:$0xff]  ;;  %v19_v8 = vld [vmem:[%s373_s0 + $0x10] sm:$0xff] }
   0x3   :  { %217 = vmatpush3.msra.mxu0 %v28_v0  ;;  %240 = vmatpush3.msra.mxu1 %v28_v0  ;;  %v17_v4 = vld [vmem:[%s373_s0] sm:$0xff]  ;;  %v22_v7 = vld [vmem:[%s373_s0 + $0x28] sm:$0xff]  ;;  %v23_v9 = vld [vmem:[%s373_s0 + $0x30] sm:$0xff] }
   0x4   :  { %218 = vmatprep.subr.mxu0 %v27_v1  ;;  %237 = vmatprep.subr.mxu1 %v27_v1  ;;  %v21_v5 = vld [vmem:[%s373_s0 + $0x20] sm:$0xff]  ;;  %v20_v10 = vld [vmem:[%s373_s0 + $0x18] sm:$0xff]  ;;  %v167_v14 = vld [vmem:[%s375_s3 + $0x8] sm:$0xff] }
   0x5   :  { %219 = vmatpush3.msra.mxu0 %v27_v1  ;;  %241 = vmatpush3.msra.mxu1 %v27_v1  ;;  %v24_v11 = vld [vmem:[%s373_s0 + $0x38] sm:$0xff]  ;;  %v195_v12 = vld [vmem:[%s374_s2] ss:$0 sm:$0xff]  ;;  %v171_v16 = vld [vmem:[%s375_s3 + $0x28] sm:$0xff] }
   0x6   :  { %220 = vmatprep.subr.mxu0 %v26_v2  ;;  %238 = vmatprep.subr.mxu1 %v26_v2  ;;  %v166_v20 = vld [vmem:[%s375_s3] sm:$0xff]  ;;  %v169_v28 = vld [vmem:[%s375_s3 + $0x18] sm:$0xff]  ;;  %v168_v36 = vld [vmem:[%s375_s3 + $0x10] sm:$0xff] }
   0x7   :  { %221 = vmatpush3.msra.mxu0 %v26_v2  ;;  %242 = vmatpush3.msra.mxu1 %v26_v2  ;;  %v170_v22 = vld [vmem:[%s375_s3 + $0x20] sm:$0xff]  ;;  %v173_v30 = vld [vmem:[%s375_s3 + $0x38] sm:$0xff]  ;;  %v172_v38 = vld [vmem:[%s375_s3 + $0x30] sm:$0xff] }
   0x8   :  { %222 = vmatprep.subr.mxu0 %v25_v3  ;;  %239 = vmatprep.subr.mxu1 %v25_v3 }
   0x9   :  { %223 = vmatpush3.msra.mxu0 %v25_v3  ;;  %243 = vmatpush3.msra.mxu1 %v25_v3 }
   0xa   :  { %224 = vmatprep.mubr.msk.f32.mxu0 %vm36_vm0, %v17_v4  ;;  %230 = vmatprep.mubr.msk.f32.mxu1 %vm36_vm0, %v21_v5 }
   0xb   :  { %225 = vmatmul.mubr.msk.f32.vlgmr.msra.gmra.mxu0 %vm36_vm0, %v18_v6  ;;  %231 = vmatmul.mubr.msk.f32.vlgmr.msra.gmra.mxu1 %vm36_vm0, %v22_v7 }
   0xc   :  { %227 = vmatprep.mubr.msk.f32.mxu0 %vm36_vm0, %v19_v8  ;;  %233 = vmatprep.mubr.msk.f32.mxu1 %vm36_vm0, %v23_v9 }
   0xf   :  { %228 = vmatmul.mubr.msk.f32.gmra.mxu0 %vm36_vm0, %v20_v10  ;;  %234 = vmatmul.mubr.msk.f32.gmra.mxu1 %vm36_vm0, %v24_v11 }
  0xcb   :  { %v226_v13 = vpop.f32.mrf.mxu0  ;;  %v232_v15 = vpop.f32.mrf.mxu1 }
  0xcc   :  { %v133_v17 = vadd.f32 %v226_v13, %v195_v12  ;;  %v153_v18 = vadd.f32 %v232_v15, %v195_v12 }
  0xcd   :  { %v127_v19 = vpop.f32.mrf.mxu0  ;;  %v147_v21 = vpop.f32.mrf.mxu1 }
  0xce   :  { %v175_v23 = vadd.f32 %v167_v14, %v133_v17  ;;  %v179_v24 = vadd.f32 %v171_v16, %v153_v18  ;;  %v128_v25 = vadd.f32 %v195_v12, %v127_v19  ;;  %v148_v26 = vadd.f32 %v195_v12, %v147_v21 }
  0xcf   :  { %v229_v27 = vpop.f32.mrf.mxu0  ;;  %v235_v29 = vpop.f32.mrf.mxu1 }
  0xd0   :  { %184 = vst.msk [vmem:[%s376_s4 + $0x8] sm:$0xff] %vm182_vm1, %v175_v23  ;;  %188 = vst.msk [vmem:[%s376_s4 + $0x28] sm:$0xff] %vm182_vm1, %v179_v24  ;;  %v174_v31 = vadd.f32 %v166_v20, %v128_v25  ;;  %v178_v32 = vadd.f32 %v170_v22, %v148_v26  ;;  %v143_v33 = vadd.f32 %v229_v27, %v195_v12 }
  0xd1   :  { %v163_v34 = vadd.f32 %v235_v29, %v195_v12  ;;  %v137_v35 = vpop.f32.mrf.mxu0  ;;  %v157_v37 = vpop.f32.mrf.mxu1 }
  0xd2   :  { %183 = vst.msk [vmem:[%s376_s4] sm:$0xff] %vm182_vm1, %v174_v31  ;;  %187 = vst.msk [vmem:[%s376_s4 + $0x20] sm:$0xff] %vm182_vm1, %v178_v32  ;;  %v177_v39 = vadd.f32 %v169_v28, %v143_v33  ;;  %v138_v41 = vadd.f32 %v195_v12, %v137_v35  ;;  %v158_v42 = vadd.f32 %v195_v12, %v157_v37 }
  0xd3   :  { %v181_v40 = vadd.f32 %v173_v30, %v163_v34 }
  0xd4   :  { %186 = vst.msk [vmem:[%s376_s4 + $0x18] sm:$0xff] %vm182_vm1, %v177_v39  ;;  %v176_v43 = vadd.f32 %v168_v36, %v138_v41  ;;  %v180_v44 = vadd.f32 %v172_v38, %v158_v42 }
  0xd5   :  { %190 = vst.msk [vmem:[%s376_s4 + $0x38] sm:$0xff] %vm182_vm1, %v181_v40 }
  0xd6   :  { %185 = vst.msk [vmem:[%s376_s4 + $0x10] sm:$0xff] %vm182_vm1, %v176_v43  ;;  %189 = vst.msk [vmem:[%s376_s4 + $0x30] sm:$0xff] %vm182_vm1, %v180_v44 }

// kernel: mae_vit_forward.7
= control target key start
LH: loop header
LB: loop body
LE: loop exit
PB: predicated region body
PF: predicated region fallthrough
CT: control target
= control target key end

     0   :  { %vm31_vm0 = vcmask 523264   ;;  %vm38_vm1 = vcmask 517120   ;;  %v338_v21 = vmov 0.0   ;;  %vm339_vm2 = vmmov 0   ;;  %s492_s0 = inlined_call_operand.vmem [shape: f32[18,64], index: 0, kind: input, shape index: {}]   ;;  %s493_s3 = inlined_call_operand.vmem [shape: f32[64,32], index: 3, kind: input, shape index: {}]   ;;  %s494_s1 = inlined_call_operand.vmem [shape: f32[1,64], index: 1, kind: input, shape index: {}]   ;;  %s495_s2 = inlined_call_operand.vmem [shape: f32[1,64], index: 2, kind: input, shape index: {}]   ;;  %s496_s4 = inlined_call_operand.vmem [shape: f32[1,32], index: 4, kind: input, shape index: {}]   ;;  %s497_s5 = inlined_call_operand.vmem [shape: f32[1,32], index: 5, kind: input, shape index: {}]   ;;  %s498_s6 = inlined_call_operand.vmem [shape: f32[1,32], index: 6, kind: input, shape index: {}]   ;;  %s499_s7 = inlined_call_operand.vmem [shape: f32[18,32], index: 7, kind: output, shape index: {}]  }
   0x1   :  { %v27_v0 = vld [vmem:[%s492_s0 + $0x8] sm:$0xff]  ;;  %v28_v1 = vld [vmem:[%s492_s0 + $0x10] sm:$0x3]  ;;  %v26_v2 = vld [vmem:[%s492_s0] sm:$0xff]  ;;  %308 = vmatprep.subr.mxu1 %v338_v21  ;;  %283 = vmatprep.subr.mxu0 %v338_v21  ;;  %vm197_vm3 = vcmask 261120   ;;  %vm204_vm4 = vcmask 254976  }
   0x2   :  { %v35_v3 = vsel %vm31_vm0, %v27_v0, 0.0  ;;  %v39_v4 = vsel %vm38_vm1, %v28_v1, 0.0  ;;  %v32_v5 = vsel %vm31_vm0, %v26_v2, 0.0  ;;  %v98_v22 = vld [vmem:[%s493_s3 + $0x38] sm:$0xff]  ;;  %v97_v23 = vld [vmem:[%s493_s3 + $0x30] sm:$0xff]  ;;  %v96_v24 = vld [vmem:[%s493_s3 + $0x28] sm:$0xff]  ;;  %302 = vmatprep.mubr.msk.f32.mxu1 %vm339_vm2, %v338_v21  ;;  %299 = vmatprep.mubr.msk.f32.mxu0 %vm339_vm2, %v338_v21 }
   0x3   :  { %36 = vadd.xlane.f32.xlu0 %v35_v3  ;;  %40 = vadd.xlane.f32.xlu1 %v39_v4  ;;  %v95_v25 = vld [vmem:[%s493_s3 + $0x20] sm:$0xff]  ;;  %v94_v26 = vld [vmem:[%s493_s3 + $0x18] sm:$0xff]  ;;  %v93_v27 = vld [vmem:[%s493_s3 + $0x10] sm:$0xff] }
   0x4   :  { %316 = vmatpush3.msra.mxu1 %v98_v22  ;;  %284 = vmatpush3.msra.mxu0 %v98_v22  ;;  %v92_v28 = vld [vmem:[%s493_s3 + $0x8] sm:$0xff]  ;;  %v91_v29 = vld [vmem:[%s493_s3] sm:$0xff] }
   0x5   :  { %309 = vmatprep.subr.mxu1 %v338_v21  ;;  %285 = vmatprep.subr.mxu0 %v338_v21  ;;  %v264_v40 = vld [vmem:[%s494_s1] ss:$0 sm:$0xff] }
   0x6   :  { %317 = vmatpush3.msra.mxu1 %v97_v23  ;;  %286 = vmatpush3.msra.mxu0 %v97_v23  ;;  %v265_v42 = vld [vmem:[%s495_s2] ss:$0 sm:$0xff] }
   0x7   :  { %33 = vadd.xlane.f32.xlu0 %v32_v5  ;;  %310 = vmatprep.subr.mxu1 %v338_v21  ;;  %v266_v53 = vld [vmem:[%s496_s4] ss:$0 sm:$0xff] }
   0x8   :  { %287 = vmatprep.subr.mxu0 %v338_v21  ;;  %318 = vmatpush3.msra.mxu1 %v96_v24 }
   0x9   :  { %288 = vmatpush3.msra.mxu0 %v96_v24  ;;  %311 = vmatprep.subr.mxu1 %v338_v21 }
   0xa   :  { %289 = vmatprep.subr.mxu0 %v338_v21  ;;  %319 = vmatpush3.msra.mxu1 %v95_v25 }
   0xb   :  { %290 = vmatpush3.msra.mxu0 %v95_v25  ;;  %312 = vmatprep.subr.mxu1 %v338_v21 }
   0xc   :  { %291 = vmatprep.subr.mxu0 %v338_v21  ;;  %320 = vmatpush3.msra.mxu1 %v94_v26 }
   0xd   :  { %292 = vmatpush3.msra.mxu0 %v94_v26  ;;  %313 = vmatprep.subr.mxu1 %v338_v21 }
   0xe   :  { %293 = vmatprep.subr.mxu0 %v338_v21  ;;  %321 = vmatpush3.msra.mxu1 %v93_v27 }
   0xf   :  { %294 = vmatpush3.msra.mxu0 %v93_v27  ;;  %314 = vmatprep.subr.mxu1 %v338_v21  ;;  %v270_v27 = vld [vmem:[%s497_s5] ss:$0 sm:$0xff] }
  0x10   :  { %322 = vmatpush3.msra.mxu1 %v92_v28  ;;  %295 = vmatprep.subr.mxu0 %v338_v21 }
  0x11   :  { %315 = vmatprep.subr.mxu1 %v338_v21  ;;  %296 = vmatpush3.msra.mxu0 %v92_v28 }
  0x12   :  { %323 = vmatpush3.msra.mxu1 %v91_v29  ;;  %297 = vmatprep.subr.mxu0 %v338_v21 }
  0x13   :  { %298 = vmatpush3.msra.mxu0 %v91_v29  ;;  %v271_v29 = vld [vmem:[%s498_s6] ss:$0 sm:$0xff] }
  0x8c   :  { %v37_v6 = vpop.xlane.xlu0 %36  ;;  %v41_v7 = vpop.xlane.xlu1 %40 }
  0x8d   :  { %v44_v8 = vmul.f32 0.015625, %v37_v6  ;;  %v45_v9 = vmul.f32 0.015625, %v41_v7 }
  0x8f   :  { %v392_v10 = vsub.f32 %v27_v0, %v44_v8  ;;  %v394_v11 = vsub.f32 %v28_v1, %v45_v9 }
  0x90   :  { %v34_v12 = vpop.xlane.xlu0 %33 }
  0x91   :  { %v43_v13 = vmul.f32 0.015625, %v34_v12  ;;  %v50_v14 = vmul.f32 %v392_v10, %v392_v10  ;;  %v51_v15 = vmul.f32 %v394_v11, %v394_v11 }
  0x93   :  { %v400_v16 = vsub.f32 %v26_v2, %v43_v13  ;;  %v55_v17 = vsel %vm31_vm0, %v50_v14, 0.0  ;;  %v58_v18 = vsel %vm38_vm1, %v51_v15, 0.0 }
  0x94   :  { %56 = vadd.xlane.f32.xlu1 %v55_v17 }
  0x95   :  { %v49_v19 = vmul.f32 %v400_v16, %v400_v16 }
  0x97   :  { %v52_v20 = vsel %vm31_vm0, %v49_v19, 0.0 }
  0x98   :  { %59 = vadd.xlane.f32.xlu1 %v58_v18  ;;  %53 = vadd.xlane.f32.xlu0 %v52_v20 }
 0x11d   :  { %v57_v30 = vpop.xlane.xlu1 %56 }
 0x11e   :  { %v62_v31 = vmul.f32 0.015625, %v57_v30 }
 0x120   :  { %v65_v32 = vadd.f32 1e-05, %v62_v31 }
 0x121   :  { %v60_v33 = vpop.xlane.xlu1 %59  ;;  %v54_v34 = vpop.xlane.xlu0 %53 }
 0x122   :  { %326 = vrsqrt.f32 %v65_v32  ;;  %v63_v35 = vmul.f32 0.015625, %v60_v33  ;;  %v61_v36 = vmul.f32 0.015625, %v54_v34 }
 0x124   :  { %v66_v37 = vadd.f32 1e-05, %v63_v35  ;;  %v64_v38 = vadd.f32 1e-05, %v61_v36 }
 0x126   :  { %328 = vrsqrt.f32 %v66_v37 }
 0x127   :  { %330 = vrsqrt.f32 %v64_v38 }
 0x12f   :  { %v327_v39 = vpop.eup %326 }
 0x130   :  { %v71_v41 = vmul.f32 %v327_v39, %v392_v10 }
 0x132   :  { %v80_v43 = vmul.f32 %v264_v40, %v71_v41 }
 0x133   :  { %v329_v44 = vpop.eup %328 }
 0x134   :  { %v331_v45 = vpop.eup %330  ;;  %v89_v46 = vadd.f32 %v265_v42, %v80_v43  ;;  %v72_v47 = vmul.f32 %v329_v44, %v394_v11 }
 0x135   :  { %v70_v48 = vmul.f32 %v331_v45, %v400_v16 }
 0x136   :  { %303 = vmatmul.mubr.msk.f32.vlgmr.msra.gmra.mxu1 %vm31_vm0, %v89_v46  ;;  %v81_v49 = vmul.f32 %v264_v40, %v72_v47 }
 0x137   :  { %305 = vmatprep.mubr.msk.f32.mxu1 %vm339_vm2, %v338_v21  ;;  %v79_v50 = vmul.f32 %v264_v40, %v70_v48 }
 0x138   :  { %v90_v51 = vadd.f32 %v265_v42, %v81_v49 }
 0x139   :  { %v88_v52 = vadd.f32 %v265_v42, %v79_v50 }
 0x13a   :  { %306 = vmatmul.mubr.msk.f32.gmra.mxu1 %vm31_vm0, %v90_v51 }
 0x13b   :  { %300 = vmatmul.mubr.msk.f32.vlgmr.msra.gmra.mxu0 %vm31_vm0, %v88_v52 }
 0x1f6   :  { %v186_v54 = vpop.f32.mrf.mxu1 }
 0x1f7   :  { %v187_v55 = vadd.f32 %v266_v53, %v186_v54 }
 0x1f8   :  { %v304_v56 = vpop.f32.mrf.mxu1 }
 0x1f9   :  { %v201_v57 = vsel %vm197_vm3, %v187_v55, 0.0 }
 0x1fa   :  { %202 = vadd.xlane.f32.xlu1 %v201_v57  ;;  %v191_v58 = vpop.f32.mrf.mxu1 }
 0x1fb   :  { %v181_v59 = vpop.f32.mrf.mxu0  ;;  %v192_v63 = vadd.f32 %v266_v53, %v191_v58 }
 0x1fc   :  { %v182_v60 = vadd.f32 %v266_v53, %v181_v59  ;;  %v307_v61 = vpop.f32.mrf.mxu1 }
 0x1fd   :  { %v301_v62 = vpop.f32.mrf.mxu0  ;;  %v205_v1 = vsel %vm204_vm4, %v192_v63, 0.0 }
 0x1fe   :  { %v198_v0 = vsel %vm197_vm3, %v182_v60, 0.0 }
 0x1ff   :  { %199 = vadd.xlane.f32.xlu0 %v198_v0 }
 0x203   :  { %206 = vadd.xlane.f32.xlu0 %v205_v1 }
 0x283   :  { %v203_v2 = vpop.xlane.xlu1 %202 }
 0x284   :  { %v210_v3 = vmul.f32 0.03125, %v203_v2 }
 0x286   :  { %v213_v4 = vsub.f32 %v187_v55, %v210_v3 }
 0x288   :  { %v200_v5 = vpop.xlane.xlu0 %199  ;;  %v216_v6 = vmul.f32 %v213_v4, %v213_v4 }
 0x289   :  { %v209_v7 = vmul.f32 0.03125, %v200_v5 }
 0x28a   :  { %v221_v8 = vsel %vm197_vm3, %v216_v6, 0.0 }
 0x28b   :  { %v212_v9 = vsub.f32 %v182_v60, %v209_v7  ;;  %222 = vadd.xlane.f32.xlu0 %v221_v8 }
 0x28c   :  { %v207_v10 = vpop.xlane.xlu0 %206 }
 0x28d   :  { %v211_v11 = vmul.f32 0.03125, %v207_v10  ;;  %v215_v12 = vmul.f32 %v212_v9, %v212_v9 }
 0x28f   :  { %v214_v13 = vsub.f32 %v192_v63, %v211_v11  ;;  %v218_v14 = vsel %vm197_vm3, %v215_v12, 0.0 }
 0x290   :  { %219 = vadd.xlane.f32.xlu1 %v218_v14 }
 0x291   :  { %v217_v15 = vmul.f32 %v214_v13, %v214_v13 }
 0x293   :  { %v224_v16 = vsel %vm204_vm4, %v217_v15, 0.0 }
 0x294   :  { %225 = vadd.xlane.f32.xlu1 %v224_v16 }
 0x314   :  { %v223_v17 = vpop.xlane.xlu0 %222 }
 0x315   :  { %v228_v18 = vmul.f32 0.03125, %v223_v17 }
 0x317   :  { %v231_v19 = vadd.f32 1e-05, %v228_v18 }
 0x319   :  { %332 = vrsqrt.f32 %v231_v19  ;;  %v220_v20 = vpop.xlane.xlu1 %219 }
 0x31a   :  { %v227_v21 = vmul.f32 0.03125, %v220_v20 }
 0x31c   :  { %v230_v22 = vadd.f32 1e-05, %v227_v21 }
 0x31d   :  { %v226_v23 = vpop.xlane.xlu1 %225 }
 0x31e   :  { %334 = vrsqrt.f32 %v230_v22  ;;  %v229_v24 = vmul.f32 0.03125, %v226_v23 }
 0x320   :  { %v232_v25 = vadd.f32 1e-05, %v229_v24 }
 0x322   :  { %336 = vrsqrt.f32 %v232_v25 }
 0x326   :  { %v333_v26 = vpop.eup %332 }
 0x327   :  { %v237_v28 = vmul.f32 %v333_v26, %v213_v4 }
 0x329   :  { %v246_v30 = vmul.f32 %v270_v27, %v237_v28 }
 0x32b   :  { %v335_v31 = vpop.eup %334  ;;  %v255_v32 = vadd.f32 %v271_v29, %v246_v30 }
 0x32c   :  { %v236_v33 = vmul.f32 %v335_v31, %v212_v9 }
 0x32d   :  { %258 = vst.msk [vmem:[%s499_s7 + $0x8] sm:$0xff] %vm197_vm3, %v255_v32 }
 0x32e   :  { %v245_v34 = vmul.f32 %v270_v27, %v236_v33 }
 0x32f   :  { %v337_v35 = vpop.eup %336 }
 0x330   :  { %v254_v36 = vadd.f32 %v271_v29, %v245_v34  ;;  %v238_v37 = vmul.f32 %v337_v35, %v214_v13 }
 0x332   :  { %257 = vst.msk [vmem:[%s499_s7] sm:$0xff] %vm197_vm3, %v254_v36  ;;  %v247_v38 = vmul.f32 %v270_v27, %v238_v37 }
 0x334   :  { %v256_v39 = vadd.f32 %v271_v29, %v247_v38 }
 0x336   :  { %259 = vst.msk [vmem:[%s499_s7 + $0x10] sm:$0x3] %vm204_vm4, %v256_v39 }

// kernel: mae_vit_forward.9
= control target key start
LH: loop header
LB: loop body
LE: loop exit
PB: predicated region body
PF: predicated region fallthrough
CT: control target
= control target key end

     0   :  { %vm39_vm0 = vcmask 261120   ;;  %s554_s1 = inlined_call_operand.vmem [shape: f32[32,32], index: 1, kind: input, shape index: {}]   ;;  %s555_s0 = inlined_call_operand.vmem [shape: f32[64,32], index: 0, kind: input, shape index: {}]   ;;  %s556_s2 = inlined_call_operand.vmem [shape: f32[1,32], index: 2, kind: input, shape index: {}]   ;;  %s557_s3 = inlined_call_operand.vmem [shape: f32[1,32], index: 3, kind: input, shape index: {}]   ;;  %s558_s4 = inlined_call_operand.vmem [shape: f32[1,32], index: 4, kind: input, shape index: {}]   ;;  %s559_s5 = inlined_call_operand.vmem [shape: f32[64,32], index: 5, kind: output, shape index: {}]  }
   0x1   :  { %v31_v0 = vld [vmem:[%s554_s1 + $0x18] sm:$0xff]  ;;  %v30_v1 = vld [vmem:[%s554_s1 + $0x10] sm:$0xff]  ;;  %v29_v2 = vld [vmem:[%s554_s1 + $0x8] sm:$0xff] }
   0x2   :  { %339 = vmatprep.subr.mxu0 %v31_v0  ;;  %359 = vmatprep.subr.mxu1 %v31_v0  ;;  %v28_v3 = vld [vmem:[%s554_s1] sm:$0xff]  ;;  %v21_v6 = vld [vmem:[%s555_s0 + $0x8] sm:$0xff]  ;;  %v22_v8 = vld [vmem:[%s555_s0 + $0x10] sm:$0xff] }
   0x3   :  { %340 = vmatpush3.msra.mxu0 %v31_v0  ;;  %363 = vmatpush3.msra.mxu1 %v31_v0  ;;  %v20_v4 = vld [vmem:[%s555_s0] sm:$0xff]  ;;  %v25_v7 = vld [vmem:[%s555_s0 + $0x28] sm:$0xff]  ;;  %v26_v9 = vld [vmem:[%s555_s0 + $0x30] sm:$0xff] }
   0x4   :  { %341 = vmatprep.subr.mxu0 %v30_v1  ;;  %360 = vmatprep.subr.mxu1 %v30_v1  ;;  %v24_v5 = vld [vmem:[%s555_s0 + $0x20] sm:$0xff]  ;;  %v23_v10 = vld [vmem:[%s555_s0 + $0x18] sm:$0xff] }
   0x5   :  { %342 = vmatpush3.msra.mxu0 %v30_v1  ;;  %364 = vmatpush3.msra.mxu1 %v30_v1  ;;  %v27_v11 = vld [vmem:[%s555_s0 + $0x38] sm:$0xff]  ;;  %v316_v12 = vld [vmem:[%s556_s2] ss:$0 sm:$0xff] }
   0x6   :  { %343 = vmatprep.subr.mxu0 %v29_v2  ;;  %361 = vmatprep.subr.mxu1 %v29_v2 }
   0x7   :  { %344 = vmatpush3.msra.mxu0 %v29_v2  ;;  %365 = vmatpush3.msra.mxu1 %v29_v2 }
   0x8   :  { %345 = vmatprep.subr.mxu0 %v28_v3  ;;  %362 = vmatprep.subr.mxu1 %v28_v3 }
   0x9   :  { %346 = vmatpush3.msra.mxu0 %v28_v3  ;;  %366 = vmatpush3.msra.mxu1 %v28_v3 }
   0xa   :  { %347 = vmatprep.mubr.msk.f32.mxu0 %vm39_vm0, %v20_v4  ;;  %353 = vmatprep.mubr.msk.f32.mxu1 %vm39_vm0, %v24_v5 }
   0xb   :  { %348 = vmatmul.mubr.msk.f32.vlgmr.msra.gmra.mxu0 %vm39_vm0, %v21_v6  ;;  %354 = vmatmul.mubr.msk.f32.vlgmr.msra.gmra.mxu1 %vm39_vm0, %v25_v7 }
   0xc   :  { %350 = vmatprep.mubr.msk.f32.mxu0 %vm39_vm0, %v22_v8  ;;  %356 = vmatprep.mubr.msk.f32.mxu1 %vm39_vm0, %v26_v9 }
   0xf   :  { %351 = vmatmul.mubr.msk.f32.gmra.mxu0 %vm39_vm0, %v23_v10  ;;  %357 = vmatmul.mubr.msk.f32.gmra.mxu1 %vm39_vm0, %v27_v11 }
  0xcb   :  { %v349_v13 = vpop.f32.mrf.mxu0  ;;  %v355_v14 = vpop.f32.mrf.mxu1 }
  0xcc   :  { %v136_v15 = vadd.f32 %v349_v13, %v316_v12  ;;  %v156_v16 = vadd.f32 %v355_v14, %v316_v12 }
  0xcd   :  { %v130_v17 = vpop.f32.mrf.mxu0  ;;  %v150_v18 = vpop.f32.mrf.mxu1 }
  0xce   :  { %v131_v19 = vadd.f32 %v316_v12, %v130_v17  ;;  %v186_v20 = vsel %vm39_vm0, %v156_v16, 0.0  ;;  %v174_v21 = vsel %vm39_vm0, %v136_v15, 0.0  ;;  %v151_v27 = vadd.f32 %v316_v12, %v150_v18 }
  0xcf   :  { %187 = vadd.xlane.f32.xlu1 %v186_v20  ;;  %175 = vadd.xlane.f32.xlu0 %v174_v21  ;;  %v352_v22 = vpop.f32.mrf.mxu0  ;;  %v358_v23 = vpop.f32.mrf.mxu1 }
  0xd0   :  { %v146_v24 = vadd.f32 %v352_v22, %v316_v12  ;;  %v171_v30 = vsel %vm39_vm0, %v131_v19, 0.0  ;;  %v166_v31 = vadd.f32 %v358_v23, %v316_v12  ;;  %v183_v34 = vsel %vm39_vm0, %v151_v27, 0.0 }
  0xd1   :  { %v140_v25 = vpop.f32.mrf.mxu0  ;;  %v160_v26 = vpop.f32.mrf.mxu1 }
  0xd2   :  { %v180_v28 = vsel %vm39_vm0, %v146_v24, 0.0  ;;  %v141_v29 = vadd.f32 %v316_v12, %v140_v25  ;;  %v161_v32 = vadd.f32 %v316_v12, %v160_v26  ;;  %v192_v35 = vsel %vm39_vm0, %v166_v31, 0.0 }
  0xd3   :  { %181 = vadd.xlane.f32.xlu1 %v180_v28  ;;  %172 = vadd.xlane.f32.xlu0 %v171_v30 }
  0xd4   :  { %v177_v33 = vsel %vm39_vm0, %v141_v29, 0.0  ;;  %v189_v36 = vsel %vm39_vm0, %v161_v32, 0.0 }
  0xd7   :  { %178 = vadd.xlane.f32.xlu1 %v177_v33  ;;  %184 = vadd.xlane.f32.xlu0 %v183_v34 }
  0xdb   :  { %193 = vadd.xlane.f32.xlu1 %v192_v35  ;;  %190 = vadd.xlane.f32.xlu0 %v189_v36 }
 0x158   :  { %v188_v37 = vpop.xlane.xlu1 %187  ;;  %v176_v38 = vpop.xlane.xlu0 %175 }
 0x159   :  { %v201_v39 = vmul.f32 0.03125, %v188_v37  ;;  %v197_v40 = vmul.f32 0.03125, %v176_v38  ;;  %v325_v37 = vld [vmem:[%s557_s3] ss:$0 sm:$0xff] }
 0x15b   :  { %v468_v41 = vsub.f32 %v156_v16, %v201_v39  ;;  %v470_v42 = vsub.f32 %v136_v15, %v197_v40  ;;  %v326_v40 = vld [vmem:[%s558_s4] ss:$0 sm:$0xff] }
 0x15c   :  { %v182_v43 = vpop.xlane.xlu1 %181  ;;  %v173_v44 = vpop.xlane.xlu0 %172 }
 0x15d   :  { %v199_v45 = vmul.f32 0.03125, %v182_v43  ;;  %v196_v46 = vmul.f32 0.03125, %v173_v44  ;;  %v213_v47 = vmul.f32 %v470_v42, %v470_v42  ;;  %v217_v51 = vmul.f32 %v468_v41, %v468_v41 }
 0x15f   :  { %v474_v48 = vsub.f32 %v146_v24, %v199_v45  ;;  %v476_v49 = vsub.f32 %v131_v19, %v196_v46  ;;  %v223_v50 = vsel %vm39_vm0, %v213_v47, 0.0  ;;  %v235_v60 = vsel %vm39_vm0, %v217_v51, 0.0 }
 0x160   :  { %224 = vadd.xlane.f32.xlu1 %v223_v50  ;;  %v179_v52 = vpop.xlane.xlu1 %178  ;;  %v185_v53 = vpop.xlane.xlu0 %184 }
 0x161   :  { %v198_v54 = vmul.f32 0.03125, %v179_v52  ;;  %v200_v55 = vmul.f32 0.03125, %v185_v53  ;;  %v212_v56 = vmul.f32 %v476_v49, %v476_v49  ;;  %v215_v57 = vmul.f32 %v474_v48, %v474_v48 }
 0x163   :  { %v485_v58 = vsub.f32 %v141_v29, %v198_v54  ;;  %v487_v59 = vsub.f32 %v151_v27, %v200_v55  ;;  %v220_v61 = vsel %vm39_vm0, %v212_v56, 0.0  ;;  %v229_v3 = vsel %vm39_vm0, %v215_v57, 0.0 }
 0x164   :  { %236 = vadd.xlane.f32.xlu1 %v235_v60  ;;  %v194_v62 = vpop.xlane.xlu1 %193  ;;  %221 = vadd.xlane.f32.xlu0 %v220_v61  ;;  %v191_v63 = vpop.xlane.xlu0 %190 }
 0x165   :  { %v203_v0 = vmul.f32 0.03125, %v194_v62  ;;  %v202_v1 = vmul.f32 0.03125, %v191_v63  ;;  %v216_v2 = vmul.f32 %v487_v59, %v487_v59  ;;  %v214_v7 = vmul.f32 %v485_v58, %v485_v58 }
 0x167   :  { %v494_v4 = vsub.f32 %v166_v31, %v203_v0  ;;  %v496_v5 = vsub.f32 %v161_v32, %v202_v1  ;;  %v232_v6 = vsel %vm39_vm0, %v216_v2, 0.0  ;;  %v226_v10 = vsel %vm39_vm0, %v214_v7, 0.0 }
 0x168   :  { %230 = vadd.xlane.f32.xlu1 %v229_v3  ;;  %233 = vadd.xlane.f32.xlu0 %v232_v6 }
 0x169   :  { %v219_v8 = vmul.f32 %v494_v4, %v494_v4  ;;  %v218_v11 = vmul.f32 %v496_v5, %v496_v5 }
 0x16b   :  { %v241_v9 = vsel %vm39_vm0, %v219_v8, 0.0  ;;  %v238_v12 = vsel %vm39_vm0, %v218_v11, 0.0 }
 0x16c   :  { %242 = vadd.xlane.f32.xlu1 %v241_v9  ;;  %227 = vadd.xlane.f32.xlu0 %v226_v10 }
 0x170   :  { %239 = vadd.xlane.f32.xlu0 %v238_v12 }
 0x1e9   :  { %v225_v13 = vpop.xlane.xlu1 %224 }
 0x1ea   :  { %v245_v14 = vmul.f32 0.03125, %v225_v13 }
 0x1ec   :  { %v253_v15 = vadd.f32 1e-05, %v245_v14 }
 0x1ed   :  { %v237_v16 = vpop.xlane.xlu1 %236  ;;  %v222_v17 = vpop.xlane.xlu0 %221 }
 0x1ee   :  { %367 = vrsqrt.f32 %v253_v15  ;;  %v249_v18 = vmul.f32 0.03125, %v237_v16  ;;  %v244_v19 = vmul.f32 0.03125, %v222_v17 }
 0x1f0   :  { %v257_v20 = vadd.f32 1e-05, %v249_v18  ;;  %v252_v21 = vadd.f32 1e-05, %v244_v19 }
 0x1f1   :  { %v231_v22 = vpop.xlane.xlu1 %230  ;;  %v234_v23 = vpop.xlane.xlu0 %233 }
 0x1f2   :  { %369 = vrsqrt.f32 %v257_v20  ;;  %v247_v24 = vmul.f32 0.03125, %v231_v22  ;;  %v248_v25 = vmul.f32 0.03125, %v234_v23 }
 0x1f3   :  { %371 = vrsqrt.f32 %v252_v21 }
 0x1f4   :  { %v255_v26 = vadd.f32 1e-05, %v247_v24  ;;  %v256_v27 = vadd.f32 1e-05, %v248_v25 }
 0x1f5   :  { %v243_v28 = vpop.xlane.xlu1 %242  ;;  %v228_v29 = vpop.xlane.xlu0 %227 }
 0x1f6   :  { %373 = vrsqrt.f32 %v255_v26  ;;  %v251_v30 = vmul.f32 0.03125, %v243_v28  ;;  %v246_v31 = vmul.f32 0.03125, %v228_v29 }
 0x1f7   :  { %375 = vrsqrt.f32 %v256_v27 }
 0x1f8   :  { %v259_v32 = vadd.f32 1e-05, %v251_v30  ;;  %v254_v33 = vadd.f32 1e-05, %v246_v31 }
 0x1f9   :  { %v240_v34 = vpop.xlane.xlu0 %239 }
 0x1fa   :  { %377 = vrsqrt.f32 %v259_v32  ;;  %v250_v35 = vmul.f32 0.03125, %v240_v34 }
 0x1fb   :  { %v368_v36 = vpop.eup %367  ;;  %379 = vrsqrt.f32 %v254_v33 }
 0x1fc   :  { %v269_v38 = vmul.f32 %v368_v36, %v470_v42  ;;  %v258_v39 = vadd.f32 1e-05, %v250_v35 }
 0x1fe   :  { %v283_v43 = vmul.f32 %v325_v37, %v269_v38  ;;  %381 = vrsqrt.f32 %v258_v39 }
 0x1ff   :  { %v370_v44 = vpop.eup %369 }
 0x200   :  { %v372_v45 = vpop.eup %371  ;;  %v297_v46 = vadd.f32 %v326_v40, %v283_v43  ;;  %v273_v47 = vmul.f32 %v370_v44, %v468_v41 }
 0x201   :  { %v268_v50 = vmul.f32 %v372_v45, %v476_v49 }
 0x202   :  { %305 = vst.msk [vmem:[%s559_s5 + $0x8] sm:$0xff] %vm39_vm0, %v297_v46  ;;  %v287_v42 = vmul.f32 %v325_v37, %v273_v47 }
 0x203   :  { %v374_v51 = vpop.eup %373  ;;  %v282_v52 = vmul.f32 %v325_v37, %v268_v50 }
 0x204   :  { %v376_v53 = vpop.eup %375  ;;  %v301_v54 = vadd.f32 %v326_v40, %v287_v42  ;;  %v271_v55 = vmul.f32 %v374_v51, %v474_v48 }
 0x205   :  { %v296_v56 = vadd.f32 %v326_v40, %v282_v52  ;;  %v272_v57 = vmul.f32 %v376_v53, %v487_v59 }
 0x206   :  { %309 = vst.msk [vmem:[%s559_s5 + $0x28] sm:$0xff] %vm39_vm0, %v301_v54  ;;  %v285_v41 = vmul.f32 %v325_v37, %v271_v55 }
 0x207   :  { %v378_v49 = vpop.eup %377  ;;  %304 = vst.msk [vmem:[%s559_s5] sm:$0xff] %vm39_vm0, %v296_v56  ;;  %v286_v60 = vmul.f32 %v325_v37, %v272_v57 }
 0x208   :  { %v380_v61 = vpop.eup %379  ;;  %v299_v62 = vadd.f32 %v326_v40, %v285_v41  ;;  %v275_v48 = vmul.f32 %v378_v49, %v494_v4 }
 0x209   :  { %v300_v63 = vadd.f32 %v326_v40, %v286_v60  ;;  %v270_v59 = vmul.f32 %v380_v61, %v485_v58 }
 0x20a   :  { %307 = vst.msk [vmem:[%s559_s5 + $0x18] sm:$0xff] %vm39_vm0, %v299_v62  ;;  %v289_v0 = vmul.f32 %v325_v37, %v275_v48 }
 0x20b   :  { %v382_v1 = vpop.eup %381  ;;  %308 = vst.msk [vmem:[%s559_s5 + $0x20] sm:$0xff] %vm39_vm0, %v300_v63  ;;  %v284_v2 = vmul.f32 %v325_v37, %v270_v59 }
 0x20c   :  { %v303_v3 = vadd.f32 %v326_v40, %v289_v0  ;;  %v274_v6 = vmul.f32 %v382_v1, %v496_v5 }
 0x20d   :  { %v298_v4 = vadd.f32 %v326_v40, %v284_v2 }
 0x20e   :  { %311 = vst.msk [vmem:[%s559_s5 + $0x38] sm:$0xff] %vm39_vm0, %v303_v3  ;;  %v288_v58 = vmul.f32 %v325_v37, %v274_v6 }
 0x20f   :  { %306 = vst.msk [vmem:[%s559_s5 + $0x10] sm:$0xff] %vm39_vm0, %v298_v4 }
 0x210   :  { %v302_v7 = vadd.f32 %v326_v40, %v288_v58 }
 0x212   :  { %310 = vst.msk [vmem:[%s559_s5 + $0x30] sm:$0xff] %vm39_vm0, %v302_v7 }

// kernel: mae_vit_forward.6
= control target key start
LH: loop header
LB: loop body
LE: loop exit
PB: predicated region body
PF: predicated region fallthrough
CT: control target
= control target key end

     0   :  { %s5712_s27 = smov 0   ;;  %s6739_s0 = inlined_call_operand.vmem [shape: f32[18,64], index: 0, kind: input, shape index: {}]   ;;  %s6740_s1 = inlined_call_operand.vmem [shape: f32[2,64,64], index: 1, kind: input, shape index: {}]   ;;  %s6741_s2 = inlined_call_operand.vmem [shape: f32[2,64,64], index: 2, kind: input, shape index: {}]   ;;  %s6742_s3 = inlined_call_operand.vmem [shape: f32[2,64,64], index: 3, kind: input, shape index: {}]   ;;  %s6743_s4 = inlined_call_operand.vmem [shape: f32[2,64,64], index: 4, kind: input, shape index: {}]   ;;  %s6744_s5 = inlined_call_operand.vmem [shape: f32[2,64,256], index: 5, kind: input, shape index: {}]   ;;  %s6745_s6 = inlined_call_operand.vmem [shape: f32[2,256,64], index: 6, kind: input, shape index: {}]   ;;  %s6746_s7 = inlined_call_operand.vmem [shape: f32[2,10,256], index: 7, kind: input, shape index: {}]   ;;  %s6747_s8 = inlined_call_operand.vmem [shape: f32[18,64], index: 8, kind: output, shape index: {}]  }
   0x1 LB: > { %s5014_s28 = sadd.s32 4294967295, %s5658_s27   ;;  %p5017_p0 = scmp.ge.s32.totalorder %s5658_s27, 1  ;;  %s5658_s27 = sphi %s5712_s27, %s18_s27  }
   0x2   : > { %p317_p1 = scmp.lt.s32.totalorder %s5658_s27, 3 }
   0x4   : > { %p318_p2 = pnand %p5017_p0, %p317_p1 }
   0x5   : > { %p376_p3 = scmp.lt.s32.totalorder (!%p318_p2), %s5014_s28, 1  ;;  %p5032_p4 = scmp.ne.s32.totalorder (!%p318_p2), %s5014_s28, 0 }
   0x6   : > { %321 = sbr.rel (%p318_p2) target bundleno = 4270 (0x10ae), region = 52 }
   0xb   : > { %s377_s29 = scalar_select %p376_p3, %s5014_s28, 1 }
   0xd   : > { %s5129_s30 = sshll.u32 %s377_s29, 6  ;;  %s5133_s9 = sshll.u32 %s377_s29, 7 }
   0xe   : > { %s5723_s12 = scalar_lea.vmem %s6740_s1, %s5129_s30  ;;  %s5728_s15 = scalar_lea.vmem %s6741_s2, %s5129_s30 }
   0xf   : > { %s5733_s18 = scalar_lea.vmem %s6742_s3, %s5129_s30  ;;  %s5738_s21 = scalar_lea.vmem %s6743_s4, %s5129_s30 }
  0x10   : > { %s5743_s24 = scalar_lea.vmem %s6744_s5, %s5133_s9  ;;  %s5134_s25 = sshll.u32 %s377_s29, 8 }
  0x11   : > { %s5748_s11 = scalar_lea.vmem %s6745_s6, %s5134_s25  ;;  %s5135_s13 = sshll.u32 %s377_s29, 5 }
  0x12   : > { %s5753_s17 = scalar_lea.vmem %s6746_s7, %s5135_s13  ;;  %414 = sbr.rel (%p5032_p4) target bundleno = 26 (0x1a), region = 56 }
  0x17   : > { %v415_v0 = vld [vmem:[%s6739_s0] sm:$0xff]  ;;  %vm418_vm0 = vcmask 523264   ;;  %v416_v1 = vld [vmem:[%s6739_s0 + $0x8] sm:$0xff]  ;;  %v417_v2 = vld [vmem:[%s6739_s0 + $0x10] sm:$0x3]  ;;  %vm421_vm1 = vcmask 517120  }
  0x18   : > { %419 = vst.msk [vmem:[%s6747_s8] sm:$0xff] %vm418_vm0, %v415_v0  ;;  %420 = vst.msk [vmem:[%s6747_s8 + $0x8] sm:$0xff] %vm418_vm0, %v416_v1 }
  0x19   : > { %422 = vst.msk [vmem:[%s6747_s8 + $0x10] sm:$0x3] %vm421_vm1, %v417_v2 }
  0x1a PF: > { %vm509_vm2 = vcmask 523264   ;;  %vm516_vm3 = vcmask 517120   ;;  %v5660_v24 = vmov 0.0   ;;  %v436_v25 = vld [vmem:[%s5723_s12 + $0x38] sm:$0xff]  ;;  %v435_v27 = vld [vmem:[%s5723_s12 + $0x30] sm:$0xff]  ;;  %v434_v29 = vld [vmem:[%s5723_s12 + $0x28] sm:$0xff]  ;;  %v551_v48 = vlaneseq }
  0x1b   : > { %5294 = vmatprep.subr.mxu0 %v5660_v24  ;;  %5319 = vmatprep.subr.mxu1 %v5660_v24  ;;  %v444_v26 = vld [vmem:[%s5728_s15 + $0x38] sm:$0xff]  ;;  %v443_v28 = vld [vmem:[%s5728_s15 + $0x30] sm:$0xff]  ;;  %v442_v30 = vld [vmem:[%s5728_s15 + $0x28] sm:$0xff]  ;;  %vm5661_vm4 = vmmov 0   ;;  %vm1321_vm5 = vcmask 130048   ;;  %vm1734_vm6 = vcmask 1040384  }
  0x1c   : > { %5295 = vmatpush3.msra.mxu0 %v436_v25  ;;  %5320 = vmatpush3.msra.mxu1 %v444_v26  ;;  %v433_v31 = vld [vmem:[%s5723_s12 + $0x20] sm:$0xff]  ;;  %v432_v33 = vld [vmem:[%s5723_s12 + $0x18] sm:$0xff]  ;;  %v431_v35 = vld [vmem:[%s5723_s12 + $0x10] sm:$0xff]  ;;  %v5837_v51 = vshrl.u32 %v551_v48, 7  ;;  %vm1622_vm7 = vcmask 65536   ;;  %vm1618_vm8 = vcmask 72704  }
  0x1d   : > { %5296 = vmatprep.subr.mxu0 %v5660_v24  ;;  %5321 = vmatprep.subr.mxu1 %v5660_v24  ;;  %v441_v32 = vld [vmem:[%s5728_s15 + $0x20] sm:$0xff]  ;;  %v440_v34 = vld [vmem:[%s5728_s15 + $0x18] sm:$0xff]  ;;  %v439_v36 = vld [vmem:[%s5728_s15 + $0x10] sm:$0xff] }
  0x1e   : > { %5297 = vmatpush3.msra.mxu0 %v435_v27  ;;  %5322 = vmatpush3.msra.mxu1 %v443_v28  ;;  %v430_v37 = vld [vmem:[%s5723_s12 + $0x8] sm:$0xff]  ;;  %v429_v39 = vld [vmem:[%s5723_s12] sm:$0xff]  ;;  %v5840_v52 = vsub.s32 0, %v5837_v51  ;;  %v560_v54 = vsub.s32 1, %v5837_v51  ;;  %v452_v63 = vld [vmem:[%s5733_s18 + $0x38] sm:$0xff]  ;;  %s5663_s12 = smov 112  }
  0x1f   : > { %v423_v3 = vld [vmem:[%s6747_s8] sm:$0xff]  ;;  %v424_v5 = vld [vmem:[%s6747_s8 + $0x8] sm:$0xff]  ;;  %5298 = vmatprep.subr.mxu0 %v5660_v24  ;;  %5323 = vmatprep.subr.mxu1 %v5660_v24  ;;  %v451_v2 = vld [vmem:[%s5733_s18 + $0x30] sm:$0xff] }
  0x20   : > { %v425_v4 = vld [vmem:[%s6747_s8 + $0x10] sm:$0x3]  ;;  %v510_v6 = vsel %vm509_vm2, %v423_v3, 0.0  ;;  %v513_v8 = vsel %vm509_vm2, %v424_v5, 0.0  ;;  %5299 = vmatpush3.msra.mxu0 %v434_v29  ;;  %5324 = vmatpush3.msra.mxu1 %v442_v30  ;;  %v438_v38 = vld [vmem:[%s5728_s15 + $0x8] sm:$0xff]  ;;  %v437_v40 = vld [vmem:[%s5728_s15] sm:$0xff] }
  0x21   : > { %v517_v7 = vsel %vm516_vm3, %v425_v4, 0.0  ;;  %511 = vadd.xlane.f32.xlu0 %v510_v6  ;;  %5300 = vmatprep.subr.mxu0 %v5660_v24  ;;  %v5843_v53 = vld [vmem:[%s5753_s17] sm:$0xff]  ;;  %s5664_s15 = smov 96  }
  0x22   : > { %518 = vadd.xlane.f32.xlu1 %v517_v7  ;;  %5301 = vmatpush3.msra.mxu0 %v433_v31  ;;  %v554_v55 = vrot.slane %v5843_v53, %v5840_v52  ;;  %v561_v58 = vrot.slane %v5843_v53, %v560_v54  ;;  %v449_v7 = vld [vmem:[%s5733_s18 + $0x20] sm:$0xff] }
  0x23   : > { %5325 = vmatprep.subr.mxu1 %v5660_v24  ;;  %5302 = vmatprep.subr.mxu0 %v5660_v24 }
  0x24   : > { %5326 = vmatpush3.msra.mxu1 %v441_v32  ;;  %5303 = vmatpush3.msra.mxu0 %v432_v33 }
  0x25   : > { %514 = vadd.xlane.f32.xlu0 %v513_v8  ;;  %5327 = vmatprep.subr.mxu1 %v5660_v24 }
  0x26   : > { %5304 = vmatprep.subr.mxu0 %v5660_v24  ;;  %5328 = vmatpush3.msra.mxu1 %v440_v34 }
  0x27   : > { %5305 = vmatpush3.msra.mxu0 %v431_v35  ;;  %5329 = vmatprep.subr.mxu1 %v5660_v24 }
  0x28   : > { %5306 = vmatprep.subr.mxu0 %v5660_v24  ;;  %5330 = vmatpush3.msra.mxu1 %v439_v36 }
  0x29   : > { %5307 = vmatpush3.msra.mxu0 %v430_v37  ;;  %5331 = vmatprep.subr.mxu1 %v5660_v24 }
  0x2a   : > { %5308 = vmatprep.subr.mxu0 %v5660_v24  ;;  %5332 = vmatpush3.msra.mxu1 %v438_v38 }
  0x2b   : > { %5309 = vmatpush3.msra.mxu0 %v429_v39  ;;  %5333 = vmatprep.subr.mxu1 %v5660_v24 }
  0x2c   : > { %5310 = vmatprep.mubr.msk.f32.mxu0 %vm5661_vm4, %v5660_v24  ;;  %5334 = vmatpush3.msra.mxu1 %v437_v40 }
  0x2d   : > { %5335 = vmatprep.mubr.msk.f32.mxu1 %vm5661_vm4, %v5660_v24  ;;  %5344 = vmatprep.subr.mxu0 %v5660_v24 }
  0xaa   : > { %v512_v9 = vpop.xlane.xlu0 %511 }
  0xab   : > { %v519_v10 = vpop.xlane.xlu1 %518  ;;  %v521_v11 = vmul.f32 0.015625, %v512_v9  ;;  %v448_v9 = vld [vmem:[%s5733_s18 + $0x18] sm:$0xff] }
  0xac   : > { %v523_v12 = vmul.f32 0.015625, %v519_v10  ;;  %v447_v10 = vld [vmem:[%s5733_s18 + $0x10] sm:$0xff] }
  0xad   : > { %v5785_v13 = vsub.f32 %v423_v3, %v521_v11  ;;  %v446_v11 = vld [vmem:[%s5733_s18 + $0x8] sm:$0xff] }
  0xae   : > { %v5787_v14 = vsub.f32 %v425_v4, %v523_v12  ;;  %v515_v15 = vpop.xlane.xlu0 %514  ;;  %v445_v12 = vld [vmem:[%s5733_s18] sm:$0xff] }
  0xaf   : > { %v522_v16 = vmul.f32 0.015625, %v515_v15  ;;  %v527_v17 = vmul.f32 %v5785_v13, %v5785_v13  ;;  %v567_v15 = vsub.s32 2, %v5837_v51 }
  0xb0   : > { %v529_v18 = vmul.f32 %v5787_v14, %v5787_v14 }
  0xb1   : > { %v5793_v19 = vsub.f32 %v424_v5, %v522_v16  ;;  %v530_v20 = vsel %vm509_vm2, %v527_v17, 0.0  ;;  %v450_v5 = vld [vmem:[%s5733_s18 + $0x28] sm:$0xff]  ;;  %v660_v16 = vsub.s32 3, %v5837_v51  ;;  %s5665_s18 = smov 80  }
  0xb2   : > { %531 = vadd.xlane.f32.xlu1 %v530_v20  ;;  %v536_v21 = vsel %vm516_vm3, %v529_v18, 0.0  ;;  %v5895_v18 = vrot.slane %v5843_v53, %v567_v15 }
  0xb3   : > { %v528_v22 = vmul.f32 %v5793_v19, %v5793_v19 }
  0xb5   : > { %v533_v23 = vsel %vm509_vm2, %v528_v22, 0.0 }
  0xb6   : > { %537 = vadd.xlane.f32.xlu1 %v536_v21  ;;  %534 = vadd.xlane.f32.xlu0 %v533_v23 }
 0x13b   : > { %v532_v41 = vpop.xlane.xlu1 %531 }
 0x13c   : > { %v539_v42 = vmul.f32 0.015625, %v532_v41 }
 0x13e   : > { %v542_v43 = vadd.f32 1e-05, %v539_v42 }
 0x13f   : > { %v538_v44 = vpop.xlane.xlu1 %537  ;;  %v535_v45 = vpop.xlane.xlu0 %534 }
 0x140   : > { %5548 = vrsqrt.f32 %v542_v43  ;;  %v541_v46 = vmul.f32 0.015625, %v538_v44  ;;  %v540_v47 = vmul.f32 0.015625, %v535_v45 }
 0x142   : > { %v544_v49 = vadd.f32 1e-05, %v541_v46  ;;  %v543_v50 = vadd.f32 1e-05, %v540_v47 }
 0x144   : > { %5550 = vrsqrt.f32 %v544_v49 }
 0x145   : > { %5552 = vrsqrt.f32 %v543_v50 }
 0x14d   : > { %v5549_v56 = vpop.eup %5548 }
 0x14e   : > { %v548_v57 = vmul.f32 %v5549_v56, %v5785_v13  ;;  %v5662_v13 = vmov 1966171168  }
 0x150   : > { %v555_v59 = vmul.f32 %v554_v55, %v548_v57 }
 0x151   : > { %v5551_v60 = vpop.eup %5550 }
 0x152   : > { %v5553_v61 = vpop.eup %5552  ;;  %v562_v62 = vadd.f32 %v561_v58, %v555_v59  ;;  %v550_v1 = vmul.f32 %v5551_v60, %v5787_v14  ;;  %v831_v14 = vunpack.c.l.s4 %v5662_v13 }
 0x153   : > { %v549_v0 = vmul.f32 %v5553_v61, %v5793_v19  ;;  %v5898_v19 = vrot.slane %v5843_v53, %v660_v16 }
 0x154   : > { %5311 = vmatmul.mubr.msk.f32.vlgmr.msra.gmra.mxu0 %vm509_vm2, %v562_v62  ;;  %5336 = vmatmul.mubr.msk.f32.vlgmr.msra.gmra.mxu1 %vm509_vm2, %v562_v62  ;;  %v557_v6 = vmul.f32 %v554_v55, %v550_v1  ;;  %v832_v17 = vunpack.c.0.s8 %v831_v14 }
 0x155   : > { %5345 = vmatpush3.msra.mxu0 %v452_v63  ;;  %5313 = vmatprep.mubr.msk.f32.mxu0 %vm5661_vm4, %v5660_v24  ;;  %v556_v3 = vmul.f32 %v554_v55, %v549_v0  ;;  %v744_v55 = vsub.s32 4, %v5837_v51 }
 0x156   : > { %5346 = vmatprep.subr.mxu0 %v5660_v24  ;;  %5338 = vmatprep.mubr.msk.f32.mxu1 %vm5661_vm4, %v5660_v24  ;;  %v564_v8 = vadd.f32 %v561_v58, %v557_v6  ;;  %v5901_v20 = vsub.s32 %v832_v17, %v5837_v51 }
 0x157   : > { %5347 = vmatpush3.msra.mxu0 %v451_v2  ;;  %v563_v4 = vadd.f32 %v561_v58, %v556_v3 }
 0x158   : > { %5348 = vmatprep.subr.mxu0 %v5660_v24 }
 0x159   : > { %5314 = vmatmul.mubr.msk.f32.gmra.mxu0 %vm509_vm2, %v563_v4  ;;  %5339 = vmatmul.mubr.msk.f32.gmra.mxu1 %vm509_vm2, %v563_v4 }
 0x15a   : > { %5349 = vmatpush3.msra.mxu0 %v450_v5  ;;  %5316 = vmatprep.mubr.msk.f32.mxu0 %vm5661_vm4, %v5660_v24 }
 0x15b   : > { %5350 = vmatprep.subr.mxu0 %v5660_v24  ;;  %5341 = vmatprep.mubr.msk.f32.mxu1 %vm5661_vm4, %v5660_v24 }
 0x15c   : > { %5351 = vmatpush3.msra.mxu0 %v449_v7 }
 0x15d   : > { %5352 = vmatprep.subr.mxu0 %v5660_v24  ;;  %5317 = vmatmul.mubr.msk.f32.gmra.mxu0 %vm509_vm2, %v564_v8 }
 0x15e   : > { %5342 = vmatmul.mubr.msk.f32.gmra.mxu1 %vm509_vm2, %v564_v8  ;;  %5353 = vmatpush3.msra.mxu0 %v448_v9 }
 0x15f   : > { %5354 = vmatprep.subr.mxu0 %v5660_v24  ;;  %5360 = vmatprep.mubr.msk.f32.mxu0 %vm5661_vm4, %v5660_v24 }
 0x160   : > { %5355 = vmatpush3.msra.mxu0 %v447_v10 }
 0x161   : > { %5356 = vmatprep.subr.mxu0 %v5660_v24 }
 0x162   : > { %5357 = vmatpush3.msra.mxu0 %v446_v11 }
 0x163   : > { %5358 = vmatprep.subr.mxu0 %v5660_v24 }
 0x164   : > { %5359 = vmatpush3.msra.mxu0 %v445_v12 }
 0x165   : > { %5361 = vmatmul.mubr.msk.f32.vlgmr.msra.gmra.mxu0 %vm509_vm2, %v562_v62 }
 0x166   : > { %5363 = vmatprep.mubr.msk.f32.mxu0 %vm5661_vm4, %v5660_v24 }
 0x169   : > { %5364 = vmatmul.mubr.msk.f32.gmra.mxu0 %vm509_vm2, %v563_v4 }
 0x16a   : > { %5366 = vmatprep.mubr.msk.f32.mxu0 %vm5661_vm4, %v5660_v24 }
 0x16d   : > { %5367 = vmatmul.mubr.msk.f32.gmra.mxu0 %vm509_vm2, %v564_v8  ;;  %v5923_v8 = vrot.slane %v5843_v53, %v744_v55 }
 0x214   : > { %v644_v21 = vpop.f32.mrf.mxu0  ;;  %v728_v22 = vpop.f32.mrf.mxu1 }
 0x215   : > { %v645_v23 = vadd.f32 %v644_v21, %v5895_v18  ;;  %v729_v25 = vadd.f32 %v728_v22, %v5898_v19 }
 0x216   : > { %v5312_v26 = vpop.f32.mrf.mxu0  ;;  %v5337_v27 = vpop.f32.mrf.mxu1 }
 0x217   : > { %v829_v28 = vcombine.high %v645_v23, %v645_v23  ;;  %v836_v29 = vrot.slane %v645_v23, %v5901_v20  ;;  %v952_v30 = vcombine.high %v729_v25, %v729_v25  ;;  %v959_v31 = vrot.slane %v729_v25, %v5901_v20 }
 0x219   : > { %v843_v32 = vrot.slane %v829_v28, %v5901_v20  ;;  %v844_v33 = vcombine.high %v836_v29, %v836_v29  ;;  %v966_v34 = vrot.slane %v952_v30, %v5901_v20  ;;  %v649_v35 = vpop.f32.mrf.mxu0  ;;  %v733_v36 = vpop.f32.mrf.mxu1  ;;  %v967_v37 = vcombine.high %v959_v31, %v959_v31 }
 0x21a   : > { %v650_v38 = vadd.f32 %v649_v35, %v5895_v18  ;;  %v975_v41 = vrot.slane %v959_v31, %v5901_v20  ;;  %v852_v56 = vrot.slane %v836_v29, %v5901_v20  ;;  %v734_v0 = vadd.f32 %v733_v36, %v5898_v19 }
 0x21b   : > { %v845_v39 = vcombine.high %v843_v32, %v843_v32  ;;  %v968_v40 = vcombine.high %v966_v34, %v966_v34  ;;  %v5315_v42 = vpop.f32.mrf.mxu0  ;;  %v5340_v43 = vpop.f32.mrf.mxu1  ;;  %v866_v44 = vrot.slane %v844_v33, %v5901_v20  ;;  %v989_v45 = vrot.slane %v967_v37, %v5901_v20 }
 0x21c   : > { %v878_v46 = vcombine.high %v650_v38, %v650_v38  ;;  %v885_v47 = vrot.slane %v650_v38, %v5901_v20  ;;  %v859_v57 = vrot.slane %v843_v32, %v5901_v20  ;;  %v982_v61 = vrot.slane %v966_v34, %v5901_v20 }
 0x21d   : > { %v873_v48 = vrot.slane %v845_v39, %v5901_v20  ;;  %v996_v49 = vrot.slane %v968_v40, %v5901_v20  ;;  %v654_v50 = vpop.f32.mrf.mxu0  ;;  %v1258_v58 = vcombine.low %v975_v41, %v989_v45  ;;  %v5044_v62 = vcombine.high %v975_v41, %v989_v45 }
 0x21e   : > { %v892_v59 = vrot.slane %v878_v46, %v5901_v20  ;;  %v738_v60 = vpop.f32.mrf.mxu1  ;;  %v893_v63 = vcombine.high %v885_v47, %v885_v47  ;;  %v1195_v2 = vcombine.low %v852_v56, %v866_v44  ;;  %v5042_v3 = vcombine.high %v852_v56, %v866_v44 }
 0x21f   : > { %v5318_v1 = vpop.f32.mrf.mxu0  ;;  %v1197_v4 = vcombine.low %v859_v57, %v873_v48  ;;  %v1260_v6 = vcombine.low %v982_v61, %v996_v49  ;;  %v5045_v7 = vcombine.high %v982_v61, %v996_v49  ;;  %v5043_v9 = vcombine.high %v859_v57, %v873_v48 }
 0x220   : > { %v5343_v5 = vpop.f32.mrf.mxu1  ;;  %v1268_v10 = vrot.slane %v1258_v58, %v5901_v20  ;;  %v894_v11 = vcombine.high %v892_v59, %v892_v59  ;;  %v901_v12 = vrot.slane %v885_v47, %v5901_v20  ;;  %v1275_v13 = vrot.slane %v5044_v62, %v5901_v20 }
 0x221   : > { %v908_v14 = vrot.slane %v892_v59, %v5901_v20  ;;  %v915_v15 = vrot.slane %v893_v63, %v5901_v20  ;;  %v1001_v16 = vcombine.high %v734_v0, %v734_v0  ;;  %v5931_v17 = vrot.slane %v1195_v2, %v5901_v20 }
 0x222   : > { %v5934_v53 = vrot.slane %v5042_v3, %v5901_v20  ;;  %v5937_v21 = vrot.slane %v1197_v4, %v5901_v20  ;;  %v923_v22 = vcombine.high %v901_v12, %v901_v12  ;;  %v5940_v23 = vrot.slane %v1260_v6, %v5901_v20 }
 0x223   : > { %v5943_v25 = vrot.slane %v5045_v7, %v5901_v20  ;;  %v1008_v26 = vrot.slane %v734_v0, %v5901_v20  ;;  %v1015_v27 = vrot.slane %v1001_v16, %v5901_v20  ;;  %v922_v29 = vrot.slane %v894_v11, %v5901_v20 }
 0x224   : > { %v924_v30 = vcombine.high %v908_v14, %v908_v14  ;;  %v925_v31 = vcombine.high %v915_v15, %v915_v15  ;;  %v655_v32 = vadd.f32 %v654_v50, %v5895_v18  ;;  %v1290_v33 = vcombine.low %v1268_v10, %v1275_v13 }
 0x225   : > { %v812_v28 = vpop.f32.mrf.mxu0  ;;  %v1250_v34 = vrot.slane %v901_v12, %v5901_v20  ;;  %v1016_v35 = vcombine.high %v1008_v26, %v1008_v26  ;;  %v1017_v36 = vcombine.high %v1015_v27, %v1015_v27  ;;  %v5951_v38 = vrot.slane %v5043_v9, %v5901_v20 }
 0x226   : > { %v5953_v39 = vcombine.low %v915_v15, %v923_v22  ;;  %v1024_v40 = vrot.slane %v1008_v26, %v5901_v20  ;;  %v1031_v41 = vrot.slane %v1015_v27, %v5901_v20  ;;  %v1227_v42 = vcombine.low %v5931_v17, %v5934_v53 }
 0x227   : > { %v5362_v37 = vpop.f32.mrf.mxu0  ;;  %v1291_v18 = vcombine.low %v5940_v23, %v5943_v25  ;;  %v1038_v43 = vrot.slane %v1016_v35, %v5901_v20  ;;  %v1045_v44 = vrot.slane %v1017_v36, %v5901_v20  ;;  %v5963_v46 = vcombine.low %v925_v31, %v908_v14 }
 0x228   : > { %v5965_v47 = vcombine.low %v922_v29, %v924_v30  ;;  %v1313_v48 = vrot.slane %v1024_v40, %v5901_v20  ;;  %v933_v49 = vrot.slane %v655_v32, %v5901_v20  ;;  %v5970_v50 = vrot.slane %v1290_v33, %v5901_v20 }
 0x229   : > { %v817_v45 = vpop.f32.mrf.mxu0  ;;  %v5973_v55 = vrot.slane %v1250_v34, %v5901_v20  ;;  %v1047_v56 = vcombine.high %v1031_v41, %v1031_v41  ;;  %v739_v57 = vadd.f32 %v738_v60, %v5898_v19  ;;  %v1415_v59 = vrot.slane %v5953_v39, %v5901_v20 }
 0x22a   : > { %v1046_v61 = vcombine.high %v1024_v40, %v1024_v40  ;;  %v5979_v62 = vrot.slane %v1313_v48, %v5901_v20  ;;  %v926_v63 = vcombine.high %v922_v29, %v922_v29  ;;  %v1048_v0 = vcombine.high %v1038_v43, %v1038_v43 }
 0x22b   : > { %v5365_v58 = vpop.f32.mrf.mxu0  ;;  %v1049_v1 = vcombine.high %v1045_v44, %v1045_v44  ;;  %v1056_v2 = vrot.slane %v739_v57, %v5901_v20  ;;  %v813_v3 = vadd.f32 %v812_v28, %v5923_v8  ;;  %v1422_v19 = vrot.slane %v5963_v46, %v5901_v20 }
 0x22c   : > { %v934_v60 = vcombine.high %v933_v49, %v933_v49  ;;  %v1429_v5 = vrot.slane %v5965_v47, %v5901_v20  ;;  %5369 = vmatprep.subr.msk.mxu0 %vm1321_vm5, %v5979_v62  ;;  %v818_v6 = vadd.f32 %v817_v45, %v5923_v8  ;;  %v1470_v7 = vcombine.low %v1045_v44, %v1047_v56 }
 0x22d   : > { %v5983_v4 = vpop.f32.mrf.mxu0  ;;  %v941_v9 = vrot.slane %v933_v49, %v5901_v20  ;;  %v1057_v10 = vcombine.high %v1056_v2, %v1056_v2  ;;  %v1064_v11 = vrot.slane %v1056_v2, %v5901_v20  ;;  %5370 = vmatpush3.xpose.msk.msra.mxu0 %vm1321_vm5, %v5979_v62  ;;  %v1468_v13 = vcombine.low %v1038_v43, %v1046_v61 }
 0x22e   : > { %v1075_v14 = vcombine.high %v813_v3, %v813_v3  ;;  %v1082_v15 = vrot.slane %v813_v3, %v5901_v20  ;;  %v1124_v16 = vcombine.high %v818_v6, %v818_v6  ;;  %v1469_v22 = vcombine.low %v1048_v0, %v1031_v41 }
 0x22f   : > { %v5368_v12 = vpop.f32.mrf.mxu0  ;;  %v1408_v23 = vcombine.low %v926_v63, %v941_v9  ;;  %v1071_v25 = vrot.slane %v1057_v10, %v5901_v20  ;;  %v1471_v26 = vcombine.low %v1049_v1, %v1064_v11  ;;  %v5999_v27 = vrot.slane %v934_v60, %v5901_v20 }
 0x230   : > { %v1089_v28 = vrot.slane %v1075_v14, %v5901_v20  ;;  %v1090_v29 = vcombine.high %v1082_v15, %v1082_v15  ;;  %v1131_v30 = vrot.slane %v818_v6, %v5901_v20  ;;  %v1492_v31 = vrot.slane %v1470_v7, %v5901_v20 }
 0x231   : > { %v1523_v32 = vrot.slane %v1071_v25, %v5901_v20  ;;  %v1098_v33 = vrot.slane %v1082_v15, %v5901_v20  ;;  %v1138_v34 = vrot.slane %v1124_v16, %v5901_v20  ;;  %v1499_v35 = vrot.slane %v1471_v26, %v5901_v20 }
 0x232   : > { %v1091_v36 = vcombine.high %v1089_v28, %v1089_v28  ;;  %v1112_v37 = vrot.slane %v1090_v29, %v5901_v20  ;;  %v1139_v40 = vcombine.high %v1131_v30, %v1131_v30  ;;  %v1485_v41 = vrot.slane %v1469_v22, %v5901_v20 }
 0x233   : > { %v1436_v43 = vrot.slane %v1408_v23, %v5901_v20  ;;  %v6012_v44 = vrot.slane %v1523_v32, %v5901_v20  ;;  %v1305_v45 = vrot.slane %v1291_v18, %v5901_v20  ;;  %v1105_v47 = vrot.slane %v1089_v28, %v5901_v20 }
 0x234   : > { %v1119_v48 = vrot.slane %v1091_v36, %v5901_v20  ;;  %v1664_v49 = vcombine.low %v1098_v33, %v1112_v37  ;;  %v5054_v56 = vcombine.high %v1098_v33, %v1112_v37  ;;  %v1478_v57 = vrot.slane %v1468_v13, %v5901_v20 }
 0x235   : > { %v1140_v58 = vcombine.high %v1138_v34, %v1138_v34  ;;  %v1147_v61 = vrot.slane %v1131_v30, %v5901_v20  ;;  %v1161_v63 = vrot.slane %v1139_v40, %v5901_v20  ;;  %5376 = vmatprep.subr.msk.mxu1 %vm1321_vm5, %v6012_v44  ;;  %v1501_v0 = vcombine.low %v1492_v31, %v1499_v35 }
 0x236   : > { %v1666_v1 = vcombine.low %v1105_v47, %v1119_v48  ;;  %v5055_v2 = vcombine.high %v1105_v47, %v1119_v48  ;;  %v1154_v18 = vrot.slane %v1138_v34, %v5901_v20  ;;  %5377 = vmatpush3.xpose.msk.msra.mxu1 %vm1321_vm5, %v6012_v44  ;;  %v1500_v3 = vcombine.low %v1478_v57, %v1485_v41 }
 0x237   : > { %v1674_v60 = vrot.slane %v1664_v49, %v5901_v20  ;;  %v1681_v6 = vrot.slane %v5054_v56, %v5901_v20  ;;  %v1171_v7 = vcombine.high %v1161_v63, %v1161_v63  ;;  %v1438_v9 = vcombine.low %v1429_v5, %v1436_v43 }
 0x238   : > { %v1688_v10 = vrot.slane %v1666_v1, %v5901_v20  ;;  %v1695_v11 = vrot.slane %v5055_v2, %v5901_v20  ;;  %v6030_v12 = vcombine.low %v5970_v50, %v1305_v45  ;;  %v1460_v13 = vrot.slane %v5999_v27, %v5901_v20 }
 0x239   : > { %v1168_v14 = vrot.slane %v1140_v58, %v5901_v20  ;;  %v1169_v15 = vcombine.high %v1147_v61, %v1147_v61  ;;  %v1719_v16 = vrot.slane %v1147_v61, %v5901_v20  ;;  %v1515_v22 = vrot.slane %v1501_v0, %v5901_v20 }
 0x23a   : > { %v1697_v23 = vcombine.low %v1688_v10, %v1695_v11  ;;  %v1170_v25 = vcombine.high %v1154_v18, %v1154_v18  ;;  %5371 = vmatprep.subr.msk.mxu0 %vm1321_vm5, %v6030_v12  ;;  %v1228_v5 = vcombine.low %v5937_v21, %v5951_v38  ;;  %v1696_v50 = vcombine.low %v1674_v60, %v1681_v6 }
 0x23b   : > { %v1813_v26 = vcombine.low %v1171_v7, %v1154_v18  ;;  %v1235_v27 = vrot.slane %v1227_v42, %v5901_v20  ;;  %5372 = vmatpush3.xpose.msk.msra.mxu0 %vm1321_vm5, %v6030_v12  ;;  %v823_v28 = vadd.f32 %v5983_v4, %v5923_v8  ;;  %v1508_v30 = vrot.slane %v1500_v3, %v5901_v20 }
 0x23c   : > { %v1242_v29 = vrot.slane %v1228_v5, %v5901_v20  ;;  %v1437_v21 = vcombine.low %v1415_v59, %v1422_v19  ;;  %v1452_v17 = vrot.slane %v1438_v9, %v5901_v20  ;;  %v6059_v53 = vrot.slane %v1719_v16, %v5901_v20 }
 0x23d   : > { %v1812_v38 = vcombine.low %v1161_v63, %v1169_v15  ;;  %v1172_v42 = vcombine.high %v1168_v14, %v1168_v14  ;;  %v1179_v8 = vrot.slane %v823_v28, %v5901_v20  ;;  %v6064_v31 = vcombine.low %v1508_v30, %v1515_v22 }
 0x23e   : > { %v6062_v4 = vcombine.low %v1235_v27, %v1242_v29  ;;  %v1445_v32 = vrot.slane %v1437_v21, %v5901_v20  ;;  %v1711_v46 = vrot.slane %v1697_v23, %v5901_v20  ;;  %v1814_v33 = vcombine.low %v1168_v14, %v1170_v25 }
 0x23f   : > { %v1829_v39 = vrot.slane %v1813_v26, %v5901_v20  ;;  %v1180_v59 = vcombine.high %v1179_v8, %v1179_v8  ;;  %v1187_v19 = vrot.slane %v1179_v8, %v5901_v20  ;;  %v1704_v34 = vrot.slane %v1696_v50, %v5901_v20  ;;  %5378 = vmatprep.subr.msk.mxu1 %vm1321_vm5, %v6064_v31 }
 0x240   : > { %5373 = vmatprep.mubr.msk.f32.mxu0 %vm1321_vm5, %v6062_v4  ;;  %v6075_v35 = vcombine.low %v1445_v32, %v1452_v17  ;;  %v1822_v36 = vrot.slane %v1812_v38, %v5901_v20  ;;  %5379 = vmatpush3.xpose.msk.msra.mxu1 %vm1321_vm5, %v6064_v31  ;;  %v6084_v41 = vrot.slane %v1460_v13, %v5901_v20 }
 0x241   : > { %v1194_v37 = vrot.slane %v1180_v59, %v5901_v20  ;;  %v1815_v40 = vcombine.low %v1172_v42, %v1187_v19  ;;  %5374 = vmatmul.mubr.msk.f32.vlgmr.msra.gmra.mxu0 %vm1321_vm5, %v5973_v55  ;;  %5383 = vmatprep.subr.msk.mxu1 %vm1734_vm6, %v6059_v53  ;;  %v6090_v43 = vcombine.low %v1704_v34, %v1711_v46 }
 0x242   : > { %5380 = vmatprep.mubr.msk.f32.mxu1 %vm1321_vm5, %v6075_v35  ;;  %v1844_v45 = vcombine.low %v1822_v36, %v1829_v39  ;;  %v1836_v47 = vrot.slane %v1814_v33, %v5901_v20 }
 0x243   : > { %v1843_v48 = vrot.slane %v1815_v40, %v5901_v20  ;;  %v1867_v49 = vrot.slane %v1194_v37, %v5901_v20  ;;  %5381 = vmatmul.mubr.msk.f32.vlgmr.msra.gmra.mxu1 %vm1321_vm5, %v6084_v41 }
 0x244   : > { %5384 = vmatpush3.msk.msra.mxu1 %vm1734_vm6, %v6059_v53  ;;  %v1852_v61 = vrot.slane %v1844_v45, %v5901_v20 }
 0x245   : > { %v1845_v56 = vcombine.low %v1836_v47, %v1843_v48  ;;  %v6098_v57 = vrot.slane %v1867_v49, %v5901_v20  ;;  %5385 = vmatprep.subr.mxu1 %v6090_v43 }
 0x246   : > { %5386 = vmatpush3.msra.mxu1 %v6090_v43 }
 0x247   : > { %v1859_v58 = vrot.slane %v1845_v56, %v5901_v20  ;;  %5390 = vmatprep.subr.msk.mxu0 %vm1734_vm6, %v6098_v57 }
 0x248   : > { %5391 = vmatpush3.msk.msra.mxu0 %vm1734_vm6, %v6098_v57 }
 0x249   : > { %v6110_v63 = vcombine.low %v1852_v61, %v1859_v58 }
 0x24b   : > { %5392 = vmatprep.subr.mxu0 %v6110_v63 }
 0x24c   : > { %5393 = vmatpush3.msra.mxu0 %v6110_v63 }
 0x301   : > { %v5375_v0 = vpop.f32.mrf.mxu0 }
 0x302   : > { %v1615_v1 = vmul.f32 0.25, %v5375_v0 }
 0x303   : > { %v1396_v2 = vpop.f32.mrf.mxu0  ;;  %v5382_v60 = vpop.f32.mrf.mxu1 }
 0x304   : > { %v1614_v18 = vmul.f32 0.25, %v1396_v2  ;;  %v1623_v3 = vsel %vm1622_vm7, %v1615_v1, -inf  ;;  %v1617_v6 = vmul.f32 0.25, %v5382_v60 }
 0x305   : > { %1624 = vmax.xlane.f32.xlu1 %v1623_v3  ;;  %v1605_v9 = vpop.f32.mrf.mxu1 }
 0x306   : > { %v1619_v7 = vsel %vm1618_vm8, %v1614_v18, -inf  ;;  %v1616_v10 = vmul.f32 0.25, %v1605_v9  ;;  %v1629_v11 = vsel %vm1622_vm7, %v1617_v6, -inf }
 0x307   : > { %1620 = vmax.xlane.f32.xlu0 %v1619_v7 }
 0x308   : > { %v1626_v13 = vsel %vm1618_vm8, %v1616_v10, -inf }
 0x309   : > { %1630 = vmax.xlane.f32.xlu1 %v1629_v11 }
 0x30b   : > { %1627 = vmax.xlane.f32.xlu0 %v1626_v13 }
 0x31a   : > { %2093 = vrot.lane.b32.xlu1 %v6030_v12, %s5663_s12 }
 0x31e   : > { %2186 = vrot.lane.b32.xlu1 %v6012_v44, %s5663_s12 }
 0x321   : > { %2095 = vrot.lane.b32.xlu0 %v5979_v62, %s5663_s12 }
 0x322   : > { %2089 = vrot.lane.b32.xlu1 %v6062_v4, %s5663_s12 }
 0x38e   : > { %v1625_v14 = vpop.xlane.xlu1 %1624 }
 0x38f   : > { %v1633_v15 = vsub.f32 %v1615_v1, %v1625_v14 }
 0x390   : > { %v1621_v16 = vpop.xlane.xlu0 %1620 }
 0x391   : > { %v1638_v22 = vmul.f32 1.442695, %v1633_v15  ;;  %v1632_v23 = vsub.f32 %v1614_v18, %v1621_v16 }
 0x392   : > { %v1631_v25 = vpop.xlane.xlu1 %1630 }
 0x393   : > { %5554 = vpow2.f32 %v1638_v22  ;;  %v1636_v5 = vmul.f32 1.442695, %v1632_v23  ;;  %v1635_v50 = vsub.f32 %v1617_v6, %v1631_v25 }
 0x394   : > { %v1628_v26 = vpop.xlane.xlu0 %1627 }
 0x395   : > { %5556 = vpow2.f32 %v1636_v5  ;;  %v1642_v27 = vmul.f32 1.442695, %v1635_v50  ;;  %v1634_v28 = vsub.f32 %v1616_v10, %v1628_v26 }
 0x396   : > { %v2094_v29 = vpop.permute.xlu1 %2093 }
 0x397   : > { %5558 = vpow2.f32 %v1642_v27  ;;  %v1640_v30 = vmul.f32 1.442695, %v1634_v28 }
 0x398   : > { %v2096_v21 = vpop.permute.xlu0 %2095 }
 0x399   : > { %5560 = vpow2.f32 %v1640_v30  ;;  %5397 = vmatprep.subr.msk.mxu1 %vm1321_vm5, %v2096_v21 }
 0x39a   : > { %v2187_v17 = vpop.permute.xlu1 %2186 }
 0x39b   : > { %5404 = vmatprep.subr.msk.mxu0 %vm1321_vm5, %v2187_v17 }
 0x39e   : > { %v2090_v19 = vpop.permute.xlu1 %2089 }
 0x3a0   : > { %v5555_v38 = vpop.eup %5554 }
 0x3a1   : > { %v1647_v42 = vsel %vm1622_vm7, %v5555_v38, 0.0 }
 0x3a2   : > { %v5557_v8 = vpop.eup %5556  ;;  %1648 = vadd.xlane.f32.xlu1 %v1647_v42 }
 0x3a3   : > { %v1644_v32 = vsel %vm1618_vm8, %v5557_v8, 0.0 }
 0x3a4   : > { %v5559_v46 = vpop.eup %5558  ;;  %1645 = vadd.xlane.f32.xlu0 %v1644_v32 }
 0x3a5   : > { %v1653_v33 = vsel %vm1622_vm7, %v5559_v46, 0.0 }
 0x3a6   : > { %v5561_v39 = vpop.eup %5560  ;;  %1654 = vadd.xlane.f32.xlu1 %v1653_v33 }
 0x3a7   : > { %v1650_v59 = vsel %vm1618_vm8, %v5561_v39, 0.0 }
 0x3a8   : > { %1651 = vadd.xlane.f32.xlu0 %v1650_v59 }
 0x3b7   : > { %2184 = vrot.lane.b32.xlu1 %v6064_v31, %s5663_s12 }
 0x3bb   : > { %2182 = vrot.lane.b32.xlu1 %v6084_v41, %s5663_s12 }
 0x3be   : > { %2091 = vrot.lane.b32.xlu0 %v5973_v55, %s5663_s12 }
 0x3c2   : > { %2180 = vrot.lane.b32.xlu0 %v6075_v35, %s5663_s12 }
 0x42b   : > { %v1649_v34 = vpop.xlane.xlu1 %1648 }
 0x42c   : > { %5562 = vrcp.f32 %v1649_v34 }
 0x42d   : > { %v1646_v36 = vpop.xlane.xlu0 %1645 }
 0x42e   : > { %5564 = vrcp.f32 %v1646_v36 }
 0x42f   : > { %v1655_v37 = vpop.xlane.xlu1 %1654 }
 0x430   : > { %5566 = vrcp.f32 %v1655_v37 }
 0x431   : > { %v1652_v40 = vpop.xlane.xlu0 %1651 }
 0x432   : > { %5568 = vrcp.f32 %v1652_v40 }
 0x433   : > { %v2185_v2 = vpop.permute.xlu1 %2184 }
 0x435   : > { %v2092_v58 = vpop.permute.xlu0 %2091 }
 0x437   : > { %v2183_v3 = vpop.permute.xlu1 %2182 }
 0x439   : > { %v5563_v45 = vpop.eup %5562  ;;  %v2181_v18 = vpop.permute.xlu0 %2180 }
 0x43a   : > { %v1661_v49 = vmul.f32 %v5563_v45, %v5555_v38 }
 0x43b   : > { %v5565_v47 = vpop.eup %5564 }
 0x43c   : > { %v1660_v48 = vmul.f32 %v5565_v47, %v5557_v8 }
 0x43d   : > { %v5567_v56 = vpop.eup %5566 }
 0x43e   : > { %5387 = vmatprep.mubr.msk.f32.mxu1 %vm1618_vm8, %v1660_v48  ;;  %v1663_v1 = vmul.f32 %v5567_v56, %v5559_v46 }
 0x43f   : > { %v5569_v61 = vpop.eup %5568  ;;  %5388 = vmatmul.mubr.msk.f32.vlgmr.msra.gmra.mxu1 %vm1618_vm8, %v1661_v49 }
 0x440   : > { %5398 = vmatpush3.xpose.msk.msra.mxu1 %vm1321_vm5, %v2096_v21  ;;  %5401 = vmatprep.mubr.msk.f32.mxu1 %vm1321_vm5, %v2090_v19  ;;  %v1662_v0 = vmul.f32 %v5569_v61, %v5561_v39 }
 0x441   : > { %5399 = vmatprep.subr.msk.mxu1 %vm1321_vm5, %v2094_v29 }
 0x442   : > { %5394 = vmatprep.mubr.msk.f32.mxu0 %vm1618_vm8, %v1662_v0 }
 0x443   : > { %5395 = vmatmul.mubr.msk.f32.vlgmr.msra.gmra.mxu0 %vm1618_vm8, %v1663_v1 }
 0x444   : > { %5400 = vmatpush3.xpose.msk.msra.mxu1 %vm1321_vm5, %v2094_v29  ;;  %5405 = vmatpush3.xpose.msk.msra.mxu0 %vm1321_vm5, %v2187_v17 }
 0x445   : > { %5406 = vmatprep.subr.msk.mxu0 %vm1321_vm5, %v2185_v2  ;;  %5408 = vmatprep.mubr.msk.f32.mxu0 %vm1321_vm5, %v2181_v18 }
 0x447   : > { %5402 = vmatmul.mubr.msk.f32.vlgmr.msra.gmra.mxu1 %vm1321_vm5, %v2092_v58 }
 0x448   : > { %5407 = vmatpush3.xpose.msk.msra.mxu0 %vm1321_vm5, %v2185_v2 }
 0x44b   : > { %5409 = vmatmul.mubr.msk.f32.vlgmr.msra.gmra.mxu0 %vm1321_vm5, %v2183_v3 }
 0x4ff   : > { %v5389_v60 = vpop.f32.mrf.mxu1 }
 0x500   : > { %v2018_v10 = vrot.slane %v5389_v60, %v5901_v20 }
 0x501   : > { %v6154_v7 = vpop.f32.mrf.mxu1 }
 0x502   : > { %v2025_v23 = vrot.slane %v2018_v10, %v5901_v20 }
 0x503   : > { %v5396_v6 = vpop.f32.mrf.mxu0 }
 0x504   : > { %v2081_v29 = vrot.slane %v5396_v6, %v5901_v20 }
 0x505   : > { %v1950_v9 = vpop.f32.mrf.mxu0 }
 0x506   : > { %v2026_v13 = vcombine.high %v1950_v9, %v1950_v9  ;;  %v2033_v14 = vrot.slane %v1950_v9, %v5901_v20  ;;  %v2088_v36 = vrot.slane %v2081_v29, %v5901_v20 }
 0x507   : > { %v5403_v11 = vpop.f32.mrf.mxu1 }
 0x508   : > { %v2040_v15 = vrot.slane %v2026_v13, %v5901_v20  ;;  %v2041_v16 = vcombine.high %v2033_v14, %v2033_v14  ;;  %v2049_v22 = vrot.slane %v2033_v14, %v5901_v20  ;;  %v2272_v30 = vmul.f32 0.25, %v5403_v11 }
 0x509   : > { %v2171_v27 = vpop.f32.mrf.mxu1 }
 0x50a   : > { %v2042_v25 = vcombine.high %v2040_v15, %v2040_v15  ;;  %v2056_v5 = vrot.slane %v2040_v15, %v5901_v20  ;;  %v2063_v50 = vrot.slane %v2041_v16, %v5901_v20  ;;  %v2071_v26 = vcombine.high %v2049_v22, %v2049_v22 }
 0x50b   : > { %v5410_v28 = vpop.f32.mrf.mxu0  ;;  %v2873_v21 = vcombine.low %v2025_v23, %v2049_v22  ;;  %v2271_v46 = vmul.f32 0.25, %v2171_v27  ;;  %v2278_v37 = vsel %vm1622_vm7, %v2272_v30, -inf }
 0x50c   : > { %v2070_v17 = vrot.slane %v2042_v25, %v5901_v20  ;;  %v2072_v38 = vcombine.high %v2056_v5, %v2056_v5  ;;  %v2073_v42 = vcombine.high %v2063_v50, %v2063_v50  ;;  %v2874_v8 = vcombine.low %v2063_v50, %v2071_v26  ;;  %2279 = vmax.xlane.f32.xlu1 %v2278_v37 }
 0x50d   : > { %v2883_v32 = vrot.slane %v2873_v21, %v5901_v20  ;;  %v2262_v33 = vpop.f32.mrf.mxu0  ;;  %v2275_v40 = vsel %vm1618_vm8, %v2271_v46, -inf  ;;  %v2274_v0 = vmul.f32 0.25, %v5410_v28 }
 0x50e   : > { %v2074_v39 = vcombine.high %v2070_v17, %v2070_v17  ;;  %v2875_v59 = vcombine.low %v2073_v42, %v2056_v5  ;;  %v2876_v19 = vcombine.low %v2070_v17, %v2072_v38  ;;  %v2890_v34 = vrot.slane %v2874_v8, %v5901_v20  ;;  %2276 = vmax.xlane.f32.xlu0 %v2275_v40 }
 0x50f   : > { %v2273_v49 = vmul.f32 0.25, %v2262_v33  ;;  %v2284_v3 = vsel %vm1622_vm7, %v2274_v0, -inf  ;;  %v1963_v17 = vcombine.high %v6154_v7, %v6154_v7  ;;  %v1970_v8 = vrot.slane %v6154_v7, %v5901_v20 }
 0x510   : > { %v2897_v45 = vrot.slane %v2875_v59, %v5901_v20  ;;  %v2904_v47 = vrot.slane %v2876_v19, %v5901_v20  ;;  %v2905_v48 = vcombine.low %v2883_v32, %v2890_v34  ;;  %v6172_v56 = vcombine.low %v2074_v39, %v2088_v36 }
 0x511   : > { %v2281_v58 = vsel %vm1618_vm8, %v2273_v49, -inf  ;;  %v1977_v38 = vrot.slane %v1963_v17, %v5901_v20  ;;  %v1978_v33 = vcombine.high %v1970_v8, %v1970_v8  ;;  %v1986_v7 = vrot.slane %v1970_v8, %v5901_v20 }
 0x512   : > { %v2906_v61 = vcombine.low %v2897_v45, %v2904_v47  ;;  %2282 = vmax.xlane.f32.xlu0 %v2281_v58  ;;  %v2913_v1 = vrot.slane %v2905_v48, %v5901_v20 }
 0x513   : > { %v1993_v34 = vrot.slane %v1977_v38, %v5901_v20  ;;  %v2000_v36 = vrot.slane %v1978_v33, %v5901_v20 }
 0x514   : > { %v2920_v2 = vrot.slane %v2906_v61, %v5901_v20 }
 0x515   : > { %v2824_v48 = vcombine.low %v1986_v7, %v2000_v36 }
 0x516   : > { %v6177_v18 = vcombine.low %v2913_v1, %v2920_v2  ;;  %2285 = vmax.xlane.f32.xlu0 %v2284_v3 }
 0x595   : > { %v2280_v60 = vpop.xlane.xlu1 %2279 }
 0x596   : > { %v2288_v9 = vsub.f32 %v2272_v30, %v2280_v60  ;;  %v2834_v60 = vrot.slane %v2824_v48, %v5901_v20 }
 0x597   : > { %v2277_v6 = vpop.xlane.xlu0 %2276 }
 0x598   : > { %v2287_v10 = vsub.f32 %v2271_v46, %v2277_v6  ;;  %v2293_v11 = vmul.f32 1.442695, %v2288_v9  ;;  %v1979_v46 = vcombine.high %v1977_v38, %v1977_v38 }
 0x59a   : > { %v2291_v13 = vmul.f32 1.442695, %v2287_v10  ;;  %5570 = vpow2.f32 %v2293_v11  ;;  %v2007_v59 = vrot.slane %v1979_v46, %v5901_v20  ;;  %v456_v10 = vld [vmem:[%s5738_s21 + $0x18] sm:$0xff] }
 0x59b   : > { %v2283_v14 = vpop.xlane.xlu0 %2282 }
 0x59c   : > { %v2289_v15 = vsub.f32 %v2273_v49, %v2283_v14  ;;  %5572 = vpow2.f32 %v2291_v13  ;;  %v2826_v40 = vcombine.low %v1993_v34, %v2007_v59  ;;  %v5082_v45 = vcombine.high %v1993_v34, %v2007_v59 }
 0x59d   : > { %v5081_v49 = vcombine.high %v1986_v7, %v2000_v36 }
 0x59e   : > { %v2295_v16 = vmul.f32 1.442695, %v2289_v15  ;;  %v2855_v1 = vrot.slane %v5082_v45, %v5901_v20  ;;  %v455_v15 = vld [vmem:[%s5738_s21 + $0x10] sm:$0xff] }
 0x59f   : > { %v2286_v22 = vpop.xlane.xlu0 %2285  ;;  %v2841_v6 = vrot.slane %v5081_v49, %v5901_v20 }
 0x5a0   : > { %5574 = vpow2.f32 %v2295_v16  ;;  %v2290_v23 = vsub.f32 %v2274_v0, %v2286_v22  ;;  %v2848_v0 = vrot.slane %v2826_v40, %v5901_v20 }
 0x5a2   : > { %v2297_v25 = vmul.f32 1.442695, %v2290_v23  ;;  %v2857_v13 = vcombine.low %v2848_v0, %v2855_v1  ;;  %v2856_v23 = vcombine.low %v2834_v60, %v2841_v6 }
 0x5a4   : > { %5576 = vpow2.f32 %v2297_v25 }
 0x5a7   : > { %v5571_v5 = vpop.eup %5570 }
 0x5a8   : > { %v2302_v26 = vsel %vm1622_vm7, %v5571_v5, 0.0 }
 0x5a9   : > { %v5573_v50 = vpop.eup %5572  ;;  %2303 = vadd.xlane.f32.xlu1 %v2302_v26  ;;  %v454_v26 = vld [vmem:[%s5738_s21 + $0x8] sm:$0xff] }
 0x5aa   : > { %v2299_v27 = vsel %vm1618_vm8, %v5573_v50, 0.0 }
 0x5ab   : > { %2300 = vadd.xlane.f32.xlu0 %v2299_v27 }
 0x5ad   : > { %v6182_v28 = vpop.eup %5574 }
 0x5ae   : > { %v2305_v29 = vsel %vm1618_vm8, %v6182_v28, 0.0 }
 0x5af   : > { %2306 = vadd.xlane.f32.xlu0 %v2305_v29 }
 0x5b1   : > { %v6186_v30 = vpop.eup %5576 }
 0x5b2   : > { %v2308_v21 = vsel %vm1622_vm7, %v6186_v30, 0.0 }
 0x5b3   : > { %2309 = vadd.xlane.f32.xlu1 %v2308_v21  ;;  %v453_v21 = vld [vmem:[%s5738_s21] sm:$0xff] }
 0x5c4   : > { %2319 = vrot.lane.b32.xlu1 %v6090_v43, %s5663_s12 }
 0x5c5   : > { %2321 = vrot.lane.b32.xlu0 %v6059_v53, %s5663_s12 }
 0x5c8   : > { %2409 = vrot.lane.b32.xlu1 %v6098_v57, %s5663_s12 }
 0x5c9   : > { %3029 = vrot.lane.b32.xlu0 %v5979_v62, %s5664_s15 }
 0x5cc   : > { %2407 = vrot.lane.b32.xlu1 %v6110_v63, %s5663_s12 }
 0x5cd   : > { %3120 = vrot.lane.b32.xlu0 %v6012_v44, %s5664_s15 }
 0x5d0   : > { %3027 = vrot.lane.b32.xlu1 %v6030_v12, %s5664_s15 }
 0x5d1   : > { %3025 = vrot.lane.b32.xlu0 %v5973_v55, %s5664_s15 }
 0x5d4   : > { %3023 = vrot.lane.b32.xlu1 %v6062_v4, %s5664_s15 }
 0x5d5   : > { %3114 = vrot.lane.b32.xlu0 %v6075_v35, %s5664_s15 }
 0x5d8   : > { %3118 = vrot.lane.b32.xlu1 %v6064_v31, %s5664_s15 }
 0x5dc   : > { %3116 = vrot.lane.b32.xlu1 %v6084_v41, %s5664_s15 }
 0x632   : > { %v2304_v42 = vpop.xlane.xlu1 %2303 }
 0x633   : > { %5578 = vrcp.f32 %v2304_v42  ;;  %v2929_v42 = vrot.slane %v6172_v56, %v5901_v20 }
 0x634   : > { %v2301_v32 = vpop.xlane.xlu0 %2300 }
 0x635   : > { %5580 = vrcp.f32 %v2301_v32  ;;  %v2936_v32 = vrot.slane %v2929_v42, %v5901_v20 }
 0x638   : > { %v2307_v39 = vpop.xlane.xlu0 %2306 }
 0x639   : > { %5582 = vrcp.f32 %v2307_v39 }
 0x63c   : > { %v2310_v19 = vpop.xlane.xlu1 %2309  ;;  %v2322_v37 = vpop.permute.xlu0 %2321 }
 0x63d   : > { %5584 = vrcp.f32 %v2310_v19  ;;  %5411 = vmatprep.subr.msk.mxu1 %vm1734_vm6, %v2322_v37 }
 0x63e   : > { %5412 = vmatpush3.msk.msra.mxu1 %vm1734_vm6, %v2322_v37 }
 0x640   : > { %v2320_v47 = vpop.permute.xlu1 %2319  ;;  %v5579_v58 = vpop.eup %5578 }
 0x641   : > { %5413 = vmatprep.subr.mxu1 %v2320_v47  ;;  %v2316_v9 = vmul.f32 %v5579_v58, %v5571_v5  ;;  %v6234_v14 = vpop.permute.xlu0 %3029  ;;  %v2871_v5 = vrot.slane %v2857_v13, %v5901_v20 }
 0x642   : > { %5414 = vmatpush3.msra.mxu1 %v2320_v47  ;;  %v5581_v61 = vpop.eup %5580 }
 0x643   : > { %5425 = vmatprep.subr.mxu1 %v5660_v24  ;;  %v2315_v2 = vmul.f32 %v5581_v61, %v5573_v50 }
 0x644   : > { %v2410_v3 = vpop.permute.xlu1 %2409 }
 0x645   : > { %5418 = vmatprep.subr.msk.mxu0 %vm1734_vm6, %v2410_v3  ;;  %5415 = vmatprep.mubr.msk.f32.mxu1 %vm1618_vm8, %v2315_v2  ;;  %v3121_v29 = vpop.permute.xlu0 %3120 }
 0x646   : > { %5419 = vmatpush3.msk.msra.mxu0 %vm1734_vm6, %v2410_v3  ;;  %v5583_v11 = vpop.eup %5582  ;;  %5416 = vmatmul.mubr.msk.f32.vlgmr.msra.gmra.mxu1 %vm1618_vm8, %v2316_v9 }
 0x647   : > { %5426 = vmatpush3.msra.mxu1 %v456_v10  ;;  %v2317_v22 = vmul.f32 %v5583_v11, %v6182_v28  ;;  %5429 = vmatprep.mubr.msk.f32.mxu1 %vm5661_vm4, %v5660_v24  ;;  %v2864_v28 = vrot.slane %v2856_v23, %v5901_v20 }
 0x648   : > { %v2408_v16 = vpop.permute.xlu1 %2407  ;;  %5427 = vmatprep.subr.mxu1 %v5660_v24 }
 0x649   : > { %5420 = vmatprep.subr.mxu0 %v2408_v16  ;;  %5428 = vmatpush3.msra.mxu1 %v455_v15  ;;  %v2872_v17 = vcombine.low %v2864_v28, %v2871_v5  ;;  %v6264_v38 = vpop.permute.xlu0 %3025 }
 0x64a   : > { %v5585_v25 = vpop.eup %5584  ;;  %5422 = vmatprep.mubr.msk.f32.mxu0 %vm1618_vm8, %v2317_v22  ;;  %5451 = vmatprep.subr.msk.mxu1 %vm1321_vm5, %v6234_v14 }
 0x64b   : > { %5421 = vmatpush3.msra.mxu0 %v2408_v16  ;;  %v2318_v50 = vmul.f32 %v5585_v25, %v6186_v30 }
 0x64c   : > { %5438 = vmatprep.subr.mxu0 %v5660_v24  ;;  %v6249_v27 = vpop.permute.xlu1 %3027 }
 0x64d   : > { %5423 = vmatmul.mubr.msk.f32.vlgmr.msra.gmra.mxu0 %vm1618_vm8, %v2318_v50  ;;  %v3115_v46 = vpop.permute.xlu0 %3114 }
 0x64e   : > { %5439 = vmatpush3.msra.mxu0 %v454_v26  ;;  %5442 = vmatprep.mubr.msk.f32.mxu0 %vm5661_vm4, %v5660_v24 }
 0x64f   : > { %5440 = vmatprep.subr.mxu0 %v5660_v24 }
 0x650   : > { %5441 = vmatpush3.msra.mxu0 %v453_v21  ;;  %v6257_v30 = vpop.permute.xlu1 %3023 }
 0x651   : > { %5458 = vmatprep.subr.msk.mxu0 %vm1321_vm5, %v3121_v29  ;;  %5443 = vmatmul.mubr.msk.f32.vlgmr.msra.gmra.mxu0 %vm1321_vm5, %v2872_v17 }
 0x652   : > { %5459 = vmatpush3.xpose.msk.msra.mxu0 %vm1321_vm5, %v3121_v29  ;;  %5445 = vmatprep.mubr.msk.f32.mxu0 %vm5661_vm4, %v5660_v24 }
 0x654   : > { %v3119_v8 = vpop.permute.xlu1 %3118 }
 0x655   : > { %5446 = vmatmul.mubr.msk.f32.gmra.mxu0 %vm1321_vm5, %v6177_v18  ;;  %5460 = vmatprep.subr.msk.mxu0 %vm1321_vm5, %v3119_v8 }
 0x656   : > { %5461 = vmatpush3.xpose.msk.msra.mxu0 %vm1321_vm5, %v3119_v8  ;;  %5448 = vmatprep.mubr.msk.f32.mxu0 %vm5661_vm4, %v5660_v24 }
 0x658   : > { %v3117_v33 = vpop.permute.xlu1 %3116 }
 0x659   : > { %5449 = vmatmul.mubr.msk.f32.gmra.mxu0 %vm1321_vm5, %v2936_v32 }
 0x65a   : > { %5462 = vmatprep.mubr.msk.f32.mxu0 %vm1321_vm5, %v3115_v46 }
 0x65d   : > { %5463 = vmatmul.mubr.msk.f32.vlgmr.msra.gmra.mxu0 %vm1321_vm5, %v3117_v33 }
 0x706   : > { %v5417_v56 = vpop.f32.mrf.mxu1 }
 0x707   : > { %v2554_v45 = vrot.slane %v5417_v56, %v5901_v20 }
 0x708   : > { %v2398_v39 = vpop.f32.mrf.mxu1 }
 0x709   : > { %v2499_v18 = vcombine.high %v2398_v39, %v2398_v39  ;;  %v2506_v59 = vrot.slane %v2398_v39, %v5901_v20  ;;  %v2561_v16 = vrot.slane %v2554_v45, %v5901_v20 }
 0x70b   : > { %v2513_v19 = vrot.slane %v2499_v18, %v5901_v20  ;;  %v2514_v34 = vcombine.high %v2506_v59, %v2506_v59  ;;  %v2522_v7 = vrot.slane %v2506_v59, %v5901_v20 }
 0x70d   : > { %v5424_v36 = vpop.f32.mrf.mxu0  ;;  %v2515_v37 = vcombine.high %v2513_v19, %v2513_v19  ;;  %v2536_v40 = vrot.slane %v2514_v34, %v5901_v20  ;;  %v2529_v48 = vrot.slane %v2513_v19, %v5901_v20 }
 0x70e   : > { %v2617_v17 = vrot.slane %v5424_v36, %v5901_v20 }
 0x70f   : > { %v2486_v47 = vpop.f32.mrf.mxu0  ;;  %v2543_v49 = vrot.slane %v2515_v37, %v5901_v20  ;;  %v2625_v58 = vcombine.low %v2522_v7, %v2536_v40  ;;  %v5076_v61 = vcombine.high %v2522_v7, %v2536_v40 }
 0x710   : > { %v2562_v0 = vcombine.high %v2486_v47, %v2486_v47  ;;  %v2569_v1 = vrot.slane %v2486_v47, %v5901_v20  ;;  %v2624_v45 = vrot.slane %v2617_v17, %v5901_v20 }
 0x711   : > { %v6286_v2 = vpop.f32.mrf.mxu0  ;;  %v2627_v3 = vcombine.low %v2529_v48, %v2543_v49  ;;  %v5077_v60 = vcombine.high %v2529_v48, %v2543_v49  ;;  %v2635_v6 = vrot.slane %v2625_v58, %v5901_v20  ;;  %v2642_v9 = vrot.slane %v5076_v61, %v5901_v20 }
 0x712   : > { %v2576_v10 = vrot.slane %v2562_v0, %v5901_v20  ;;  %v2577_v11 = vcombine.high %v2569_v1, %v2569_v1  ;;  %v2585_v13 = vrot.slane %v2569_v1, %v5901_v20 }
 0x713   : > { %v5444_v15 = vpop.f32.mrf.mxu0  ;;  %v2649_v22 = vrot.slane %v2627_v3, %v5901_v20  ;;  %v2656_v23 = vrot.slane %v5077_v60, %v5901_v20  ;;  %v2657_v25 = vcombine.low %v2635_v6, %v2642_v9 }
 0x714   : > { %v2578_v5 = vcombine.high %v2576_v10, %v2576_v10  ;;  %v2592_v50 = vrot.slane %v2576_v10, %v5901_v20  ;;  %v2599_v26 = vrot.slane %v2577_v11, %v5901_v20  ;;  %v2607_v28 = vcombine.high %v2585_v13, %v2585_v13 }
 0x715   : > { %v6297_v29 = vpop.f32.mrf.mxu0  ;;  %v2658_v21 = vcombine.low %v2649_v22, %v2656_v23  ;;  %v2674_v42 = vcombine.low %v2561_v16, %v2585_v13  ;;  %v2665_v39 = vrot.slane %v2657_v25, %v5901_v20 }
 0x716   : > { %v2606_v8 = vrot.slane %v2578_v5, %v5901_v20  ;;  %v2608_v32 = vcombine.high %v2592_v50, %v2592_v50  ;;  %v2609_v46 = vcombine.high %v2599_v26, %v2599_v26  ;;  %v2675_v33 = vcombine.low %v2599_v26, %v2607_v28 }
 0x717   : > { %v5447_v56 = vpop.f32.mrf.mxu0  ;;  %v2672_v18 = vrot.slane %v2658_v21, %v5901_v20  ;;  %v2684_v59 = vrot.slane %v2674_v42, %v5901_v20 }
 0x718   : > { %v2610_v19 = vcombine.high %v2606_v8, %v2606_v8  ;;  %v2676_v34 = vcombine.low %v2609_v46, %v2592_v50  ;;  %v2677_v37 = vcombine.low %v2606_v8, %v2608_v32  ;;  %v2691_v7 = vrot.slane %v2675_v33, %v5901_v20 }
 0x719   : > { %v6305_v40 = vpop.f32.mrf.mxu0  ;;  %v2673_v36 = vcombine.low %v2665_v39, %v2672_v18 }
 0x71a   : > { %v2698_v47 = vrot.slane %v2676_v34, %v5901_v20  ;;  %v2705_v48 = vrot.slane %v2677_v37, %v5901_v20  ;;  %v2706_v49 = vcombine.low %v2684_v59, %v2691_v7  ;;  %v2723_v0 = vcombine.low %v2610_v19, %v2624_v45 }
 0x71b   : > { %v5450_v58 = vpop.f32.mrf.mxu0  ;;  %5430 = vmatmul.mubr.msk.f32.vlgmr.msra.gmra.mxu1 %vm1321_vm5, %v2673_v36 }
 0x71c   : > { %5452 = vmatpush3.xpose.msk.msra.mxu1 %vm1321_vm5, %v6234_v14  ;;  %5432 = vmatprep.mubr.msk.f32.mxu1 %vm5661_vm4, %v5660_v24  ;;  %v2707_v61 = vcombine.low %v2698_v47, %v2705_v48  ;;  %v2714_v1 = vrot.slane %v2706_v49, %v5901_v20  ;;  %v2730_v6 = vrot.slane %v2723_v0, %v5901_v20 }
 0x71d   : > { %5453 = vmatprep.subr.msk.mxu1 %vm1321_vm5, %v6249_v27  ;;  %v5464_v15 = vpop.f32.mrf.mxu0 }
 0x71e   : > { %v2721_v3 = vrot.slane %v2707_v61, %v5901_v20  ;;  %v2737_v14 = vrot.slane %v2730_v6, %v5901_v20  ;;  %v3208_v28 = vmul.f32 0.25, %v5464_v15 }
 0x71f   : > { %v3196_v25 = vpop.f32.mrf.mxu0 }
 0x720   : > { %5454 = vmatpush3.xpose.msk.msra.mxu1 %vm1321_vm5, %v6249_v27  ;;  %v2722_v60 = vcombine.low %v2714_v1, %v2721_v3  ;;  %v3207_v26 = vmul.f32 0.25, %v3196_v25  ;;  %v3218_v17 = vsel %vm1622_vm7, %v3208_v28, -inf  ;;  %v457_v25 = vld [vmem:[%s5738_s21 + $0x20] sm:$0xff] }
 0x722   : > { %5433 = vmatmul.mubr.msk.f32.gmra.mxu1 %vm1321_vm5, %v2722_v60  ;;  %v3215_v21 = vsel %vm1618_vm8, %v3207_v26, -inf }
 0x723   : > { %5435 = vmatprep.mubr.msk.f32.mxu1 %vm5661_vm4, %v5660_v24 }
 0x726   : > { %5436 = vmatmul.mubr.msk.f32.gmra.mxu1 %vm1321_vm5, %v2737_v14 }
 0x727   : > { %5455 = vmatprep.mubr.msk.f32.mxu1 %vm1321_vm5, %v6257_v30 }
 0x72a   : > { %5456 = vmatmul.mubr.msk.f32.vlgmr.msra.gmra.mxu1 %vm1321_vm5, %v6264_v38 }
 0x7db   : > { %v6331_v9 = vpop.f32.mrf.mxu1 }
 0x7dd   : > { %v5431_v27 = vpop.f32.mrf.mxu1 }
 0x7e2   : > { %v6333_v10 = vpop.f32.mrf.mxu1 }
 0x7e4   : > { %v5434_v11 = vpop.f32.mrf.mxu1 }
 0x7e6   : > { %v6335_v13 = vpop.f32.mrf.mxu1 }
 0x7e8   : > { %v5437_v16 = vpop.f32.mrf.mxu1 }
 0x7e9   : > { %v458_v16 = vld [vmem:[%s5738_s21 + $0x28] sm:$0xff] }
 0x7ea   : > { %v5457_v22 = vpop.f32.mrf.mxu1 }
 0x7eb   : > { %v3206_v23 = vmul.f32 0.25, %v5457_v22 }
 0x7ec   : > { %v3105_v5 = vpop.f32.mrf.mxu1 }
 0x7ed   : > { %v3205_v50 = vmul.f32 0.25, %v3105_v5  ;;  %v3212_v30 = vsel %vm1622_vm7, %v3206_v23, -inf }
 0x7ee   : > { %3213 = vmax.xlane.f32.xlu1 %v3212_v30 }
 0x7ef   : > { %v3209_v38 = vsel %vm1618_vm8, %v3205_v50, -inf }
 0x7f0   : > { %3210 = vmax.xlane.f32.xlu0 %v3209_v38 }
 0x7f4   : > { %3216 = vmax.xlane.f32.xlu0 %v3215_v21 }
 0x7f8   : > { %3219 = vmax.xlane.f32.xlu0 %v3218_v17 }
 0x877   : > { %v3214_v32 = vpop.xlane.xlu1 %3213 }
 0x878   : > { %v3222_v56 = vsub.f32 %v3206_v23, %v3214_v32 }
 0x879   : > { %v3211_v42 = vpop.xlane.xlu0 %3210 }
 0x87a   : > { %v3221_v8 = vsub.f32 %v3205_v50, %v3211_v42  ;;  %v3227_v34 = vmul.f32 1.442695, %v3222_v56 }
 0x87c   : > { %v3225_v39 = vmul.f32 1.442695, %v3221_v8 }
 0x87d   : > { %v3217_v46 = vpop.xlane.xlu0 %3216 }
 0x87e   : > { %v3223_v33 = vsub.f32 %v3207_v26, %v3217_v46 }
 0x880   : > { %v3229_v18 = vmul.f32 1.442695, %v3223_v33 }
 0x881   : > { %v3220_v59 = vpop.xlane.xlu0 %3219 }
 0x882   : > { %5586 = vpow2.f32 %v3229_v18  ;;  %v3224_v19 = vsub.f32 %v3208_v28, %v3220_v59 }
 0x883   : > { %5588 = vpow2.f32 %v3225_v39 }
 0x884   : > { %v3231_v37 = vmul.f32 1.442695, %v3224_v19 }
 0x886   : > { %5590 = vpow2.f32 %v3231_v37 }
 0x887   : > { %5592 = vpow2.f32 %v3227_v34 }
 0x88f   : > { %v5587_v7 = vpop.eup %5586 }
 0x890   : > { %v3239_v36 = vsel %vm1618_vm8, %v5587_v7, 0.0  ;;  %v5589_v45 = vpop.eup %5588 }
 0x891   : > { %3240 = vadd.xlane.f32.xlu0 %v3239_v36  ;;  %v3233_v48 = vsel %vm1618_vm8, %v5589_v45, 0.0 }
 0x893   : > { %v5591_v47 = vpop.eup %5590 }
 0x894   : > { %v3242_v49 = vsel %vm1622_vm7, %v5591_v47, 0.0  ;;  %v5593_v58 = vpop.eup %5592 }
 0x895   : > { %3234 = vadd.xlane.f32.xlu0 %v3233_v48  ;;  %3243 = vadd.xlane.f32.xlu1 %v3242_v49  ;;  %v3236_v61 = vsel %vm1622_vm7, %v5593_v58, 0.0 }
 0x899   : > { %3237 = vadd.xlane.f32.xlu1 %v3236_v61 }
 0x8aa   : > { %3253 = vrot.lane.b32.xlu1 %v6090_v43, %s5664_s15 }
 0x8ab   : > { %3255 = vrot.lane.b32.xlu0 %v6059_v53, %s5664_s15 }
 0x8ae   : > { %3343 = vrot.lane.b32.xlu1 %v6098_v57, %s5664_s15 }
 0x8af   : > { %3767 = vrot.lane.b32.xlu0 %v5979_v62, %s5665_s18 }
 0x8b2   : > { %3341 = vrot.lane.b32.xlu1 %v6110_v63, %s5664_s15 }
 0x8b3   : > { %3858 = vrot.lane.b32.xlu0 %v6012_v44, %s5665_s18 }
 0x8b6   : > { %3765 = vrot.lane.b32.xlu1 %v6030_v12, %s5665_s18 }
 0x8b7   : > { %3763 = vrot.lane.b32.xlu0 %v5973_v55, %s5665_s18 }
 0x8ba   : > { %3761 = vrot.lane.b32.xlu1 %v6062_v4, %s5665_s18 }
 0x8bb   : > { %3852 = vrot.lane.b32.xlu0 %v6075_v35, %s5665_s18 }
 0x8be   : > { %3856 = vrot.lane.b32.xlu1 %v6064_v31, %s5665_s18 }
 0x8c2   : > { %3854 = vrot.lane.b32.xlu1 %v6084_v41, %s5665_s18 }
 0x91a   : > { %v3241_v62 = vpop.xlane.xlu0 %3240 }
 0x91b   : > { %5594 = vrcp.f32 %v3241_v62 }
 0x91e   : > { %v3244_v44 = vpop.xlane.xlu1 %3243  ;;  %v3235_v0 = vpop.xlane.xlu0 %3234 }
 0x91f   : > { %5596 = vrcp.f32 %v3244_v44 }
 0x920   : > { %5598 = vrcp.f32 %v3235_v0 }
 0x922   : > { %v3238_v12 = vpop.xlane.xlu1 %3237  ;;  %v3256_v55 = vpop.permute.xlu0 %3255 }
 0x923   : > { %5600 = vrcp.f32 %v3238_v12  ;;  %5465 = vmatprep.subr.msk.mxu1 %vm1734_vm6, %v3256_v55 }
 0x924   : > { %5466 = vmatpush3.msk.msra.mxu1 %vm1734_vm6, %v3256_v55 }
 0x926   : > { %v3254_v4 = vpop.permute.xlu1 %3253  ;;  %v3768_v3 = vpop.permute.xlu0 %3767 }
 0x927   : > { %5467 = vmatprep.subr.mxu1 %v3254_v4 }
 0x928   : > { %v5595_v35 = vpop.eup %5594  ;;  %5468 = vmatpush3.msra.mxu1 %v3254_v4 }
 0x929   : > { %v3251_v31 = vmul.f32 %v5595_v35, %v5587_v7  ;;  %5479 = vmatprep.subr.mxu1 %v5660_v24 }
 0x92a   : > { %v3344_v41 = vpop.permute.xlu1 %3343  ;;  %v6379_v22 = vpop.permute.xlu0 %3858 }
 0x92b   : > { %5472 = vmatprep.subr.msk.mxu0 %vm1734_vm6, %v3344_v41  ;;  %5476 = vmatprep.mubr.msk.f32.mxu0 %vm1618_vm8, %v3251_v31 }
 0x92c   : > { %v5597_v1 = vpop.eup %5596  ;;  %5473 = vmatpush3.msk.msra.mxu0 %vm1734_vm6, %v3344_v41 }
 0x92d   : > { %v5599_v60 = vpop.eup %5598  ;;  %v3252_v27 = vmul.f32 %v5597_v1, %v5591_v47 }
 0x92e   : > { %v3342_v6 = vpop.permute.xlu1 %3341  ;;  %v3249_v14 = vmul.f32 %v5599_v60, %v5589_v45  ;;  %v3764_v50 = vpop.permute.xlu0 %3763 }
 0x92f   : > { %5474 = vmatprep.subr.mxu0 %v3342_v6 }
 0x930   : > { %v5601_v11 = vpop.eup %5600  ;;  %5469 = vmatprep.mubr.msk.f32.mxu1 %vm1618_vm8, %v3249_v14  ;;  %5475 = vmatpush3.msra.mxu0 %v3342_v6 }
 0x931   : > { %5477 = vmatmul.mubr.msk.f32.vlgmr.msra.gmra.mxu0 %vm1618_vm8, %v3252_v27  ;;  %5492 = vmatprep.subr.msk.mxu0 %vm1321_vm5, %v3768_v3  ;;  %v3250_v15 = vmul.f32 %v5601_v11, %v5593_v58 }
 0x932   : > { %v3766_v23 = vpop.permute.xlu1 %3765  ;;  %5493 = vmatpush3.xpose.msk.msra.mxu0 %vm1321_vm5, %v3768_v3 }
 0x933   : > { %5470 = vmatmul.mubr.msk.f32.vlgmr.msra.gmra.mxu1 %vm1618_vm8, %v3250_v15  ;;  %5494 = vmatprep.subr.msk.mxu0 %vm1321_vm5, %v3766_v23 }
 0x934   : > { %5480 = vmatpush3.msra.mxu1 %v458_v16  ;;  %5483 = vmatprep.mubr.msk.f32.mxu1 %vm5661_vm4, %v5660_v24 }
 0x935   : > { %5481 = vmatprep.subr.mxu1 %v5660_v24 }
 0x936   : > { %5482 = vmatpush3.msra.mxu1 %v457_v25  ;;  %v3762_v5 = vpop.permute.xlu1 %3761  ;;  %5495 = vmatpush3.xpose.msk.msra.mxu0 %vm1321_vm5, %v3766_v23 }
 0x937   : > { %5499 = vmatprep.subr.msk.mxu1 %vm1321_vm5, %v6379_v22  ;;  %5496 = vmatprep.mubr.msk.f32.mxu0 %vm1321_vm5, %v3762_v5 }
 0x939   : > { %5497 = vmatmul.mubr.msk.f32.vlgmr.msra.gmra.mxu0 %vm1321_vm5, %v3764_v50 }
 0x9f1   : > { %v5478_v30 = vpop.f32.mrf.mxu0 }
 0x9f2   : > { %v3551_v16 = vrot.slane %v5478_v30, %v5901_v20 }
 0x9f3   : > { %v5471_v26 = vpop.f32.mrf.mxu1  ;;  %v3420_v38 = vpop.f32.mrf.mxu0 }
 0x9f4   : > { %v3496_v28 = vcombine.high %v3420_v38, %v3420_v38  ;;  %v3503_v21 = vrot.slane %v3420_v38, %v5901_v20  ;;  %v3488_v42 = vrot.slane %v5471_v26, %v5901_v20  ;;  %v3558_v30 = vrot.slane %v3551_v16, %v5901_v20 }
 0x9f5   : > { %v3332_v17 = vpop.f32.mrf.mxu1 }
 0x9f6   : > { %v3510_v8 = vrot.slane %v3496_v28, %v5901_v20  ;;  %v3511_v32 = vcombine.high %v3503_v21, %v3503_v21  ;;  %v3519_v46 = vrot.slane %v3503_v21, %v5901_v20  ;;  %v3433_v33 = vcombine.high %v3332_v17, %v3332_v17 }
 0x9f7   : > { %v3440_v56 = vrot.slane %v3332_v17, %v5901_v20  ;;  %v3495_v36 = vrot.slane %v3488_v42, %v5901_v20 }
 0x9f8   : > { %v3512_v39 = vcombine.high %v3510_v8, %v3510_v8  ;;  %v3526_v18 = vrot.slane %v3510_v8, %v5901_v20  ;;  %v3533_v59 = vrot.slane %v3511_v32, %v5901_v20  ;;  %v3541_v19 = vcombine.high %v3519_v46, %v3519_v46 }
 0x9f9   : > { %v3447_v34 = vrot.slane %v3433_v33, %v5901_v20  ;;  %v3448_v37 = vcombine.high %v3440_v56, %v3440_v56  ;;  %v5498_v7 = vpop.f32.mrf.mxu0  ;;  %v3456_v58 = vrot.slane %v3440_v56, %v5901_v20  ;;  %v3608_v1 = vcombine.low %v3495_v36, %v3519_v46 }
 0x9fa   : > { %v3540_v45 = vrot.slane %v3512_v39, %v5901_v20  ;;  %v3542_v47 = vcombine.high %v3526_v18, %v3526_v18  ;;  %v3543_v48 = vcombine.high %v3533_v59, %v3533_v59  ;;  %v3609_v44 = vcombine.low %v3533_v59, %v3541_v19  ;;  %v3857_v59 = vpop.permute.xlu1 %3856 }
 0x9fb   : > { %v3449_v49 = vcombine.high %v3447_v34, %v3447_v34  ;;  %v3470_v61 = vrot.slane %v3448_v37, %v5901_v20  ;;  %v3843_v62 = vpop.f32.mrf.mxu0  ;;  %v3463_v55 = vrot.slane %v3447_v34, %v5901_v20  ;;  %v3944_v41 = vmul.f32 0.25, %v5498_v7 }
 0x9fc   : > { %v3610_v0 = vcombine.low %v3543_v48, %v3526_v18  ;;  %v3611_v12 = vcombine.low %v3540_v45, %v3542_v47  ;;  %v3943_v6 = vmul.f32 0.25, %v3843_v62  ;;  %v3625_v23 = vrot.slane %v3609_v44, %v5901_v20 }
 0x9fd   : > { %v3477_v4 = vrot.slane %v3449_v49, %v5901_v20  ;;  %v3559_v35 = vcombine.low %v3456_v58, %v3470_v61  ;;  %v5100_v31 = vcombine.high %v3456_v58, %v3470_v61  ;;  %v3950_v25 = vsel %vm1622_vm7, %v3944_v41, -inf }
 0x9fe   : > { %v3632_v3 = vrot.slane %v3610_v0, %v5901_v20  ;;  %v3639_v60 = vrot.slane %v3611_v12, %v5901_v20  ;;  %v3947_v5 = vsel %vm1618_vm8, %v3943_v6, -inf  ;;  %3951 = vmax.xlane.f32.xlu1 %v3950_v25  ;;  %v3544_v28 = vcombine.high %v3540_v45, %v3540_v45  ;;  %v3855_v7 = vpop.permute.xlu1 %3854 }
 0x9ff   : > { %v3561_v14 = vcombine.low %v3463_v55, %v3477_v4  ;;  %v5101_v27 = vcombine.high %v3463_v55, %v3477_v4  ;;  %v3569_v11 = vrot.slane %v3559_v35, %v5901_v20  ;;  %v3576_v15 = vrot.slane %v5100_v31, %v5901_v20  ;;  %3948 = vmax.xlane.f32.xlu0 %v3947_v5 }
 0xa00   : > { %v3618_v21 = vrot.slane %v3608_v1, %v5901_v20  ;;  %v3641_v42 = vcombine.low %v3632_v3, %v3639_v60  ;;  %v3657_v39 = vcombine.low %v3544_v28, %v3558_v30  ;;  %v3010_v61 = vadd.f32 %v6286_v2, %v6331_v9 }
 0xa01   : > { %v3583_v50 = vrot.slane %v3561_v14, %v5901_v20  ;;  %v3590_v26 = vrot.slane %v5101_v27, %v5901_v20  ;;  %v3591_v38 = vcombine.low %v3569_v11, %v3576_v15  ;;  %v3015_v55 = vadd.f32 %v6297_v29, %v6333_v10 }
 0xa02   : > { %v3640_v8 = vcombine.low %v3618_v21, %v3625_v23  ;;  %v3655_v56 = vrot.slane %v3641_v42, %v5901_v20  ;;  %v3664_v34 = vrot.slane %v3657_v39, %v5901_v20  ;;  %v3020_v1 = vadd.f32 %v6305_v40, %v6335_v13 }
 0xa03   : > { %v3592_v17 = vcombine.low %v3583_v50, %v3590_v26  ;;  %v3599_v32 = vrot.slane %v3591_v38, %v5901_v20 }
 0xa04   : > { %v3648_v18 = vrot.slane %v3640_v8, %v5901_v20  ;;  %v3671_v37 = vrot.slane %v3664_v34, %v5901_v20  ;;  %v459_v34 = vld [vmem:[%s5738_s21 + $0x30] sm:$0xff] }
 0xa05   : > { %v3606_v46 = vrot.slane %v3592_v17, %v5901_v20 }
 0xa06   : > { %v3656_v19 = vcombine.low %v3648_v18, %v3655_v56 }
 0xa07   : > { %v3607_v33 = vcombine.low %v3599_v32, %v3606_v46 }
 0xa09   : > { %5484 = vmatmul.mubr.msk.f32.vlgmr.msra.gmra.mxu1 %vm1321_vm5, %v3607_v33 }
 0xa0a   : > { %5500 = vmatpush3.xpose.msk.msra.mxu1 %vm1321_vm5, %v6379_v22  ;;  %5486 = vmatprep.mubr.msk.f32.mxu1 %vm5661_vm4, %v5660_v24  ;;  %v3853_v22 = vpop.permute.xlu0 %3852 }
 0xa0b   : > { %5501 = vmatprep.subr.msk.mxu1 %vm1321_vm5, %v3857_v59 }
 0xa0d   : > { %5487 = vmatmul.mubr.msk.f32.gmra.mxu1 %vm1321_vm5, %v3656_v19  ;;  %v460_v19 = vld [vmem:[%s5738_s21 + $0x38] sm:$0xff] }
 0xa0e   : > { %5502 = vmatpush3.xpose.msk.msra.mxu1 %vm1321_vm5, %v3857_v59  ;;  %5489 = vmatprep.mubr.msk.f32.mxu1 %vm5661_vm4, %v5660_v24 }
 0xa0f   : > { %5520 = vmatprep.subr.mxu1 %v5660_v24 }
 0xa11   : > { %5490 = vmatmul.mubr.msk.f32.gmra.mxu1 %vm1321_vm5, %v3671_v37 }
 0xa12   : > { %5503 = vmatprep.mubr.msk.f32.mxu1 %vm1321_vm5, %v3853_v22 }
 0xa15   : > { %5504 = vmatmul.mubr.msk.f32.vlgmr.msra.gmra.mxu1 %vm1321_vm5, %v3855_v7 }
 0xa16   : > { %5524 = vmatprep.mubr.msk.f32.mxu1 %vm5661_vm4, %v5660_v24  ;;  %5521 = vmatpush3.msra.mxu1 %v460_v19 }
 0xa17   : > { %5522 = vmatprep.subr.mxu1 %v5660_v24 }
 0xa18   : > { %5523 = vmatpush3.msra.mxu1 %v459_v34 }
 0xa87   : > { %v3952_v36 = vpop.xlane.xlu1 %3951 }
 0xa88   : > { %v3960_v45 = vsub.f32 %v3944_v41, %v3952_v36  ;;  %v3949_v58 = vpop.xlane.xlu0 %3948 }
 0xa89   : > { %v3959_v44 = vsub.f32 %v3943_v6, %v3949_v58 }
 0xa8a   : > { %v3965_v47 = vmul.f32 1.442695, %v3960_v45 }
 0xa8b   : > { %v3963_v35 = vmul.f32 1.442695, %v3959_v44 }
 0xa8c   : > { %5602 = vpow2.f32 %v3965_v47 }
 0xa8d   : > { %5604 = vpow2.f32 %v3963_v35 }
 0xa99   : > { %v6441_v48 = vpop.eup %5602 }
 0xa9a   : > { %v3974_v49 = vsel %vm1622_vm7, %v6441_v48, 0.0  ;;  %v5605_v10 = vpop.eup %5604 }
 0xa9b   : > { %3975 = vadd.xlane.f32.xlu1 %v3974_v49  ;;  %v3971_v15 = vsel %vm1618_vm8, %v5605_v10, 0.0 }
 0xac9   : > { %v3744_v62 = vpop.f32.mrf.mxu1 }
 0xaca   : > { %v6447_v0 = vadd.f32 %v3744_v62, %v3010_v61 }
 0xacb   : > { %v5485_v12 = vpop.f32.mrf.mxu1 }
 0xacd   : > { %v3749_v4 = vpop.f32.mrf.mxu1 }
 0xace   : > { %v6451_v31 = vadd.f32 %v3749_v4, %v3015_v55 }
 0xacf   : > { %v5488_v41 = vpop.f32.mrf.mxu1 }
 0xad1   : > { %v3754_v3 = vpop.f32.mrf.mxu1 }
 0xad2   : > { %v6455_v60 = vadd.f32 %v3754_v3, %v3020_v1 }
 0xad3   : > { %v5491_v2 = vpop.f32.mrf.mxu1 }
 0xad5   : > { %v5505_v9 = vpop.f32.mrf.mxu1 }
 0xad6   : > { %v3946_v27 = vmul.f32 0.25, %v5505_v9 }
 0xad7   : > { %v3934_v6 = vpop.f32.mrf.mxu1 }
 0xad8   : > { %v3945_v14 = vmul.f32 0.25, %v3934_v6  ;;  %v3956_v29 = vsel %vm1622_vm7, %v3946_v27, -inf }
 0xada   : > { %v3953_v11 = vsel %vm1618_vm8, %v3945_v14, -inf }
 0xadb   : > { %3954 = vmax.xlane.f32.xlu0 %v3953_v11 }
 0xadf   : > { %3957 = vmax.xlane.f32.xlu0 %v3956_v29 }
 0xae3   : > { %3972 = vadd.xlane.f32.xlu0 %v3971_v15 }
 0xb24   : > { %v3976_v30 = vpop.xlane.xlu1 %3975 }
 0xb64   : > { %v3955_v40 = vpop.xlane.xlu0 %3954 }
 0xb65   : > { %v3961_v13 = vsub.f32 %v3945_v14, %v3955_v40 }
 0xb67   : > { %v3967_v16 = vmul.f32 1.442695, %v3961_v13 }
 0xb68   : > { %v3958_v23 = vpop.xlane.xlu0 %3957 }
 0xb69   : > { %5606 = vpow2.f32 %v3967_v16  ;;  %v3962_v25 = vsub.f32 %v3946_v27, %v3958_v23 }
 0xb6b   : > { %v3969_v5 = vmul.f32 1.442695, %v3962_v25 }
 0xb6c   : > { %v3973_v50 = vpop.xlane.xlu0 %3972 }
 0xb6d   : > { %5608 = vpow2.f32 %v3969_v5 }
 0xb6e   : > { %5610 = vrcp.f32 %v3973_v50 }
 0xb6f   : > { %5612 = vrcp.f32 %v3976_v30 }
 0xb76   : > { %v5607_v26 = vpop.eup %5606 }
 0xb77   : > { %v3977_v38 = vsel %vm1618_vm8, %v5607_v26, 0.0 }
 0xb78   : > { %3978 = vadd.xlane.f32.xlu0 %v3977_v38 }
 0xb7a   : > { %v5609_v28 = vpop.eup %5608 }
 0xb7b   : > { %v5611_v21 = vpop.eup %5610  ;;  %v3980_v17 = vsel %vm1622_vm7, %v5609_v28, 0.0 }
 0xb7c   : > { %3981 = vadd.xlane.f32.xlu1 %v3980_v17  ;;  %v3987_v42 = vmul.f32 %v5611_v21, %v5605_v10  ;;  %v5613_v33 = vpop.eup %5612 }
 0xb7e   : > { %5510 = vmatprep.mubr.msk.f32.mxu0 %vm1618_vm8, %v3987_v42 }
 0xb8d   : > { %3991 = vrot.lane.b32.xlu1 %v6090_v43, %s5665_s18 }
 0xb8e   : > { %3993 = vrot.lane.b32.xlu0 %v6059_v53, %s5665_s18  ;;  %v3988_v53 = vmul.f32 %v5613_v33, %v6441_v48 }
 0xb91   : > { %4081 = vrot.lane.b32.xlu1 %v6098_v57, %s5665_s18 }
 0xb95   : > { %4079 = vrot.lane.b32.xlu1 %v6110_v63, %s5665_s18 }
 0xc01   : > { %v3979_v8 = vpop.xlane.xlu0 %3978 }
 0xc02   : > { %5614 = vrcp.f32 %v3979_v8 }
 0xc05   : > { %v3982_v32 = vpop.xlane.xlu1 %3981  ;;  %v3994_v46 = vpop.permute.xlu0 %3993 }
 0xc06   : > { %5616 = vrcp.f32 %v3982_v32  ;;  %5506 = vmatprep.subr.msk.mxu0 %vm1734_vm6, %v3994_v46 }
 0xc07   : > { %5507 = vmatpush3.msk.msra.mxu0 %vm1734_vm6, %v3994_v46 }
 0xc09   : > { %v3992_v43 = vpop.permute.xlu1 %3991 }
 0xc0a   : > { %5508 = vmatprep.subr.mxu0 %v3992_v43 }
 0xc0b   : > { %5509 = vmatpush3.msra.mxu0 %v3992_v43 }
 0xc0c   : > { %5511 = vmatmul.mubr.msk.f32.vlgmr.msra.gmra.mxu0 %vm1618_vm8, %v3988_v53 }
 0xc0d   : > { %v4082_v57 = vpop.permute.xlu1 %4081 }
 0xc0e   : > { %5513 = vmatprep.subr.msk.mxu0 %vm1734_vm6, %v4082_v57 }
 0xc0f   : > { %v5615_v63 = vpop.eup %5614  ;;  %5514 = vmatpush3.msk.msra.mxu0 %vm1734_vm6, %v4082_v57 }
 0xc10   : > { %v3989_v56 = vmul.f32 %v5615_v63, %v5607_v26 }
 0xc11   : > { %v4080_v39 = vpop.permute.xlu1 %4079 }
 0xc12   : > { %5515 = vmatprep.subr.mxu0 %v4080_v39  ;;  %5517 = vmatprep.mubr.msk.f32.mxu0 %vm1618_vm8, %v3989_v56 }
 0xc13   : > { %v5617_v18 = vpop.eup %5616  ;;  %5516 = vmatpush3.msra.mxu0 %v4080_v39 }
 0xc14   : > { %v3990_v59 = vmul.f32 %v5617_v18, %v5609_v28 }
 0xc16   : > { %5518 = vmatmul.mubr.msk.f32.vlgmr.msra.gmra.mxu0 %vm1618_vm8, %v3990_v59 }
 0xc17   : > { %4643 = vmatprep.mubr.f32.mxu0 %v5660_v24 }
 0xccc   : > { %v5512_v37 = vpop.f32.mrf.mxu0 }
 0xccd   : > { %v4226_v3 = vrot.slane %v5512_v37, %v5901_v20 }
 0xcce   : > { %v4070_v22 = vpop.f32.mrf.mxu0 }
 0xccf   : > { %v4171_v7 = vcombine.high %v4070_v22, %v4070_v22  ;;  %v4178_v36 = vrot.slane %v4070_v22, %v5901_v20  ;;  %v4233_v15 = vrot.slane %v4226_v3, %v5901_v20 }
 0xcd1   : > { %v4185_v45 = vrot.slane %v4171_v7, %v5901_v20  ;;  %v4186_v47 = vcombine.high %v4178_v36, %v4178_v36  ;;  %v4194_v49 = vrot.slane %v4178_v36, %v5901_v20  ;;  %v4504_v36 = vsub.s32 5, %v5837_v51 }
 0xcd3   : > { %v4187_v48 = vcombine.high %v4185_v45, %v4185_v45  ;;  %v4208_v58 = vrot.slane %v4186_v47, %v5901_v20  ;;  %v4201_v61 = vrot.slane %v4185_v45, %v5901_v20 }
 0xcd5   : > { %v4215_v62 = vrot.slane %v4187_v48, %v5901_v20  ;;  %v4297_v44 = vcombine.low %v4194_v49, %v4208_v58  ;;  %v5119_v12 = vcombine.high %v4194_v49, %v4208_v58  ;;  %v6523_v48 = vld [vmem:[%s5753_s17] sm:$0xff] }
 0xcd6   : > { %v5519_v55 = vpop.f32.mrf.mxu0  ;;  %v4505_v49 = vrot.slane %v6523_v48, %v4504_v36  ;;  %v4550_v36 = vsub.s32 6, %v5837_v51 }
 0xcd7   : > { %v4299_v4 = vcombine.low %v4201_v61, %v4215_v62  ;;  %v5120_v35 = vcombine.high %v4201_v61, %v4215_v62  ;;  %v4307_v41 = vrot.slane %v4297_v44, %v5901_v20  ;;  %v4314_v1 = vrot.slane %v5119_v12, %v5901_v20  ;;  %v5649_v61 = vld [vmem:[%s6747_s8] sm:$0xff] }
 0xcd8   : > { %v4158_v2 = vpop.f32.mrf.mxu0  ;;  %v4289_v42 = vrot.slane %v5519_v55, %v5901_v20 }
 0xcd9   : > { %v4321_v9 = vrot.slane %v4299_v4, %v5901_v20  ;;  %v4328_v6 = vrot.slane %v5120_v35, %v5901_v20  ;;  %v4329_v14 = vcombine.low %v4307_v41, %v4314_v1  ;;  %v4234_v27 = vcombine.high %v4158_v2, %v4158_v2  ;;  %v5650_v4 = vld [vmem:[%s6747_s8 + $0x8] sm:$0xff] }
 0xcda   : > { %v4241_v11 = vrot.slane %v4158_v2, %v5901_v20  ;;  %v4296_v63 = vrot.slane %v4289_v42, %v5901_v20  ;;  %v474_v42 = vld [vmem:[%s5743_s24 + $0x68] sm:$0xff] }
 0xcdb   : > { %v4330_v29 = vcombine.low %v4321_v9, %v4328_v6  ;;  %v4248_v10 = vrot.slane %v4234_v27, %v5901_v20  ;;  %v4337_v16 = vrot.slane %v4329_v14, %v5901_v20  ;;  %v5651_v9 = vld [vmem:[%s6747_s8 + $0x10] sm:$0x3] }
 0xcdc   : > { %v4249_v40 = vcombine.high %v4241_v11, %v4241_v11  ;;  %v4257_v13 = vrot.slane %v4241_v11, %v5901_v20 }
 0xcdd   : > { %v4344_v23 = vrot.slane %v4330_v29, %v5901_v20  ;;  %v4250_v25 = vcombine.high %v4248_v10, %v4248_v10  ;;  %v4264_v5 = vrot.slane %v4248_v10, %v5901_v20 }
 0xcde   : > { %v4271_v50 = vrot.slane %v4249_v40, %v5901_v20  ;;  %v4279_v26 = vcombine.high %v4257_v13, %v4257_v13  ;;  %v4346_v38 = vcombine.low %v4233_v15, %v4257_v13 }
 0xcdf   : > { %v4278_v28 = vrot.slane %v4250_v25, %v5901_v20  ;;  %v4280_v21 = vcombine.high %v4264_v5, %v4264_v5  ;;  %v4345_v17 = vcombine.low %v4337_v16, %v4344_v23 }
 0xce0   : > { %v4281_v30 = vcombine.high %v4271_v50, %v4271_v50  ;;  %v4347_v8 = vcombine.low %v4271_v50, %v4279_v26  ;;  %v4356_v43 = vrot.slane %v4346_v38, %v5901_v20 }
 0xce1   : > { %v4349_v32 = vcombine.low %v4278_v28, %v4280_v21  ;;  %5525 = vmatmul.mubr.msk.f32.vlgmr.msra.gmra.mxu1 %vm1321_vm5, %v4345_v17  ;;  %v4282_v46 = vcombine.high %v4278_v28, %v4278_v28  ;;  %v476_v21 = vld [vmem:[%s5743_s24 + $0x78] sm:$0xff]  ;;  %v475_v17 = vld [vmem:[%s5743_s24 + $0x70] sm:$0xff] }
 0xce2   : > { %v4348_v33 = vcombine.low %v4281_v30, %v4264_v5  ;;  %v4363_v53 = vrot.slane %v4347_v8, %v5901_v20  ;;  %5527 = vmatprep.mubr.msk.f32.mxu1 %vm5661_vm4, %v5660_v24  ;;  %4595 = vmatprep.subr.mxu0 %v476_v21  ;;  %v473_v30 = vld [vmem:[%s5743_s24 + $0x60] sm:$0xff]  ;;  %v472_v8 = vld [vmem:[%s5743_s24 + $0x58] sm:$0xff] }
 0xce3   : > { %v4377_v57 = vrot.slane %v4349_v32, %v5901_v20  ;;  %v4395_v59 = vcombine.low %v4282_v46, %v4296_v63  ;;  %4596 = vmatpush1.msra.mxu0 %v475_v17  ;;  %v471_v32 = vld [vmem:[%s5743_s24 + $0x50] sm:$0xff]  ;;  %v470_v46 = vld [vmem:[%s5743_s24 + $0x48] sm:$0xff]  ;;  %v465_v63 = vld [vmem:[%s5743_s24 + $0x20] sm:$0xff] }
 0xce4   : > { %v4370_v56 = vrot.slane %v4348_v33, %v5901_v20  ;;  %v4378_v39 = vcombine.low %v4356_v43, %v4363_v53  ;;  %4597 = vmatprep.subr.mxu0 %v474_v42  ;;  %v469_v33 = vld [vmem:[%s5743_s24 + $0x40] sm:$0xff]  ;;  %v468_v43 = vld [vmem:[%s5743_s24 + $0x38] sm:$0xff]  ;;  %v467_v53 = vld [vmem:[%s5743_s24 + $0x30] sm:$0xff] }
 0xce5   : > { %v4402_v22 = vrot.slane %v4395_v59, %v5901_v20  ;;  %4598 = vmatpush1.msra.mxu0 %v473_v30  ;;  %v461_v59 = vld [vmem:[%s5743_s24] sm:$0xff]  ;;  %v484_v21 = vld [vmem:[%s5748_s11 + $0x38] sm:$0xff]  ;;  %v499_v17 = vld [vmem:[%s5748_s11 + $0xb0] sm:$0xff] }
 0xce6   : > { %v4379_v18 = vcombine.low %v4370_v56, %v4377_v57  ;;  %v4386_v19 = vrot.slane %v4378_v39, %v5901_v20  ;;  %4599 = vmatprep.subr.mxu0 %v472_v8  ;;  %v466_v57 = vld [vmem:[%s5743_s24 + $0x28] sm:$0xff]  ;;  %v464_v56 = vld [vmem:[%s5743_s24 + $0x18] sm:$0xff]  ;;  %v463_v39 = vld [vmem:[%s5743_s24 + $0x10] sm:$0xff] }
 0xce7   : > { %v4409_v7 = vrot.slane %v4402_v22, %v5901_v20  ;;  %4600 = vmatpush1.msra.mxu0 %v471_v32  ;;  %v483_v42 = vld [vmem:[%s5748_s11 + $0x30] sm:$0xff]  ;;  %v498_v30 = vld [vmem:[%s5748_s11 + $0xa8] sm:$0xff]  ;;  %v497_v32 = vld [vmem:[%s5748_s11 + $0xa0] sm:$0xff] }
 0xce8   : > { %v4393_v34 = vrot.slane %v4379_v18, %v5901_v20  ;;  %4601 = vmatprep.subr.mxu0 %v470_v46  ;;  %v462_v18 = vld [vmem:[%s5743_s24 + $0x8] sm:$0xff]  ;;  %v481_v46 = vld [vmem:[%s5748_s11 + $0x20] sm:$0xff] }
 0xce9   : > { %4602 = vmatpush1.msra.mxu0 %v469_v33  ;;  %v482_v8 = vld [vmem:[%s5748_s11 + $0x28] sm:$0xff]  ;;  %v496_v33 = vld [vmem:[%s5748_s11 + $0x98] sm:$0xff] }
 0xcea   : > { %v4394_v37 = vcombine.low %v4386_v19, %v4393_v34  ;;  %4603 = vmatprep.subr.mxu0 %v468_v43  ;;  %v480_v43 = vld [vmem:[%s5748_s11 + $0x18] sm:$0xff] }
 0xceb   : > { %4604 = vmatpush1.msra.mxu0 %v467_v53  ;;  %v495_v53 = vld [vmem:[%s5748_s11 + $0x90] sm:$0xff] }
 0xcec   : > { %5528 = vmatmul.mubr.msk.f32.gmra.mxu1 %vm1321_vm5, %v4394_v37  ;;  %4605 = vmatprep.subr.mxu0 %v466_v57  ;;  %v479_v57 = vld [vmem:[%s5748_s11 + $0x10] sm:$0xff] }
 0xced   : > { %5530 = vmatprep.mubr.msk.f32.mxu1 %vm5661_vm4, %v5660_v24  ;;  %4606 = vmatpush1.msra.mxu0 %v465_v63  ;;  %v494_v63 = vld [vmem:[%s5748_s11 + $0x88] sm:$0xff] }
 0xcee   : > { %4607 = vmatprep.subr.mxu0 %v464_v56  ;;  %v478_v56 = vld [vmem:[%s5748_s11 + $0x8] sm:$0xff] }
 0xcef   : > { %4608 = vmatpush1.msra.mxu0 %v463_v39  ;;  %v493_v39 = vld [vmem:[%s5748_s11 + $0x80] sm:$0xff] }
 0xcf0   : > { %5531 = vmatmul.mubr.msk.f32.gmra.mxu1 %vm1321_vm5, %v4409_v7  ;;  %4609 = vmatprep.subr.mxu0 %v462_v18  ;;  %v477_v18 = vld [vmem:[%s5748_s11] sm:$0xff] }
 0xcf1   : > { %4610 = vmatpush1.msra.mxu0 %v461_v59  ;;  %v6628_v59 = vld [vmem:[%s5753_s17 + $0x10] sm:$0x3] }
 0xda1   : > { %v4482_v45 = vpop.f32.mrf.mxu1 }
 0xda2   : > { %v4496_v47 = vadd.f32 %v4482_v45, %v6447_v0 }
 0xda3   : > { %v5526_v58 = vpop.f32.mrf.mxu1 }
 0xda4   : > { %v4499_v62 = vadd.f32 %v5649_v61, %v4496_v47  ;;  %v4551_v61 = vrot.slane %v6523_v48, %v4550_v36 }
 0xda6   : > { %v6529_v44 = vadd.f32 %v4505_v49, %v4499_v62 }
 0xda8   : > { %v4509_v20 = vsel %vm509_vm2, %v6529_v44, 0.0 }
 0xda9   : > { %4510 = vadd.xlane.f32.xlu0 %v4509_v20 }
 0xdac   : > { %v4487_v12 = vpop.f32.mrf.mxu1 }
 0xdad   : > { %v4497_v55 = vadd.f32 %v4487_v12, %v6451_v31 }
 0xdae   : > { %v5529_v0 = vpop.f32.mrf.mxu1 }
 0xdaf   : > { %v4500_v35 = vadd.f32 %v5650_v4, %v4497_v55 }
 0xdb0   : > { %v4492_v41 = vpop.f32.mrf.mxu1 }
 0xdb1   : > { %v6537_v1 = vadd.f32 %v4505_v49, %v4500_v35  ;;  %v4498_v3 = vadd.f32 %v4492_v41, %v6455_v60 }
 0xdb2   : > { %v5532_v2 = vpop.f32.mrf.mxu1 }
 0xdb3   : > { %v4501_v6 = vadd.f32 %v5651_v9, %v4498_v3  ;;  %v4512_v31 = vsel %vm509_vm2, %v6537_v1, 0.0 }
 0xdb4   : > { %4513 = vadd.xlane.f32.xlu1 %v4512_v31 }
 0xdb5   : > { %v6545_v14 = vadd.f32 %v4505_v49, %v4501_v6  ;;  %v4557_v49 = vsub.s32 7, %v5837_v51 }
 0xdb7   : > { %v4515_v27 = vsel %vm516_vm3, %v6545_v14, 0.0  ;;  %v4558_v55 = vrot.slane %v6523_v48, %v4557_v49 }
 0xdb8   : > { %4516 = vadd.xlane.f32.xlu0 %v4515_v27  ;;  %v508_v27 = vld [vmem:[%s5748_s11 + $0xf8] sm:$0xff] }
 0xdb9   : > { %5253 = vmatprep.subr.mxu1 %v508_v27 }
 0xe32   : > { %v4511_v11 = vpop.xlane.xlu0 %4510 }
 0xe33   : > { %v4518_v29 = vmul.f32 0.015625, %v4511_v11  ;;  %v492_v11 = vld [vmem:[%s5748_s11 + $0x78] sm:$0xff] }
 0xe34   : > { %5254 = vmatpush3.msra.mxu1 %v492_v11 }
 0xe35   : > { %v6550_v60 = vsub.f32 %v6529_v44, %v4518_v29  ;;  %v507_v29 = vld [vmem:[%s5748_s11 + $0xf0] sm:$0xff] }
 0xe36   : > { %5255 = vmatprep.subr.mxu1 %v507_v29 }
 0xe37   : > { %v4524_v10 = vmul.f32 %v6550_v60, %v6550_v60 }
 0xe39   : > { %v4527_v15 = vsel %vm509_vm2, %v4524_v10, 0.0  ;;  %v506_v10 = vld [vmem:[%s5748_s11 + $0xe8] sm:$0xff] }
 0xe3a   : > { %4528 = vadd.xlane.f32.xlu0 %v4527_v15  ;;  %v505_v15 = vld [vmem:[%s5748_s11 + $0xe0] sm:$0xff] }
 0xe3d   : > { %v4514_v40 = vpop.xlane.xlu1 %4513 }
 0xe3e   : > { %v4519_v13 = vmul.f32 0.015625, %v4514_v40  ;;  %v489_v40 = vld [vmem:[%s5748_s11 + $0x60] sm:$0xff] }
 0xe40   : > { %v6556_v16 = vsub.f32 %v6537_v1, %v4519_v13  ;;  %v504_v13 = vld [vmem:[%s5748_s11 + $0xd8] sm:$0xff] }
 0xe41   : > { %v4517_v23 = vpop.xlane.xlu0 %4516 }
 0xe42   : > { %v4520_v25 = vmul.f32 0.015625, %v4517_v23  ;;  %v4525_v5 = vmul.f32 %v6556_v16, %v6556_v16  ;;  %v503_v23 = vld [vmem:[%s5748_s11 + $0xd0] sm:$0xff] }
 0xe44   : > { %v6561_v50 = vsub.f32 %v6545_v14, %v4520_v25  ;;  %v4530_v26 = vsel %vm509_vm2, %v4525_v5, 0.0  ;;  %v487_v25 = vld [vmem:[%s5748_s11 + $0x50] sm:$0xff]  ;;  %v502_v5 = vld [vmem:[%s5748_s11 + $0xc8] sm:$0xff] }
 0xe45   : > { %4531 = vadd.xlane.f32.xlu0 %v4530_v26  ;;  %v501_v26 = vld [vmem:[%s5748_s11 + $0xc0] sm:$0xff] }
 0xe46   : > { %v4526_v38 = vmul.f32 %v6561_v50, %v6561_v50 }
 0xe48   : > { %v4533_v28 = vsel %vm516_vm3, %v4526_v38, 0.0  ;;  %v485_v38 = vld [vmem:[%s5748_s11 + $0x40] sm:$0xff] }
 0xe49   : > { %4534 = vadd.xlane.f32.xlu1 %v4533_v28  ;;  %v500_v28 = vld [vmem:[%s5748_s11 + $0xb8] sm:$0xff] }
 0xec3   : > { %v4529_v19 = vpop.xlane.xlu0 %4528 }
 0xec4   : > { %v4536_v34 = vmul.f32 0.015625, %v4529_v19  ;;  %v428_v19 = vld [vmem:[%s5753_s17 + $0x18] sm:$0x3] }
 0xec6   : > { %v4539_v37 = vadd.f32 1e-05, %v4536_v34  ;;  %v4565_v34 = vrot.slane %v6628_v59, %v5840_v52 }
 0xec8   : > { %5618 = vrsqrt.f32 %v4539_v37  ;;  %v4569_v37 = vrot.slane %v428_v19, %v5840_v52 }
 0xece   : > { %v4532_v22 = vpop.xlane.xlu0 %4531 }
 0xecf   : > { %v4537_v7 = vmul.f32 0.015625, %v4532_v22 }
 0xed1   : > { %v4540_v45 = vadd.f32 1e-05, %v4537_v7 }
 0xed2   : > { %v4535_v47 = vpop.xlane.xlu1 %4534 }
 0xed3   : > { %5620 = vrsqrt.f32 %v4540_v45  ;;  %v4538_v58 = vmul.f32 0.015625, %v4535_v47 }
 0xed5   : > { %v5619_v62 = vpop.eup %5618  ;;  %v4541_v20 = vadd.f32 1e-05, %v4538_v58 }
 0xed6   : > { %v4545_v12 = vmul.f32 %v5619_v62, %v6550_v60  ;;  %v491_v60 = vld [vmem:[%s5748_s11 + $0x70] sm:$0xff] }
 0xed7   : > { %5622 = vrsqrt.f32 %v4541_v20  ;;  %5256 = vmatpush3.msra.mxu1 %v491_v60 }
 0xed8   : > { %v4552_v0 = vmul.f32 %v4551_v61, %v4545_v12  ;;  %5257 = vmatprep.subr.mxu1 %v506_v10 }
 0xeda   : > { %v4559_v4 = vadd.f32 %v4558_v55, %v4552_v0 }
 0xedc   : > { %5124 = vmatmul.mubr.msk.f32.vlgmr.msra.gmra.mxu0 %vm509_vm2, %v4559_v4 }
 0xedd   : > { %4649 = vmatprep.mubr.f32.mxu0 %v5660_v24 }
 0xee0   : > { %v5621_v35 = vpop.eup %5620 }
 0xee1   : > { %v4546_v41 = vmul.f32 %v5621_v35, %v6556_v16  ;;  %v488_v16 = vld [vmem:[%s5748_s11 + $0x58] sm:$0xff] }
 0xee3   : > { %v4553_v3 = vmul.f32 %v4551_v61, %v4546_v41 }
 0xee4   : > { %v5623_v2 = vpop.eup %5622 }
 0xee5   : > { %v4560_v9 = vadd.f32 %v4558_v55, %v4553_v3  ;;  %v4547_v48 = vmul.f32 %v5623_v2, %v6561_v50  ;;  %v486_v50 = vld [vmem:[%s5748_s11 + $0x48] sm:$0xff] }
 0xee7   : > { %5125 = vmatmul.mubr.msk.f32.gmra.mxu0 %vm509_vm2, %v4560_v9  ;;  %v4554_v6 = vmul.f32 %v4551_v61, %v4547_v48 }
 0xee8   : > { %4655 = vmatprep.mubr.f32.mxu0 %v5660_v24  ;;  %v490_v24 = vld [vmem:[%s5748_s11 + $0x68] sm:$0xff] }
 0xee9   : > { %v4561_v31 = vadd.f32 %v4558_v55, %v4554_v6  ;;  %5258 = vmatpush3.msra.mxu1 %v490_v24 }
 0xeea   : > { %5259 = vmatprep.subr.mxu1 %v505_v15 }
 0xeeb   : > { %5126 = vmatmul.mubr.msk.f32.gmra.mxu0 %vm509_vm2, %v4561_v31  ;;  %5260 = vmatpush3.msra.mxu1 %v489_v40 }
 0xeec   : > { %5261 = vmatprep.subr.mxu1 %v504_v13 }
 0xeed   : > { %5262 = vmatpush3.msra.mxu1 %v488_v16 }
 0xeee   : > { %5263 = vmatprep.subr.mxu1 %v503_v23 }
 0xeef   : > { %5264 = vmatpush3.msra.mxu1 %v487_v25 }
 0xef0   : > { %5265 = vmatprep.subr.mxu1 %v502_v5 }
 0xef1   : > { %5266 = vmatpush3.msra.mxu1 %v486_v50 }
 0xef2   : > { %5267 = vmatprep.subr.mxu1 %v501_v26 }
 0xef3   : > { %5268 = vmatpush3.msra.mxu1 %v485_v38 }
 0xef4   : > { %5269 = vmatprep.subr.mxu1 %v500_v28 }
 0xef5   : > { %5270 = vmatpush3.msra.mxu1 %v484_v21 }
 0xef6   : > { %5271 = vmatprep.subr.mxu1 %v499_v17 }
 0xef7   : > { %5272 = vmatpush3.msra.mxu1 %v483_v42 }
 0xef8   : > { %5273 = vmatprep.subr.mxu1 %v498_v30 }
 0xef9   : > { %5274 = vmatpush3.msra.mxu1 %v482_v8 }
 0xefa   : > { %5275 = vmatprep.subr.mxu1 %v497_v32 }
 0xefb   : > { %5276 = vmatpush3.msra.mxu1 %v481_v46 }
 0xefc   : > { %5277 = vmatprep.subr.mxu1 %v496_v33 }
 0xefd   : > { %5278 = vmatpush3.msra.mxu1 %v480_v43 }
 0xefe   : > { %5279 = vmatprep.subr.mxu1 %v495_v53 }
 0xeff   : > { %5280 = vmatpush3.msra.mxu1 %v479_v57 }
 0xf00   : > { %5281 = vmatprep.subr.mxu1 %v494_v63 }
 0xf01   : > { %5282 = vmatpush3.msra.mxu1 %v478_v56 }
 0xf02   : > { %5283 = vmatprep.subr.mxu1 %v493_v39 }
 0xf03   : > { %5284 = vmatpush3.msra.mxu1 %v477_v18 }
 0xf9c   : > { %v4645_v22 = vpop.f32.mrf.mxu0 }
 0xf9d   : > { %v6634_v7 = vadd.f32 %v4645_v22, %v4565_v34 }
 0xf9e   : > { %v4647_v36 = vpop.f32.mrf.mxu0 }
 0xf9f   : > { %v6637_v45 = vmul.f32 0.70710677, %v6634_v7  ;;  %v6639_v47 = vadd.f32 %v4647_v36, %v4569_v37 }
 0xfa1   : > { %v4686_v49 = vand.u32 2147483647, %v6637_v45  ;;  %v6643_v58 = vmul.f32 0.70710677, %v6639_v47  ;;  %vm4674_vm9 = vcmp.ge.f32.partialorder %v6637_v45, 0.0 }
 0xfa3   : > { %v4692_v61 = vmul.f32 0.3275911, %v4686_v49  ;;  %v4687_v62 = vand.u32 2147483647, %v6643_v58  ;;  %v4770_v48 = vsub.f32 0.0, %v4686_v49  ;;  %vm4675_vm10 = vcmp.ge.f32.partialorder %v6643_v58, 0.0 }
 0xfa5   : > { %v4698_v20 = vadd.f32 1.0, %v4692_v61  ;;  %v4693_v12 = vmul.f32 0.3275911, %v4687_v62  ;;  %v4771_v10 = vsub.f32 0.0, %v4687_v62  ;;  %v4776_v40 = vmul.f32 %v4770_v48, %v4686_v49 }
 0xfa7   : > { %5624 = vrcp.f32 %v4698_v20  ;;  %v4699_v52 = vadd.f32 1.0, %v4693_v12  ;;  %v4651_v55 = vpop.f32.mrf.mxu0  ;;  %v4777_v50 = vmul.f32 %v4771_v10, %v4687_v62  ;;  %v4782_v28 = vmul.f32 1.442695, %v4776_v40 }
 0xfa8   : > { %v6646_v0 = vadd.f32 %v4651_v55, %v4565_v34 }
 0xfa9   : > { %v4653_v4 = vpop.f32.mrf.mxu0  ;;  %5626 = vrcp.f32 %v4699_v52  ;;  %v4784_v8 = vmul.f32 1.442695, %v4777_v50  ;;  %v5666_v50 = vmov -1.0  }
 0xfaa   : > { %v6649_v35 = vmul.f32 0.70710677, %v6646_v0  ;;  %v6651_v41 = vadd.f32 %v4653_v4, %v4569_v37 }
 0xfab   : > { %v4657_v3 = vpop.f32.mrf.mxu0 }
 0xfac   : > { %v4688_v2 = vand.u32 2147483647, %v6649_v35  ;;  %v6655_v9 = vmul.f32 0.70710677, %v6651_v41  ;;  %v6657_v6 = vadd.f32 %v4657_v3, %v4565_v34  ;;  %vm4676_vm11 = vcmp.ge.f32.partialorder %v6649_v35, 0.0 }
 0xfad   : > { %v4659_v31 = vpop.f32.mrf.mxu0 }
 0xfae   : > { %v4694_v27 = vmul.f32 0.3275911, %v4688_v2  ;;  %v4689_v11 = vand.u32 2147483647, %v6655_v9  ;;  %v6661_v29 = vmul.f32 0.70710677, %v6657_v6  ;;  %v6663_v60 = vadd.f32 %v4659_v31, %v4569_v37 }
 0xfaf   : > { %v4772_v32 = vsub.f32 0.0, %v4688_v2  ;;  %vm4677_vm12 = vcmp.ge.f32.partialorder %v6655_v9, 0.0 }
 0xfb0   : > { %v4700_v24 = vadd.f32 1.0, %v4694_v27  ;;  %v4695_v15 = vmul.f32 0.3275911, %v4689_v11  ;;  %v4690_v13 = vand.u32 2147483647, %v6661_v29  ;;  %v4773_v63 = vsub.f32 0.0, %v4689_v11 }
 0xfb1   : > { %v6667_v16 = vmul.f32 0.70710677, %v6663_v60  ;;  %v4778_v56 = vmul.f32 %v4772_v32, %v4688_v2  ;;  %vm4678_vm13 = vcmp.ge.f32.partialorder %v6661_v29, 0.0  ;;  %v4664_v29 = vmul.f32 0.5, %v6646_v0 }
 0xfb2   : > { %5628 = vrcp.f32 %v4700_v24  ;;  %v4701_v23 = vadd.f32 1.0, %v4695_v15  ;;  %v4696_v25 = vmul.f32 0.3275911, %v4690_v13  ;;  %v4774_v19 = vsub.f32 0.0, %v4690_v13 }
 0xfb3   : > { %v4691_v26 = vand.u32 2147483647, %v6667_v16  ;;  %v4779_v36 = vmul.f32 %v4773_v63, %v4689_v11  ;;  %v4786_v49 = vmul.f32 1.442695, %v4778_v56  ;;  %v4684_v9 = vsel %vm4678_vm13, 1.0, %v5666_v50 }
 0xfb4   : > { %v5625_v5 = vpop.eup %5624  ;;  %5630 = vrcp.f32 %v4701_v23  ;;  %v4702_v21 = vadd.f32 1.0, %v4696_v25  ;;  %v4780_v52 = vmul.f32 %v4774_v19, %v4690_v13  ;;  %vm4679_vm14 = vcmp.ge.f32.partialorder %v6667_v16, 0.0 }
 0xfb5   : > { %v4716_v38 = vmul.f32 1.0614054, %v5625_v5  ;;  %v4697_v17 = vmul.f32 0.3275911, %v4691_v26  ;;  %v4775_v61 = vsub.f32 0.0, %v4691_v26  ;;  %v4827_v0 = vrot.slane %v6628_v59, %v560_v54 }
 0xfb6   : > { %v5627_v42 = vpop.eup %5626  ;;  %5632 = vrcp.f32 %v4702_v21  ;;  %v4788_v48 = vmul.f32 1.442695, %v4779_v36  ;;  %v4790_v40 = vmul.f32 1.442695, %v4780_v52 }
 0xfb7   : > { %v4722_v30 = vadd.f32 -1.4531521, %v4716_v38  ;;  %v4703_v46 = vadd.f32 1.0, %v4697_v17  ;;  %v4717_v33 = vmul.f32 1.0614054, %v5627_v42  ;;  %5634 = vpow2.f32 %v4782_v28 }
 0xfb8   : > { %v4781_v11 = vmul.f32 %v4775_v61, %v4691_v26  ;;  %v4680_v38 = vsel %vm4674_vm9, 1.0, %v5666_v50 }
 0xfb9   : > { %v4728_v43 = vmul.f32 %v5625_v5, %v4722_v30  ;;  %5636 = vrcp.f32 %v4703_v46  ;;  %v4723_v53 = vadd.f32 -1.4531521, %v4717_v33 }
 0xfba   : > { %5638 = vpow2.f32 %v4784_v8 }
 0xfbb   : > { %v4734_v57 = vadd.f32 1.4214138, %v4728_v43  ;;  %v4729_v39 = vmul.f32 %v5627_v42, %v4723_v53  ;;  %5640 = vpow2.f32 %v4786_v49  ;;  %v4681_v49 = vsel %vm4675_vm10, 1.0, %v5666_v50 }
 0xfbc   : > { %5642 = vpow2.f32 %v4788_v48 }
 0xfbd   : > { %v4740_v18 = vmul.f32 %v5625_v5, %v4734_v57  ;;  %v4735_v34 = vadd.f32 1.4214138, %v4729_v39  ;;  %5644 = vpow2.f32 %v4790_v40 }
 0xfbf   : > { %v6670_v37 = vpop.eup %5628  ;;  %v4746_v22 = vadd.f32 -0.28449672, %v4740_v18  ;;  %v4741_v62 = vmul.f32 %v5627_v42, %v4735_v34 }
 0xfc0   : > { %v4718_v20 = vmul.f32 1.0614054, %v6670_v37 }
 0xfc1   : > { %v4752_v12 = vmul.f32 %v5625_v5, %v4746_v22  ;;  %v6673_v55 = vpop.eup %5630  ;;  %v4747_v4 = vadd.f32 -0.28449672, %v4741_v62 }
 0xfc2   : > { %v4724_v3 = vadd.f32 -1.4531521, %v4718_v20  ;;  %v4719_v31 = vmul.f32 1.0614054, %v6673_v55 }
 0xfc3   : > { %v4758_v2 = vadd.f32 0.2548296, %v4752_v12  ;;  %v6677_v27 = vpop.eup %5632  ;;  %v4753_v10 = vmul.f32 %v5627_v42, %v4747_v4 }
 0xfc4   : > { %v4730_v24 = vmul.f32 %v6670_v37, %v4724_v3  ;;  %v4725_v13 = vadd.f32 -1.4531521, %v4719_v31  ;;  %v4720_v23 = vmul.f32 1.0614054, %v6677_v27  ;;  %v5635_v25 = vpop.eup %5634 }
 0xfc5   : > { %v4764_v15 = vmul.f32 %v5625_v5, %v4758_v2  ;;  %v4759_v28 = vadd.f32 0.2548296, %v4753_v10  ;;  %v4792_v5 = vmul.f32 1.442695, %v4781_v11  ;;  %v4663_v2 = vmul.f32 0.5, %v6639_v47 }
 0xfc6   : > { %v4736_v21 = vadd.f32 1.4214138, %v4730_v24  ;;  %v6684_v17 = vpop.eup %5636  ;;  %v4731_v26 = vmul.f32 %v6673_v55, %v4725_v13  ;;  %v4726_v8 = vadd.f32 -1.4531521, %v4720_v23  ;;  %v4662_v24 = vmul.f32 0.5, %v6634_v7 }
 0xfc7   : > { %v4794_v30 = vmul.f32 %v5635_v25, %v4764_v15  ;;  %v4765_v32 = vmul.f32 %v5627_v42, %v4759_v28  ;;  %v4721_v33 = vmul.f32 1.0614054, %v6684_v17  ;;  %v5639_v43 = vpop.eup %5638  ;;  %5646 = vpow2.f32 %v4792_v5 }
 0xfc8   : > { %v4742_v46 = vmul.f32 %v6670_v37, %v4736_v21  ;;  %v4737_v45 = vadd.f32 1.4214138, %v4731_v26  ;;  %v4732_v57 = vmul.f32 %v6677_v27, %v4726_v8  ;;  %v5641_v10 = vpop.eup %5640  ;;  %v4682_v26 = vsel %vm4676_vm11, 1.0, %v5666_v50 }
 0xfc9   : > { %v4800_v53 = vsub.f32 1.0, %v4794_v30  ;;  %v4795_v63 = vmul.f32 %v5639_v43, %v4765_v32  ;;  %v4727_v39 = vadd.f32 -1.4531521, %v4721_v33  ;;  %v5643_v21 = vpop.eup %5642  ;;  %v4683_v33 = vsel %vm4677_vm12, 1.0, %v5666_v50 }
 0xfca   : > { %v4748_v56 = vadd.f32 -0.28449672, %v4742_v46  ;;  %v4743_v19 = vmul.f32 %v6673_v55, %v4737_v45  ;;  %v4738_v34 = vadd.f32 1.4214138, %v4732_v57  ;;  %v5645_v8 = vpop.eup %5644 }
 0xfcb   : > { %v4806_v18 = vmul.f32 %v4800_v53, %v4680_v38  ;;  %v4801_v42 = vsub.f32 1.0, %v4795_v63  ;;  %v4733_v36 = vmul.f32 %v6684_v17, %v4727_v39 }
 0xfcc   : > { %v4754_v22 = vmul.f32 %v6670_v37, %v4748_v56  ;;  %v4749_v61 = vadd.f32 -0.28449672, %v4743_v19  ;;  %v4744_v62 = vmul.f32 %v6677_v27, %v4738_v34  ;;  %v4665_v56 = vmul.f32 0.5, %v6651_v41 }
 0xfcd   : > { %v4807_v20 = vmul.f32 %v4801_v42, %v4681_v49  ;;  %v4739_v12 = vadd.f32 1.4214138, %v4733_v36  ;;  %v4812_v52 = vadd.f32 1.0, %v4806_v18  ;;  %v4685_v34 = vsel %vm4679_vm14, 1.0, %v5666_v50 }
 0xfce   : > { %v4760_v58 = vadd.f32 0.2548296, %v4754_v22  ;;  %v4755_v4 = vmul.f32 %v6673_v55, %v4749_v61  ;;  %v4750_v3 = vadd.f32 -0.28449672, %v4744_v62  ;;  %v4667_v49 = vmul.f32 0.5, %v6663_v60 }
 0xfcf   : > { %v4813_v48 = vadd.f32 1.0, %v4807_v20  ;;  %v4745_v11 = vmul.f32 %v6684_v17, %v4739_v12  ;;  %v4818_v38 = vmul.f32 %v4812_v52, %v4662_v24  ;;  %v4666_v61 = vmul.f32 0.5, %v6657_v6 }
 0xfd0   : > { %v4766_v31 = vmul.f32 %v6670_v37, %v4760_v58  ;;  %v4761_v15 = vadd.f32 0.2548296, %v4755_v4  ;;  %v4756_v40 = vmul.f32 %v6677_v27, %v4750_v3 }
 0xfd1   : > { %v4819_v13 = vmul.f32 %v4813_v48, %v4663_v2  ;;  %v4751_v25 = vadd.f32 -0.28449672, %v4745_v11 }
 0xfd2   : > { %v4796_v23 = vmul.f32 %v5641_v10, %v4766_v31  ;;  %v4767_v28 = vmul.f32 %v6673_v55, %v4761_v15  ;;  %v4762_v47 = vadd.f32 0.2548296, %v4756_v40 }
 0xfd3   : > { %4892 = vmatprep.mubr.f32.mxu1 %v4819_v13  ;;  %v4757_v30 = vmul.f32 %v6684_v17, %v4751_v25 }
 0xfd4   : > { %v4802_v37 = vsub.f32 1.0, %v4796_v23  ;;  %4893 = vmatmul.mubr.f32.vlgmr.msra.gmra.mxu1 %v4818_v38  ;;  %v4797_v7 = vmul.f32 %v5643_v21, %v4767_v28  ;;  %v4768_v35 = vmul.f32 %v6677_v27, %v4762_v47  ;;  %v5647_v53 = vpop.eup %5646 }
 0xfd5   : > { %v4763_v32 = vadd.f32 0.2548296, %v4757_v30 }
 0xfd6   : > { %v4808_v5 = vmul.f32 %v4802_v37, %v4682_v26  ;;  %v4803_v55 = vsub.f32 1.0, %v4797_v7  ;;  %v4798_v46 = vmul.f32 %v5645_v8, %v4768_v35 }
 0xfd7   : > { %v4769_v43 = vmul.f32 %v6684_v17, %v4763_v32 }
 0xfd8   : > { %v4809_v45 = vmul.f32 %v4803_v55, %v4683_v33  ;;  %v4804_v57 = vsub.f32 1.0, %v4798_v46  ;;  %v4814_v63 = vadd.f32 1.0, %v4808_v5 }
 0xfd9   : > { %v4799_v27 = vmul.f32 %v5647_v53, %v4769_v43 }
 0xfda   : > { %v4815_v39 = vadd.f32 1.0, %v4809_v45  ;;  %v4810_v18 = vmul.f32 %v4804_v57, %v4684_v9  ;;  %v4820_v17 = vmul.f32 %v4814_v63, %v4664_v29 }
 0xfdb   : > { %v4805_v19 = vsub.f32 1.0, %v4799_v27 }
 0xfdc   : > { %v4821_v42 = vmul.f32 %v4815_v39, %v4665_v56  ;;  %v4816_v36 = vadd.f32 1.0, %v4810_v18 }
 0xfdd   : > { %v4811_v22 = vmul.f32 %v4805_v19, %v4685_v34 }
 0xfde   : > { %4897 = vmatprep.mubr.f32.mxu1 %v4821_v42  ;;  %v4822_v41 = vmul.f32 %v4816_v36, %v4666_v61 }
 0xfdf   : > { %4898 = vmatmul.mubr.f32.gmra.mxu1 %v4820_v17  ;;  %v4817_v16 = vadd.f32 1.0, %v4811_v22 }
 0xfe1   : > { %v4823_v62 = vmul.f32 %v4817_v16, %v4667_v49 }
 0xfe3   : > { %4902 = vmatprep.mubr.f32.mxu1 %v4823_v62 }
 0xfe4   : > { %4903 = vmatmul.mubr.f32.gmra.mxu1 %v4822_v41 }
0x1094   : > { %v5285_v20 = vpop.f32.mrf.mxu1 }
0x1096   : > { %v5286_v50 = vpop.f32.mrf.mxu1 }
0x1097   : > { %v5287_v58 = vadd.f32 %v5286_v50, %v5285_v20 }
0x1099   : > { %v4895_v12 = vadd.f32 %v5287_v58, %v4827_v0 }
0x109b   : > { %v4908_v52 = vadd.f32 %v4895_v12, %v6529_v44 }
0x109d   : > { %4911 = vst.msk [vmem:[%s6747_s8] sm:$0xff] %vm509_vm2, %v4908_v52 }
0x109f   : > { %v5288_v6 = vpop.f32.mrf.mxu1 }
0x10a1   : > { %v5289_v60 = vpop.f32.mrf.mxu1 }
0x10a2   : > { %v5290_v4 = vadd.f32 %v5289_v60, %v5288_v6 }
0x10a4   : > { %v4900_v3 = vadd.f32 %v5290_v4, %v4827_v0  ;;  %v5291_v2 = vpop.f32.mrf.mxu1 }
0x10a6   : > { %v4909_v48 = vadd.f32 %v4900_v3, %v6537_v1  ;;  %v5292_v51 = vpop.f32.mrf.mxu1 }
0x10a7   : > { %v5293_v31 = vadd.f32 %v5292_v51, %v5291_v2 }
0x10a8   : > { %4912 = vst.msk [vmem:[%s6747_s8 + $0x8] sm:$0xff] %vm509_vm2, %v4909_v48 }
0x10a9   : > { %v4905_v54 = vadd.f32 %v5293_v31, %v4827_v0 }
0x10ab   : > { %v4910_v44 = vadd.f32 %v4905_v54, %v6545_v14 }
0x10ad   : > { %4913 = vst.msk [vmem:[%s6747_s8 + $0x10] sm:$0x3] %vm516_vm3, %v4910_v44 }
0x10ae PF: > { %s18_s27 = sadd.s32 1, %s5658_s27  }
0x10af   : > { %p15_p5 = scmp.ge.s32.totalorder %s18_s27, 4  }
0x10b1   :  { %17 = sbr.rel (!%p15_p5) target bundleno = 1 (0x1), region = 100 }

// kernel: mae_vit_forward.8
= control target key start
LH: loop header
LB: loop body
LE: loop exit
PB: predicated region body
PF: predicated region fallthrough
CT: control target
= control target key end

     0   :  { %vm63_vm0 = vcmask 261120   ;;  %vm72_vm1 = vcmask 254976   ;;  %vm11666_vm2 = vmmov 0   ;;  %vm2325_vm3 = vcmask 64512   ;;  %s15143_s0 = inlined_call_operand.vmem [shape: f32[66,32], index: 0, kind: input, shape index: {}]   ;;  %s15144_s1 = inlined_call_operand.vmem [shape: f32[66,32], index: 1, kind: input, shape index: {}]   ;;  %s15145_s9 = inlined_call_operand.vmem [shape: f32[66,32], index: 9, kind: output, shape index: {}]   ;;  %s15146_s2 = inlined_call_operand.vmem [shape: f32[1,32,32], index: 2, kind: input, shape index: {}]   ;;  %s15147_s8 = inlined_call_operand.vmem [shape: f32[1,10,128], index: 8, kind: input, shape index: {}]   ;;  %s15148_s3 = inlined_call_operand.vmem [shape: f32[1,32,32], index: 3, kind: input, shape index: {}]   ;;  %s15149_s4 = inlined_call_operand.vmem [shape: f32[1,32,32], index: 4, kind: input, shape index: {}]   ;;  %s15150_s5 = inlined_call_operand.vmem [shape: f32[1,32,32], index: 5, kind: input, shape index: {}]   ;;  %s15151_s6 = inlined_call_operand.vmem [shape: f32[1,32,128], index: 6, kind: input, shape index: {}]   ;;  %s15152_s7 = inlined_call_operand.vmem [shape: f32[1,128,32], index: 7, kind: input, shape index: {}]  }
   0x1   :  { %v42_v0 = vld [vmem:[%s15143_s0 + $0x30] sm:$0xff]  ;;  %v44_v2 = vld [vmem:[%s15143_s0 + $0x40] sm:$0x3]  ;;  %v43_v5 = vld [vmem:[%s15143_s0 + $0x38] sm:$0xff]  ;;  %vm3317_vm4 = vcmask 1040384   ;;  %vm2976_vm5 = vcmask 269312  }
   0x2   :  { %v51_v1 = vld [vmem:[%s15144_s1 + $0x30] sm:$0xff]  ;;  %v53_v4 = vld [vmem:[%s15144_s1 + $0x40] sm:$0x3]  ;;  %v52_v6 = vld [vmem:[%s15144_s1 + $0x38] sm:$0xff]  ;;  %vm2989_vm6 = vcmask 262144  }
   0x3   :  { %v60_v3 = vadd.f32 %v51_v1, %v42_v0  ;;  %v62_v7 = vadd.f32 %v53_v4, %v44_v2  ;;  %v61_v8 = vadd.f32 %v52_v6, %v43_v5  ;;  %v37_v9 = vld [vmem:[%s15143_s0 + $0x8] sm:$0xff]  ;;  %v36_v11 = vld [vmem:[%s15143_s0] sm:$0xff]  ;;  %v39_v14 = vld [vmem:[%s15143_s0 + $0x18] sm:$0xff] }
   0x4   :  { %v46_v10 = vld [vmem:[%s15144_s1 + $0x8] sm:$0xff]  ;;  %v45_v13 = vld [vmem:[%s15144_s1] sm:$0xff]  ;;  %v48_v15 = vld [vmem:[%s15144_s1 + $0x18] sm:$0xff] }
   0x5   :  { %70 = vst.msk [vmem:[%s15145_s9 + $0x30] sm:$0xff] %vm63_vm0, %v60_v3  ;;  %v55_v12 = vadd.f32 %v46_v10, %v37_v9  ;;  %71 = vst.msk [vmem:[%s15145_s9 + $0x38] sm:$0xff] %vm63_vm0, %v61_v8  ;;  %v54_v16 = vadd.f32 %v45_v13, %v36_v11  ;;  %v57_v17 = vadd.f32 %v48_v15, %v39_v14  ;;  %v38_v18 = vld [vmem:[%s15143_s0 + $0x10] sm:$0xff]  ;;  %v41_v20 = vld [vmem:[%s15143_s0 + $0x28] sm:$0xff] }
   0x6   :  { %73 = vst.msk [vmem:[%s15145_s9 + $0x40] sm:$0x3] %vm72_vm1, %v62_v7  ;;  %v47_v19 = vld [vmem:[%s15144_s1 + $0x10] sm:$0xff]  ;;  %v50_v22 = vld [vmem:[%s15144_s1 + $0x28] sm:$0xff]  ;;  %v40_v23 = vld [vmem:[%s15143_s0 + $0x20] sm:$0xff]  ;;  %s11669_s0 = smov 112  }
   0x7   :  { %65 = vst.msk [vmem:[%s15145_s9 + $0x8] sm:$0xff] %vm63_vm0, %v55_v12  ;;  %v56_v21 = vadd.f32 %v47_v19, %v38_v18  ;;  %v49_v24 = vld [vmem:[%s15144_s1 + $0x20] sm:$0xff]  ;;  %64 = vst.msk [vmem:[%s15145_s9] sm:$0xff] %vm63_vm0, %v54_v16  ;;  %v59_v25 = vadd.f32 %v50_v22, %v41_v20  ;;  %s11670_s1 = smov 104  }
   0x8   :  { %67 = vst.msk [vmem:[%s15145_s9 + $0x18] sm:$0xff] %vm63_vm0, %v57_v17  ;;  %v58_v26 = vadd.f32 %v49_v24, %v40_v23 }
   0x9   :  { %66 = vst.msk [vmem:[%s15145_s9 + $0x10] sm:$0xff] %vm63_vm0, %v56_v21  ;;  %69 = vst.msk [vmem:[%s15145_s9 + $0x28] sm:$0xff] %vm63_vm0, %v59_v25 }
   0xa   :  { %68 = vst.msk [vmem:[%s15145_s9 + $0x20] sm:$0xff] %vm63_vm0, %v58_v26  ;;  %v15155_v26 = vmov 0.0  }
   0xb   :  { %11408 = vmatprep.subr.mxu1 %v15155_v26  ;;  %10693 = vmatprep.subr.mxu0 %v15155_v26 }
   0xc   :  { %v80_v27 = vld [vmem:[%s15145_s9 + $0x30] sm:$0xff]  ;;  %v81_v30 = vld [vmem:[%s15145_s9 + $0x38] sm:$0xff]  ;;  %10719 = vmatprep.mubr.msk.f32.mxu1 %vm11666_vm2, %v15155_v26  ;;  %10701 = vmatprep.mubr.msk.f32.mxu0 %vm11666_vm2, %v15155_v26 }
   0xd   :  { %v140_v28 = vsel %vm63_vm0, %v80_v27, 0.0  ;;  %v82_v29 = vld [vmem:[%s15145_s9 + $0x40] sm:$0x3]  ;;  %v143_v32 = vsel %vm63_vm0, %v81_v30, 0.0 }
   0xe   :  { %141 = vadd.xlane.f32.xlu0 %v140_v28  ;;  %v147_v31 = vsel %vm72_vm1, %v82_v29, 0.0  ;;  %v74_v33 = vld [vmem:[%s15145_s9] sm:$0xff]  ;;  %v75_v34 = vld [vmem:[%s15145_s9 + $0x8] sm:$0xff]  ;;  %v87_v28 = vld [vmem:[%s15146_s2 + $0x10] sm:$0xff] }
   0xf   :  { %148 = vadd.xlane.f32.xlu1 %v147_v31  ;;  %v122_v35 = vsel %vm63_vm0, %v74_v33, 0.0  ;;  %v125_v37 = vsel %vm63_vm0, %v75_v34, 0.0  ;;  %v77_v38 = vld [vmem:[%s15145_s9 + $0x18] sm:$0xff] }
  0x10   :  { %v76_v36 = vld [vmem:[%s15145_s9 + $0x10] sm:$0xff]  ;;  %v131_v41 = vsel %vm63_vm0, %v77_v38, 0.0  ;;  %v79_v42 = vld [vmem:[%s15145_s9 + $0x28] sm:$0xff] }
  0x11   :  { %v128_v39 = vsel %vm63_vm0, %v76_v36, 0.0  ;;  %v78_v40 = vld [vmem:[%s15145_s9 + $0x20] sm:$0xff]  ;;  %v137_v44 = vsel %vm63_vm0, %v79_v42, 0.0 }
  0x12   :  { %144 = vadd.xlane.f32.xlu0 %v143_v32  ;;  %v134_v43 = vsel %vm63_vm0, %v78_v40, 0.0 }
  0x13   :  { %123 = vadd.xlane.f32.xlu1 %v122_v35 }
  0x16   :  { %126 = vadd.xlane.f32.xlu0 %v125_v37 }
  0x17   :  { %129 = vadd.xlane.f32.xlu1 %v128_v39 }
  0x1a   :  { %132 = vadd.xlane.f32.xlu0 %v131_v41 }
  0x1b   :  { %135 = vadd.xlane.f32.xlu1 %v134_v43 }
  0x1e   :  { %138 = vadd.xlane.f32.xlu0 %v137_v44 }
  0x97   :  { %v142_v45 = vpop.xlane.xlu0 %141 }
  0x98   :  { %v157_v46 = vmul.f32 0.03125, %v142_v45  ;;  %v149_v47 = vpop.xlane.xlu1 %148 }
  0x99   :  { %v159_v48 = vmul.f32 0.03125, %v149_v47 }
  0x9a   :  { %v11848_v49 = vsub.f32 %v80_v27, %v157_v46  ;;  %v88_v27 = vld [vmem:[%s15146_s2 + $0x18] sm:$0xff] }
  0x9b   :  { %v11850_v50 = vsub.f32 %v82_v29, %v159_v48  ;;  %v145_v51 = vpop.xlane.xlu0 %144  ;;  %11412 = vmatpush3.msra.mxu1 %v88_v27  ;;  %10694 = vmatpush3.msra.mxu0 %v88_v27  ;;  %v86_v29 = vld [vmem:[%s15146_s2 + $0x8] sm:$0xff] }
  0x9c   :  { %v158_v52 = vmul.f32 0.03125, %v145_v51  ;;  %v175_v53 = vmul.f32 %v11848_v49, %v11848_v49  ;;  %v124_v54 = vpop.xlane.xlu1 %123  ;;  %11409 = vmatprep.subr.mxu1 %v15155_v26  ;;  %10695 = vmatprep.subr.mxu0 %v15155_v26 }
  0x9d   :  { %v151_v55 = vmul.f32 0.03125, %v124_v54  ;;  %v177_v56 = vmul.f32 %v11850_v50, %v11850_v50  ;;  %11413 = vmatpush3.msra.mxu1 %v87_v28  ;;  %10696 = vmatpush3.msra.mxu0 %v87_v28 }
  0x9e   :  { %v11856_v57 = vsub.f32 %v81_v30, %v158_v52  ;;  %v196_v58 = vsel %vm63_vm0, %v175_v53, 0.0  ;;  %11410 = vmatprep.subr.mxu1 %v15155_v26  ;;  %v85_v30 = vld [vmem:[%s15146_s2] sm:$0xff]  ;;  %10697 = vmatprep.subr.mxu0 %v15155_v26 }
  0x9f   :  { %v127_v59 = vpop.xlane.xlu0 %126  ;;  %197 = vadd.xlane.f32.xlu1 %v196_v58  ;;  %v11859_v60 = vsub.f32 %v74_v33, %v151_v55  ;;  %v202_v63 = vsel %vm72_vm1, %v177_v56, 0.0  ;;  %11414 = vmatpush3.msra.mxu1 %v86_v29  ;;  %v11925_v55 = vld [vmem:[%s15147_s8] sm:$0xff] }
  0xa0   :  { %v152_v61 = vmul.f32 0.03125, %v127_v59  ;;  %v176_v62 = vmul.f32 %v11856_v57, %v11856_v57  ;;  %v130_v0 = vpop.xlane.xlu1 %129  ;;  %11411 = vmatprep.subr.mxu1 %v15155_v26  ;;  %10698 = vmatpush3.msra.mxu0 %v86_v29 }
  0xa1   :  { %v153_v1 = vmul.f32 0.03125, %v130_v0  ;;  %v169_v2 = vmul.f32 %v11859_v60, %v11859_v60  ;;  %11415 = vmatpush3.msra.mxu1 %v85_v30  ;;  %10699 = vmatprep.subr.mxu0 %v15155_v26 }
  0xa2   :  { %v11866_v3 = vsub.f32 %v75_v34, %v152_v61  ;;  %v199_v4 = vsel %vm63_vm0, %v176_v62, 0.0  ;;  %10728 = vmatprep.subr.mxu1 %v15155_v26  ;;  %10700 = vmatpush3.msra.mxu0 %v85_v30 }
  0xa3   :  { %200 = vadd.xlane.f32.xlu0 %v199_v4  ;;  %v133_v5 = vpop.xlane.xlu0 %132  ;;  %203 = vadd.xlane.f32.xlu1 %v202_v63  ;;  %v11869_v6 = vsub.f32 %v76_v36, %v153_v1  ;;  %v178_v9 = vsel %vm63_vm0, %v169_v2, 0.0 }
  0xa4   :  { %v154_v7 = vmul.f32 0.03125, %v133_v5  ;;  %v170_v8 = vmul.f32 %v11866_v3, %v11866_v3  ;;  %v136_v10 = vpop.xlane.xlu1 %135  ;;  %10763 = vmatprep.subr.mxu0 %v15155_v26 }
  0xa5   :  { %v155_v11 = vmul.f32 0.03125, %v136_v10  ;;  %v171_v12 = vmul.f32 %v11869_v6, %v11869_v6 }
  0xa6   :  { %v11876_v13 = vsub.f32 %v77_v38, %v154_v7  ;;  %v181_v14 = vsel %vm63_vm0, %v170_v8, 0.0  ;;  %v241_v38 = vlaneseq }
  0xa7   :  { %v139_v15 = vpop.xlane.xlu0 %138  ;;  %182 = vadd.xlane.f32.xlu1 %v181_v14  ;;  %179 = vadd.xlane.f32.xlu0 %v178_v9  ;;  %v11879_v16 = vsub.f32 %v78_v40, %v155_v11  ;;  %v184_v19 = vsel %vm63_vm0, %v171_v12, 0.0 }
  0xa8   :  { %v156_v17 = vmul.f32 0.03125, %v139_v15  ;;  %v172_v18 = vmul.f32 %v11876_v13, %v11876_v13  ;;  %v11919_v45 = vshrl.u32 %v241_v38, 7  ;;  %v92_v15 = vld [vmem:[%s15148_s3 + $0x18] sm:$0xff] }
  0xa9   :  { %v173_v20 = vmul.f32 %v11879_v16, %v11879_v16 }
  0xaa   :  { %v11886_v21 = vsub.f32 %v79_v42, %v156_v17  ;;  %v187_v22 = vsel %vm63_vm0, %v172_v18, 0.0  ;;  %15183 = vst [vmem:[#allocation2_spill] sm:$0xff] %v11919_v45  ;;  %v15154_v54 = vsub.s32 0, %v11919_v45  ;;  %v15153_v56 = vsub.s32 1, %v11919_v45  ;;  %v91_v18 = vld [vmem:[%s15148_s3 + $0x10] sm:$0xff] }
  0xab   :  { %188 = vadd.xlane.f32.xlu1 %v187_v22  ;;  %185 = vadd.xlane.f32.xlu0 %v184_v19  ;;  %v190_v24 = vsel %vm63_vm0, %v173_v20, 0.0 }
  0xac   :  { %v174_v23 = vmul.f32 %v11886_v21, %v11886_v21  ;;  %v11931_v0 = vrot.slane %v11925_v55, %v15154_v54  ;;  %v11936_v2 = vrot.slane %v11925_v55, %v15153_v56 }
  0xae   :  { %v193_v25 = vsel %vm63_vm0, %v174_v23, 0.0  ;;  %v90_v23 = vld [vmem:[%s15148_s3 + $0x8] sm:$0xff] }
  0xaf   :  { %194 = vadd.xlane.f32.xlu1 %v193_v25  ;;  %191 = vadd.xlane.f32.xlu0 %v190_v24 }
 0x128   :  { %v198_v31 = vpop.xlane.xlu1 %197 }
 0x129   :  { %v211_v32 = vmul.f32 0.03125, %v198_v31 }
 0x12b   :  { %v220_v33 = vadd.f32 1e-05, %v211_v32  ;;  %v96_v32 = vld [vmem:[%s15149_s4 + $0x18] sm:$0xff] }
 0x12c   :  { %v201_v34 = vpop.xlane.xlu0 %200  ;;  %v204_v35 = vpop.xlane.xlu1 %203 }
 0x12d   :  { %11423 = vrsqrt.f32 %v220_v33  ;;  %v212_v36 = vmul.f32 0.03125, %v201_v34  ;;  %v213_v37 = vmul.f32 0.03125, %v204_v35 }
 0x12f   :  { %v221_v39 = vadd.f32 1e-05, %v212_v36  ;;  %v222_v40 = vadd.f32 1e-05, %v213_v37  ;;  %v95_v36 = vld [vmem:[%s15149_s4 + $0x10] sm:$0xff] }
 0x130   :  { %v180_v41 = vpop.xlane.xlu0 %179  ;;  %v183_v42 = vpop.xlane.xlu1 %182 }
 0x131   :  { %11425 = vrsqrt.f32 %v221_v39  ;;  %v205_v43 = vmul.f32 0.03125, %v180_v41  ;;  %v206_v44 = vmul.f32 0.03125, %v183_v42 }
 0x132   :  { %11427 = vrsqrt.f32 %v222_v40  ;;  %v94_v40 = vld [vmem:[%s15149_s4 + $0x8] sm:$0xff] }
 0x133   :  { %v214_v46 = vadd.f32 1e-05, %v205_v43  ;;  %v215_v47 = vadd.f32 1e-05, %v206_v44  ;;  %v93_v43 = vld [vmem:[%s15149_s4] sm:$0xff]  ;;  %s11668_s4 = smov 120  }
 0x134   :  { %v186_v48 = vpop.xlane.xlu0 %185  ;;  %v189_v51 = vpop.xlane.xlu1 %188 }
 0x135   :  { %11429 = vrsqrt.f32 %v214_v46  ;;  %v207_v52 = vmul.f32 0.03125, %v186_v48  ;;  %v208_v53 = vmul.f32 0.03125, %v189_v51  ;;  %v269_v51 = vsub.s32 2, %v11919_v45 }
 0x136   :  { %11431 = vrsqrt.f32 %v215_v47  ;;  %v11667_v47 = vmov 1966171168  }
 0x137   :  { %v216_v58 = vadd.f32 1e-05, %v207_v52  ;;  %v217_v59 = vadd.f32 1e-05, %v208_v53  ;;  %v647_v48 = vunpack.c.l.s4 %v11667_v47  ;;  %v12095_v53 = vrot.slane %v11925_v55, %v269_v51 }
 0x138   :  { %v192_v61 = vpop.xlane.xlu0 %191  ;;  %v195_v62 = vpop.xlane.xlu1 %194 }
 0x139   :  { %11433 = vrsqrt.f32 %v216_v58  ;;  %v209_v63 = vmul.f32 0.03125, %v192_v61  ;;  %v210_v5 = vmul.f32 0.03125, %v195_v62  ;;  %v648_v52 = vunpack.c.0.s8 %v647_v48 }
 0x13a   :  { %v11424_v1 = vpop.eup %11423  ;;  %11435 = vrsqrt.f32 %v217_v59 }
 0x13b   :  { %v218_v4 = vadd.f32 1e-05, %v209_v63  ;;  %v238_v7 = vmul.f32 %v11424_v1, %v11848_v49  ;;  %v219_v11 = vadd.f32 1e-05, %v210_v5  ;;  %v12098_v58 = vsub.s32 %v648_v52, %v11919_v45 }
 0x13d   :  { %v251_v8 = vmul.f32 %v11931_v0, %v238_v7  ;;  %11437 = vrsqrt.f32 %v218_v4 }
 0x13e   :  { %v11426_v9 = vpop.eup %11425  ;;  %11439 = vrsqrt.f32 %v219_v11 }
 0x13f   :  { %v11428_v10 = vpop.eup %11427  ;;  %v11941_v12 = vadd.f32 %v11936_v2, %v251_v8  ;;  %v239_v14 = vmul.f32 %v11426_v9, %v11856_v57 }
 0x140   :  { %v240_v17 = vmul.f32 %v11428_v10, %v11850_v50 }
 0x141   :  { %10720 = vmatmul.mubr.msk.f32.vlgmr.msra.gmra.mxu1 %vm63_vm0, %v11941_v12  ;;  %v252_v49 = vmul.f32 %v11931_v0, %v239_v14 }
 0x142   :  { %v11430_v19 = vpop.eup %11429  ;;  %10722 = vmatprep.mubr.msk.f32.mxu1 %vm11666_vm2, %v15155_v26  ;;  %10729 = vmatpush3.msra.mxu1 %v92_v15  ;;  %v253_v22 = vmul.f32 %v11931_v0, %v240_v17 }
 0x143   :  { %v11432_v57 = vpop.eup %11431  ;;  %v11957_v20 = vadd.f32 %v11936_v2, %v252_v49  ;;  %10730 = vmatprep.subr.mxu1 %v15155_v26  ;;  %v232_v50 = vmul.f32 %v11430_v19, %v11859_v60  ;;  %v89_v60 = vld [vmem:[%s15148_s3] sm:$0xff] }
 0x144   :  { %10731 = vmatpush3.msra.mxu1 %v91_v18  ;;  %v233_v24 = vmul.f32 %v11432_v57, %v11866_v3  ;;  %v11977_v3 = vadd.f32 %v11936_v2, %v253_v22 }
 0x145   :  { %10723 = vmatmul.mubr.msk.f32.gmra.mxu1 %vm63_vm0, %v11957_v20  ;;  %v245_v25 = vmul.f32 %v11931_v0, %v232_v50  ;;  %10732 = vmatprep.subr.mxu1 %v15155_v26 }
 0x146   :  { %v11434_v27 = vpop.eup %11433  ;;  %10725 = vmatprep.mubr.msk.f32.mxu1 %vm11666_vm2, %v15155_v26  ;;  %10733 = vmatpush3.msra.mxu1 %v90_v23  ;;  %v246_v29 = vmul.f32 %v11931_v0, %v233_v24 }
 0x147   :  { %v258_v28 = vadd.f32 %v11936_v2, %v245_v25  ;;  %10734 = vmatprep.subr.mxu1 %v15155_v26  ;;  %v234_v30 = vmul.f32 %v11434_v27, %v11869_v6  ;;  %v11436_v31 = vpop.eup %11435 }
 0x148   :  { %10735 = vmatpush3.msra.mxu1 %v89_v60  ;;  %v259_v33 = vadd.f32 %v11936_v2, %v246_v29  ;;  %v235_v34 = vmul.f32 %v11436_v31, %v11876_v13 }
 0x149   :  { %10702 = vmatmul.mubr.msk.f32.vlgmr.msra.gmra.mxu0 %vm63_vm0, %v258_v28  ;;  %10726 = vmatmul.mubr.msk.f32.gmra.mxu1 %vm63_vm0, %v11977_v3  ;;  %v247_v6 = vmul.f32 %v11931_v0, %v234_v30 }
 0x14a   :  { %10704 = vmatprep.mubr.msk.f32.mxu0 %vm11666_vm2, %v15155_v26  ;;  %10736 = vmatprep.mubr.msk.f32.mxu1 %vm11666_vm2, %v15155_v26  ;;  %v11438_v35 = vpop.eup %11437  ;;  %v248_v37 = vmul.f32 %v11931_v0, %v235_v34 }
 0x14b   :  { %10764 = vmatpush3.msra.mxu0 %v96_v32  ;;  %10798 = vmatprep.subr.mxu1 %v15155_v26  ;;  %v260_v13 = vadd.f32 %v11936_v2, %v247_v6  ;;  %v236_v38 = vmul.f32 %v11438_v35, %v11879_v16  ;;  %v11440_v39 = vpop.eup %11439 }
 0x14c   :  { %10765 = vmatprep.subr.mxu0 %v15155_v26  ;;  %v261_v16 = vadd.f32 %v11936_v2, %v248_v37  ;;  %v237_v42 = vmul.f32 %v11440_v39, %v11886_v21 }
 0x14d   :  { %10705 = vmatmul.mubr.msk.f32.gmra.mxu0 %vm63_vm0, %v259_v33  ;;  %10737 = vmatmul.mubr.msk.f32.vlgmr.msra.gmra.mxu1 %vm63_vm0, %v258_v28  ;;  %v249_v41 = vmul.f32 %v11931_v0, %v236_v38 }
 0x14e   :  { %10707 = vmatprep.mubr.msk.f32.mxu0 %vm11666_vm2, %v15155_v26  ;;  %10739 = vmatprep.mubr.msk.f32.mxu1 %vm11666_vm2, %v15155_v26  ;;  %v250_v21 = vmul.f32 %v11931_v0, %v237_v42 }
 0x14f   :  { %10766 = vmatpush3.msra.mxu0 %v95_v36  ;;  %v262_v44 = vadd.f32 %v11936_v2, %v249_v41 }
 0x150   :  { %10767 = vmatprep.subr.mxu0 %v15155_v26  ;;  %v263_v46 = vadd.f32 %v11936_v2, %v250_v21  ;;  %v524_v21 = vsub.s32 4, %v11919_v45 }
 0x151   :  { %10708 = vmatmul.mubr.msk.f32.gmra.mxu0 %vm63_vm0, %v260_v13  ;;  %10740 = vmatmul.mubr.msk.f32.gmra.mxu1 %vm63_vm0, %v259_v33 }
 0x152   :  { %10710 = vmatprep.mubr.msk.f32.mxu0 %vm11666_vm2, %v15155_v26  ;;  %10742 = vmatprep.mubr.msk.f32.mxu1 %vm11666_vm2, %v15155_v26 }
 0x153   :  { %10768 = vmatpush3.msra.mxu0 %v94_v40 }
 0x154   :  { %10769 = vmatprep.subr.mxu0 %v15155_v26 }
 0x155   :  { %10711 = vmatmul.mubr.msk.f32.gmra.mxu0 %vm63_vm0, %v261_v16  ;;  %10743 = vmatmul.mubr.msk.f32.gmra.mxu1 %vm63_vm0, %v260_v13 }
 0x156   :  { %10713 = vmatprep.mubr.msk.f32.mxu0 %vm11666_vm2, %v15155_v26  ;;  %10745 = vmatprep.mubr.msk.f32.mxu1 %vm11666_vm2, %v15155_v26 }
 0x157   :  { %10770 = vmatpush3.msra.mxu0 %v93_v43 }
 0x158   :  { %10848 = vmatprep.subr.mxu0 %v15155_v26 }
 0x159   :  { %10714 = vmatmul.mubr.msk.f32.gmra.mxu0 %vm63_vm0, %v262_v44  ;;  %10746 = vmatmul.mubr.msk.f32.gmra.mxu1 %vm63_vm0, %v261_v16 }
 0x15a   :  { %10716 = vmatprep.mubr.msk.f32.mxu0 %vm11666_vm2, %v15155_v26  ;;  %10748 = vmatprep.mubr.msk.f32.mxu1 %vm11666_vm2, %v15155_v26 }
 0x15d   :  { %10717 = vmatmul.mubr.msk.f32.gmra.mxu0 %vm63_vm0, %v263_v46  ;;  %10749 = vmatmul.mubr.msk.f32.gmra.mxu1 %vm63_vm0, %v262_v44 }
 0x15e   :  { %10751 = vmatprep.mubr.msk.f32.mxu1 %vm11666_vm2, %v15155_v26  ;;  %10771 = vmatprep.mubr.msk.f32.mxu0 %vm11666_vm2, %v15155_v26 }
 0x161   :  { %10752 = vmatmul.mubr.msk.f32.gmra.mxu1 %vm63_vm0, %v263_v46  ;;  %10772 = vmatmul.mubr.msk.f32.vlgmr.msra.gmra.mxu0 %vm63_vm0, %v258_v28  ;;  %v410_v28 = vsub.s32 3, %v11919_v45 }
 0x162   :  { %10754 = vmatprep.mubr.msk.f32.mxu1 %vm11666_vm2, %v15155_v26  ;;  %10774 = vmatprep.mubr.msk.f32.mxu0 %vm11666_vm2, %v15155_v26 }
 0x163   :  { %v12131_v40 = vrot.slane %v11925_v55, %v410_v28 }
 0x165   :  { %10755 = vmatmul.mubr.msk.f32.gmra.mxu1 %vm63_vm0, %v11941_v12  ;;  %10775 = vmatmul.mubr.msk.f32.gmra.mxu0 %vm63_vm0, %v259_v33 }
 0x166   :  { %10757 = vmatprep.mubr.msk.f32.mxu1 %vm11666_vm2, %v15155_v26  ;;  %10777 = vmatprep.mubr.msk.f32.mxu0 %vm11666_vm2, %v15155_v26 }
 0x169   :  { %10758 = vmatmul.mubr.msk.f32.gmra.mxu1 %vm63_vm0, %v11957_v20  ;;  %10778 = vmatmul.mubr.msk.f32.gmra.mxu0 %vm63_vm0, %v260_v13 }
 0x16a   :  { %10760 = vmatprep.mubr.msk.f32.mxu1 %vm11666_vm2, %v15155_v26  ;;  %10780 = vmatprep.mubr.msk.f32.mxu0 %vm11666_vm2, %v15155_v26 }
 0x16d   :  { %10761 = vmatmul.mubr.msk.f32.gmra.mxu1 %vm63_vm0, %v11977_v3  ;;  %10781 = vmatmul.mubr.msk.f32.gmra.mxu0 %vm63_vm0, %v261_v16 }
 0x16e   :  { %10783 = vmatprep.mubr.msk.f32.mxu0 %vm11666_vm2, %v15155_v26  ;;  %10808 = vmatprep.mubr.msk.f32.mxu1 %vm11666_vm2, %v15155_v26 }
 0x171   :  { %10784 = vmatmul.mubr.msk.f32.gmra.mxu0 %vm63_vm0, %v262_v44 }
 0x172   :  { %10786 = vmatprep.mubr.msk.f32.mxu0 %vm11666_vm2, %v15155_v26 }
 0x175   :  { %10787 = vmatmul.mubr.msk.f32.gmra.mxu0 %vm63_vm0, %v263_v46 }
 0x176   :  { %10789 = vmatprep.mubr.msk.f32.mxu0 %vm11666_vm2, %v15155_v26 }
 0x179   :  { %10790 = vmatmul.mubr.msk.f32.gmra.mxu0 %vm63_vm0, %v11941_v12 }
 0x17a   :  { %10792 = vmatprep.mubr.msk.f32.mxu0 %vm11666_vm2, %v15155_v26 }
 0x17d   :  { %10793 = vmatmul.mubr.msk.f32.gmra.mxu0 %vm63_vm0, %v11957_v20 }
 0x17e   :  { %10795 = vmatprep.mubr.msk.f32.mxu0 %vm11666_vm2, %v15155_v26 }
 0x181   :  { %10796 = vmatmul.mubr.msk.f32.gmra.mxu0 %vm63_vm0, %v11977_v3 }
 0x182   :  { %10858 = vmatprep.mubr.msk.f32.mxu0 %vm11666_vm2, %v15155_v26 }
 0x201   :  { %v394_v59 = vpop.f32.mrf.mxu1 }
 0x202   :  { %v395_v61 = vadd.f32 %v394_v59, %v12095_v53 }
 0x203   :  { %v10721_v62 = vpop.f32.mrf.mxu1 }
 0x204   :  { %v939_v63 = vcombine.high %v395_v61, %v395_v61  ;;  %v946_v0 = vrot.slane %v395_v61, %v12098_v58 }
 0x205   :  { %v399_v1 = vpop.f32.mrf.mxu1 }
 0x206   :  { %v953_v2 = vrot.slane %v939_v63, %v12098_v58  ;;  %v400_v4 = vadd.f32 %v399_v1, %v12095_v53  ;;  %v954_v5 = vcombine.high %v946_v0, %v946_v0  ;;  %v12108_v49 = vrot.slane %v946_v0, %v12098_v58 }
 0x207   :  { %v10724_v7 = vpop.f32.mrf.mxu1 }
 0x208   :  { %v955_v8 = vcombine.high %v953_v2, %v953_v2  ;;  %v969_v9 = vrot.slane %v953_v2, %v12098_v58  ;;  %v988_v10 = vcombine.high %v400_v4, %v400_v4  ;;  %v995_v11 = vrot.slane %v400_v4, %v12098_v58 }
 0x209   :  { %v364_v12 = vpop.f32.mrf.mxu0  ;;  %v404_v14 = vpop.f32.mrf.mxu1  ;;  %v976_v18 = vrot.slane %v954_v5, %v12098_v58  ;;  %v984_v31 = vcombine.high %v12108_v49, %v12108_v49 }
 0x20a   :  { %v983_v15 = vrot.slane %v955_v8, %v12098_v58  ;;  %v985_v17 = vcombine.high %v969_v9, %v969_v9  ;;  %v1002_v19 = vrot.slane %v988_v10, %v12098_v58  ;;  %v365_v57 = vadd.f32 %v364_v12, %v12095_v53 }
 0x20b   :  { %v10703_v20 = vpop.f32.mrf.mxu0  ;;  %v10727_v50 = vpop.f32.mrf.mxu1  ;;  %v12114_v24 = vrot.slane %v995_v11, %v12098_v58  ;;  %v986_v32 = vcombine.high %v976_v18, %v976_v18  ;;  %v1003_v33 = vcombine.high %v995_v11, %v995_v11  ;;  %v405_v38 = vadd.f32 %v404_v14, %v12095_v53 }
 0x20c   :  { %v2536_v22 = vcombine.low %v983_v15, %v985_v17  ;;  %v987_v23 = vcombine.high %v983_v15, %v983_v15  ;;  %v1004_v25 = vcombine.high %v1002_v19, %v1002_v19  ;;  %v12117_v60 = vrot.slane %v1002_v19, %v12098_v58 }
 0x20d   :  { %v369_v27 = vpop.f32.mrf.mxu0  ;;  %v478_v3 = vpop.f32.mrf.mxu1  ;;  %v645_v30 = vcombine.high %v365_v57, %v365_v57  ;;  %v652_v37 = vrot.slane %v365_v57, %v12098_v58  ;;  %v12139_v46 = vcombine.low %v976_v18, %v984_v31  ;;  %v12142_v48 = vrot.slane %v405_v38, %v12098_v58 }
 0x20e   :  { %v2537_v29 = vcombine.low %v987_v23, %v12114_v24  ;;  %v1032_v6 = vrot.slane %v1004_v25, %v12098_v58  ;;  %v2558_v36 = vrot.slane %v2536_v22, %v12098_v58  ;;  %v1034_v39 = vcombine.high %v12117_v60, %v12117_v60 }
 0x20f   :  { %v10706_v34 = vpop.f32.mrf.mxu0  ;;  %v10738_v35 = vpop.f32.mrf.mxu1  ;;  %v659_v43 = vrot.slane %v645_v30, %v12098_v58  ;;  %v660_v44 = vcombine.high %v652_v37, %v652_v37  ;;  %15185 = vst [vmem:[#allocation4_spill] sm:$0xff] %v12139_v46  ;;  %15186 = vst [vmem:[#allocation5_spill] sm:$0xff] %v12142_v48  ;;  %v12144_v59 = vcombine.low %v986_v32, %v969_v9 }
 0x210   :  { %v2565_v13 = vrot.slane %v2537_v29, %v12098_v58  ;;  %v1036_v47 = vcombine.high %v1032_v6, %v1032_v6  ;;  %v1025_v61 = vrot.slane %v1003_v33, %v12098_v58  ;;  %v370_v62 = vadd.f32 %v369_v27, %v12095_v53 }
 0x211   :  { %v374_v16 = vpop.f32.mrf.mxu0  ;;  %v12133_v41 = vpop.f32.mrf.mxu1  ;;  %15187 = vst [vmem:[#allocation6_spill] sm:$0xff] %v12144_v59  ;;  %v2585_v63 = vcombine.low %v1032_v6, %v1034_v39  ;;  %v1051_v0 = vrot.slane %v12142_v48, %v12098_v58  ;;  %v661_v5 = vcombine.high %v659_v43, %v659_v43  ;;  %v682_v7 = vrot.slane %v660_v44, %v12098_v58 }
 0x212   :  { %v12135_v42 = vcombine.low %v2558_v36, %v2565_v13  ;;  %v375_v1 = vadd.f32 %v374_v16, %v12095_v53  ;;  %v479_v8 = vadd.f32 %v478_v3, %v12131_v40  ;;  %v12158_v9 = vrot.slane %v11925_v55, %v524_v21 }
 0x213   :  { %v10709_v51 = vpop.f32.mrf.mxu0  ;;  %v10741_v52 = vpop.f32.mrf.mxu1  ;;  %v2586_v11 = vcombine.low %v1036_v47, %v1051_v0  ;;  %v694_v12 = vcombine.high %v370_v62, %v370_v62  ;;  %v701_v14 = vrot.slane %v370_v62, %v12098_v58  ;;  %v1033_v19 = vcombine.high %v12114_v24, %v12114_v24 }
 0x214   :  { %15184 = vst [vmem:[#allocation3_spill] sm:$0xff] %v12135_v42  ;;  %v1035_v57 = vcombine.high %v1025_v61, %v1025_v61  ;;  %v668_v20 = vrot.slane %v652_v37, %v12098_v58  ;;  %v2607_v55 = vrot.slane %v2585_v63, %v12098_v58  ;;  %v689_v28 = vrot.slane %v661_v5, %v12098_v58 }
 0x215   :  { %v12151_v2 = vpop.f32.mrf.mxu0  ;;  %v12153_v4 = vpop.f32.mrf.mxu1  ;;  %v2614_v50 = vrot.slane %v2586_v11, %v12098_v58  ;;  %v708_v22 = vrot.slane %v694_v12, %v12098_v58  ;;  %v709_v23 = vcombine.high %v701_v14, %v701_v14  ;;  %v1068_v29 = vcombine.high %v479_v8, %v479_v8 }
 0x216   :  { %v1905_v3 = vcombine.low %v668_v20, %v682_v7  ;;  %v1075_v24 = vrot.slane %v479_v8, %v12098_v58  ;;  %v675_v30 = vrot.slane %v659_v43, %v12098_v58  ;;  %v10187_v31 = vcombine.high %v668_v20, %v682_v7 }
 0x217   :  { %v10712_v15 = vpop.f32.mrf.mxu0  ;;  %v10744_v17 = vpop.f32.mrf.mxu1  ;;  %v12178_v32 = vcombine.low %v2607_v55, %v2614_v50  ;;  %v710_v33 = vcombine.high %v708_v22, %v708_v22  ;;  %v731_v35 = vrot.slane %v709_v23, %v12098_v58  ;;  %v1082_v36 = vrot.slane %v1068_v29, %v12098_v58 }
 0x218   :  { %v1083_v13 = vcombine.high %v1075_v24, %v1075_v24  ;;  %v743_v37 = vcombine.high %v375_v1, %v375_v1  ;;  %v12182_v38 = vcombine.low %v1025_v61, %v1033_v19  ;;  %v12185_v39 = vcombine.low %v1035_v57, %v12117_v60 }
 0x219   :  { %v12171_v25 = vpop.f32.mrf.mxu0  ;;  %v12173_v27 = vpop.f32.mrf.mxu1  ;;  %15188 = vst [vmem:[#allocation7_spill] sm:$0xff] %v12178_v32  ;;  %v738_v16 = vrot.slane %v710_v33, %v12098_v58  ;;  %v750_v43 = vrot.slane %v375_v1, %v12098_v58  ;;  %v1907_v47 = vcombine.low %v675_v30, %v689_v28  ;;  %v10188_v51 = vcombine.high %v675_v30, %v689_v28 }
 0x21a   :  { %15189 = vst [vmem:[#allocation8_spill] sm:$0xff] %v12182_v38  ;;  %15190 = vst [vmem:[#allocation9_spill] sm:$0xff] %v12185_v39  ;;  %v12194_v52 = vrot.slane %v1905_v3, %v12098_v58  ;;  %v717_v62 = vrot.slane %v701_v14, %v12098_v58  ;;  %v12198_v61 = vrot.slane %v10187_v31, %v12098_v58 }
 0x21b   :  { %v10715_v6 = vpop.f32.mrf.mxu0  ;;  %v10747_v34 = vpop.f32.mrf.mxu1  ;;  %v724_v60 = vrot.slane %v708_v22, %v12098_v58  ;;  %v1084_v63 = vcombine.high %v1082_v36, %v1082_v36  ;;  %v1105_v0 = vrot.slane %v1083_v13, %v12098_v58  ;;  %v757_v11 = vrot.slane %v743_v37, %v12098_v58 }
 0x21c   :  { %v1954_v7 = vcombine.low %v717_v62, %v731_v35  ;;  %v10189_v8 = vcombine.high %v717_v62, %v731_v35  ;;  %v484_v12 = vadd.f32 %v12133_v41, %v12131_v40  ;;  %v1091_v14 = vrot.slane %v1075_v24, %v12098_v58 }
 0x21d   :  { %v12189_v44 = vpop.f32.mrf.mxu0  ;;  %v12191_v21 = vpop.f32.mrf.mxu1  ;;  %v1956_v15 = vcombine.low %v724_v60, %v738_v16  ;;  %v10190_v17 = vcombine.high %v724_v60, %v738_v16  ;;  %v758_v19 = vcombine.high %v750_v43, %v750_v43  ;;  %v12215_v22 = vrot.slane %v1907_v47, %v12098_v58 }
 0x21e   :  { %v12218_v41 = vrot.slane %v10188_v51, %v12098_v58  ;;  %v1098_v28 = vrot.slane %v1082_v36, %v12098_v58  ;;  %v1112_v3 = vrot.slane %v1084_v63, %v12098_v58  ;;  %v2115_v29 = vcombine.low %v1091_v14, %v1105_v0 }
 0x21f   :  { %v10718_v1 = vpop.f32.mrf.mxu0  ;;  %v10750_v5 = vpop.f32.mrf.mxu1  ;;  %v12225_v31 = vrot.slane %v1954_v7, %v12098_v58  ;;  %v12228_v33 = vrot.slane %v10189_v8, %v12098_v58  ;;  %v759_v6 = vcombine.high %v757_v11, %v757_v11  ;;  %v1117_v34 = vcombine.high %v484_v12, %v484_v12 }
 0x220   :  { %v12231_v35 = vrot.slane %v1956_v15, %v12098_v58  ;;  %v12234_v13 = vrot.slane %v10190_v17, %v12098_v58  ;;  %v10195_v36 = vcombine.high %v1091_v14, %v1105_v0  ;;  %v780_v37 = vrot.slane %v758_v19, %v12098_v58 }
 0x221   :  { %v12206_v57 = vpop.f32.mrf.mxu1  ;;  %v12208_v20 = vpop.f32.mrf.mxu0  ;;  %v1124_v51 = vrot.slane %v484_v12, %v12098_v58  ;;  %v1131_v62 = vrot.slane %v1117_v34, %v12098_v58  ;;  %v380_v60 = vadd.f32 %v12151_v2, %v12095_v53  ;;  %v489_v63 = vadd.f32 %v12153_v4, %v12131_v40 }
 0x222   :  { %v2117_v1 = vcombine.low %v1098_v28, %v1112_v3  ;;  %v10196_v5 = vcombine.high %v1098_v28, %v1112_v3  ;;  %v12248_v0 = vrot.slane %v2115_v29, %v12098_v58  ;;  %v766_v7 = vrot.slane %v750_v43, %v12098_v58 }
 0x223   :  { %v10753_v24 = vpop.f32.mrf.mxu1  ;;  %v10773_v30 = vpop.f32.mrf.mxu0  ;;  %v773_v17 = vrot.slane %v757_v11, %v12098_v58  ;;  %v787_v12 = vrot.slane %v759_v6, %v12098_v58  ;;  %v1132_v14 = vcombine.high %v1124_v51, %v1124_v51  ;;  %v1133_v19 = vcombine.high %v1131_v62, %v1131_v62 }
 0x224   :  { %v2003_v24 = vcombine.low %v766_v7, %v780_v37  ;;  %v10191_v2 = vcombine.high %v766_v7, %v780_v37  ;;  %v792_v30 = vcombine.high %v380_v60, %v380_v60  ;;  %v799_v4 = vrot.slane %v380_v60, %v12098_v58 }
 0x225   :  { %v12237_v16 = vpop.f32.mrf.mxu1  ;;  %v12239_v47 = vpop.f32.mrf.mxu0  ;;  %v1140_v3 = vrot.slane %v1124_v51, %v12098_v58  ;;  %v1154_v43 = vrot.slane %v1132_v14, %v12098_v58  ;;  %v1166_v29 = vcombine.high %v489_v63, %v489_v63  ;;  %v385_v11 = vadd.f32 %v12171_v25, %v12095_v53 }
 0x226   :  { %v12263_v6 = vrot.slane %v10195_v36, %v12098_v58  ;;  %v1161_v37 = vrot.slane %v1133_v19, %v12098_v58  ;;  %v806_v7 = vrot.slane %v792_v30, %v12098_v58  ;;  %v1173_v60 = vrot.slane %v489_v63, %v12098_v58 }
 0x227   :  { %v10756_v8 = vpop.f32.mrf.mxu1  ;;  %v10776_v15 = vpop.f32.mrf.mxu0  ;;  %v2005_v56 = vcombine.low %v773_v17, %v787_v12  ;;  %v2164_v54 = vcombine.low %v1140_v3, %v1154_v43  ;;  %v10197_v51 = vcombine.high %v1140_v3, %v1154_v43  ;;  %v807_v55 = vcombine.high %v799_v4, %v799_v4 }
 0x228   :  { %v10192_v14 = vcombine.high %v773_v17, %v787_v12  ;;  %v12269_v50 = vrot.slane %v2003_v24, %v12098_v58  ;;  %v12272_v25 = vrot.slane %v10191_v2, %v12098_v58  ;;  %v1147_v36 = vrot.slane %v1131_v62, %v12098_v58 }
 0x229   :  { %v12254_v34 = vpop.f32.mrf.mxu1  ;;  %v12256_v28 = vpop.f32.mrf.mxu0  ;;  %v808_v3 = vcombine.high %v806_v7, %v806_v7  ;;  %v1180_v17 = vrot.slane %v1166_v29, %v12098_v58  ;;  %v12286_v12 = vrot.slane %v10196_v5, %v12098_v58  ;;  %v1181_v43 = vcombine.high %v1173_v60, %v1173_v60 }
 0x22a   :  { %15191 = vst [vmem:[#allocation10_spill] sm:$0xff] %v12269_v50  ;;  %15192 = vst [vmem:[#allocation11_spill] sm:$0xff] %v12272_v25  ;;  %v2166_v24 = vcombine.low %v1147_v36, %v1161_v37  ;;  %v10198_v2 = vcombine.high %v1147_v36, %v1161_v37  ;;  %v12291_v18 = vrot.slane %v2164_v54, %v12098_v58 }
 0x22b   :  { %v10759_v8 = vpop.f32.mrf.mxu1  ;;  %v10779_v15 = vpop.f32.mrf.mxu0  ;;  %v829_v63 = vrot.slane %v807_v55, %v12098_v58  ;;  %v12298_v29 = vrot.slane %v2005_v56, %v12098_v58  ;;  %v12301_v5 = vrot.slane %v10192_v14, %v12098_v58  ;;  %v815_v36 = vrot.slane %v799_v4, %v12098_v58 }
 0x22c   :  { %v12282_v8 = vrot.slane %v2117_v1, %v12098_v58  ;;  %v12294_v1 = vrot.slane %v10197_v51, %v12098_v58  ;;  %v822_v54 = vrot.slane %v806_v7, %v12098_v58  ;;  %v836_v51 = vrot.slane %v808_v3, %v12098_v58 }
 0x22d   :  { %v12275_v19 = vpop.f32.mrf.mxu1  ;;  %v12277_v30 = vpop.f32.mrf.mxu0  ;;  %15193 = vst [vmem:[#allocation12_spill] sm:$0xff] %v12298_v29  ;;  %v841_v26 = vcombine.high %v385_v11, %v385_v11  ;;  %v12311_v55 = vrot.slane %v2166_v24, %v12098_v58  ;;  %v12314_v56 = vrot.slane %v10198_v2, %v12098_v58  ;;  %v1203_v14 = vrot.slane %v1181_v43, %v12098_v58 }
 0x22e   :  { %v848_v37 = vrot.slane %v385_v11, %v12098_v58  ;;  %v2052_v23 = vcombine.low %v815_v36, %v829_v63  ;;  %v10193_v7 = vcombine.high %v815_v36, %v829_v63  ;;  %v1189_v3 = vrot.slane %v1173_v60, %v12098_v58 }
 0x22f   :  { %v10762_v62 = vpop.f32.mrf.mxu1  ;;  %v10782_v15 = vpop.f32.mrf.mxu0  ;;  %v855_v45 = vrot.slane %v841_v26, %v12098_v58  ;;  %v494_v2 = vadd.f32 %v12173_v27, %v12131_v40  ;;  %v2054_v11 = vcombine.low %v822_v54, %v836_v51  ;;  %v390_v63 = vadd.f32 %v12189_v44, %v12095_v53 }
 0x230   :  { %v1182_v15 = vcombine.high %v1180_v17, %v1180_v17  ;;  %v856_v48 = vcombine.high %v848_v37, %v848_v37  ;;  %v12323_v24 = vrot.slane %v848_v37, %v12098_v58  ;;  %v2213_v60 = vcombine.low %v1189_v3, %v1203_v14 }
 0x231   :  { %v12306_v62 = vpop.f32.mrf.mxu0  ;;  %v857_v36 = vcombine.high %v855_v45, %v855_v45  ;;  %v871_v26 = vrot.slane %v855_v45, %v12098_v58  ;;  %v10199_v38 = vcombine.high %v1189_v3, %v1203_v14  ;;  %v1215_v39 = vcombine.high %v494_v2, %v494_v2 }
 0x232   :  { %15194 = vst [vmem:[#allocation13_spill] sm:$0xff] %v12323_v24  ;;  %v1210_v4 = vrot.slane %v1182_v15, %v12098_v58  ;;  %v878_v37 = vrot.slane %v856_v48, %v12098_v58  ;;  %v1222_v27 = vrot.slane %v494_v2, %v12098_v58  ;;  %v890_v42 = vcombine.high %v390_v63, %v390_v63 }
 0x233   :  { %v10785_v10 = vpop.f32.mrf.mxu0  ;;  %v10194_v46 = vcombine.high %v822_v54, %v836_v51  ;;  %v886_v15 = vcombine.high %v12323_v24, %v12323_v24  ;;  %v885_v45 = vrot.slane %v857_v36, %v12098_v58  ;;  %v887_v59 = vcombine.high %v871_v26, %v871_v26 }
 0x234   :  { %v1196_v10 = vrot.slane %v1180_v17, %v12098_v58  ;;  %v12337_v17 = vrot.slane %v2052_v23, %v12098_v58  ;;  %v888_v53 = vcombine.high %v878_v37, %v878_v37  ;;  %v1229_v48 = vrot.slane %v1215_v39, %v12098_v58 }
 0x235   :  { %v12327_v43 = vpop.f32.mrf.mxu0  ;;  %v12346_v14 = vrot.slane %v10193_v7, %v12098_v58  ;;  %v12349_v2 = vrot.slane %v2213_v60, %v12098_v58  ;;  %v12352_v25 = vrot.slane %v10199_v38, %v12098_v58  ;;  %v897_v50 = vrot.slane %v390_v63, %v12098_v58 }
 0x236   :  { %15195 = vst [vmem:[#allocation14_spill] sm:$0xff] %v12337_v17  ;;  %v2215_v3 = vcombine.low %v1196_v10, %v1210_v4  ;;  %v10200_v54 = vcombine.high %v1196_v10, %v1210_v4  ;;  %v2437_v51 = vcombine.low %v888_v53, %v871_v26  ;;  %v904_v36 = vrot.slane %v890_v42, %v12098_v58 }
 0x237   :  { %v10788_v32 = vpop.f32.mrf.mxu0  ;;  %15196 = vst [vmem:[#allocation15_spill] sm:$0xff] %v12346_v14  ;;  %v12357_v39 = vrot.slane %v2054_v11, %v12098_v58  ;;  %v12360_v7 = vrot.slane %v10194_v46, %v12098_v58  ;;  %v2436_v29 = vcombine.low %v878_v37, %v886_v15  ;;  %v1231_v4 = vcombine.high %v1229_v48, %v1229_v48 }
 0x238   :  { %v1230_v32 = vcombine.high %v1222_v27, %v1222_v27  ;;  %v2438_v26 = vcombine.low %v885_v45, %v887_v59  ;;  %v889_v53 = vcombine.high %v885_v45, %v885_v45  ;;  %v906_v38 = vcombine.high %v904_v36, %v904_v36 }
 0x239   :  { %v12341_v44 = vpop.f32.mrf.mxu0  ;;  %15197 = vst [vmem:[#allocation16_spill] sm:$0xff] %v12357_v39  ;;  %v12368_v42 = vrot.slane %v2215_v3, %v12098_v58  ;;  %v12371_v11 = vrot.slane %v10200_v54, %v12098_v58  ;;  %v2453_v46 = vrot.slane %v2437_v51, %v12098_v58  ;;  %v1238_v59 = vrot.slane %v1222_v27, %v12098_v58 }
 0x23a   :  { %v1252_v60 = vrot.slane %v1230_v32, %v12098_v58  ;;  %v905_v32 = vcombine.high %v897_v50, %v897_v50  ;;  %v12378_v45 = vrot.slane %v897_v50, %v12098_v58  ;;  %v2446_v3 = vrot.slane %v2436_v29, %v12098_v58 }
 0x23b   :  { %v10791_v23 = vpop.f32.mrf.mxu0  ;;  %v12384_v54 = vrot.slane %v1231_v4, %v12098_v58  ;;  %v12387_v51 = vrot.slane %v906_v38, %v12098_v58  ;;  %v12392_v63 = vrot.slane %v1229_v48, %v12098_v58  ;;  %v2460_v15 = vrot.slane %v2438_v26, %v12098_v58 }
 0x23c   :  { %v2262_v27 = vcombine.low %v1238_v59, %v1252_v60  ;;  %v2439_v50 = vcombine.low %v889_v53, %v12378_v45  ;;  %v2468_v14 = vcombine.low %v2446_v3, %v2453_v46  ;;  %v10201_v23 = vcombine.high %v1238_v59, %v1252_v60 }
 0x23d   :  { %v12362_v10 = vpop.f32.mrf.mxu0  ;;  %v12397_v29 = vrot.slane %v904_v36, %v12098_v58  ;;  %v938_v4 = vcombine.high %v12387_v51, %v12387_v51  ;;  %v12402_v24 = vrot.slane %v905_v32, %v12098_v58  ;;  %v499_v17 = vadd.f32 %v12191_v21, %v12131_v40 }
 0x23e   :  { %v2467_v48 = vrot.slane %v2439_v50, %v12098_v58  ;;  %v1938_v26 = vcombine.low %v12215_v22, %v12218_v41  ;;  %v935_v53 = vcombine.high %v12378_v45, %v12378_v45  ;;  %v2476_v22 = vrot.slane %v2468_v14, %v12098_v58 }
 0x23f   :  { %v10794_v37 = vpop.f32.mrf.mxu0  ;;  %v12416_v46 = vcombine.low %v938_v4, %v12108_v49  ;;  %v1264_v32 = vcombine.high %v499_v17, %v499_v17  ;;  %v1271_v21 = vrot.slane %v499_v17, %v12098_v58  ;;  %v12422_v41 = vrot.slane %v2262_v27, %v12098_v58 }
 0x240   :  { %v2469_v59 = vcombine.low %v2460_v15, %v2467_v48  ;;  %v1952_v3 = vrot.slane %v1938_v26, %v12098_v58  ;;  %v15199_v50 = vcombine.low %v12194_v52, %v12198_v61  ;;  %v504_v49 = vadd.f32 %v12206_v57, %v12131_v40 }
 0x241   :  { %v12389_v37 = vpop.f32.mrf.mxu0  ;;  %15198 = vst [vmem:[#allocation17_spill] sm:$0xff] %v12416_v46  ;;  %v1278_v45 = vrot.slane %v1264_v32, %v12098_v58  ;;  %v1279_v17 = vcombine.high %v1271_v21, %v1271_v21  ;;  %v1287_v4 = vrot.slane %v1271_v21, %v12098_v58  ;;  %v593_v26 = vadd.f32 %v12208_v20, %v12158_v9 }
 0x242   :  { %v2483_v15 = vrot.slane %v2469_v59, %v12098_v58  ;;  %v1313_v14 = vcombine.high %v504_v49, %v504_v49  ;;  %v1320_v27 = vrot.slane %v504_v49, %v12098_v58  ;;  %v12443_v32 = vrot.slane %v10201_v23, %v12098_v58 }
 0x243   :  { %v10797_v38 = vpop.f32.mrf.mxu0  ;;  %v1280_v61 = vcombine.high %v1278_v45, %v1278_v45  ;;  %v1294_v57 = vrot.slane %v1278_v45, %v12098_v58  ;;  %v1301_v59 = vrot.slane %v1279_v17, %v12098_v58  ;;  %v2317_v21 = vrot.slane %v1287_v4, %v12098_v58 }
 0x244   :  { %v1945_v38 = vrot.slane %v15199_v50, %v12098_v58  ;;  %v12438_v52 = vcombine.low %v2476_v22, %v2483_v15  ;;  %v1309_v50 = vcombine.high %v1287_v4, %v1287_v4  ;;  %v2148_v49 = vcombine.low %v12282_v8, %v12286_v12 }
 0x245   :  { %v1308_v20 = vrot.slane %v1280_v61, %v12098_v58  ;;  %v1310_v22 = vcombine.high %v1294_v57, %v1294_v57  ;;  %v12452_v15 = vrot.slane %v2317_v21, %v12098_v58  ;;  %v1327_v45 = vrot.slane %v1313_v14, %v12098_v58 }
 0x246   :  { %v12433_v48 = vcombine.low %v1945_v38, %v1952_v3  ;;  %15201 = vst [vmem:[#allocation19_spill] sm:$0xff] %v12438_v52  ;;  %v1328_v3 = vcombine.high %v1320_v27, %v1320_v27  ;;  %v1311_v38 = vcombine.high %v1301_v59, %v1301_v59  ;;  %v2646_v23 = vcombine.low %v1301_v59, %v1309_v50 }
 0x247   :  { %15202 = vst [vmem:[#allocation20_spill] sm:$0xff] %v12452_v15  ;;  %v1491_v17 = vcombine.high %v593_v26, %v593_v26  ;;  %v2648_v60 = vcombine.low %v1308_v20, %v1310_v22  ;;  %v1312_v36 = vcombine.high %v1308_v20, %v1308_v20  ;;  %v1336_v52 = vrot.slane %v1320_v27, %v12098_v58 }
 0x248   :  { %15200 = vst [vmem:[#allocation18_spill] sm:$0xff] %v12433_v48  ;;  %4161 = vrot.lane.b32.xlu0 %v12433_v48, %s11668_s4  ;;  %v2647_v4 = vcombine.low %v1311_v38, %v1294_v57  ;;  %v936_v61 = vcombine.high %v12397_v29, %v12397_v29  ;;  %v937_v46 = vcombine.high %v12402_v24, %v12402_v24  ;;  %v15205_v21 = vmov 0.0  }
 0x249   :  { %v12461_v8 = vcombine.low %v12402_v24, %v935_v53  ;;  %v1350_v12 = vrot.slane %v1328_v3, %v12098_v58  ;;  %10799 = vmatpush3.xpose.msk.msra.mxu1 %vm2325_vm3, %v12452_v15  ;;  %v2656_v14 = vrot.slane %v2646_v23, %v12098_v58  ;;  %v2649_v59 = vcombine.low %v1312_v36, %v1336_v52 }
 0x24a   :  { %v2663_v57 = vrot.slane %v2647_v4, %v12098_v58  ;;  %v15204_v27 = vcombine.low %v12248_v0, %v12263_v6  ;;  %10800 = vmatprep.subr.mxu1 %v15205_v21  ;;  %v1329_v20 = vcombine.high %v1327_v45, %v1327_v45  ;;  %v1343_v24 = vrot.slane %v1327_v45, %v12098_v58 }
 0x24b   :  { %15203 = vst [vmem:[#allocation21_spill] sm:$0xff] %v12461_v8  ;;  %v1498_v53 = vrot.slane %v593_v26, %v12098_v58  ;;  %v1505_v3 = vrot.slane %v1491_v17, %v12098_v58  ;;  %v2670_v38 = vrot.slane %v2648_v60, %v12098_v58  ;;  %v2677_v36 = vrot.slane %v2649_v59, %v12098_v58 }
 0x24c   :  { %v2155_v50 = vrot.slane %v15204_v27, %v12098_v58  ;;  %v12476_v22 = vcombine.low %v2656_v14, %v2663_v57  ;;  %v2162_v23 = vrot.slane %v2148_v49, %v12098_v58  ;;  %v1358_v4 = vcombine.high %v1336_v52, %v1336_v52 }
 0x24d   :  { %v1360_v0 = vcombine.high %v1350_v12, %v1350_v12  ;;  %v1506_v6 = vcombine.high %v1498_v53, %v1498_v53  ;;  %v1507_v27 = vcombine.high %v1505_v3, %v1505_v3  ;;  %v15206_v45 = vcombine.low %v12392_v63, %v12384_v54 }
 0x24e   :  { %v15207_v26 = vcombine.high %v12392_v63, %v12384_v54  ;;  %v12493_v60 = vcombine.low %v2670_v38, %v2677_v36  ;;  %v12495_v14 = vcombine.low %v2155_v50, %v2162_v23  ;;  %v12498_v52 = vcombine.low %v937_v46, %v12397_v29 }
 0x24f   :  { %v12485_v39 = vrot.slane %v15206_v45, %v12098_v58  ;;  %v12501_v49 = vcombine.low %v12387_v51, %v936_v61  ;;  %v1357_v57 = vrot.slane %v1329_v20, %v12098_v58  ;;  %v509_v59 = vadd.f32 %v12237_v16, %v12131_v40 }
 0x250   :  { %v12491_v17 = vrot.slane %v15207_v26, %v12098_v58  ;;  %15208 = vst [vmem:[#allocation22_spill] sm:$0xff] %v12498_v52  ;;  %v1359_v38 = vcombine.high %v1343_v24, %v1343_v24  ;;  %4171 = vrot.lane.b32.xlu1 %v12495_v14, %s11668_s4  ;;  %v598_v29 = vadd.f32 %v12239_v47, %v12158_v9 }
 0x251   :  { %15209 = vst [vmem:[#allocation23_spill] sm:$0xff] %v12501_v49  ;;  %v2695_v51 = vcombine.low %v1350_v12, %v1358_v4  ;;  %v2696_v46 = vcombine.low %v1360_v0, %v1343_v24  ;;  %v1528_v61 = vrot.slane %v1506_v6, %v12098_v58  ;;  %v1535_v50 = vrot.slane %v1507_v27, %v12098_v58 }
 0x252   :  { %v1362_v16 = vcombine.high %v509_v59, %v509_v59  ;;  %v1369_v20 = vrot.slane %v509_v59, %v12098_v58  ;;  %v1540_v36 = vcombine.high %v598_v29, %v598_v29  ;;  %v1547_v23 = vrot.slane %v598_v29, %v12098_v58 }
 0x253   :  { %v1514_v47 = vrot.slane %v1498_v53, %v12098_v58  ;;  %v1361_v12 = vcombine.high %v1357_v57, %v1357_v57  ;;  %v2697_v24 = vcombine.low %v1357_v57, %v1359_v38  ;;  %v1521_v4 = vrot.slane %v1505_v3, %v12098_v58 }
 0x254   :  { %v1376_v0 = vrot.slane %v1362_v16, %v12098_v58  ;;  %v1377_v6 = vcombine.high %v1369_v20, %v1369_v20  ;;  %v2705_v27 = vrot.slane %v2695_v51, %v12098_v58  ;;  %v1385_v29 = vrot.slane %v1369_v20, %v12098_v58 }
 0x255   :  { %v3088_v59 = vcombine.low %v1514_v47, %v1528_v61  ;;  %v10223_v54 = vcombine.high %v1514_v47, %v1528_v61  ;;  %v2712_v45 = vrot.slane %v2696_v46, %v12098_v58  ;;  %v3090_v63 = vcombine.low %v1521_v4, %v1535_v50 }
 0x256   :  { %v1554_v26 = vrot.slane %v1540_v36, %v12098_v58  ;;  %v1555_v49 = vcombine.high %v1547_v23, %v1547_v23  ;;  %v1378_v57 = vcombine.high %v1376_v0, %v1376_v0  ;;  %v1392_v3 = vrot.slane %v1376_v0, %v12098_v58 }
 0x257   :  { %v2698_v38 = vcombine.low %v1361_v12, %v1385_v29  ;;  %v10224_v16 = vcombine.high %v1521_v4, %v1535_v50  ;;  %v1399_v51 = vrot.slane %v1377_v6, %v12098_v58  ;;  %v2719_v61 = vrot.slane %v2697_v24, %v12098_v58 }
 0x258   :  { %v2197_v20 = vcombine.low %v12311_v55, %v12314_v56  ;;  %v12537_v46 = vrot.slane %v3088_v59, %v12098_v58  ;;  %v12540_v36 = vrot.slane %v10223_v54, %v12098_v58  ;;  %v1407_v47 = vcombine.high %v1385_v29, %v1385_v29 }
 0x259   :  { %v2726_v53 = vrot.slane %v2698_v38, %v12098_v58  ;;  %v12543_v8 = vcombine.low %v2705_v27, %v2712_v45  ;;  %v12546_v50 = vrot.slane %v3090_v63, %v12098_v58  ;;  %v1556_v12 = vcombine.high %v1554_v26, %v1554_v26 }
 0x25a   :  { %v1577_v24 = vrot.slane %v1555_v49, %v12098_v58  ;;  %v1406_v4 = vrot.slane %v1378_v57, %v12098_v58  ;;  %v1408_v55 = vcombine.high %v1392_v3, %v1392_v3  ;;  %v1563_v0 = vrot.slane %v1547_v23, %v12098_v58 }
 0x25b   :  { %v12550_v56 = vcombine.low %v2719_v61, %v2726_v53  ;;  %v1409_v54 = vcombine.high %v1399_v51, %v1399_v51  ;;  %v15210_v6 = vcombine.low %v12291_v18, %v12294_v1  ;;  %v2211_v27 = vrot.slane %v2197_v20, %v12098_v58 }
 0x25c   :  { %v514_v63 = vadd.f32 %v12254_v34, %v12131_v40  ;;  %v12561_v49 = vrot.slane %v10224_v16, %v12098_v58  ;;  %v2744_v29 = vcombine.low %v1399_v51, %v1407_v47  ;;  %v1570_v23 = vrot.slane %v1554_v26, %v12098_v58 }
 0x25d   :  { %v2204_v45 = vrot.slane %v15210_v6, %v12098_v58  ;;  %v1584_v53 = vrot.slane %v1556_v12, %v12098_v58  ;;  %v3137_v57 = vcombine.low %v1563_v0, %v1577_v24  ;;  %v10225_v1 = vcombine.high %v1563_v0, %v1577_v24 }
 0x25e   :  { %v1411_v18 = vcombine.high %v514_v63, %v514_v63  ;;  %v1410_v61 = vcombine.high %v1406_v4, %v1406_v4  ;;  %v1418_v20 = vrot.slane %v514_v63, %v12098_v58  ;;  %v603_v34 = vadd.f32 %v12256_v28, %v12158_v9 }
 0x25f   :  { %v12567_v38 = vcombine.low %v2204_v45, %v2211_v27  ;;  %v2745_v16 = vcombine.low %v1409_v54, %v1392_v3  ;;  %v2746_v6 = vcombine.low %v1406_v4, %v1408_v55  ;;  %v519_v51 = vadd.f32 %v12275_v19, %v12131_v40 }
 0x260   :  { %v1425_v26 = vrot.slane %v1411_v18, %v12098_v58  ;;  %v1426_v47 = vcombine.high %v1418_v20, %v1418_v20  ;;  %v1434_v12 = vrot.slane %v1418_v20, %v12098_v58  ;;  %v1589_v24 = vcombine.high %v603_v34, %v603_v34 }
 0x261   :  { %15211 = vst [vmem:[#allocation24_spill] sm:$0xff] %v12567_v38  ;;  %4173 = vrot.lane.b32.xlu1 %v12567_v38, %s11668_s4  ;;  %v1596_v0 = vrot.slane %v603_v34, %v12098_v58  ;;  %v2754_v45 = vrot.slane %v2744_v29, %v12098_v58  ;;  %v3139_v27 = vcombine.low %v1570_v23, %v1584_v53 }
 0x262   :  { %v1427_v28 = vcombine.high %v1425_v26, %v1425_v26  ;;  %v1441_v3 = vrot.slane %v1425_v26, %v12098_v58  ;;  %v10226_v4 = vcombine.high %v1570_v23, %v1584_v53  ;;  %v1448_v55 = vrot.slane %v1426_v47, %v12098_v58 }
 0x263   :  { %v2747_v54 = vcombine.low %v1410_v61, %v1434_v12  ;;  %v1603_v63 = vrot.slane %v1589_v24, %v12098_v58  ;;  %v1604_v18 = vcombine.high %v1596_v0, %v1596_v0  ;;  %v12587_v20 = vrot.slane %v519_v51, %v12098_v58 }
 0x264   :  { %v1455_v40 = vrot.slane %v1427_v28, %v12098_v58  ;;  %v1457_v19 = vcombine.high %v1441_v3, %v1441_v3  ;;  %v12590_v29 = vrot.slane %v3137_v57, %v12098_v58  ;;  %v1458_v34 = vcombine.high %v1448_v55, %v1448_v55 }
 0x265   :  { %4179 = vrot.lane.b32.xlu1 %v12452_v15, %s11668_s4  ;;  %v2768_v23 = vrot.slane %v2746_v6, %v12098_v58  ;;  %v2775_v53 = vrot.slane %v2747_v54, %v12098_v58  ;;  %v2761_v61 = vrot.slane %v2745_v16, %v12098_v58  ;;  %v12596_v26 = vrot.slane %v10225_v1, %v12098_v58 }
 0x266   :  { %v1605_v47 = vcombine.high %v1603_v63, %v1603_v63  ;;  %v1459_v24 = vcombine.high %v1455_v40, %v1455_v40  ;;  %v1456_v28 = vcombine.high %v1434_v12, %v1434_v12  ;;  %v1626_v51 = vrot.slane %v1604_v18, %v12098_v58 }
 0x267   :  { %v12598_v59 = vcombine.low %v2768_v23, %v2775_v53  ;;  %v608_v57 = vadd.f32 %v12277_v30, %v12158_v9  ;;  %v12606_v54 = vrot.slane %v3139_v27, %v12098_v58  ;;  %v2795_v16 = vcombine.low %v1455_v40, %v1457_v19 }
 0x268   :  { %v1474_v1 = vrot.slane %v12587_v20, %v12098_v58  ;;  %v12611_v15 = vrot.slane %v10226_v4, %v12098_v58  ;;  %v2794_v12 = vcombine.low %v1458_v34, %v1441_v3  ;;  %v1612_v23 = vrot.slane %v1596_v0, %v12098_v58 }
 0x269   :  { %v2295_v18 = vcombine.low %v12485_v39, %v12491_v17  ;;  %v12616_v30 = vcombine.low %v2754_v45, %v2761_v61  ;;  %v1633_v53 = vrot.slane %v1605_v47, %v12098_v58  ;;  %v15212_v27 = vcombine.low %v12422_v41, %v12443_v32 }
 0x26a   :  { %v2796_v6 = vcombine.low %v1459_v24, %v1474_v1  ;;  %v2793_v19 = vcombine.low %v1448_v55, %v1456_v28  ;;  %v1619_v4 = vrot.slane %v1603_v63, %v12098_v58  ;;  %v3186_v52 = vcombine.low %v1612_v23, %v1626_v51 }
 0x26b   :  { %v2302_v40 = vrot.slane %v15212_v27, %v12098_v58  ;;  %v1638_v3 = vcombine.high %v608_v57, %v608_v57  ;;  %v10227_v34 = vcombine.high %v1612_v23, %v1626_v51  ;;  %v2817_v0 = vrot.slane %v2795_v16, %v12098_v58 }
 0x26c   :  { %v2824_v39 = vrot.slane %v2796_v6, %v12098_v58  ;;  %v1645_v17 = vrot.slane %v608_v57, %v12098_v58  ;;  %v2810_v45 = vrot.slane %v2794_v12, %v12098_v58  ;;  %v1467_v61 = vcombine.high %v12587_v20, %v12587_v20 }
 0x26d   :  { %v2309_v41 = vrot.slane %v2295_v18, %v12098_v58  ;;  %v2246_v32 = vcombine.low %v12368_v42, %v12371_v11  ;;  %v3188_v55 = vcombine.low %v1619_v4, %v1633_v53  ;;  %v10228_v63 = vcombine.high %v1619_v4, %v1633_v53 }
 0x26e   :  { %v12633_v47 = vcombine.low %v2817_v0, %v2824_v39  ;;  %v613_v24 = vadd.f32 %v12306_v62, %v12158_v9  ;;  %v1652_v28 = vrot.slane %v1638_v3, %v12098_v58  ;;  %v15213_v20 = vcombine.low %v12349_v2, %v12352_v25 }
 0x26f   :  { %v12638_v51 = vcombine.low %v2302_v40, %v2309_v41  ;;  %v2260_v6 = vrot.slane %v2246_v32, %v12098_v58  ;;  %v12646_v42 = vrot.slane %v3186_v52, %v12098_v58  ;;  %v1653_v11 = vcombine.high %v1645_v17, %v1645_v17 }
 0x270   :  { %v2253_v57 = vrot.slane %v15213_v20, %v12098_v58  ;;  %v1687_v16 = vcombine.high %v613_v24, %v613_v24  ;;  %v1694_v1 = vrot.slane %v613_v24, %v12098_v58  ;;  %v12650_v62 = vrot.slane %v10227_v34, %v12098_v58 }
 0x271   :  { %4177 = vrot.lane.b32.xlu0 %v12638_v51, %s11668_s4  ;;  %10801 = vmatpush3.xpose.msk.msra.mxu1 %vm2325_vm3, %v12638_v51  ;;  %v618_v25 = vadd.f32 %v12327_v43, %v12158_v9  ;;  %v2803_v52 = vrot.slane %v2793_v19, %v12098_v58  ;;  %v1654_v27 = vcombine.high %v1652_v28, %v1652_v28 }
 0x272   :  { %v12654_v12 = vcombine.low %v2253_v57, %v2260_v6  ;;  %v1701_v23 = vrot.slane %v1687_v16, %v12098_v58  ;;  %v1702_v18 = vcombine.high %v1694_v1, %v1694_v1  ;;  %10802 = vmatprep.subr.mxu1 %v15205_v21  ;;  %v1710_v40 = vrot.slane %v1694_v1, %v12098_v58 }
 0x273   :  { %v1736_v43 = vcombine.high %v618_v25, %v618_v25  ;;  %v12670_v4 = vcombine.low %v2803_v52, %v2810_v45  ;;  %v12673_v3 = vrot.slane %v1467_v61, %v12098_v58  ;;  %v1675_v19 = vrot.slane %v1653_v11, %v12098_v58 }
 0x274   :  { %4175 = vrot.lane.b32.xlu1 %v12654_v12, %s11668_s4  ;;  %v1703_v34 = vcombine.high %v1701_v23, %v1701_v23  ;;  %v12677_v0 = vrot.slane %v3188_v55, %v12098_v58  ;;  %v12680_v39 = vrot.slane %v10228_v63, %v12098_v58  ;;  %v1717_v32 = vrot.slane %v1701_v23, %v12098_v58 }
 0x275   :  { %10803 = vmatpush3.xpose.msk.msra.mxu1 %vm2325_vm3, %v12654_v12  ;;  %v1661_v45 = vrot.slane %v1645_v17, %v12098_v58  ;;  %v1724_v61 = vrot.slane %v1702_v18, %v12098_v58  ;;  %v3290_v55 = vrot.slane %v1710_v40, %v12098_v58  ;;  %v1682_v63 = vrot.slane %v1654_v27, %v12098_v58 }
 0x276   :  { %v1731_v24 = vrot.slane %v1703_v34, %v12098_v58  ;;  %10804 = vmatprep.subr.mxu1 %v15205_v21  ;;  %v1743_v20 = vrot.slane %v618_v25, %v12098_v58  ;;  %v1750_v57 = vrot.slane %v1736_v43, %v12098_v58  ;;  %v623_v17 = vadd.f32 %v12341_v44, %v12158_v9 }
 0x277   :  { %v3235_v6 = vcombine.low %v1661_v45, %v1675_v19  ;;  %v10229_v11 = vcombine.high %v1661_v45, %v1675_v19  ;;  %v12696_v16 = vrot.slane %v3290_v55, %v12098_v58  ;;  %v1668_v1 = vrot.slane %v1652_v28, %v12098_v58 }
 0x278   :  { %v1733_v52 = vcombine.high %v1717_v32, %v1717_v32  ;;  %v1751_v23 = vcombine.high %v1743_v20, %v1743_v20  ;;  %v1752_v18 = vcombine.high %v1750_v57, %v1750_v57  ;;  %v1734_v25 = vcombine.high %v1724_v61, %v1724_v61 }
 0x279   :  { %10805 = vmatpush3.xpose.msk.msra.mxu1 %vm2325_vm3, %v12567_v38  ;;  %v1735_v27 = vcombine.high %v1731_v24, %v1731_v24  ;;  %v1759_v43 = vrot.slane %v1743_v20, %v12098_v58  ;;  %v1785_v34 = vcombine.high %v623_v17, %v623_v17  ;;  %v3237_v19 = vcombine.low %v1668_v1, %v1682_v63 }
 0x27a   :  { %10806 = vmatprep.subr.mxu1 %v15205_v21  ;;  %v1766_v45 = vrot.slane %v1750_v57, %v12098_v58  ;;  %v1773_v44 = vrot.slane %v1751_v23, %v12098_v58  ;;  %v1792_v28 = vrot.slane %v623_v17, %v12098_v58  ;;  %10849 = vmatpush3.msk.msra.mxu0 %vm3317_vm4, %v12696_v16 }
 0x27b   :  { %v10230_v55 = vcombine.high %v1668_v1, %v1682_v63  ;;  %v12711_v2 = vrot.slane %v3235_v6, %v12098_v58  ;;  %v12714_v53 = vrot.slane %v10229_v11, %v12098_v58  ;;  %v1732_v20 = vcombine.high %v1710_v40, %v1710_v40  ;;  %10850 = vmatprep.subr.mxu0 %v15205_v21 }
 0x27c   :  { %v12717_v41 = vcombine.low %v1731_v24, %v1733_v52  ;;  %v1780_v57 = vrot.slane %v1752_v18, %v12098_v58  ;;  %v1781_v23 = vcombine.high %v1759_v43, %v1759_v43  ;;  %v1799_v17 = vrot.slane %v1785_v34, %v12098_v58 }
 0x27d   :  { %10807 = vmatpush3.xpose.msk.msra.mxu1 %vm2325_vm3, %v12495_v14  ;;  %v2840_v63 = vrot.slane %v12633_v47, %v12098_v58  ;;  %v2848_v6 = vrot.slane %v12673_v3, %v12098_v58  ;;  %v12727_v11 = vcombine.low %v1734_v25, %v1717_v32  ;;  %v12729_v40 = vcombine.low %v1735_v27, %v1759_v43 }
 0x27e   :  { %10823 = vmatprep.subr.mxu1 %v15205_v21  ;;  %v12733_v24 = vrot.slane %v3237_v19, %v12098_v58  ;;  %v1782_v1 = vcombine.high %v1766_v45, %v1766_v45  ;;  %v1783_v52 = vcombine.high %v1773_v44, %v1773_v44  ;;  %v1800_v18 = vcombine.high %v1792_v28, %v1792_v28 }
 0x27f   :  { %v3266_v34 = vrot.slane %v10230_v55, %v12098_v58  ;;  %v3267_v47 = vcombine.low %v12711_v2, %v12714_v53  ;;  %v12738_v38 = vcombine.low %v1724_v61, %v1732_v20  ;;  %v1808_v3 = vrot.slane %v1792_v28, %v12098_v58 }
 0x280   :  { %10809 = vmatmul.mubr.msk.f32.vlgmr.msra.gmra.mxu1 %vm2325_vm3, %v12433_v48  ;;  %v12745_v25 = vcombine.low %v1773_v44, %v1781_v23  ;;  %v1784_v27 = vcombine.high %v1780_v57, %v1780_v57  ;;  %v1801_v43 = vcombine.high %v1799_v17, %v1799_v17  ;;  %v12754_v61 = vrot.slane %v2848_v6, %v12098_v58 }
 0x281   :  { %10811 = vmatprep.mubr.msk.f32.mxu1 %vm11666_vm2, %v15205_v21  ;;  %v628_v19 = vadd.f32 %v12362_v10, %v12158_v9  ;;  %v12758_v28 = vcombine.low %v1783_v52, %v1766_v45  ;;  %v12760_v44 = vcombine.low %v1780_v57, %v1782_v1  ;;  %v1822_v55 = vrot.slane %v1800_v18, %v12098_v58 }
 0x282   :  { %v633_v20 = vadd.f32 %v12389_v37, %v12158_v9  ;;  %v1815_v23 = vrot.slane %v1799_v17, %v12098_v58  ;;  %v1830_v2 = vcombine.high %v1808_v3, %v1808_v3  ;;  %4309 = vrot.lane.b32.xlu1 %v12754_v61, %s11668_s4  ;;  %v1829_v45 = vrot.slane %v1801_v43, %v12098_v58 }
 0x283   :  { %v1834_v6 = vcombine.high %v628_v19, %v628_v19  ;;  %v1841_v32 = vrot.slane %v628_v19, %v12098_v58  ;;  %v12772_v57 = vcombine.low %v1784_v27, %v1808_v3  ;;  %10824 = vmatpush3.xpose.msk.msra.mxu1 %vm2325_vm3, %v12754_v61  ;;  %v1987_v9 = vcombine.low %v12231_v35, %v12234_v13 }
 0x284   :  { %v1889_v52 = vrot.slane %v633_v20, %v12098_v58  ;;  %10825 = vmatprep.subr.mxu1 %v15205_v21  ;;  %v1832_v18 = vcombine.high %v1822_v55, %v1822_v55  ;;  %v15214_v3 = vcombine.low %v12225_v31, %v12228_v33  ;;  %v2833_v35 = vrot.slane %v12670_v4, %v12098_v58 }
 0x285   :  { %v1848_v37 = vrot.slane %v1834_v6, %v12098_v58  ;;  %v1849_v17 = vcombine.high %v1841_v32, %v1841_v32  ;;  %v1857_v1 = vrot.slane %v1841_v32, %v12098_v58  ;;  %v2001_v43 = vrot.slane %v1987_v9, %v12098_v58 }
 0x286   :  { %v1994_v27 = vrot.slane %v15214_v3, %v12098_v58  ;;  %v1831_v6 = vcombine.high %v1815_v23, %v1815_v23  ;;  %v3483_v10 = vrot.slane %v12760_v44, %v12098_v58  ;;  %v12797_v31 = vcombine.low %v2833_v35, %v2840_v63 }
 0x287   :  { %v1850_v19 = vcombine.high %v1848_v37, %v1848_v37  ;;  %v1864_v32 = vrot.slane %v1848_v37, %v12098_v58  ;;  %v1871_v20 = vrot.slane %v1849_v17, %v12098_v58  ;;  %v1833_v33 = vcombine.high %v1829_v45, %v1829_v45 }
 0x288   :  { %v12795_v53 = vcombine.low %v1994_v27, %v2001_v43  ;;  %v1879_v4 = vcombine.high %v1857_v1, %v1857_v1  ;;  %v1890_v3 = vcombine.high %v1889_v52, %v1889_v52  ;;  %v3490_v13 = vrot.slane %v12772_v57, %v12098_v58  ;;  %10826 = vmatpush3.xpose.msk.msra.mxu1 %vm2325_vm3, %v12797_v31 }
 0x289   :  { %v1878_v9 = vrot.slane %v1850_v19, %v12098_v58  ;;  %v12802_v48 = vcombine.low %v1822_v55, %v1830_v2  ;;  %v12804_v37 = vcombine.low %v1832_v18, %v1815_v23  ;;  %v3268_v17 = vcombine.low %v12733_v24, %v3266_v34  ;;  %10827 = vmatprep.subr.mxu1 %v15205_v21 }
 0x28a   :  { %10812 = vmatmul.mubr.msk.f32.gmra.mxu1 %vm2325_vm3, %v12795_v53  ;;  %v1880_v27 = vcombine.high %v1864_v32, %v1864_v32  ;;  %v1881_v63 = vcombine.high %v1871_v20, %v1871_v20  ;;  %v1897_v35 = vrot.slane %v1889_v52, %v12098_v58  ;;  %v12812_v19 = vcombine.low %v1829_v45, %v1831_v6 }
 0x28b   :  { %v1882_v43 = vcombine.high %v1878_v9, %v1878_v9  ;;  %v3275_v2 = vrot.slane %v3267_v47, %v12098_v58  ;;  %v3282_v55 = vrot.slane %v3268_v17, %v12098_v58  ;;  %10814 = vmatprep.mubr.msk.f32.mxu1 %vm11666_vm2, %v15205_v21  ;;  %v3219_v24 = vcombine.low %v12677_v0, %v12680_v39  ;;  %v15216_v0 = vld [vmem:[#allocation12_spill] sm:$0xff] }
 0x28c   :  { %v12820_v34 = vcombine.low %v1833_v33, %v1857_v1  ;;  %v3557_v23 = vcombine.low %v1871_v20, %v1879_v4  ;;  %v12823_v52 = vrot.slane %v1890_v3, %v12098_v58  ;;  %v15215_v47 = vcombine.low %v12646_v42, %v12650_v62  ;;  %v15217_v42 = vld [vmem:[#allocation10_spill] sm:$0xff]  ;;  %v15218_v62 = vld [vmem:[#allocation11_spill] sm:$0xff] }
 0x28d   :  { %v3560_v18 = vcombine.low %v1882_v43, %v1897_v35  ;;  %v12826_v45 = vcombine.low %v3275_v2, %v3282_v55  ;;  %v3233_v17 = vrot.slane %v3219_v24, %v12098_v58  ;;  %v2036_v39 = vcombine.low %v15216_v0, %v12301_v5 }
 0x28e   :  { %v3226_v6 = vrot.slane %v15215_v47, %v12098_v58  ;;  %v3558_v1 = vcombine.low %v1881_v63, %v1864_v32  ;;  %v3559_v20 = vcombine.low %v1878_v9, %v1880_v27  ;;  %v2784_v33 = vrot.slane %v12616_v30, %v12098_v58  ;;  %v15222_v27 = vld [vmem:[#allocation16_spill] sm:$0xff] }
 0x28f   :  { %v3170_v4 = vcombine.low %v12606_v54, %v12611_v15  ;;  %10851 = vmatpush3.msra.mxu0 %v12826_v45  ;;  %v15219_v43 = vcombine.low %v15217_v42, %v15218_v62  ;;  %v2050_v2 = vrot.slane %v2036_v39, %v12098_v58  ;;  %v3121_v5 = vcombine.low %v12546_v50, %v12561_v49 }
 0x290   :  { %v12840_v3 = vcombine.low %v3226_v6, %v3233_v17  ;;  %10852 = vmatprep.subr.mxu0 %v15205_v21  ;;  %v15220_v30 = vrot.slane %v12598_v59, %v12098_v58  ;;  %v15221_v54 = vcombine.low %v12590_v29, %v12596_v26  ;;  %v2085_v63 = vcombine.low %v15222_v27, %v12360_v7 }
 0x291   :  { %v2043_v35 = vrot.slane %v15219_v43, %v12098_v58  ;;  %v3184_v9 = vrot.slane %v3170_v4, %v12098_v58  ;;  %v3588_v55 = vrot.slane %v3560_v18, %v12098_v58  ;;  %v3135_v49 = vrot.slane %v3121_v5, %v12098_v58  ;;  %v15225_v18 = vld [vmem:[#allocation14_spill] sm:$0xff]  ;;  %v15234_v43 = vld [vmem:[#allocation21_spill] sm:$0xff] }
 0x292   :  { %v12853_v15 = vcombine.low %v2784_v33, %v15220_v30  ;;  %v3177_v32 = vrot.slane %v15221_v54, %v12098_v58  ;;  %10853 = vmatpush3.msra.mxu0 %v12840_v3  ;;  %v2735_v59 = vrot.slane %v12543_v8, %v12098_v58  ;;  %v15224_v7 = vcombine.low %v12537_v46, %v12540_v36  ;;  %v15226_v8 = vld [vmem:[#allocation15_spill] sm:$0xff] }
 0x293   :  { %v12864_v50 = vcombine.low %v2043_v35, %v2050_v2  ;;  %10854 = vmatprep.subr.mxu0 %v15205_v21  ;;  %v2099_v24 = vrot.slane %v2085_v63, %v12098_v58  ;;  %v15227_v47 = vcombine.low %v15225_v18, %v15226_v8  ;;  %v15228_v17 = vrot.slane %v12550_v56, %v12098_v58  ;;  %v15244_v8 = vld [vmem:[#allocation3_spill] sm:$0xff] }
 0x294   :  { %10828 = vmatpush3.xpose.msk.msra.mxu1 %vm2325_vm3, %v12853_v15  ;;  %v12872_v29 = vcombine.low %v3177_v32, %v3184_v9  ;;  %v3128_v26 = vrot.slane %v15224_v7, %v12098_v58  ;;  %v2686_v46 = vrot.slane %v12476_v22, %v12098_v58  ;;  %v3574_v36 = vrot.slane %v3558_v1, %v12098_v58  ;;  %v15231_v22 = vld [vmem:[#allocation17_spill] sm:$0xff] }
 0x295   :  { %10815 = vmatmul.mubr.msk.f32.gmra.mxu1 %vm2325_vm3, %v12864_v50  ;;  %v2092_v6 = vrot.slane %v15227_v47, %v12098_v58  ;;  %10829 = vmatprep.subr.mxu1 %v15205_v21  ;;  %v12889_v0 = vcombine.low %v2735_v59, %v15228_v17  ;;  %v3581_v39 = vrot.slane %v3559_v20, %v12098_v58  ;;  %v15232_v20 = vld [vmem:[#allocation22_spill] sm:$0xff] }
 0x296   :  { %15223 = vst [vmem:[#allocation12_spill] sm:$0xff] %v12872_v29  ;;  %10855 = vmatpush3.msra.mxu0 %v12872_v29  ;;  %10817 = vmatprep.mubr.msk.f32.mxu1 %vm11666_vm2, %v15205_v21  ;;  %v12898_v33 = vcombine.low %v3128_v26, %v3135_v49  ;;  %v15230_v56 = vrot.slane %v12493_v60, %v12098_v58  ;;  %v15240_v49 = vld [vmem:[#allocation4_spill] sm:$0xff]  ;;  %v15242_v26 = vld [vmem:[#allocation13_spill] sm:$0xff] }
 0x297   :  { %10856 = vmatprep.subr.mxu0 %v15205_v21  ;;  %v12901_v4 = vcombine.low %v2092_v6, %v2099_v24  ;;  %v2516_v1 = vrot.slane %v15231_v22, %v12098_v58  ;;  %v15233_v62 = vrot.slane %v15232_v20, %v12098_v58  ;;  %v15235_v35 = vrot.slane %v15234_v43, %v12098_v58  ;;  %v15249_v43 = vld [vmem:[#allocation7_spill] sm:$0xff] }
 0x298   :  { %15229 = vst [vmem:[#allocation10_spill] sm:$0xff] %v12898_v33  ;;  %v12906_v42 = vcombine.low %v2686_v46, %v15230_v56  ;;  %v3539_v5 = vrot.slane %v12820_v34, %v12098_v58  ;;  %v3567_v30 = vrot.slane %v3557_v23, %v12098_v58  ;;  %v3590_v54 = vcombine.low %v3581_v39, %v3588_v55  ;;  %v15236_v34 = vld [vmem:[#allocation23_spill] sm:$0xff]  ;;  %v15247_v56 = vld [vmem:[#allocation8_spill] sm:$0xff] }
 0x299   :  { %v2517_v2 = vcombine.low %v15235_v35, %v15233_v62  ;;  %10857 = vmatpush3.msra.mxu0 %v12898_v33  ;;  %10830 = vmatpush3.xpose.msk.msra.mxu1 %vm2325_vm3, %v12889_v0  ;;  %v3518_v60 = vrot.slane %v12802_v48, %v12098_v58  ;;  %v3525_v32 = vrot.slane %v12804_v37, %v12098_v58  ;;  %v15238_v37 = vld [vmem:[#allocation6_spill] sm:$0xff] }
 0x29a   :  { %10818 = vmatmul.mubr.msk.f32.gmra.mxu1 %vm2325_vm3, %v12901_v4  ;;  %10831 = vmatprep.subr.mxu1 %v15205_v21  ;;  %v15237_v23 = vrot.slane %v15236_v34, %v12098_v58  ;;  %v3532_v27 = vrot.slane %v12812_v19, %v12098_v58  ;;  %v3612_v63 = vrot.slane %v12823_v52, %v12098_v58 }
 0x29b   :  { %10820 = vmatprep.mubr.msk.f32.mxu1 %vm11666_vm2, %v15205_v21  ;;  %v3589_v48 = vcombine.low %v3567_v30, %v3574_v36  ;;  %v15239_v55 = vrot.slane %v15238_v37, %v12098_v58  ;;  %v15241_v59 = vrot.slane %v15240_v49, %v12098_v58  ;;  %v15243_v24 = vrot.slane %v15242_v26, %v12098_v58  ;;  %v15245_v36 = vld [vmem:[#allocation9_spill] sm:$0xff] }
 0x29c   :  { %v2518_v9 = vcombine.low %v15237_v23, %v2516_v1  ;;  %v2525_v19 = vrot.slane %v2517_v2, %v12098_v58  ;;  %v2581_v47 = vrot.slane %v15244_v8, %v12098_v58  ;;  %10898 = vmatprep.subr.mxu0 %v15205_v21  ;;  %v3541_v6 = vcombine.low %v3532_v27, %v3539_v5 }
 0x29d   :  { %v2566_v7 = vcombine.low %v15241_v59, %v15239_v55  ;;  %v12948_v18 = vrot.slane %v15243_v24, %v12098_v58  ;;  %10832 = vmatpush3.xpose.msk.msra.mxu1 %vm2325_vm3, %v12906_v42  ;;  %v3604_v17 = vrot.slane %v3590_v54, %v12098_v58  ;;  %v15246_v39 = vrot.slane %v15245_v36, %v12098_v58 }
 0x29e   :  { %v2532_v52 = vrot.slane %v2518_v9, %v12098_v58  ;;  %v15248_v22 = vrot.slane %v15247_v56, %v12098_v58  ;;  %v3492_v20 = vcombine.low %v3483_v10, %v3490_v13  ;;  %10873 = vmatprep.subr.mxu1 %v15205_v21  ;;  %v2630_v35 = vrot.slane %v15249_v43, %v12098_v58 }
 0x29f   :  { %v2574_v46 = vrot.slane %v2566_v7, %v12098_v58  ;;  %10821 = vmatmul.mubr.msk.f32.gmra.mxu1 %vm2325_vm3, %v12948_v18  ;;  %v3597_v2 = vrot.slane %v3589_v48, %v12098_v58  ;;  %v3540_v57 = vcombine.low %v3518_v60, %v3525_v32  ;;  %v3420_v10 = vrot.slane %v12738_v38, %v12098_v58  ;;  %v15256_v48 = vld [vmem:[#allocation5_spill] sm:$0xff] }
 0x2a0   :  { %v2615_v1 = vcombine.low %v15248_v22, %v15246_v39  ;;  %v12974_v62 = vcombine.low %v2525_v19, %v2532_v52  ;;  %10833 = vmatprep.mubr.msk.f32.mxu1 %vm11666_vm2, %v15205_v21  ;;  %v15250_v13 = vrot.slane %v12729_v40, %v12098_v58  ;;  %v15251_v30 = vrot.slane %v12717_v41, %v12098_v58  ;;  %v15254_v40 = vld [vmem:[#allocation19_spill] sm:$0xff] }
 0x2a1   :  { %v12981_v5 = vcombine.low %v2574_v46, %v2581_v47  ;;  %v12993_v34 = vrot.slane %v3612_v63, %v12098_v58  ;;  %v12995_v23 = vcombine.low %v3597_v2, %v3604_v17  ;;  %v3555_v60 = vrot.slane %v3541_v6, %v12098_v58 }
 0x2a2   :  { %v2623_v44 = vrot.slane %v2615_v1, %v12098_v58  ;;  %v3443_v54 = vcombine.low %v15251_v30, %v15250_v13  ;;  %v15252_v32 = vrot.slane %v12758_v28, %v12098_v58  ;;  %v15253_v38 = vrot.slane %v12745_v25, %v12098_v58 }
 0x2a3   :  { %10834 = vmatmul.mubr.msk.f32.vlgmr.msra.gmra.mxu1 %vm2325_vm3, %v15254_v40  ;;  %v3548_v41 = vrot.slane %v3540_v57, %v12098_v58  ;;  %v3506_v63 = vrot.slane %v3492_v20, %v12098_v58  ;;  %v15255_v28 = vrot.slane %v12727_v11, %v12098_v58  ;;  %v1044_v37 = vcombine.high %v15256_v48, %v15256_v48 }
 0x2a4   :  { %v3491_v9 = vcombine.low %v15253_v38, %v15252_v32  ;;  %v13004_v27 = vcombine.low %v2623_v44, %v2630_v35  ;;  %10874 = vmatpush3.msk.msra.mxu1 %vm3317_vm4, %v12993_v34  ;;  %10836 = vmatprep.mubr.msk.f32.mxu1 %vm11666_vm2, %v15205_v21  ;;  %v3457_v59 = vrot.slane %v3443_v54, %v12098_v58 }
 0x2a5   :  { %v3442_v25 = vcombine.low %v3420_v10, %v15255_v28  ;;  %10875 = vmatprep.subr.mxu1 %v15205_v21  ;;  %v13021_v55 = vcombine.low %v3548_v41, %v3555_v60  ;;  %v1058_v26 = vrot.slane %v1044_v37, %v12098_v58 }
 0x2a6   :  { %10876 = vmatpush3.msra.mxu1 %v12995_v23  ;;  %v3499_v49 = vrot.slane %v3491_v9, %v12098_v58 }
 0x2a7   :  { %10837 = vmatmul.mubr.msk.f32.gmra.mxu1 %vm2325_vm3, %v12974_v62  ;;  %10877 = vmatprep.subr.mxu1 %v15205_v21  ;;  %v3450_v7 = vrot.slane %v3442_v25, %v12098_v58  ;;  %v2638_v19 = vrot.slane %v1058_v26, %v12098_v58 }
 0x2a8   :  { %10878 = vmatpush3.msra.mxu1 %v13021_v55  ;;  %10839 = vmatprep.mubr.msk.f32.mxu1 %vm11666_vm2, %v15205_v21  ;;  %v13031_v11 = vcombine.low %v3499_v49, %v3506_v63 }
 0x2a9   :  { %10879 = vmatprep.subr.mxu1 %v15205_v21  ;;  %v13037_v24 = vcombine.low %v3450_v7, %v3457_v59  ;;  %v13052_v52 = vrot.slane %v2638_v19, %v12098_v58 }
 0x2aa   :  { %10880 = vmatpush3.msra.mxu1 %v13031_v11 }
 0x2ab   :  { %10840 = vmatmul.mubr.msk.f32.gmra.mxu1 %vm2325_vm3, %v12981_v5  ;;  %10881 = vmatprep.subr.mxu1 %v15205_v21 }
 0x2ac   :  { %10882 = vmatpush3.msra.mxu1 %v13037_v24  ;;  %10842 = vmatprep.mubr.msk.f32.mxu1 %vm11666_vm2, %v15205_v21 }
 0x2ad   :  { %10923 = vmatprep.subr.mxu1 %v15205_v21 }
 0x2af   :  { %10843 = vmatmul.mubr.msk.f32.gmra.mxu1 %vm2325_vm3, %v13004_v27 }
 0x2b0   :  { %10845 = vmatprep.mubr.msk.f32.mxu1 %vm11666_vm2, %v15205_v21 }
 0x2b3   :  { %10846 = vmatmul.mubr.msk.f32.gmra.mxu1 %vm2325_vm3, %v13052_v52 }
 0x2b4   :  { %10883 = vmatprep.mubr.msk.f32.mxu1 %vm11666_vm2, %v15205_v21 }
 0x340   :  { %v2412_v8 = vpop.f32.mrf.mxu1 }
 0x341   :  { %v2966_v47 = vmul.f32 0.35355338, %v2412_v8 }
 0x342   :  { %v10810_v6 = vpop.f32.mrf.mxu1 }
 0x343   :  { %v2977_v17 = vsel %vm2976_vm5, %v2966_v47, -inf }
 0x344   :  { %2978 = vmax.xlane.f32.xlu0 %v2977_v17 }
 0x34a   :  { %v2417_v46 = vpop.f32.mrf.mxu1 }
 0x34b   :  { %v2967_v36 = vmul.f32 0.35355338, %v2417_v46 }
 0x34c   :  { %v10813_v39 = vpop.f32.mrf.mxu1 }
 0x34d   :  { %v2980_v56 = vsel %vm2976_vm5, %v2967_v36, -inf }
 0x34e   :  { %2981 = vmax.xlane.f32.xlu1 %v2980_v56  ;;  %v13081_v56 = vpop.permute.xlu1 %4171 }
 0x355   :  { %v2422_v22 = vpop.f32.mrf.mxu1 }
 0x356   :  { %v2968_v1 = vmul.f32 0.35355338, %v2422_v22  ;;  %v13083_v22 = vpop.permute.xlu1 %4173 }
 0x357   :  { %v10816_v20 = vpop.f32.mrf.mxu1 }
 0x358   :  { %v2983_v43 = vsel %vm2976_vm5, %v2968_v1, -inf  ;;  %v13085_v20 = vpop.permute.xlu0 %4161 }
 0x359   :  { %2984 = vmax.xlane.f32.xlu0 %v2983_v43 }
 0x35a   :  { %v2427_v35 = vpop.f32.mrf.mxu1 }
 0x35b   :  { %v2969_v2 = vmul.f32 0.35355338, %v2427_v35  ;;  %v13089_v35 = vpop.permute.xlu1 %4179 }
 0x35c   :  { %v10819_v57 = vpop.f32.mrf.mxu1  ;;  %v13087_v43 = vpop.permute.xlu0 %4177 }
 0x35d   :  { %v2986_v44 = vsel %vm2976_vm5, %v2969_v2, -inf }
 0x35e   :  { %2987 = vmax.xlane.f32.xlu1 %v2986_v44 }
 0x35f   :  { %v2432_v10 = vpop.f32.mrf.mxu1 }
 0x360   :  { %v2970_v13 = vmul.f32 0.35355338, %v2432_v10  ;;  %v13091_v10 = vpop.permute.xlu1 %4175 }
 0x361   :  { %v10822_v30 = vpop.f32.mrf.mxu1 }
 0x362   :  { %v2990_v54 = vsel %vm2989_vm6, %v2970_v13, -inf }
 0x363   :  { %2991 = vmax.xlane.f32.xlu0 %v2990_v54  ;;  %v2942_v60 = vpop.f32.mrf.mxu1 }
 0x364   :  { %v2971_v32 = vmul.f32 0.35355338, %v2942_v60  ;;  %v13093_v54 = vpop.permute.xlu1 %4309 }
 0x365   :  { %v10835_v38 = vpop.f32.mrf.mxu1 }
 0x366   :  { %v2993_v9 = vsel %vm2976_vm5, %v2971_v32, -inf }
 0x367   :  { %2994 = vmax.xlane.f32.xlu1 %v2993_v9  ;;  %v2947_v41 = vpop.f32.mrf.mxu1 }
 0x368   :  { %v2972_v63 = vmul.f32 0.35355338, %v2947_v41 }
 0x369   :  { %v10838_v28 = vpop.f32.mrf.mxu1 }
 0x36a   :  { %v2996_v25 = vsel %vm2976_vm5, %v2972_v63, -inf }
 0x36b   :  { %2997 = vmax.xlane.f32.xlu0 %v2996_v25  ;;  %v2952_v48 = vpop.f32.mrf.mxu1 }
 0x36c   :  { %v13065_v37 = vmul.f32 0.35355338, %v2952_v48 }
 0x36d   :  { %v10841_v49 = vpop.f32.mrf.mxu1 }
 0x36e   :  { %v2999_v59 = vsel %vm2976_vm5, %v13065_v37, -inf }
 0x36f   :  { %3000 = vmax.xlane.f32.xlu1 %v2999_v59  ;;  %v2957_v7 = vpop.f32.mrf.mxu1 }
 0x370   :  { %v13069_v26 = vmul.f32 0.35355338, %v2957_v7 }
 0x371   :  { %v10844_v19 = vpop.f32.mrf.mxu1 }
 0x372   :  { %v3002_v8 = vsel %vm2976_vm5, %v13069_v26, -inf }
 0x373   :  { %3003 = vmax.xlane.f32.xlu0 %v3002_v8  ;;  %v2962_v6 = vpop.f32.mrf.mxu1 }
 0x374   :  { %v13073_v17 = vmul.f32 0.35355338, %v2962_v6 }
 0x375   :  { %v10847_v46 = vpop.f32.mrf.mxu1 }
 0x376   :  { %v3005_v39 = vsel %vm2989_vm6, %v13073_v17, -inf }
 0x377   :  { %3006 = vmax.xlane.f32.xlu1 %v3005_v39 }
 0x388   :  { %4307 = vrot.lane.b32.xlu1 %v12797_v31, %s11668_s4 }
 0x389   :  { %4163 = vrot.lane.b32.xlu0 %v12795_v53, %s11668_s4 }
 0x3cd   :  { %v2979_v57 = vpop.xlane.xlu0 %2978 }
 0x3ce   :  { %v3008_v44 = vsub.f32 %v2966_v47, %v2979_v57 }
 0x3d0   :  { %v3018_v30 = vmul.f32 1.442695, %v3008_v44 }
 0x3d2   :  { %11441 = vpow2.f32 %v3018_v30 }
 0x3d7   :  { %v2982_v60 = vpop.xlane.xlu1 %2981 }
 0x3d8   :  { %v3009_v38 = vsub.f32 %v2967_v36, %v2982_v60 }
 0x3da   :  { %v3020_v9 = vmul.f32 1.442695, %v3009_v38 }
 0x3dc   :  { %11443 = vpow2.f32 %v3020_v9 }
 0x3df   :  { %v13095_v41 = vpop.eup %11441 }
 0x3e0   :  { %v3038_v28 = vsel %vm2976_vm5, %v13095_v41, 0.0 }
 0x3e1   :  { %3039 = vadd.xlane.f32.xlu0 %v3038_v28 }
 0x3e2   :  { %v2985_v25 = vpop.xlane.xlu0 %2984 }
 0x3e3   :  { %v3010_v48 = vsub.f32 %v2968_v1, %v2985_v25 }
 0x3e5   :  { %v3022_v49 = vmul.f32 1.442695, %v3010_v48 }
 0x3e7   :  { %v2988_v47 = vpop.xlane.xlu1 %2987  ;;  %11445 = vpow2.f32 %v3022_v49 }
 0x3e8   :  { %v3011_v59 = vsub.f32 %v2969_v2, %v2988_v47 }
 0x3e9   :  { %v13099_v19 = vpop.eup %11443 }
 0x3ea   :  { %v3024_v7 = vmul.f32 1.442695, %v3011_v59  ;;  %v3041_v6 = vsel %vm2976_vm5, %v13099_v19, 0.0 }
 0x3eb   :  { %3042 = vadd.xlane.f32.xlu1 %v3041_v6 }
 0x3ec   :  { %v2992_v8 = vpop.xlane.xlu0 %2991  ;;  %11447 = vpow2.f32 %v3024_v7 }
 0x3ed   :  { %v3012_v36 = vsub.f32 %v2970_v13, %v2992_v8 }
 0x3ef   :  { %v3026_v46 = vmul.f32 1.442695, %v3012_v36 }
 0x3f0   :  { %v2995_v39 = vpop.xlane.xlu1 %2994 }
 0x3f1   :  { %11449 = vpow2.f32 %v3026_v46  ;;  %v3013_v57 = vsub.f32 %v2971_v32, %v2995_v39 }
 0x3f3   :  { %v3028_v44 = vmul.f32 1.442695, %v3013_v57 }
 0x3f4   :  { %v2998_v1 = vpop.xlane.xlu0 %2997  ;;  %v13103_v60 = vpop.eup %11445 }
 0x3f5   :  { %11451 = vpow2.f32 %v3028_v44  ;;  %v3014_v30 = vsub.f32 %v2972_v63, %v2998_v1  ;;  %v3044_v38 = vsel %vm2976_vm5, %v13103_v60, 0.0 }
 0x3f6   :  { %3045 = vadd.xlane.f32.xlu0 %v3044_v38 }
 0x3f7   :  { %v3030_v2 = vmul.f32 1.442695, %v3014_v30 }
 0x3f8   :  { %v3001_v47 = vpop.xlane.xlu1 %3000 }
 0x3f9   :  { %11453 = vpow2.f32 %v3030_v2  ;;  %v13107_v13 = vpop.eup %11447  ;;  %v3015_v59 = vsub.f32 %v13065_v37, %v3001_v47 }
 0x3fa   :  { %v3047_v9 = vsel %vm2976_vm5, %v13107_v13, 0.0 }
 0x3fb   :  { %3048 = vadd.xlane.f32.xlu1 %v3047_v9  ;;  %v3032_v8 = vmul.f32 1.442695, %v3015_v59 }
 0x3fc   :  { %v3004_v7 = vpop.xlane.xlu0 %3003 }
 0x3fd   :  { %v3016_v36 = vsub.f32 %v13069_v26, %v3004_v7  ;;  %11455 = vpow2.f32 %v3032_v8 }
 0x3fe   :  { %v13111_v28 = vpop.eup %11449 }
 0x3ff   :  { %v3050_v32 = vsel %vm2989_vm6, %v13111_v28, 0.0  ;;  %v3034_v46 = vmul.f32 1.442695, %v3016_v36 }
 0x400   :  { %3051 = vadd.xlane.f32.xlu0 %v3050_v32  ;;  %v3007_v6 = vpop.xlane.xlu1 %3006  ;;  %v4164_v2 = vpop.permute.xlu0 %4163 }
 0x401   :  { %v3017_v39 = vsub.f32 %v13073_v17, %v3007_v6  ;;  %11457 = vpow2.f32 %v3034_v46 }
 0x402   :  { %v13115_v63 = vpop.eup %11451 }
 0x403   :  { %v3053_v25 = vsel %vm2976_vm5, %v13115_v63, 0.0  ;;  %v3036_v57 = vmul.f32 1.442695, %v3017_v39 }
 0x404   :  { %3054 = vadd.xlane.f32.xlu1 %v3053_v25  ;;  %v4308_v9 = vpop.permute.xlu1 %4307 }
 0x405   :  { %11459 = vpow2.f32 %v3036_v57 }
 0x406   :  { %v13119_v48 = vpop.eup %11453 }
 0x407   :  { %v3056_v49 = vsel %vm2976_vm5, %v13119_v48, 0.0 }
 0x408   :  { %3057 = vadd.xlane.f32.xlu0 %v3056_v49 }
 0x40a   :  { %v13130_v44 = vpop.eup %11455 }
 0x40b   :  { %v3059_v1 = vsel %vm2976_vm5, %v13130_v44, 0.0 }
 0x40e   :  { %v13134_v30 = vpop.eup %11457 }
 0x40f   :  { %v3062_v37 = vsel %vm2976_vm5, %v13134_v30, 0.0 }
 0x412   :  { %v13138_v26 = vpop.eup %11459 }
 0x413   :  { %v3065_v17 = vsel %vm2989_vm6, %v13138_v26, 0.0 }
 0x415   :  { %4305 = vrot.lane.b32.xlu1 %v12853_v15, %s11668_s4 }
 0x41e   :  { %4165 = vrot.lane.b32.xlu0 %v12864_v50, %s11668_s4 }
 0x439   :  { %3060 = vadd.xlane.f32.xlu1 %v3059_v1 }
 0x43d   :  { %3063 = vadd.xlane.f32.xlu0 %v3062_v37 }
 0x441   :  { %3066 = vadd.xlane.f32.xlu0 %v3065_v17 }
 0x44a   :  { %4303 = vrot.lane.b32.xlu1 %v12889_v0, %s11668_s4 }
 0x44e   :  { %4301 = vrot.lane.b32.xlu1 %v12906_v42, %s11668_s4 }
 0x452   :  { %4169 = vrot.lane.b32.xlu1 %v12948_v18, %s11668_s4 }
 0x456   :  { %4295 = vrot.lane.b32.xlu1 %v12981_v5, %s11668_s4 }
 0x457   :  { %4167 = vrot.lane.b32.xlu0 %v12901_v4, %s11668_s4 }
 0x45a   :  { %4299 = vrot.lane.b32.xlu1 %v13052_v52, %s11668_s4 }
 0x45b   :  { %4291 = vrot.lane.b32.xlu0 %v15254_v40, %s11668_s4 }
 0x45e   :  { %4549 = vrot.lane.b32.xlu1 %v12696_v16, %s11668_s4 }
 0x45f   :  { %4293 = vrot.lane.b32.xlu0 %v12974_v62, %s11668_s4 }
 0x462   :  { %4545 = vrot.lane.b32.xlu1 %v12840_v3, %s11668_s4 }
 0x463   :  { %4297 = vrot.lane.b32.xlu0 %v13004_v27, %s11668_s4 }
 0x467   :  { %4547 = vrot.lane.b32.xlu0 %v12826_v45, %s11668_s4 }
 0x46a   :  { %v3040_v38 = vpop.xlane.xlu0 %3039 }
 0x46b   :  { %4543 = vrot.lane.b32.xlu0 %v12872_v29, %s11668_s4  ;;  %11461 = vrcp.f32 %v3040_v38 }
 0x474   :  { %v3043_v32 = vpop.xlane.xlu1 %3042 }
 0x475   :  { %11463 = vrcp.f32 %v3043_v32 }
 0x478   :  { %v11462_v25 = vpop.eup %11461 }
 0x479   :  { %v3078_v49 = vmul.f32 %v11462_v25, %v13095_v41 }
 0x47b   :  { %10859 = vmatmul.mubr.msk.f32.vlgmr.msra.gmra.mxu0 %vm2976_vm5, %v3078_v49 }
 0x47c   :  { %10899 = vmatpush3.xpose.msk.msra.mxu0 %vm2325_vm3, %v13089_v35  ;;  %10861 = vmatprep.mubr.msk.f32.mxu0 %vm11666_vm2, %v15205_v21 }
 0x47d   :  { %10900 = vmatprep.subr.mxu0 %v15205_v21 }
 0x47f   :  { %v3046_v47 = vpop.xlane.xlu0 %3045 }
 0x480   :  { %11465 = vrcp.f32 %v3046_v47  ;;  %10901 = vmatpush3.xpose.msk.msra.mxu0 %vm2325_vm3, %v13087_v43 }
 0x481   :  { %10902 = vmatprep.subr.mxu0 %v15205_v21 }
 0x482   :  { %v11464_v59 = vpop.eup %11463 }
 0x483   :  { %v3079_v41 = vmul.f32 %v11464_v59, %v13099_v19 }
 0x484   :  { %v3049_v7 = vpop.xlane.xlu1 %3048  ;;  %10903 = vmatpush3.xpose.msk.msra.mxu0 %vm2325_vm3, %v13091_v10 }
 0x485   :  { %11467 = vrcp.f32 %v3049_v7  ;;  %10904 = vmatprep.subr.mxu0 %v15205_v21  ;;  %10862 = vmatmul.mubr.msk.f32.gmra.mxu0 %vm2976_vm5, %v3079_v41 }
 0x486   :  { %10864 = vmatprep.mubr.msk.f32.mxu0 %vm11666_vm2, %v15205_v21 }
 0x488   :  { %10905 = vmatpush3.xpose.msk.msra.mxu0 %vm2325_vm3, %v13083_v22 }
 0x489   :  { %v3052_v35 = vpop.xlane.xlu0 %3051  ;;  %10906 = vmatprep.subr.mxu0 %v15205_v21 }
 0x48a   :  { %11469 = vrcp.f32 %v3052_v35 }
 0x48c   :  { %10907 = vmatpush3.xpose.msk.msra.mxu0 %vm2325_vm3, %v13081_v56 }
 0x48d   :  { %v3055_v43 = vpop.xlane.xlu1 %3054  ;;  %v11466_v10 = vpop.eup %11465  ;;  %10948 = vmatprep.subr.mxu0 %v15205_v21 }
 0x48e   :  { %11471 = vrcp.f32 %v3055_v43  ;;  %v3080_v19 = vmul.f32 %v11466_v10, %v13103_v60 }
 0x490   :  { %10865 = vmatmul.mubr.msk.f32.gmra.mxu0 %vm2976_vm5, %v3080_v19 }
 0x491   :  { %v3058_v8 = vpop.xlane.xlu0 %3057  ;;  %10867 = vmatprep.mubr.msk.f32.mxu0 %vm11666_vm2, %v15205_v21 }
 0x492   :  { %11473 = vrcp.f32 %v3058_v8  ;;  %v11468_v36 = vpop.eup %11467 }
 0x493   :  { %v3081_v22 = vmul.f32 %v11468_v36, %v13107_v13 }
 0x495   :  { %10868 = vmatmul.mubr.msk.f32.gmra.mxu0 %vm2976_vm5, %v3081_v22 }
 0x496   :  { %10870 = vmatprep.mubr.msk.f32.mxu0 %vm11666_vm2, %v15205_v21 }
 0x497   :  { %v11470_v6 = vpop.eup %11469 }
 0x498   :  { %v3082_v56 = vmul.f32 %v11470_v6, %v13111_v28 }
 0x49a   :  { %10871 = vmatmul.mubr.msk.f32.gmra.mxu0 %vm2976_vm5, %v3082_v56 }
 0x49b   :  { %v11472_v60 = vpop.eup %11471  ;;  %10908 = vmatprep.mubr.msk.f32.mxu0 %vm11666_vm2, %v15205_v21 }
 0x49c   :  { %v3083_v46 = vmul.f32 %v11472_v60, %v13115_v63 }
 0x49e   :  { %10884 = vmatmul.mubr.msk.f32.vlgmr.msra.gmra.mxu1 %vm2976_vm5, %v3083_v46  ;;  %10909 = vmatmul.mubr.msk.f32.vlgmr.msra.gmra.mxu0 %vm2325_vm3, %v13085_v20  ;;  %v4166_v20 = vpop.permute.xlu0 %4165 }
 0x49f   :  { %v11474_v13 = vpop.eup %11473  ;;  %10924 = vmatpush3.xpose.msk.msra.mxu1 %vm2325_vm3, %v13093_v54  ;;  %10886 = vmatprep.mubr.msk.f32.mxu1 %vm11666_vm2, %v15205_v21  ;;  %v4306_v54 = vpop.permute.xlu1 %4305 }
 0x4a0   :  { %10911 = vmatprep.mubr.msk.f32.mxu0 %vm11666_vm2, %v15205_v21  ;;  %10925 = vmatprep.subr.mxu1 %v15205_v21  ;;  %v3084_v28 = vmul.f32 %v11474_v13, %v13119_v48 }
 0x4a2   :  { %10887 = vmatmul.mubr.msk.f32.gmra.mxu1 %vm2976_vm5, %v3084_v28  ;;  %10912 = vmatmul.mubr.msk.f32.gmra.mxu0 %vm2325_vm3, %v4164_v2 }
 0x4a3   :  { %10926 = vmatpush3.xpose.msk.msra.mxu1 %vm2325_vm3, %v4308_v9  ;;  %10914 = vmatprep.mubr.msk.f32.mxu0 %vm11666_vm2, %v15205_v21 }
 0x4a4   :  { %10927 = vmatprep.subr.mxu1 %v15205_v21  ;;  %10889 = vmatprep.mubr.msk.f32.mxu1 %vm11666_vm2, %v15205_v21 }
 0x4a6   :  { %10915 = vmatmul.mubr.msk.f32.gmra.mxu0 %vm2325_vm3, %v4166_v20 }
 0x4a7   :  { %10928 = vmatpush3.xpose.msk.msra.mxu1 %vm2325_vm3, %v4306_v54  ;;  %10917 = vmatprep.mubr.msk.f32.mxu0 %vm11666_vm2, %v15205_v21 }
 0x4a8   :  { %10929 = vmatprep.subr.mxu1 %v15205_v21 }
 0x4c2   :  { %v3061_v63 = vpop.xlane.xlu1 %3060 }
 0x4c3   :  { %11475 = vrcp.f32 %v3061_v63 }
 0x4c6   :  { %v3064_v48 = vpop.xlane.xlu0 %3063  ;;  %v4304_v39 = vpop.permute.xlu1 %4303 }
 0x4c7   :  { %11477 = vrcp.f32 %v3064_v48  ;;  %10930 = vmatpush3.xpose.msk.msra.mxu1 %vm2325_vm3, %v4304_v39 }
 0x4c8   :  { %10931 = vmatprep.subr.mxu1 %v15205_v21 }
 0x4ca   :  { %v3067_v57 = vpop.xlane.xlu0 %3066  ;;  %v4302_v1 = vpop.permute.xlu1 %4301 }
 0x4cb   :  { %11479 = vrcp.f32 %v3067_v57  ;;  %10932 = vmatpush3.xpose.msk.msra.mxu1 %vm2325_vm3, %v4302_v1 }
 0x4cc   :  { %10973 = vmatprep.subr.mxu1 %v15205_v21 }
 0x4ce   :  { %v4168_v37 = vpop.permute.xlu0 %4167  ;;  %v4170_v17 = vpop.permute.xlu1 %4169 }
 0x4cf   :  { %10918 = vmatmul.mubr.msk.f32.gmra.mxu0 %vm2325_vm3, %v4168_v37 }
 0x4d0   :  { %v11476_v2 = vpop.eup %11475  ;;  %10920 = vmatprep.mubr.msk.f32.mxu0 %vm11666_vm2, %v15205_v21 }
 0x4d1   :  { %v3085_v38 = vmul.f32 %v11476_v2, %v13130_v44 }
 0x4d2   :  { %v4292_v9 = vpop.permute.xlu0 %4291  ;;  %v4296_v32 = vpop.permute.xlu1 %4295 }
 0x4d3   :  { %10890 = vmatmul.mubr.msk.f32.gmra.mxu1 %vm2976_vm5, %v3085_v38  ;;  %10921 = vmatmul.mubr.msk.f32.gmra.mxu0 %vm2325_vm3, %v4170_v17 }
 0x4d4   :  { %v11478_v25 = vpop.eup %11477  ;;  %10892 = vmatprep.mubr.msk.f32.mxu1 %vm11666_vm2, %v15205_v21  ;;  %10958 = vmatprep.mubr.msk.f32.mxu0 %vm11666_vm2, %v15205_v21 }
 0x4d5   :  { %v3086_v49 = vmul.f32 %v11478_v25, %v13134_v30 }
 0x4d6   :  { %v4294_v47 = vpop.permute.xlu0 %4293  ;;  %v4300_v59 = vpop.permute.xlu1 %4299 }
 0x4d7   :  { %10893 = vmatmul.mubr.msk.f32.gmra.mxu1 %vm2976_vm5, %v3086_v49 }
 0x4d8   :  { %v11480_v44 = vpop.eup %11479  ;;  %10895 = vmatprep.mubr.msk.f32.mxu1 %vm11666_vm2, %v15205_v21 }
 0x4d9   :  { %v3087_v7 = vmul.f32 %v11480_v44, %v13138_v26 }
 0x4da   :  { %v4298_v41 = vpop.permute.xlu0 %4297  ;;  %v4550_v35 = vpop.permute.xlu1 %4549 }
 0x4db   :  { %10896 = vmatmul.mubr.msk.f32.gmra.mxu1 %vm2976_vm5, %v3087_v7  ;;  %10949 = vmatpush3.msk.msra.mxu0 %vm3317_vm4, %v4550_v35 }
 0x4dc   :  { %10933 = vmatprep.mubr.msk.f32.mxu1 %vm11666_vm2, %v15205_v21  ;;  %10950 = vmatprep.subr.mxu0 %v15205_v21 }
 0x4de   :  { %v4548_v30 = vpop.permute.xlu0 %4547  ;;  %v4546_v43 = vpop.permute.xlu1 %4545 }
 0x4df   :  { %10934 = vmatmul.mubr.msk.f32.vlgmr.msra.gmra.mxu1 %vm2325_vm3, %v4292_v9  ;;  %10951 = vmatpush3.msra.mxu0 %v4548_v30 }
 0x4e0   :  { %10952 = vmatprep.subr.mxu0 %v15205_v21  ;;  %10936 = vmatprep.mubr.msk.f32.mxu1 %vm11666_vm2, %v15205_v21 }
 0x4e1   :  { %10953 = vmatpush3.msra.mxu0 %v4546_v43 }
 0x4e2   :  { %v4544_v26 = vpop.permute.xlu0 %4543  ;;  %10954 = vmatprep.subr.mxu0 %v15205_v21 }
 0x4e3   :  { %10937 = vmatmul.mubr.msk.f32.gmra.mxu1 %vm2325_vm3, %v4294_v47  ;;  %10955 = vmatpush3.msra.mxu0 %v4544_v26 }
 0x4e4   :  { %10939 = vmatprep.mubr.msk.f32.mxu1 %vm11666_vm2, %v15205_v21  ;;  %10956 = vmatprep.subr.mxu0 %v15205_v21 }
 0x4e7   :  { %10940 = vmatmul.mubr.msk.f32.gmra.mxu1 %vm2325_vm3, %v4296_v32 }
 0x4e8   :  { %10942 = vmatprep.mubr.msk.f32.mxu1 %vm11666_vm2, %v15205_v21 }
 0x4eb   :  { %10943 = vmatmul.mubr.msk.f32.gmra.mxu1 %vm2325_vm3, %v4298_v41 }
 0x4ec   :  { %10945 = vmatprep.mubr.msk.f32.mxu1 %vm11666_vm2, %v15205_v21 }
 0x4ef   :  { %10946 = vmatmul.mubr.msk.f32.gmra.mxu1 %vm2325_vm3, %v4300_v59 }
 0x4f0   :  { %10983 = vmatprep.mubr.msk.f32.mxu1 %vm11666_vm2, %v15205_v21 }
 0x53b   :  { %v13270_v10 = vpop.f32.mrf.mxu0 }
 0x53d   :  { %v10860_v19 = vpop.f32.mrf.mxu0 }
 0x545   :  { %v13272_v8 = vpop.f32.mrf.mxu0 }
 0x547   :  { %v10863_v36 = vpop.f32.mrf.mxu0 }
 0x550   :  { %v13274_v22 = vpop.f32.mrf.mxu0 }
 0x552   :  { %v10866_v6 = vpop.f32.mrf.mxu0 }
 0x555   :  { %v13276_v56 = vpop.f32.mrf.mxu0 }
 0x557   :  { %v10869_v60 = vpop.f32.mrf.mxu0 }
 0x55a   :  { %v3406_v46 = vpop.f32.mrf.mxu0 }
 0x55b   :  { %v3943_v28 = vrot.slane %v3406_v46, %v12098_v58 }
 0x55c   :  { %v10872_v13 = vpop.f32.mrf.mxu0 }
 0x55d   :  { %v3950_v2 = vrot.slane %v3943_v28, %v12098_v58 }
 0x55e   :  { %v3707_v20 = vpop.f32.mrf.mxu1  ;;  %v4267_v54 = vpop.f32.mrf.mxu0 }
 0x55f   :  { %v3951_v63 = vcombine.high %v3707_v20, %v3707_v20  ;;  %v3958_v48 = vrot.slane %v3707_v20, %v12098_v58  ;;  %v13280_v39 = vmul.f32 0.35355338, %v4267_v54 }
 0x560   :  { %v10885_v57 = vpop.f32.mrf.mxu1  ;;  %v10910_v1 = vpop.f32.mrf.mxu0 }
 0x561   :  { %v3965_v37 = vrot.slane %v3951_v63, %v12098_v58  ;;  %v3966_v17 = vcombine.high %v3958_v48, %v3958_v48  ;;  %v3974_v38 = vrot.slane %v3958_v48, %v12098_v58  ;;  %v4431_v9 = vsel %vm2976_vm5, %v13280_v39, -inf }
 0x562   :  { %v3712_v32 = vpop.f32.mrf.mxu1  ;;  %v4272_v25 = vpop.f32.mrf.mxu0  ;;  %4432 = vmax.xlane.f32.xlu0 %v4431_v9 }
 0x563   :  { %v3967_v49 = vcombine.high %v3965_v37, %v3965_v37  ;;  %v3981_v47 = vrot.slane %v3965_v37, %v12098_v58  ;;  %v3988_v59 = vrot.slane %v3966_v17, %v12098_v58  ;;  %v4000_v44 = vcombine.high %v3712_v32, %v3712_v32 }
 0x564   :  { %v3996_v7 = vcombine.high %v3974_v38, %v3974_v38  ;;  %v5944_v41 = vcombine.low %v3950_v2, %v3974_v38  ;;  %v4007_v35 = vrot.slane %v3712_v32, %v12098_v58  ;;  %v13290_v30 = vmul.f32 0.35355338, %v4272_v25  ;;  %v10888_v43 = vpop.f32.mrf.mxu1  ;;  %v10913_v26 = vpop.f32.mrf.mxu0 }
 0x565   :  { %v3995_v19 = vrot.slane %v3967_v49, %v12098_v58  ;;  %v3997_v36 = vcombine.high %v3981_v47, %v3981_v47  ;;  %v3998_v6 = vcombine.high %v3988_v59, %v3988_v59  ;;  %v4014_v60 = vrot.slane %v4000_v44, %v12098_v58 }
 0x566   :  { %v5945_v46 = vcombine.low %v3988_v59, %v3996_v7  ;;  %v5954_v13 = vrot.slane %v5944_v41, %v12098_v58  ;;  %v4015_v28 = vcombine.high %v4007_v35, %v4007_v35  ;;  %v4023_v20 = vrot.slane %v4007_v35, %v12098_v58  ;;  %v4277_v54 = vpop.f32.mrf.mxu0 }
 0x567   :  { %v5946_v63 = vcombine.low %v3998_v6, %v3981_v47  ;;  %v5947_v48 = vcombine.low %v3995_v19, %v3997_v36  ;;  %v3999_v57 = vcombine.high %v3995_v19, %v3995_v19  ;;  %v4016_v1 = vcombine.high %v4014_v60, %v4014_v60 }
 0x568   :  { %v5961_v37 = vrot.slane %v5945_v46, %v12098_v58  ;;  %v4030_v17 = vrot.slane %v4014_v60, %v12098_v58  ;;  %v4037_v2 = vrot.slane %v4015_v28, %v12098_v58  ;;  %v4045_v38 = vcombine.high %v4023_v20, %v4023_v20  ;;  %v10916_v9 = vpop.f32.mrf.mxu0 }
 0x569   :  { %v5968_v32 = vrot.slane %v5946_v63, %v12098_v58  ;;  %v5975_v25 = vrot.slane %v5947_v48, %v12098_v58  ;;  %v4044_v49 = vrot.slane %v4016_v1, %v12098_v58  ;;  %v5993_v59 = vcombine.low %v3999_v57, %v4023_v20 }
 0x56a   :  { %v5976_v44 = vcombine.low %v5954_v13, %v5961_v37  ;;  %v4046_v47 = vcombine.high %v4030_v17, %v4030_v17  ;;  %v4047_v7 = vcombine.high %v4037_v2, %v4037_v2  ;;  %v5994_v41 = vcombine.low %v4037_v2, %v4045_v38 }
 0x56b   :  { %v6003_v35 = vrot.slane %v5993_v59, %v12098_v58  ;;  %v4434_v43 = vsel %vm2976_vm5, %v13290_v30, -inf  ;;  %v5977_v6 = vcombine.low %v5968_v32, %v5975_v25  ;;  %v13318_v38 = vmul.f32 0.35355338, %v4277_v54 }
 0x56c   :  { %v5995_v26 = vcombine.low %v4047_v7, %v4030_v17  ;;  %v5996_v19 = vcombine.low %v4044_v49, %v4046_v47  ;;  %v6010_v36 = vrot.slane %v5994_v41, %v12098_v58  ;;  %4435 = vmax.xlane.f32.xlu1 %v4434_v43  ;;  %v5984_v13 = vrot.slane %v5976_v44, %v12098_v58 }
 0x56d   :  { %v5991_v20 = vrot.slane %v5977_v6, %v12098_v58 }
 0x56e   :  { %v6017_v60 = vrot.slane %v5995_v26, %v12098_v58  ;;  %v6024_v46 = vrot.slane %v5996_v19, %v12098_v58  ;;  %v6025_v28 = vcombine.low %v6003_v35, %v6010_v36  ;;  %v4048_v19 = vcombine.high %v4044_v49, %v4044_v49 }
 0x56f   :  { %v13310_v48 = vcombine.low %v5984_v13, %v5991_v20  ;;  %v4437_v36 = vsel %vm2976_vm5, %v13318_v38, -inf }
 0x570   :  { %v6026_v63 = vcombine.low %v6017_v60, %v6024_v46  ;;  %v6033_v57 = vrot.slane %v6025_v28, %v12098_v58 }
 0x572   :  { %v6040_v1 = vrot.slane %v6026_v63, %v12098_v58 }
 0x574   :  { %v13314_v37 = vcombine.low %v6033_v57, %v6040_v1 }
 0x578   :  { %4541 = vrot.lane.b32.xlu0 %v12898_v33, %s11668_s4 }
 0x58f   :  { %v4282_v17 = vpop.f32.mrf.mxu0 }
 0x590   :  { %v13323_v47 = vmul.f32 0.35355338, %v4282_v17 }
 0x591   :  { %v10919_v2 = vpop.f32.mrf.mxu0 }
 0x592   :  { %v4440_v49 = vsel %vm2976_vm5, %v13323_v47, -inf }
 0x593   :  { %v3717_v9 = vpop.f32.mrf.mxu1  ;;  %v4287_v32 = vpop.f32.mrf.mxu0 }
 0x594   :  { %v4049_v25 = vcombine.high %v3717_v9, %v3717_v9  ;;  %v4056_v59 = vrot.slane %v3717_v9, %v12098_v58  ;;  %v13321_v44 = vmul.f32 0.35355338, %v4287_v32 }
 0x595   :  { %v10891_v7 = vpop.f32.mrf.mxu1  ;;  %v10922_v41 = vpop.f32.mrf.mxu0 }
 0x596   :  { %v4063_v35 = vrot.slane %v4049_v25, %v12098_v58  ;;  %v4064_v43 = vcombine.high %v4056_v59, %v4056_v59  ;;  %v4072_v26 = vrot.slane %v4056_v59, %v12098_v58  ;;  %v4443_v54 = vsel %vm2989_vm6, %v13321_v44, -inf }
 0x597   :  { %v3722_v6 = vpop.f32.mrf.mxu1  ;;  %4444 = vmax.xlane.f32.xlu1 %v4443_v54  ;;  %4438 = vmax.xlane.f32.xlu0 %v4437_v36 }
 0x598   :  { %v4065_v60 = vcombine.high %v4063_v35, %v4063_v35  ;;  %v4079_v46 = vrot.slane %v4063_v35, %v12098_v58  ;;  %v4086_v28 = vrot.slane %v4064_v43, %v12098_v58  ;;  %v4094_v13 = vcombine.high %v4072_v26, %v4072_v26 }
 0x599   :  { %v6042_v20 = vcombine.low %v4048_v19, %v4072_v26  ;;  %v4098_v63 = vcombine.high %v3722_v6, %v3722_v6  ;;  %v4105_v57 = vrot.slane %v3722_v6, %v12098_v58  ;;  %v10894_v1 = vpop.f32.mrf.mxu1 }
 0x59a   :  { %v4093_v17 = vrot.slane %v4065_v60, %v12098_v58  ;;  %v4095_v2 = vcombine.high %v4079_v46, %v4079_v46  ;;  %v4096_v9 = vcombine.high %v4086_v28, %v4086_v28  ;;  %v6043_v32 = vcombine.low %v4086_v28, %v4094_v13 }
 0x59b   :  { %v6052_v25 = vrot.slane %v6042_v20, %v12098_v58  ;;  %v4112_v59 = vrot.slane %v4098_v63, %v12098_v58  ;;  %v4113_v7 = vcombine.high %v4105_v57, %v4105_v57  ;;  %v4121_v41 = vrot.slane %v4105_v57, %v12098_v58  ;;  %v3727_v35 = vpop.f32.mrf.mxu1  ;;  %4441 = vmax.xlane.f32.xlu0 %v4440_v49 }
 0x59c   :  { %v6044_v43 = vcombine.low %v4096_v9, %v4079_v46  ;;  %v6045_v26 = vcombine.low %v4093_v17, %v4095_v2  ;;  %v6059_v54 = vrot.slane %v6043_v32, %v12098_v58  ;;  %v4097_v19 = vcombine.high %v4093_v17, %v4093_v17 }
 0x59d   :  { %v4114_v36 = vcombine.high %v4112_v59, %v4112_v59  ;;  %v4128_v6 = vrot.slane %v4112_v59, %v12098_v58  ;;  %v4135_v60 = vrot.slane %v4113_v7, %v12098_v58  ;;  %v4143_v28 = vcombine.high %v4121_v41, %v4121_v41  ;;  %v10897_v13 = vpop.f32.mrf.mxu1 }
 0x59e   :  { %v6066_v20 = vrot.slane %v6044_v43, %v12098_v58  ;;  %v6073_v63 = vrot.slane %v6045_v26, %v12098_v58  ;;  %v6074_v1 = vcombine.low %v6052_v25, %v6059_v54  ;;  %v6091_v57 = vcombine.low %v4097_v19, %v4121_v41 }
 0x59f   :  { %v4142_v46 = vrot.slane %v4114_v36, %v12098_v58  ;;  %v4144_v2 = vcombine.high %v4128_v6, %v4128_v6  ;;  %v4145_v9 = vcombine.high %v4135_v60, %v4135_v60  ;;  %v6092_v32 = vcombine.low %v4135_v60, %v4143_v28  ;;  %v4397_v17 = vpop.f32.mrf.mxu1 }
 0x5a0   :  { %v6101_v49 = vrot.slane %v6091_v57, %v12098_v58  ;;  %v4153_v59 = vrot.slane %v3727_v35, %v12098_v58  ;;  %v13348_v33 = vmul.f32 0.35355338, %v4397_v17  ;;  %v6075_v7 = vcombine.low %v6066_v20, %v6073_v63 }
 0x5a1   :  { %v6093_v13 = vcombine.low %v4145_v9, %v4128_v6  ;;  %v6094_v29 = vcombine.low %v4142_v46, %v4144_v2  ;;  %v6108_v43 = vrot.slane %v6092_v32, %v12098_v58  ;;  %v4146_v26 = vcombine.high %v4142_v46, %v4142_v46  ;;  %v10935_v25 = vpop.f32.mrf.mxu1 }
 0x5a2   :  { %v4160_v41 = vrot.slane %v4153_v59, %v12098_v58  ;;  %v4446_v54 = vsel %vm2976_vm5, %v13348_v33, -inf  ;;  %v6082_v19 = vrot.slane %v6074_v1, %v12098_v58  ;;  %v6089_v36 = vrot.slane %v6075_v7, %v12098_v58 }
 0x5a3   :  { %v6115_v35 = vrot.slane %v6093_v13, %v12098_v58  ;;  %v6122_v60 = vrot.slane %v6094_v29, %v12098_v58  ;;  %v6123_v28 = vcombine.low %v6101_v49, %v6108_v43  ;;  %4447 = vmax.xlane.f32.xlu0 %v4446_v54  ;;  %v4402_v6 = vpop.f32.mrf.mxu1 }
 0x5a4   :  { %v13358_v20 = vcombine.low %v4146_v26, %v4160_v41  ;;  %v4427_v63 = vmul.f32 0.35355338, %v4402_v6  ;;  %v13360_v57 = vcombine.low %v6082_v19, %v6089_v36 }
 0x5a5   :  { %v10938_v46 = vpop.f32.mrf.mxu1  ;;  %v6124_v2 = vcombine.low %v6115_v35, %v6122_v60  ;;  %v6131_v32 = vrot.slane %v6123_v28, %v12098_v58 }
 0x5a6   :  { %v4449_v9 = vsel %vm2976_vm5, %v4427_v63, -inf }
 0x5a7   :  { %4450 = vmax.xlane.f32.xlu0 %v4449_v9  ;;  %v4407_v1 = vpop.f32.mrf.mxu1  ;;  %v6138_v17 = vrot.slane %v6124_v2, %v12098_v58 }
 0x5a8   :  { %v4428_v59 = vmul.f32 0.35355338, %v4407_v1 }
 0x5a9   :  { %v10941_v29 = vpop.f32.mrf.mxu1  ;;  %v13365_v49 = vcombine.low %v6131_v32, %v6138_v17 }
 0x5aa   :  { %v4452_v7 = vsel %vm2976_vm5, %v4428_v59, -inf }
 0x5ab   :  { %4453 = vmax.xlane.f32.xlu1 %v4452_v7  ;;  %v4412_v13 = vpop.f32.mrf.mxu1 }
 0x5ac   :  { %v13368_v43 = vmul.f32 0.35355338, %v4412_v13 }
 0x5ad   :  { %v10944_v26 = vpop.f32.mrf.mxu1 }
 0x5ae   :  { %v4455_v25 = vsel %vm2976_vm5, %v13368_v43, -inf }
 0x5af   :  { %4456 = vmax.xlane.f32.xlu0 %v4455_v25  ;;  %v4417_v41 = vpop.f32.mrf.mxu1 }
 0x5b0   :  { %v13372_v54 = vmul.f32 0.35355338, %v4417_v41 }
 0x5b1   :  { %v10947_v19 = vpop.f32.mrf.mxu1 }
 0x5b2   :  { %v4458_v36 = vsel %vm2989_vm6, %v13372_v54, -inf }
 0x5b3   :  { %4459 = vmax.xlane.f32.xlu1 %v4458_v36 }
 0x5c4   :  { %4670 = vrot.lane.b32.xlu1 %v12993_v34, %s11668_s4 }
 0x5c5   :  { %4668 = vrot.lane.b32.xlu0 %v12995_v23, %s11668_s4 }
 0x5eb   :  { %v4433_v35 = vpop.xlane.xlu0 %4432 }
 0x5ec   :  { %v4461_v60 = vsub.f32 %v13280_v39, %v4433_v35 }
 0x5ee   :  { %v4471_v28 = vmul.f32 1.442695, %v4461_v60 }
 0x5ef   :  { %v4542_v6 = vpop.permute.xlu0 %4541 }
 0x5f0   :  { %11481 = vpow2.f32 %v4471_v28  ;;  %10957 = vmatpush3.msra.mxu0 %v4542_v6 }
 0x5f1   :  { %10998 = vmatprep.subr.mxu0 %v15205_v21 }
 0x5f5   :  { %v4436_v46 = vpop.xlane.xlu1 %4435 }
 0x5f6   :  { %v4462_v2 = vsub.f32 %v13290_v30, %v4436_v46 }
 0x5f8   :  { %v4473_v9 = vmul.f32 1.442695, %v4462_v2 }
 0x5fa   :  { %11483 = vpow2.f32 %v4473_v9 }
 0x5fd   :  { %v13383_v1 = vpop.eup %11481 }
 0x5fe   :  { %v4491_v32 = vsel %vm2976_vm5, %v13383_v1, 0.0 }
 0x5ff   :  { %4492 = vadd.xlane.f32.xlu0 %v4491_v32 }
 0x607   :  { %v13387_v17 = vpop.eup %11483 }
 0x608   :  { %v4494_v39 = vsel %vm2976_vm5, %v13387_v17, 0.0 }
 0x609   :  { %4495 = vadd.xlane.f32.xlu1 %v4494_v39 }
 0x620   :  { %v4445_v29 = vpop.xlane.xlu1 %4444  ;;  %v4439_v7 = vpop.xlane.xlu0 %4438 }
 0x621   :  { %v4465_v13 = vsub.f32 %v13321_v44, %v4445_v29  ;;  %v4463_v30 = vsub.f32 %v13318_v38, %v4439_v7 }
 0x623   :  { %v4475_v26 = vmul.f32 1.442695, %v4463_v30  ;;  %v4479_v25 = vmul.f32 1.442695, %v4465_v13 }
 0x624   :  { %v4442_v41 = vpop.xlane.xlu0 %4441 }
 0x625   :  { %11485 = vpow2.f32 %v4475_v26  ;;  %v4464_v19 = vsub.f32 %v13323_v47, %v4442_v41 }
 0x626   :  { %11487 = vpow2.f32 %v4479_v25 }
 0x627   :  { %v4477_v36 = vmul.f32 1.442695, %v4464_v19 }
 0x629   :  { %11489 = vpow2.f32 %v4477_v36 }
 0x62c   :  { %v4448_v35 = vpop.xlane.xlu0 %4447 }
 0x62d   :  { %v4466_v60 = vsub.f32 %v13348_v33, %v4448_v35 }
 0x62f   :  { %v4481_v28 = vmul.f32 1.442695, %v4466_v60 }
 0x630   :  { %v4451_v6 = vpop.xlane.xlu0 %4450 }
 0x631   :  { %11491 = vpow2.f32 %v4481_v28  ;;  %v4467_v46 = vsub.f32 %v4427_v63, %v4451_v6 }
 0x632   :  { %v13395_v2 = vpop.eup %11485 }
 0x633   :  { %v4483_v44 = vmul.f32 1.442695, %v4467_v46  ;;  %v4497_v38 = vsel %vm2976_vm5, %v13395_v2, 0.0  ;;  %v13399_v32 = vpop.eup %11487 }
 0x634   :  { %v4454_v9 = vpop.xlane.xlu1 %4453  ;;  %4498 = vadd.xlane.f32.xlu0 %v4497_v38  ;;  %v4503_v63 = vsel %vm2989_vm6, %v13399_v32, 0.0 }
 0x635   :  { %11493 = vpow2.f32 %v4483_v44  ;;  %v4468_v47 = vsub.f32 %v4428_v59, %v4454_v9 }
 0x636   :  { %v13401_v39 = vpop.eup %11489 }
 0x637   :  { %v4485_v29 = vmul.f32 1.442695, %v4468_v47  ;;  %v4500_v7 = vsel %vm2976_vm5, %v13401_v39, 0.0  ;;  %v15257_v47 = vld [vmem:[#allocation20_spill] sm:$0xff] }
 0x638   :  { %v4457_v33 = vpop.xlane.xlu0 %4456  ;;  %4501 = vadd.xlane.f32.xlu1 %v4500_v7  ;;  %4504 = vadd.xlane.f32.xlu0 %v4503_v63  ;;  %v15258_v63 = vld [vmem:[#allocation24_spill] sm:$0xff] }
 0x639   :  { %11495 = vpow2.f32 %v4485_v29  ;;  %v4469_v13 = vsub.f32 %v13368_v43, %v4457_v33 }
 0x63b   :  { %v4487_v30 = vmul.f32 1.442695, %v4469_v13  ;;  %v15259_v13 = vld [vmem:[#allocation18_spill] sm:$0xff] }
 0x63c   :  { %v4460_v26 = vpop.xlane.xlu1 %4459  ;;  %v4669_v36 = vpop.permute.xlu0 %4668 }
 0x63d   :  { %11497 = vpow2.f32 %v4487_v30  ;;  %v4470_v46 = vsub.f32 %v13372_v54, %v4460_v26 }
 0x63e   :  { %v13408_v25 = vpop.eup %11491 }
 0x63f   :  { %v4506_v59 = vsel %vm2976_vm5, %v13408_v25, 0.0  ;;  %v4489_v44 = vmul.f32 1.442695, %v4470_v46 }
 0x640   :  { %4507 = vadd.xlane.f32.xlu0 %v4506_v59  ;;  %v4671_v41 = vpop.permute.xlu1 %4670 }
 0x641   :  { %10974 = vmatpush3.msk.msra.mxu1 %vm3317_vm4, %v4671_v41  ;;  %11499 = vpow2.f32 %v4489_v44 }
 0x642   :  { %v13413_v19 = vpop.eup %11493  ;;  %10975 = vmatprep.subr.mxu1 %v15205_v21 }
 0x643   :  { %10976 = vmatpush3.msra.mxu1 %v4669_v36  ;;  %v4509_v43 = vsel %vm2976_vm5, %v13413_v19, 0.0 }
 0x644   :  { %4510 = vadd.xlane.f32.xlu0 %v4509_v43  ;;  %10977 = vmatprep.subr.mxu1 %v15205_v21 }
 0x646   :  { %v13419_v35 = vpop.eup %11495 }
 0x647   :  { %v4512_v60 = vsel %vm2976_vm5, %v13419_v35, 0.0 }
 0x648   :  { %4513 = vadd.xlane.f32.xlu1 %v4512_v60 }
 0x64a   :  { %v13423_v28 = vpop.eup %11497 }
 0x64b   :  { %v4515_v6 = vsel %vm2976_vm5, %v13423_v28, 0.0 }
 0x64c   :  { %4516 = vadd.xlane.f32.xlu0 %v4515_v6 }
 0x64e   :  { %v13442_v38 = vpop.eup %11499 }
 0x64f   :  { %v4518_v54 = vsel %vm2989_vm6, %v13442_v38, 0.0 }
 0x659   :  { %4666 = vrot.lane.b32.xlu1 %v13021_v55, %s11668_s4 }
 0x662   :  { %4664 = vrot.lane.b32.xlu0 %v13031_v11, %s11668_s4 }
 0x666   :  { %4662 = vrot.lane.b32.xlu0 %v13037_v24, %s11668_s4 }
 0x66a   :  { %6431 = vrot.lane.b32.xlu0 %v12754_v61, %s11669_s0 }
 0x66e   :  { %6429 = vrot.lane.b32.xlu0 %v12797_v31, %s11669_s0 }
 0x672   :  { %6427 = vrot.lane.b32.xlu0 %v12853_v15, %s11669_s0 }
 0x676   :  { %6423 = vrot.lane.b32.xlu0 %v12906_v42, %s11669_s0 }
 0x67a   :  { %6413 = vrot.lane.b32.xlu0 %v15254_v40, %s11669_s0 }
 0x67d   :  { %4519 = vadd.xlane.f32.xlu1 %v4518_v54 }
 0x67e   :  { %6415 = vrot.lane.b32.xlu0 %v12974_v62, %s11669_s0 }
 0x682   :  { %6417 = vrot.lane.b32.xlu0 %v12981_v5, %s11669_s0 }
 0x686   :  { %6419 = vrot.lane.b32.xlu0 %v13004_v27, %s11669_s0 }
 0x688   :  { %v4493_v9 = vpop.xlane.xlu0 %4492 }
 0x689   :  { %11501 = vrcp.f32 %v4493_v9 }
 0x68a   :  { %6301 = vrot.lane.b32.xlu0 %v15257_v47, %s11669_s0 }
 0x68e   :  { %6297 = vrot.lane.b32.xlu0 %v12654_v12, %s11669_s0  ;;  %6425 = vrot.lane.b32.xlu1 %v12889_v0, %s11669_s0 }
 0x692   :  { %v4496_v29 = vpop.xlane.xlu1 %4495  ;;  %6293 = vrot.lane.b32.xlu0 %v12495_v14, %s11669_s0  ;;  %6421 = vrot.lane.b32.xlu1 %v13052_v52, %s11669_s0 }
 0x693   :  { %11503 = vrcp.f32 %v4496_v29 }
 0x696   :  { %6285 = vrot.lane.b32.xlu0 %v12795_v53, %s11669_s0  ;;  %6299 = vrot.lane.b32.xlu1 %v12638_v51, %s11669_s0  ;;  %v11502_v33 = vpop.eup %11501 }
 0x697   :  { %v4531_v7 = vmul.f32 %v11502_v33, %v13383_v1 }
 0x699   :  { %10959 = vmatmul.mubr.msk.f32.vlgmr.msra.gmra.mxu0 %vm2976_vm5, %v4531_v7  ;;  %v3741_v7 = vcombine.high %v13270_v10, %v13270_v10 }
 0x69a   :  { %6289 = vrot.lane.b32.xlu0 %v12901_v4, %s11669_s0  ;;  %6295 = vrot.lane.b32.xlu1 %v15258_v63, %s11669_s0 }
 0x69b   :  { %10961 = vmatprep.mubr.msk.f32.mxu0 %vm11666_vm2, %v15205_v21 }
 0x69e   :  { %6790 = vrot.lane.b32.xlu0 %v12995_v23, %s11669_s0  ;;  %6283 = vrot.lane.b32.xlu1 %v15259_v13, %s11669_s0 }
 0x6a0   :  { %v11504_v30 = vpop.eup %11503 }
 0x6a1   :  { %v4532_v1 = vmul.f32 %v11504_v30, %v13387_v17  ;;  %v3748_v30 = vrot.slane %v13270_v10, %v12098_v58 }
 0x6a2   :  { %6784 = vrot.lane.b32.xlu0 %v13037_v24, %s11669_s0  ;;  %6287 = vrot.lane.b32.xlu1 %v12864_v50, %s11669_s0 }
 0x6a3   :  { %10962 = vmatmul.mubr.msk.f32.gmra.mxu0 %vm2976_vm5, %v4532_v1 }
 0x6a4   :  { %10964 = vmatprep.mubr.msk.f32.mxu0 %vm11666_vm2, %v15205_v21 }
 0x6a6   :  { %7895 = vrot.lane.b32.xlu0 %v12638_v51, %s11670_s1  ;;  %6291 = vrot.lane.b32.xlu1 %v12948_v18, %s11669_s0 }
 0x6aa   :  { %7891 = vrot.lane.b32.xlu0 %v15258_v63, %s11670_s1  ;;  %6792 = vrot.lane.b32.xlu1 %v12993_v34, %s11669_s0 }
 0x6ae   :  { %7879 = vrot.lane.b32.xlu0 %v15259_v13, %s11670_s1  ;;  %6788 = vrot.lane.b32.xlu1 %v13021_v55, %s11669_s0  ;;  %v3790_v13 = vcombine.high %v13272_v8, %v13272_v8 }
 0x6b2   :  { %7881 = vrot.lane.b32.xlu0 %v12795_v53, %s11670_s1  ;;  %6786 = vrot.lane.b32.xlu1 %v13031_v11, %s11669_s0 }
 0x6b6   :  { %7897 = vrot.lane.b32.xlu1 %v15257_v47, %s11670_s1 }
 0x6ba   :  { %7893 = vrot.lane.b32.xlu1 %v12654_v12, %s11670_s1 }
 0x6bd   :  { %v4499_v51 = vpop.xlane.xlu0 %4498 }
 0x6be   :  { %11505 = vrcp.f32 %v4499_v51  ;;  %7889 = vrot.lane.b32.xlu1 %v12495_v14, %s11670_s1 }
 0x6c1   :  { %v4502_v17 = vpop.xlane.xlu1 %4501  ;;  %v4505_v26 = vpop.xlane.xlu0 %4504 }
 0x6c2   :  { %8027 = vrot.lane.b32.xlu1 %v12754_v61, %s11670_s1  ;;  %11507 = vrcp.f32 %v4502_v17  ;;  %v3804_v17 = vrot.slane %v3790_v13, %v12098_v58 }
 0x6c3   :  { %11509 = vrcp.f32 %v4505_v26  ;;  %v3839_v26 = vcombine.high %v13274_v22, %v13274_v22 }
 0x6c6   :  { %8025 = vrot.lane.b32.xlu1 %v12797_v31, %s11670_s1 }
 0x6c9   :  { %v4508_v53 = vpop.xlane.xlu0 %4507 }
 0x6ca   :  { %11511 = vrcp.f32 %v4508_v53  ;;  %v3756_v53 = vcombine.high %v3748_v30, %v3748_v30 }
 0x6cb   :  { %v11506_v59 = vpop.eup %11505 }
 0x6cc   :  { %v4533_v12 = vmul.f32 %v11506_v59, %v13395_v2  ;;  %v3797_v59 = vrot.slane %v13272_v8, %v12098_v58  ;;  %v3778_v10 = vrot.slane %v3756_v53, %v12098_v58 }
 0x6cd   :  { %v4511_v41 = vpop.xlane.xlu0 %4510 }
 0x6ce   :  { %10965 = vmatmul.mubr.msk.f32.gmra.mxu0 %vm2976_vm5, %v4533_v12  ;;  %11513 = vrcp.f32 %v4511_v41  ;;  %v3806_v41 = vcombine.high %v3804_v17, %v3804_v17 }
 0x6cf   :  { %10967 = vmatprep.mubr.msk.f32.mxu0 %vm11666_vm2, %v15205_v21  ;;  %v11508_v14 = vpop.eup %11507 }
 0x6d0   :  { %v4534_v61 = vmul.f32 %v11508_v14, %v13401_v39  ;;  %v11510_v43 = vpop.eup %11509  ;;  %v3853_v14 = vrot.slane %v3839_v26, %v12098_v58 }
 0x6d1   :  { %v4514_v36 = vpop.xlane.xlu1 %4513  ;;  %v4535_v60 = vmul.f32 %v11510_v43, %v13399_v32  ;;  %v97_v32 = vld [vmem:[%s15150_s5] sm:$0xff] }
 0x6d2   :  { %10968 = vmatmul.mubr.msk.f32.gmra.mxu0 %vm2976_vm5, %v4534_v61  ;;  %11515 = vrcp.f32 %v4514_v36  ;;  %v3888_v61 = vcombine.high %v13276_v56, %v13276_v56 }
 0x6d3   :  { %10970 = vmatprep.mubr.msk.f32.mxu0 %vm11666_vm2, %v15205_v21 }
 0x6d5   :  { %v4517_v31 = vpop.xlane.xlu0 %4516  ;;  %v4667_v2 = vpop.permute.xlu1 %4666 }
 0x6d6   :  { %10978 = vmatpush3.msra.mxu1 %v4667_v2  ;;  %10971 = vmatmul.mubr.msk.f32.gmra.mxu0 %vm2976_vm5, %v4535_v60  ;;  %11517 = vrcp.f32 %v4517_v31  ;;  %v3764_v31 = vrot.slane %v3748_v30, %v12098_v58  ;;  %v3805_v2 = vcombine.high %v3797_v59, %v3797_v59 }
 0x6d7   :  { %10979 = vmatprep.subr.mxu1 %v15205_v21  ;;  %11000 = vmatprep.mubr.msk.f32.mxu0 %vm11666_vm2, %v15205_v21  ;;  %v11512_v39 = vpop.eup %11511 }
 0x6d8   :  { %v4536_v46 = vmul.f32 %v11512_v39, %v13408_v25  ;;  %v3846_v39 = vrot.slane %v13274_v22, %v12098_v58  ;;  %v3895_v22 = vrot.slane %v13276_v56, %v12098_v58 }
 0x6d9   :  { %v4665_v6 = vpop.permute.xlu0 %4664 }
 0x6da   :  { %10980 = vmatpush3.msra.mxu1 %v4665_v6  ;;  %v3903_v56 = vcombine.high %v3895_v22, %v3895_v22 }
 0x6db   :  { %10981 = vmatprep.subr.mxu1 %v15205_v21  ;;  %v11514_v54 = vpop.eup %11513 }
 0x6dc   :  { %v4537_v9 = vmul.f32 %v11514_v54, %v13413_v19  ;;  %v98_v19 = vld [vmem:[%s15150_s5 + $0x8] sm:$0xff]  ;;  %v3902_v54 = vrot.slane %v3888_v61, %v12098_v58 }
 0x6dd   :  { %v4663_v44 = vpop.permute.xlu0 %4662  ;;  %10999 = vmatpush3.msra.mxu0 %v98_v19  ;;  %v3854_v19 = vcombine.high %v3846_v39, %v3846_v39 }
 0x6de   :  { %10982 = vmatpush3.msra.mxu1 %v4663_v44  ;;  %11056 = vmatprep.subr.mxu0 %v15205_v21  ;;  %v3855_v44 = vcombine.high %v3853_v14, %v3853_v14  ;;  %v3904_v26 = vcombine.high %v3902_v54, %v3902_v54 }
 0x6df   :  { %10984 = vmatmul.mubr.msk.f32.vlgmr.msra.gmra.mxu1 %vm2976_vm5, %v4536_v46  ;;  %11027 = vmatprep.subr.mxu1 %v15205_v21  ;;  %v11516_v25 = vpop.eup %11515  ;;  %v3834_v46 = vrot.slane %v3806_v41, %v12098_v58 }
 0x6e0   :  { %10986 = vmatprep.mubr.msk.f32.mxu1 %vm11666_vm2, %v15205_v21  ;;  %11028 = vmatpush3.msra.mxu1 %v97_v32  ;;  %v4538_v47 = vmul.f32 %v11516_v25, %v13419_v35  ;;  %v5748_v32 = vcombine.low %v3764_v31, %v3778_v10  ;;  %v3820_v25 = vrot.slane %v3804_v17, %v12098_v58 }
 0x6e1   :  { %11081 = vmatprep.subr.mxu1 %v15205_v21  ;;  %v13553_v35 = vpop.permute.xlu0 %6431 }
 0x6e2   :  { %v5799_v13 = vcombine.low %v3820_v25, %v3834_v46  ;;  %v10295_v30 = vcombine.high %v3820_v25, %v3834_v46  ;;  %v5758_v17 = vrot.slane %v5748_v32, %v12098_v58  ;;  %v3932_v46 = vrot.slane %v3904_v26, %v12098_v58 }
 0x6e3   :  { %10987 = vmatmul.mubr.msk.f32.gmra.mxu1 %vm2976_vm5, %v4537_v9  ;;  %v11518_v29 = vpop.eup %11517  ;;  %v10292_v9 = vcombine.high %v3764_v31, %v3778_v10  ;;  %v3876_v10 = vrot.slane %v3854_v19, %v12098_v58 }
 0x6e4   :  { %10989 = vmatprep.mubr.msk.f32.mxu1 %vm11666_vm2, %v15205_v21  ;;  %v4539_v33 = vmul.f32 %v11518_v29, %v13423_v28  ;;  %v3755_v28 = vrot.slane %v3741_v7, %v12098_v58 }
 0x6e5   :  { %v13557_v63 = vpop.permute.xlu0 %6429  ;;  %v5765_v53 = vrot.slane %v10292_v9, %v12098_v58 }
 0x6e6   :  { %v3757_v1 = vcombine.high %v3755_v28, %v3755_v28  ;;  %v3771_v36 = vrot.slane %v3755_v28, %v12098_v58  ;;  %v3813_v28 = vrot.slane %v3797_v59, %v12098_v58  ;;  %v5821_v59 = vrot.slane %v5799_v13, %v12098_v58 }
 0x6e7   :  { %10990 = vmatmul.mubr.msk.f32.gmra.mxu1 %vm2976_vm5, %v4538_v47  ;;  %v3827_v47 = vrot.slane %v3805_v2, %v12098_v58  ;;  %v5828_v2 = vrot.slane %v10295_v30, %v12098_v58  ;;  %v5780_v32 = vcombine.low %v5758_v17, %v5765_v53  ;;  %v3911_v13 = vrot.slane %v3895_v22, %v12098_v58 }
 0x6e8   :  { %10992 = vmatprep.mubr.msk.f32.mxu1 %vm11666_vm2, %v15205_v21  ;;  %v3785_v12 = vrot.slane %v3757_v1, %v12098_v58  ;;  %v3883_v1 = vrot.slane %v3855_v44, %v12098_v58 }
 0x6e9   :  { %v13564_v51 = vpop.permute.xlu0 %6427  ;;  %v10294_v41 = vcombine.high %v3813_v28, %v3827_v47  ;;  %v5830_v30 = vcombine.low %v5821_v59, %v5828_v2 }
 0x6ea   :  { %v5750_v6 = vcombine.low %v3771_v36, %v3785_v12  ;;  %v10293_v8 = vcombine.high %v3771_v36, %v3785_v12  ;;  %v5797_v12 = vcombine.low %v3813_v28, %v3827_v47  ;;  %v3869_v36 = vrot.slane %v3853_v14, %v12098_v58 }
 0x6eb   :  { %10993 = vmatmul.mubr.msk.f32.gmra.mxu1 %vm2976_vm5, %v4539_v33  ;;  %v5814_v9 = vrot.slane %v10294_v41, %v12098_v58  ;;  %v5844_v2 = vrot.slane %v5830_v30, %v12098_v58 }
 0x6ec   :  { %10995 = vmatprep.mubr.msk.f32.mxu1 %vm11666_vm2, %v15205_v21  ;;  %v5772_v29 = vrot.slane %v5750_v6, %v12098_v58  ;;  %v5779_v33 = vrot.slane %v10293_v8, %v12098_v58  ;;  %v3862_v6 = vrot.slane %v3846_v39, %v12098_v58  ;;  %v10297_v8 = vcombine.high %v3869_v36, %v3883_v1 }
 0x6ed   :  { %v13577_v43 = vpop.permute.xlu0 %6423  ;;  %v5807_v14 = vrot.slane %v5797_v12, %v12098_v58 }
 0x6ee   :  { %v5781_v31 = vcombine.low %v5772_v29, %v5779_v33  ;;  %v5846_v25 = vcombine.low %v3862_v6, %v3876_v10  ;;  %v10296_v47 = vcombine.high %v3862_v6, %v3876_v10  ;;  %v3918_v29 = vrot.slane %v3902_v54, %v12098_v58 }
 0x6ef   :  { %v3925_v33 = vrot.slane %v3903_v56, %v12098_v58  ;;  %v5788_v54 = vrot.slane %v5780_v32, %v12098_v58  ;;  %v5829_v41 = vcombine.low %v5807_v14, %v5814_v9 }
 0x6f0   :  { %v5795_v28 = vrot.slane %v5781_v31, %v12098_v58  ;;  %v5897_v17 = vcombine.low %v3918_v29, %v3932_v46  ;;  %v10299_v26 = vcombine.high %v3918_v29, %v3932_v46  ;;  %v5863_v10 = vrot.slane %v10296_v47, %v12098_v58 }
 0x6f1   :  { %v13590_v7 = vpop.permute.xlu0 %6413  ;;  %v5895_v56 = vcombine.low %v3911_v13, %v3925_v33  ;;  %v10298_v31 = vcombine.high %v3911_v13, %v3925_v33  ;;  %v5837_v9 = vrot.slane %v5829_v41, %v12098_v58 }
 0x6f2   :  { %v5796_v22 = vcombine.low %v5788_v54, %v5795_v28  ;;  %v5919_v59 = vrot.slane %v5897_v17, %v12098_v58 }
 0x6f3   :  { %v5905_v46 = vrot.slane %v5895_v56, %v12098_v58  ;;  %v5912_v32 = vrot.slane %v10298_v31, %v12098_v58  ;;  %v5845_v47 = vcombine.low %v5837_v9, %v5844_v2 }
 0x6f5   :  { %v13604_v44 = vpop.permute.xlu0 %6415 }
 0x706   :  { %v4520_v60 = vpop.xlane.xlu1 %4519 }
 0x707   :  { %11519 = vrcp.f32 %v4520_v60  ;;  %v5848_v60 = vcombine.low %v3869_v36, %v3883_v1  ;;  %v5877_v1 = vrot.slane %v10297_v8, %v12098_v58  ;;  %v5856_v36 = vrot.slane %v5846_v25, %v12098_v58 }
 0x709   :  { %v5870_v39 = vrot.slane %v5848_v60, %v12098_v58  ;;  %v13620_v60 = vpop.permute.xlu0 %6417  ;;  %v5878_v8 = vcombine.low %v5856_v36, %v5863_v10 }
 0x70a   :  { %v13598_v61 = vpop.permute.xlu1 %6425 }
 0x70b   :  { %v5879_v6 = vcombine.low %v5870_v39, %v5877_v1  ;;  %v5886_v28 = vrot.slane %v5878_v8, %v12098_v58 }
 0x70d   :  { %v13638_v25 = vpop.permute.xlu0 %6419  ;;  %v5893_v29 = vrot.slane %v5879_v6, %v12098_v58 }
 0x70e   :  { %v13614_v53 = vpop.permute.xlu1 %6421 }
 0x70f   :  { %v5894_v39 = vcombine.low %v5886_v28, %v5893_v29 }
 0x711   :  { %v13652_v30 = vpop.permute.xlu0 %6301 }
 0x712   :  { %v13630_v14 = vpop.permute.xlu1 %6299 }
 0x714   :  { %v11520_v19 = vpop.eup %11519 }
 0x715   :  { %v4540_v12 = vmul.f32 %v11520_v19, %v13442_v38  ;;  %v5926_v38 = vrot.slane %v10299_v26, %v12098_v58  ;;  %v5927_v19 = vcombine.low %v5905_v46, %v5912_v32  ;;  %v13668_v26 = vpop.permute.xlu0 %6297 }
 0x717   :  { %10996 = vmatmul.mubr.msk.f32.gmra.mxu1 %vm2976_vm5, %v4540_v12  ;;  %v5928_v33 = vcombine.low %v5919_v59, %v5926_v38  ;;  %v5935_v1 = vrot.slane %v5927_v19, %v12098_v58 }
 0x718   :  { %11029 = vmatprep.mubr.msk.f32.mxu1 %vm11666_vm2, %v15205_v21 }
 0x719   :  { %v5942_v13 = vrot.slane %v5928_v33, %v12098_v58 }
 0x71b   :  { %11030 = vmatmul.mubr.msk.f32.vlgmr.msra.gmra.mxu1 %vm2325_vm3, %v5796_v22 }
 0x71c   :  { %11082 = vmatpush3.xpose.msk.msra.mxu1 %vm2325_vm3, %v13553_v35  ;;  %11032 = vmatprep.mubr.msk.f32.mxu1 %vm11666_vm2, %v15205_v21  ;;  %v13648_v35 = vpop.permute.xlu1 %6295 }
 0x71d   :  { %11083 = vmatprep.subr.mxu1 %v15205_v21 }
 0x71f   :  { %11033 = vmatmul.mubr.msk.f32.gmra.mxu1 %vm2325_vm3, %v5845_v47 }
 0x720   :  { %11084 = vmatpush3.xpose.msk.msra.mxu1 %vm2325_vm3, %v13557_v63  ;;  %11035 = vmatprep.mubr.msk.f32.mxu1 %vm11666_vm2, %v15205_v21  ;;  %v5943_v63 = vcombine.low %v5935_v1, %v5942_v13  ;;  %v13661_v17 = vpop.permute.xlu1 %6283 }
 0x721   :  { %11085 = vmatprep.subr.mxu1 %v15205_v21 }
 0x723   :  { %11036 = vmatmul.mubr.msk.f32.gmra.mxu1 %vm2325_vm3, %v5894_v39 }
 0x724   :  { %11086 = vmatpush3.xpose.msk.msra.mxu1 %vm2325_vm3, %v13564_v51  ;;  %11038 = vmatprep.mubr.msk.f32.mxu1 %vm11666_vm2, %v15205_v21  ;;  %v13677_v51 = vpop.permute.xlu1 %6287 }
 0x725   :  { %11087 = vmatprep.subr.mxu1 %v15205_v21 }
 0x727   :  { %11039 = vmatmul.mubr.msk.f32.gmra.mxu1 %vm2325_vm3, %v5943_v63 }
 0x728   :  { %11088 = vmatpush3.xpose.msk.msra.mxu1 %vm2325_vm3, %v13598_v61  ;;  %11041 = vmatprep.mubr.msk.f32.mxu1 %vm11666_vm2, %v15205_v21  ;;  %v13680_v61 = vpop.permute.xlu0 %6293  ;;  %v13686_v12 = vpop.permute.xlu1 %6291 }
 0x729   :  { %11089 = vmatprep.subr.mxu1 %v15205_v21 }
 0x72b   :  { %11042 = vmatmul.mubr.msk.f32.gmra.mxu1 %vm2325_vm3, %v13310_v48  ;;  %v6147_v48 = vrot.slane %v13358_v20, %v12098_v58 }
 0x72c   :  { %11090 = vmatpush3.xpose.msk.msra.mxu1 %vm2325_vm3, %v13577_v43  ;;  %11044 = vmatprep.mubr.msk.f32.mxu1 %vm11666_vm2, %v15205_v21  ;;  %v13694_v43 = vpop.permute.xlu0 %6285 }
 0x72d   :  { %11131 = vmatprep.subr.mxu1 %v15205_v21  ;;  %v6154_v54 = vrot.slane %v6147_v48, %v12098_v58 }
 0x72f   :  { %11045 = vmatmul.mubr.msk.f32.gmra.mxu1 %vm2325_vm3, %v13314_v37  ;;  %v6793_v37 = vpop.permute.xlu1 %6792 }
 0x730   :  { %11047 = vmatprep.mubr.msk.f32.mxu1 %vm11666_vm2, %v15205_v21  ;;  %v13701_v41 = vpop.permute.xlu0 %6289 }
 0x733   :  { %11048 = vmatmul.mubr.msk.f32.gmra.mxu1 %vm2325_vm3, %v13360_v57  ;;  %v6789_v57 = vpop.permute.xlu1 %6788 }
 0x734   :  { %11050 = vmatprep.mubr.msk.f32.mxu1 %vm11666_vm2, %v15205_v21  ;;  %v6791_v20 = vpop.permute.xlu0 %6790 }
 0x737   :  { %11051 = vmatmul.mubr.msk.f32.gmra.mxu1 %vm2325_vm3, %v13365_v49  ;;  %v6787_v49 = vpop.permute.xlu1 %6786 }
 0x738   :  { %11053 = vmatprep.mubr.msk.f32.mxu1 %vm11666_vm2, %v15205_v21 }
 0x73b   :  { %11054 = vmatmul.mubr.msk.f32.gmra.mxu1 %vm2325_vm3, %v6154_v54 }
 0x73c   :  { %11091 = vmatprep.mubr.msk.f32.mxu1 %vm11666_vm2, %v15205_v21 }
 0x73f   :  { %11092 = vmatmul.mubr.msk.f32.vlgmr.msra.gmra.mxu1 %vm2325_vm3, %v13590_v7  ;;  %v6785_v7 = vpop.permute.xlu0 %6784 }
 0x740   :  { %11132 = vmatpush3.msk.msra.mxu1 %vm3317_vm4, %v6793_v37  ;;  %11094 = vmatprep.mubr.msk.f32.mxu1 %vm11666_vm2, %v15205_v21 }
 0x741   :  { %11133 = vmatprep.subr.mxu1 %v15205_v21 }
 0x742   :  { %11134 = vmatpush3.msra.mxu1 %v6791_v20 }
 0x743   :  { %11135 = vmatprep.subr.mxu1 %v15205_v21  ;;  %11095 = vmatmul.mubr.msk.f32.gmra.mxu1 %vm2325_vm3, %v13604_v44 }
 0x744   :  { %11136 = vmatpush3.msra.mxu1 %v6789_v57  ;;  %11097 = vmatprep.mubr.msk.f32.mxu1 %vm11666_vm2, %v15205_v21 }
 0x745   :  { %11137 = vmatprep.subr.mxu1 %v15205_v21 }
 0x746   :  { %11138 = vmatpush3.msra.mxu1 %v6787_v49 }
 0x747   :  { %11139 = vmatprep.subr.mxu1 %v15205_v21  ;;  %11098 = vmatmul.mubr.msk.f32.gmra.mxu1 %vm2325_vm3, %v13620_v60 }
 0x748   :  { %11140 = vmatpush3.msra.mxu1 %v6785_v7  ;;  %11100 = vmatprep.mubr.msk.f32.mxu1 %vm11666_vm2, %v15205_v21 }
 0x749   :  { %11185 = vmatprep.subr.mxu1 %v15205_v21 }
 0x74b   :  { %11101 = vmatmul.mubr.msk.f32.gmra.mxu1 %vm2325_vm3, %v13638_v25 }
 0x74c   :  { %11103 = vmatprep.mubr.msk.f32.mxu1 %vm11666_vm2, %v15205_v21 }
 0x74f   :  { %11104 = vmatmul.mubr.msk.f32.gmra.mxu1 %vm2325_vm3, %v13614_v53 }
 0x750   :  { %11141 = vmatprep.mubr.msk.f32.mxu1 %vm11666_vm2, %v15205_v21 }
 0x759   :  { %v4638_v44 = vpop.f32.mrf.mxu0 }
 0x75a   :  { %v4793_v36 = vcombine.high %v4638_v44, %v4638_v44  ;;  %v4800_v10 = vrot.slane %v4638_v44, %v12098_v58 }
 0x75b   :  { %v10960_v56 = vpop.f32.mrf.mxu0 }
 0x75c   :  { %v4807_v31 = vrot.slane %v4793_v36, %v12098_v58  ;;  %v4808_v60 = vcombine.high %v4800_v10, %v4800_v10  ;;  %v4816_v59 = vrot.slane %v4800_v10, %v12098_v58 }
 0x75e   :  { %v4809_v22 = vcombine.high %v4807_v31, %v4807_v31  ;;  %v4830_v38 = vrot.slane %v4808_v60, %v12098_v58  ;;  %v4823_v2 = vrot.slane %v4807_v31, %v12098_v58 }
 0x760   :  { %v4837_v53 = vrot.slane %v4809_v22, %v12098_v58  ;;  %v5213_v6 = vcombine.low %v4816_v59, %v4830_v38  ;;  %v10275_v8 = vcombine.high %v4816_v59, %v4830_v38 }
 0x762   :  { %v5215_v46 = vcombine.low %v4823_v2, %v4837_v53  ;;  %v10276_v32 = vcombine.high %v4823_v2, %v4837_v53  ;;  %v5223_v9 = vrot.slane %v5213_v6, %v12098_v58  ;;  %v5230_v25 = vrot.slane %v10275_v8, %v12098_v58 }
 0x763   :  { %v4643_v47 = vpop.f32.mrf.mxu0 }
 0x764   :  { %v4842_v29 = vcombine.high %v4643_v47, %v4643_v47  ;;  %v4849_v33 = vrot.slane %v4643_v47, %v12098_v58  ;;  %v5237_v19 = vrot.slane %v5215_v46, %v12098_v58  ;;  %v5244_v28 = vrot.slane %v10276_v32, %v12098_v58 }
 0x765   :  { %v5245_v39 = vcombine.low %v5223_v9, %v5230_v25  ;;  %v10963_v13 = vpop.f32.mrf.mxu0 }
 0x766   :  { %v4856_v1 = vrot.slane %v4842_v29, %v12098_v58  ;;  %v4857_v63 = vcombine.high %v4849_v33, %v4849_v33  ;;  %v5246_v48 = vcombine.low %v5237_v19, %v5244_v28  ;;  %v4865_v54 = vrot.slane %v4849_v33, %v12098_v58 }
 0x767   :  { %v5253_v20 = vrot.slane %v5245_v39, %v12098_v58 }
 0x768   :  { %v4858_v37 = vcombine.high %v4856_v1, %v4856_v1  ;;  %v4879_v57 = vrot.slane %v4857_v63, %v12098_v58  ;;  %v5260_v49 = vrot.slane %v5246_v48, %v12098_v58  ;;  %v4872_v7 = vrot.slane %v4856_v1, %v12098_v58 }
 0x76a   :  { %v4886_v44 = vrot.slane %v4858_v37, %v12098_v58  ;;  %v5262_v36 = vcombine.low %v4865_v54, %v4879_v57  ;;  %v10277_v10 = vcombine.high %v4865_v54, %v4879_v57  ;;  %v5261_v56 = vcombine.low %v5253_v20, %v5260_v49 }
 0x76c   :  { %v5264_v31 = vcombine.low %v4872_v7, %v4886_v44  ;;  %v10278_v60 = vcombine.high %v4872_v7, %v4886_v44  ;;  %v5272_v22 = vrot.slane %v5262_v36, %v12098_v58  ;;  %v5279_v59 = vrot.slane %v10277_v10, %v12098_v58  ;;  %11001 = vmatmul.mubr.msk.f32.vlgmr.msra.gmra.mxu0 %vm2325_vm3, %v5261_v56 }
 0x76d   :  { %11057 = vmatpush3.xpose.msk.msra.mxu0 %vm2325_vm3, %v13652_v30  ;;  %11003 = vmatprep.mubr.msk.f32.mxu0 %vm11666_vm2, %v15205_v21 }
 0x76e   :  { %v5286_v38 = vrot.slane %v5264_v31, %v12098_v58  ;;  %v5293_v2 = vrot.slane %v10278_v60, %v12098_v58  ;;  %v5294_v53 = vcombine.low %v5272_v22, %v5279_v59  ;;  %11058 = vmatprep.subr.mxu0 %v15205_v21 }
 0x770   :  { %v5295_v6 = vcombine.low %v5286_v38, %v5293_v2  ;;  %v5302_v8 = vrot.slane %v5294_v53, %v12098_v58 }
 0x771   :  { %11059 = vmatpush3.xpose.msk.msra.mxu0 %vm2325_vm3, %v13630_v14 }
 0x772   :  { %v5309_v46 = vrot.slane %v5295_v6, %v12098_v58  ;;  %11060 = vmatprep.subr.mxu0 %v15205_v21 }
 0x774   :  { %v5310_v32 = vcombine.low %v5302_v8, %v5309_v46 }
 0x775   :  { %11061 = vmatpush3.xpose.msk.msra.mxu0 %vm2325_vm3, %v13668_v26 }
 0x776   :  { %11004 = vmatmul.mubr.msk.f32.gmra.mxu0 %vm2325_vm3, %v5310_v32  ;;  %11062 = vmatprep.subr.mxu0 %v15205_v21 }
 0x777   :  { %11006 = vmatprep.mubr.msk.f32.mxu0 %vm11666_vm2, %v15205_v21 }
 0x779   :  { %11063 = vmatpush3.xpose.msk.msra.mxu0 %vm2325_vm3, %v13648_v35 }
 0x77a   :  { %11064 = vmatprep.subr.mxu0 %v15205_v21 }
 0x77d   :  { %11065 = vmatpush3.xpose.msk.msra.mxu0 %vm2325_vm3, %v13680_v61 }
 0x77e   :  { %11106 = vmatprep.subr.mxu0 %v15205_v21 }
 0x78e   :  { %v4648_v14 = vpop.f32.mrf.mxu0 }
 0x78f   :  { %v4891_v30 = vcombine.high %v4648_v14, %v4648_v14  ;;  %v4898_v9 = vrot.slane %v4648_v14, %v12098_v58 }
 0x790   :  { %v10966_v26 = vpop.f32.mrf.mxu0 }
 0x791   :  { %v4905_v25 = vrot.slane %v4891_v30, %v12098_v58  ;;  %v4906_v47 = vcombine.high %v4898_v9, %v4898_v9  ;;  %v4914_v33 = vrot.slane %v4898_v9, %v12098_v58 }
 0x792   :  { %v4653_v19 = vpop.f32.mrf.mxu0 }
 0x793   :  { %v4907_v29 = vcombine.high %v4905_v25, %v4905_v25  ;;  %v4928_v35 = vrot.slane %v4906_v47, %v12098_v58  ;;  %v4940_v28 = vcombine.high %v4653_v19, %v4653_v19  ;;  %v4947_v39 = vrot.slane %v4653_v19, %v12098_v58 }
 0x794   :  { %v4921_v61 = vrot.slane %v4905_v25, %v12098_v58  ;;  %v10969_v48 = vpop.f32.mrf.mxu0 }
 0x795   :  { %v4935_v13 = vrot.slane %v4907_v29, %v12098_v58  ;;  %v5311_v1 = vcombine.low %v4914_v33, %v4928_v35  ;;  %v10279_v63 = vcombine.high %v4914_v33, %v4928_v35  ;;  %v4954_v37 = vrot.slane %v4940_v28, %v12098_v58 }
 0x796   :  { %v4955_v54 = vcombine.high %v4947_v39, %v4947_v39  ;;  %v4658_v44 = vpop.f32.mrf.mxu0  ;;  %v4963_v10 = vrot.slane %v4947_v39, %v12098_v58 }
 0x797   :  { %v5313_v57 = vcombine.low %v4921_v61, %v4935_v13  ;;  %v10280_v20 = vcombine.high %v4921_v61, %v4935_v13  ;;  %v5321_v49 = vrot.slane %v5311_v1, %v12098_v58  ;;  %v5328_v7 = vrot.slane %v10279_v63, %v12098_v58 }
 0x798   :  { %v4956_v36 = vcombine.high %v4954_v37, %v4954_v37  ;;  %v4977_v56 = vrot.slane %v4955_v54, %v12098_v58  ;;  %v10972_v59 = vpop.f32.mrf.mxu0  ;;  %v4970_v38 = vrot.slane %v4954_v37, %v12098_v58  ;;  %v4995_v33 = vrot.slane %v4658_v44, %v12098_v58 }
 0x799   :  { %v5335_v31 = vrot.slane %v5313_v57, %v12098_v58  ;;  %v5342_v60 = vrot.slane %v10280_v20, %v12098_v58  ;;  %v5343_v22 = vcombine.low %v5321_v49, %v5328_v7 }
 0x79a   :  { %v4984_v2 = vrot.slane %v4956_v36, %v12098_v58  ;;  %v5360_v53 = vcombine.low %v4963_v10, %v4977_v56  ;;  %v10281_v6 = vcombine.high %v4963_v10, %v4977_v56  ;;  %v5002_v37 = vrot.slane %v4995_v33, %v12098_v58 }
 0x79b   :  { %v5344_v8 = vcombine.low %v5335_v31, %v5342_v60  ;;  %v5351_v9 = vrot.slane %v5343_v22, %v12098_v58 }
 0x79c   :  { %v5362_v46 = vcombine.low %v4970_v38, %v4984_v2  ;;  %v10282_v32 = vcombine.high %v4970_v38, %v4984_v2  ;;  %v5370_v14 = vrot.slane %v5360_v53, %v12098_v58  ;;  %v5377_v30 = vrot.slane %v10281_v6, %v12098_v58 }
 0x79d   :  { %v5358_v26 = vrot.slane %v5344_v8, %v12098_v58 }
 0x79e   :  { %v5384_v25 = vrot.slane %v5362_v46, %v12098_v58  ;;  %v5391_v47 = vrot.slane %v10282_v32, %v12098_v58  ;;  %v5392_v29 = vcombine.low %v5370_v14, %v5377_v30 }
 0x79f   :  { %v4759_v35 = vpop.f32.mrf.mxu1  ;;  %v5359_v39 = vcombine.low %v5351_v9, %v5358_v26 }
 0x7a0   :  { %v5003_v19 = vcombine.high %v4759_v35, %v4759_v35  ;;  %v5010_v28 = vrot.slane %v4759_v35, %v12098_v58  ;;  %v5393_v13 = vcombine.low %v5384_v25, %v5391_v47  ;;  %v5400_v57 = vrot.slane %v5392_v29, %v12098_v58 }
 0x7a1   :  { %v10985_v61 = vpop.f32.mrf.mxu1  ;;  %11007 = vmatmul.mubr.msk.f32.gmra.mxu0 %vm2325_vm3, %v5359_v39 }
 0x7a2   :  { %v5017_v1 = vrot.slane %v5003_v19, %v12098_v58  ;;  %v5018_v63 = vcombine.high %v5010_v28, %v5010_v28  ;;  %v5026_v48 = vrot.slane %v5010_v28, %v12098_v58  ;;  %11009 = vmatprep.mubr.msk.f32.mxu0 %vm11666_vm2, %v15205_v21  ;;  %v5407_v20 = vrot.slane %v5393_v13, %v12098_v58 }
 0x7a3   :  { %v4764_v54 = vpop.f32.mrf.mxu1 }
 0x7a4   :  { %v5019_v49 = vcombine.high %v5017_v1, %v5017_v1  ;;  %v5033_v7 = vrot.slane %v5017_v1, %v12098_v58  ;;  %v5040_v44 = vrot.slane %v5018_v63, %v12098_v58  ;;  %v5048_v36 = vcombine.high %v5026_v48, %v5026_v48 }
 0x7a5   :  { %v5409_v10 = vcombine.low %v5002_v37, %v5026_v48  ;;  %v5052_v56 = vcombine.high %v4764_v54, %v4764_v54  ;;  %v5059_v31 = vrot.slane %v4764_v54, %v12098_v58  ;;  %v10988_v60 = vpop.f32.mrf.mxu1  ;;  %v5408_v22 = vcombine.low %v5400_v57, %v5407_v20 }
 0x7a6   :  { %v5047_v59 = vrot.slane %v5019_v49, %v12098_v58  ;;  %v5049_v38 = vcombine.high %v5033_v7, %v5033_v7  ;;  %v5050_v2 = vcombine.high %v5040_v44, %v5040_v44  ;;  %v5410_v53 = vcombine.low %v5040_v44, %v5048_v36 }
 0x7a7   :  { %v5066_v6 = vrot.slane %v5052_v56, %v12098_v58  ;;  %v5067_v8 = vcombine.high %v5059_v31, %v5059_v31  ;;  %v5075_v46 = vrot.slane %v5059_v31, %v12098_v58  ;;  %11010 = vmatmul.mubr.msk.f32.gmra.mxu0 %vm2325_vm3, %v5408_v22  ;;  %v4769_v32 = vpop.f32.mrf.mxu1  ;;  %v5419_v19 = vrot.slane %v5409_v10, %v12098_v58 }
 0x7a8   :  { %v5411_v14 = vcombine.low %v5050_v2, %v5033_v7  ;;  %v5412_v30 = vcombine.low %v5047_v59, %v5049_v38  ;;  %v5426_v9 = vrot.slane %v5410_v53, %v12098_v58  ;;  %v5051_v26 = vcombine.high %v5047_v59, %v5047_v59  ;;  %11012 = vmatprep.mubr.msk.f32.mxu0 %vm11666_vm2, %v15205_v21 }
 0x7a9   :  { %v5068_v25 = vcombine.high %v5066_v6, %v5066_v6  ;;  %v5082_v47 = vrot.slane %v5066_v6, %v12098_v58  ;;  %v5089_v29 = vrot.slane %v5067_v8, %v12098_v58  ;;  %v5097_v33 = vcombine.high %v5075_v46, %v5075_v46  ;;  %v10991_v35 = vpop.f32.mrf.mxu1 }
 0x7aa   :  { %v5433_v28 = vrot.slane %v5411_v14, %v12098_v58  ;;  %v5440_v39 = vrot.slane %v5412_v30, %v12098_v58  ;;  %v5458_v61 = vcombine.low %v5051_v26, %v5075_v46  ;;  %v5441_v54 = vcombine.low %v5419_v19, %v5426_v9 }
 0x7ab   :  { %v5096_v13 = vrot.slane %v5068_v25, %v12098_v58  ;;  %v5098_v1 = vcombine.high %v5082_v47, %v5082_v47  ;;  %v5099_v63 = vcombine.high %v5089_v29, %v5089_v29  ;;  %v5459_v48 = vcombine.low %v5089_v29, %v5097_v33  ;;  %v4774_v37 = vpop.f32.mrf.mxu1 }
 0x7ac   :  { %v5101_v57 = vcombine.high %v4769_v32, %v4769_v32  ;;  %v5108_v20 = vrot.slane %v4769_v32, %v12098_v58  ;;  %v5150_v49 = vcombine.high %v4774_v37, %v4774_v37  ;;  %v5468_v36 = vrot.slane %v5458_v61, %v12098_v58 }
 0x7ad   :  { %v5460_v7 = vcombine.low %v5099_v63, %v5082_v47  ;;  %v5461_v44 = vcombine.low %v5096_v13, %v5098_v1  ;;  %v5100_v10 = vcombine.high %v5096_v13, %v5096_v13  ;;  %v10994_v56 = vpop.f32.mrf.mxu1  ;;  %v5157_v59 = vrot.slane %v4774_v37, %v12098_v58 }
 0x7ae   :  { %v5115_v31 = vrot.slane %v5101_v57, %v12098_v58  ;;  %v5116_v60 = vcombine.high %v5108_v20, %v5108_v20  ;;  %v5124_v22 = vrot.slane %v5108_v20, %v12098_v58  ;;  %v5475_v38 = vrot.slane %v5459_v48, %v12098_v58 }
 0x7af   :  { %v5482_v2 = vrot.slane %v5460_v7, %v12098_v58  ;;  %v5489_v53 = vrot.slane %v5461_v44, %v12098_v58  ;;  %v5164_v6 = vrot.slane %v5150_v49, %v12098_v58  ;;  %v5165_v9 = vcombine.high %v5157_v59, %v5157_v59 }
 0x7b0   :  { %v5117_v8 = vcombine.high %v5115_v31, %v5115_v31  ;;  %v5131_v46 = vrot.slane %v5115_v31, %v12098_v58  ;;  %v5138_v32 = vrot.slane %v5116_v60, %v12098_v58  ;;  %v5146_v14 = vcombine.high %v5124_v22, %v5124_v22 }
 0x7b1   :  { %v5507_v30 = vcombine.low %v5100_v10, %v5124_v22  ;;  %v5166_v26 = vcombine.high %v5164_v6, %v5164_v6  ;;  %v5173_v25 = vrot.slane %v5157_v59, %v12098_v58  ;;  %v5180_v61 = vrot.slane %v5164_v6, %v12098_v58 }
 0x7b2   :  { %v5145_v47 = vrot.slane %v5117_v8, %v12098_v58  ;;  %v5147_v29 = vcombine.high %v5131_v46, %v5131_v46  ;;  %v5148_v33 = vcombine.high %v5138_v32, %v5138_v32  ;;  %v5508_v35 = vcombine.low %v5138_v32, %v5146_v14 }
 0x7b3   :  { %v5517_v19 = vrot.slane %v5507_v30, %v12098_v58  ;;  %v5187_v13 = vrot.slane %v5165_v9, %v12098_v58  ;;  %v5194_v1 = vrot.slane %v5166_v26, %v12098_v58  ;;  %v5195_v20 = vcombine.high %v5173_v25, %v5173_v25 }
 0x7b4   :  { %v5509_v63 = vcombine.low %v5148_v33, %v5131_v46  ;;  %v5510_v48 = vcombine.low %v5145_v47, %v5147_v29  ;;  %v5524_v37 = vrot.slane %v5508_v35, %v12098_v58  ;;  %v5149_v57 = vcombine.high %v5145_v47, %v5145_v47 }
 0x7b5   :  { %v5196_v49 = vcombine.high %v5180_v61, %v5180_v61  ;;  %v5197_v7 = vcombine.high %v5187_v13, %v5187_v13  ;;  %v5442_v44 = vcombine.low %v5433_v28, %v5440_v39  ;;  %v5490_v10 = vcombine.low %v5468_v36, %v5475_v38 }
 0x7b6   :  { %v5531_v56 = vrot.slane %v5509_v63, %v12098_v58  ;;  %v5538_v31 = vrot.slane %v5510_v48, %v12098_v58  ;;  %v5556_v60 = vcombine.low %v5149_v57, %v5173_v25  ;;  %v5557_v22 = vcombine.low %v5187_v13, %v5195_v20 }
 0x7b7   :  { %v5558_v59 = vcombine.low %v5197_v7, %v5180_v61  ;;  %v5559_v6 = vcombine.low %v5194_v1, %v5196_v49  ;;  %v5539_v8 = vcombine.low %v5517_v19, %v5524_v37  ;;  %v5449_v46 = vrot.slane %v5441_v54, %v12098_v58 }
 0x7b8   :  { %v5456_v32 = vrot.slane %v5442_v44, %v12098_v58  ;;  %v5491_v14 = vcombine.low %v5482_v2, %v5489_v53  ;;  %v5566_v30 = vrot.slane %v5556_v60, %v12098_v58  ;;  %v5540_v39 = vcombine.low %v5531_v56, %v5538_v31 }
 0x7b9   :  { %v5580_v9 = vrot.slane %v5558_v59, %v12098_v58  ;;  %v5587_v28 = vrot.slane %v5559_v6, %v12098_v58  ;;  %v5573_v36 = vrot.slane %v5557_v22, %v12098_v58  ;;  %v5498_v26 = vrot.slane %v5490_v10, %v12098_v58 }
 0x7ba   :  { %v5457_v38 = vcombine.low %v5449_v46, %v5456_v32  ;;  %v5505_v25 = vrot.slane %v5491_v14, %v12098_v58  ;;  %v5554_v47 = vrot.slane %v5540_v39, %v12098_v58  ;;  %v5547_v29 = vrot.slane %v5539_v8, %v12098_v58 }
 0x7bb   :  { %v5589_v2 = vcombine.low %v5580_v9, %v5587_v28  ;;  %v5588_v53 = vcombine.low %v5566_v30, %v5573_v36  ;;  %v5198_v37 = vcombine.high %v5194_v1, %v5194_v1 }
 0x7bc   :  { %11013 = vmatmul.mubr.msk.f32.gmra.mxu0 %vm2325_vm3, %v5457_v38  ;;  %v5506_v54 = vcombine.low %v5498_v26, %v5505_v25  ;;  %v5555_v33 = vcombine.low %v5547_v29, %v5554_v47 }
 0x7bd   :  { %11015 = vmatprep.mubr.msk.f32.mxu0 %vm11666_vm2, %v15205_v21  ;;  %v5603_v35 = vrot.slane %v5589_v2, %v12098_v58  ;;  %v5596_v19 = vrot.slane %v5588_v53, %v12098_v58 }
 0x7bf   :  { %v5604_v61 = vcombine.low %v5596_v19, %v5603_v35 }
 0x7c0   :  { %11016 = vmatmul.mubr.msk.f32.gmra.mxu0 %vm2325_vm3, %v5506_v54 }
 0x7c1   :  { %11018 = vmatprep.mubr.msk.f32.mxu0 %vm11666_vm2, %v15205_v21 }
 0x7c4   :  { %11019 = vmatmul.mubr.msk.f32.gmra.mxu0 %vm2325_vm3, %v5555_v33 }
 0x7c5   :  { %11021 = vmatprep.mubr.msk.f32.mxu0 %vm11666_vm2, %v15205_v21 }
 0x7c8   :  { %11022 = vmatmul.mubr.msk.f32.gmra.mxu0 %vm2325_vm3, %v5604_v61 }
 0x7c9   :  { %11024 = vmatprep.mubr.msk.f32.mxu0 %vm11666_vm2, %v15205_v21 }
 0x7d7   :  { %v4779_v13 = vpop.f32.mrf.mxu1 }
 0x7d8   :  { %v5205_v63 = vrot.slane %v4779_v13, %v12098_v58 }
 0x7d9   :  { %v10997_v48 = vpop.f32.mrf.mxu1 }
 0x7da   :  { %v5212_v57 = vrot.slane %v5205_v63, %v12098_v58 }
 0x7db   :  { %v13871_v20 = vpop.f32.mrf.mxu1 }
 0x7dc   :  { %v5605_v49 = vcombine.low %v5198_v37, %v5212_v57 }
 0x7dd   :  { %v11031_v7 = vpop.f32.mrf.mxu1 }
 0x7de   :  { %v5612_v44 = vrot.slane %v5605_v49, %v12098_v58 }
 0x7df   :  { %v13874_v10 = vpop.f32.mrf.mxu1 }
 0x7e0   :  { %v5619_v56 = vrot.slane %v5612_v44, %v12098_v58 }
 0x7e1   :  { %v11034_v31 = vpop.f32.mrf.mxu1 }
 0x7e2   :  { %11025 = vmatmul.mubr.msk.f32.gmra.mxu0 %vm2325_vm3, %v5619_v56  ;;  %v13941_v56 = vpop.permute.xlu1 %7897  ;;  %v13943_v31 = vpop.permute.xlu0 %7895 }
 0x7e3   :  { %v13878_v60 = vpop.f32.mrf.mxu1  ;;  %11066 = vmatprep.mubr.msk.f32.mxu0 %vm11666_vm2, %v15205_v21 }
 0x7e5   :  { %v11037_v1 = vpop.f32.mrf.mxu1 }
 0x7e6   :  { %11067 = vmatmul.mubr.msk.f32.vlgmr.msra.gmra.mxu0 %vm2325_vm3, %v13661_v17  ;;  %v13945_v1 = vpop.permute.xlu1 %7893 }
 0x7e7   :  { %v13884_v22 = vpop.f32.mrf.mxu1  ;;  %11069 = vmatprep.mubr.msk.f32.mxu0 %vm11666_vm2, %v15205_v21 }
 0x7e9   :  { %v11040_v59 = vpop.f32.mrf.mxu1 }
 0x7ea   :  { %11070 = vmatmul.mubr.msk.f32.gmra.mxu0 %vm2325_vm3, %v13694_v43  ;;  %v13947_v59 = vpop.permute.xlu0 %7891 }
 0x7eb   :  { %v13890_v6 = vpop.f32.mrf.mxu1  ;;  %11072 = vmatprep.mubr.msk.f32.mxu0 %vm11666_vm2, %v15205_v21 }
 0x7ed   :  { %v11043_v8 = vpop.f32.mrf.mxu1 }
 0x7ee   :  { %11073 = vmatmul.mubr.msk.f32.gmra.mxu0 %vm2325_vm3, %v13677_v51 }
 0x7ef   :  { %v13896_v46 = vpop.f32.mrf.mxu1  ;;  %11075 = vmatprep.mubr.msk.f32.mxu0 %vm11666_vm2, %v15205_v21 }
 0x7f1   :  { %v11046_v17 = vpop.f32.mrf.mxu1 }
 0x7f2   :  { %11076 = vmatmul.mubr.msk.f32.gmra.mxu0 %vm2325_vm3, %v13701_v41 }
 0x7f3   :  { %v13902_v32 = vpop.f32.mrf.mxu1  ;;  %11078 = vmatprep.mubr.msk.f32.mxu0 %vm11666_vm2, %v15205_v21 }
 0x7f5   :  { %v11049_v43 = vpop.f32.mrf.mxu1 }
 0x7f6   :  { %11079 = vmatmul.mubr.msk.f32.gmra.mxu0 %vm2325_vm3, %v13686_v12  ;;  %v13951_v43 = vpop.permute.xlu1 %7889 }
 0x7f7   :  { %v13908_v14 = vpop.f32.mrf.mxu1  ;;  %11116 = vmatprep.mubr.msk.f32.mxu0 %vm11666_vm2, %v15205_v21 }
 0x7f8   :  { %15260 = vst [vmem:[#allocation11_spill] sm:$0xff] %v13908_v14 }
 0x7f9   :  { %v11052_v51 = vpop.f32.mrf.mxu1 }
 0x7fa   :  { %v13955_v51 = vpop.permute.xlu0 %7879 }
 0x7fb   :  { %v13912_v30 = vpop.f32.mrf.mxu1 }
 0x7fc   :  { %15261 = vst [vmem:[#allocation16_spill] sm:$0xff] %v13912_v30 }
 0x7fd   :  { %v11055_v9 = vpop.f32.mrf.mxu1 }
 0x7ff   :  { %v6519_v28 = vpop.f32.mrf.mxu1 }
 0x800   :  { %v6548_v41 = vmul.f32 0.35355338, %v6519_v28 }
 0x801   :  { %v11093_v39 = vpop.f32.mrf.mxu1 }
 0x802   :  { %v6568_v36 = vsel %vm2976_vm5, %v6548_v41, -inf  ;;  %v13959_v39 = vpop.permute.xlu1 %8027 }
 0x803   :  { %6569 = vmax.xlane.f32.xlu0 %v6568_v36  ;;  %v6524_v38 = vpop.f32.mrf.mxu1 }
 0x804   :  { %v6549_v26 = vmul.f32 0.35355338, %v6524_v38  ;;  %v13961_v38 = vpop.permute.xlu0 %7881 }
 0x805   :  { %v11096_v25 = vpop.f32.mrf.mxu1 }
 0x806   :  { %v6571_v12 = vsel %vm2976_vm5, %v6549_v26, -inf }
 0x807   :  { %6572 = vmax.xlane.f32.xlu1 %v6571_v12  ;;  %v6529_v54 = vpop.f32.mrf.mxu1 }
 0x808   :  { %v6550_v47 = vmul.f32 0.35355338, %v6529_v54  ;;  %v13965_v54 = vpop.permute.xlu1 %8025 }
 0x809   :  { %v11099_v2 = vpop.f32.mrf.mxu1 }
 0x80a   :  { %v6574_v53 = vsel %vm2976_vm5, %v6550_v47, -inf }
 0x80b   :  { %6575 = vmax.xlane.f32.xlu0 %v6574_v53  ;;  %v6534_v29 = vpop.f32.mrf.mxu1 }
 0x80c   :  { %v13917_v33 = vmul.f32 0.35355338, %v6534_v29 }
 0x80d   :  { %v11102_v35 = vpop.f32.mrf.mxu1 }
 0x80e   :  { %v6577_v19 = vsel %vm2976_vm5, %v13917_v33, -inf }
 0x80f   :  { %6578 = vmax.xlane.f32.xlu0 %v6577_v19  ;;  %v6539_v61 = vpop.f32.mrf.mxu1 }
 0x810   :  { %v13931_v49 = vmul.f32 0.35355338, %v6539_v61 }
 0x811   :  { %v11105_v13 = vpop.f32.mrf.mxu1 }
 0x812   :  { %v6580_v7 = vsel %vm2989_vm6, %v13931_v49, -inf }
 0x818   :  { %8023 = vrot.lane.b32.xlu1 %v12853_v15, %s11670_s1 }
 0x81c   :  { %7885 = vrot.lane.b32.xlu1 %v12901_v4, %s11670_s1 }
 0x825   :  { %7883 = vrot.lane.b32.xlu0 %v12864_v50, %s11670_s1 }
 0x82c   :  { %v13927_v63 = vpop.f32.mrf.mxu0 }
 0x82e   :  { %v11002_v48 = vpop.f32.mrf.mxu0 }
 0x836   :  { %v13929_v37 = vpop.f32.mrf.mxu0 }
 0x838   :  { %v11005_v57 = vpop.f32.mrf.mxu0 }
 0x840   :  { %6581 = vmax.xlane.f32.xlu1 %v6580_v7 }
 0x851   :  { %8021 = vrot.lane.b32.xlu1 %v12889_v0, %s11670_s1 }
 0x861   :  { %v13937_v15 = vpop.f32.mrf.mxu0 }
 0x863   :  { %v11008_v4 = vpop.f32.mrf.mxu0 }
 0x867   :  { %v13939_v44 = vpop.f32.mrf.mxu0 }
 0x869   :  { %v11011_v50 = vpop.f32.mrf.mxu0 }
 0x87c   :  { %v13949_v8 = vpop.f32.mrf.mxu0 }
 0x87e   :  { %v11014_v17 = vpop.f32.mrf.mxu0 }
 0x880   :  { %v13953_v0 = vpop.f32.mrf.mxu0 }
 0x882   :  { %v11017_v9 = vpop.f32.mrf.mxu0 }
 0x884   :  { %v13957_v28 = vpop.f32.mrf.mxu0 }
 0x886   :  { %v11020_v36 = vpop.f32.mrf.mxu0 }
 0x888   :  { %v13963_v25 = vpop.f32.mrf.mxu0 }
 0x889   :  { %15262 = vst [vmem:[#allocation14_spill] sm:$0xff] %v13963_v25 }
 0x88a   :  { %v11023_v12 = vpop.f32.mrf.mxu0 }
 0x88c   :  { %v6570_v2 = vpop.xlane.xlu0 %6569 }
 0x88d   :  { %v6588_v53 = vsub.f32 %v6548_v41, %v6570_v2 }
 0x88f   :  { %v6603_v29 = vmul.f32 1.442695, %v6588_v53 }
 0x890   :  { %v6573_v35 = vpop.xlane.xlu1 %6572 }
 0x891   :  { %11521 = vpow2.f32 %v6603_v29  ;;  %v6589_v19 = vsub.f32 %v6549_v26, %v6573_v35 }
 0x893   :  { %v6605_v61 = vmul.f32 1.442695, %v6589_v19 }
 0x894   :  { %v6576_v13 = vpop.xlane.xlu0 %6575 }
 0x895   :  { %11523 = vpow2.f32 %v6605_v61  ;;  %v6590_v48 = vsub.f32 %v6550_v47, %v6576_v13 }
 0x897   :  { %v6607_v57 = vmul.f32 1.442695, %v6590_v48 }
 0x899   :  { %11525 = vpow2.f32 %v6607_v57  ;;  %v13987_v57 = vpop.permute.xlu1 %8023 }
 0x89e   :  { %v13967_v7 = vpop.eup %11521 }
 0x89f   :  { %v6628_v4 = vsel %vm2976_vm5, %v13967_v7, 0.0 }
 0x8a0   :  { %6629 = vadd.xlane.f32.xlu0 %v6628_v4  ;;  %v6579_v4 = vpop.xlane.xlu0 %6578 }
 0x8a2   :  { %v13971_v50 = vpop.eup %11523  ;;  %v13973_v17 = vpop.f32.mrf.mxu0 }
 0x8a3   :  { %15263 = vst [vmem:[#allocation15_spill] sm:$0xff] %v13973_v17  ;;  %v6631_v41 = vsel %vm2976_vm5, %v13971_v50, 0.0 }
 0x8a4   :  { %v11026_v26 = vpop.f32.mrf.mxu0  ;;  %6632 = vadd.xlane.f32.xlu1 %v6631_v41  ;;  %v6591_v41 = vsub.f32 %v13917_v33, %v6579_v4 }
 0x8a5   :  { %v13990_v26 = vpop.permute.xlu1 %7885 }
 0x8a6   :  { %v13977_v9 = vpop.eup %11525  ;;  %v6389_v47 = vpop.f32.mrf.mxu0 }
 0x8a7   :  { %v6634_v36 = vsel %vm2976_vm5, %v13977_v9, 0.0 }
 0x8a8   :  { %6635 = vadd.xlane.f32.xlu0 %v6634_v36  ;;  %v11068_v12 = vpop.f32.mrf.mxu0  ;;  %v6609_v36 = vmul.f32 1.442695, %v6591_v41 }
 0x8aa   :  { %v6394_v2 = vpop.f32.mrf.mxu0  ;;  %11527 = vpow2.f32 %v6609_v36 }
 0x8ac   :  { %v11071_v53 = vpop.f32.mrf.mxu0 }
 0x8ae   :  { %v6399_v29 = vpop.f32.mrf.mxu0 }
 0x8b0   :  { %v11074_v35 = vpop.f32.mrf.mxu0 }
 0x8b2   :  { %v6404_v19 = vpop.f32.mrf.mxu0 }
 0x8b4   :  { %v11077_v61 = vpop.f32.mrf.mxu0 }
 0x8b5   :  { %8019 = vrot.lane.b32.xlu1 %v12906_v42, %s11670_s1  ;;  %v13997_v61 = vmul.f32 0.35355338, %v6389_v47 }
 0x8b6   :  { %v6409_v13 = vpop.f32.mrf.mxu0 }
 0x8b7   :  { %v13993_v35 = vpop.eup %11527  ;;  %v6553_v41 = vsel %vm2976_vm5, %v13997_v61, -inf }
 0x8b8   :  { %v11080_v48 = vpop.f32.mrf.mxu0  ;;  %v6637_v33 = vsel %vm2976_vm5, %v13993_v35, 0.0 }
 0x8b9   :  { %8009 = vrot.lane.b32.xlu1 %v15254_v40, %s11670_s1 }
 0x8be   :  { %7887 = vrot.lane.b32.xlu0 %v12948_v18, %s11670_s1  ;;  %v13999_v18 = vmul.f32 0.35355338, %v6394_v2  ;;  %v14019_v2 = vmul.f32 0.35355338, %v6404_v19 }
 0x8c0   :  { %v6556_v4 = vsel %vm2976_vm5, %v13999_v18, -inf  ;;  %v6562_v36 = vsel %vm2976_vm5, %v14019_v2, -inf }
 0x8c9   :  { %v6582_v12 = vpop.xlane.xlu1 %6581 }
 0x8ca   :  { %v6592_v53 = vsub.f32 %v13931_v49, %v6582_v12  ;;  %v14005_v49 = vmul.f32 0.35355338, %v6399_v29  ;;  %v14021_v29 = vmul.f32 0.35355338, %v6409_v13 }
 0x8cc   :  { %v6611_v42 = vmul.f32 1.442695, %v6592_v53  ;;  %v6559_v47 = vsel %vm2976_vm5, %v14005_v49, -inf  ;;  %v6565_v12 = vsel %vm2989_vm6, %v14021_v29, -inf  ;;  %v14027_v53 = vpop.permute.xlu0 %7883 }
 0x8ce   :  { %11529 = vpow2.f32 %v6611_v42 }
 0x8db   :  { %v13995_v40 = vpop.eup %11529 }
 0x8dc   :  { %v6640_v48 = vsel %vm2989_vm6, %v13995_v40, 0.0 }
 0x8dd   :  { %6638 = vadd.xlane.f32.xlu1 %v6637_v33  ;;  %6641 = vadd.xlane.f32.xlu0 %v6640_v48 }
 0x8e1   :  { %6557 = vmax.xlane.f32.xlu1 %v6556_v4  ;;  %6554 = vmax.xlane.f32.xlu0 %v6553_v41 }
 0x8e5   :  { %6560 = vmax.xlane.f32.xlu0 %v6559_v47 }
 0x8f2   :  { %8013 = vrot.lane.b32.xlu1 %v12981_v5, %s11670_s1  ;;  %v14029_v5 = vpop.permute.xlu1 %8021 }
 0x8f6   :  { %8015 = vrot.lane.b32.xlu1 %v13004_v27, %s11670_s1 }
 0x8fb   :  { %8011 = vrot.lane.b32.xlu0 %v12974_v62, %s11670_s1 }
 0x91a   :  { %6563 = vmax.xlane.f32.xlu1 %v6562_v36  ;;  %6566 = vmax.xlane.f32.xlu0 %v6565_v12 }
 0x929   :  { %v6630_v27 = vpop.xlane.xlu0 %6629 }
 0x92a   :  { %11531 = vrcp.f32 %v6630_v27 }
 0x92b   :  { %8017 = vrot.lane.b32.xlu1 %v13052_v52, %s11670_s1 }
 0x92d   :  { %v6633_v62 = vpop.xlane.xlu1 %6632 }
 0x92e   :  { %11533 = vrcp.f32 %v6633_v62 }
 0x930   :  { %6671 = vrot.lane.b32.xlu0 %v12696_v16, %s11669_s0 }
 0x931   :  { %v6636_v19 = vpop.xlane.xlu0 %6635 }
 0x932   :  { %11535 = vrcp.f32 %v6636_v19 }
 0x937   :  { %v11532_v13 = vpop.eup %11531 }
 0x938   :  { %v6658_v42 = vmul.f32 %v11532_v13, %v13967_v7  ;;  %v7888_v7 = vpop.permute.xlu0 %7887 }
 0x93a   :  { %11142 = vmatmul.mubr.msk.f32.vlgmr.msra.gmra.mxu1 %vm2976_vm5, %v6658_v42 }
 0x93b   :  { %v11534_v33 = vpop.eup %11533  ;;  %11186 = vmatpush3.xpose.msk.msra.mxu1 %vm2325_vm3, %v13941_v56  ;;  %11144 = vmatprep.mubr.msk.f32.mxu1 %vm11666_vm2, %v15205_v21 }
 0x93c   :  { %11187 = vmatprep.subr.mxu1 %v15205_v21  ;;  %v6659_v52 = vmul.f32 %v11534_v33, %v13971_v50 }
 0x93e   :  { %11145 = vmatmul.mubr.msk.f32.gmra.mxu1 %vm2976_vm5, %v6659_v52 }
 0x93f   :  { %v11536_v48 = vpop.eup %11535  ;;  %11188 = vmatpush3.xpose.msk.msra.mxu1 %vm2325_vm3, %v13943_v31  ;;  %11147 = vmatprep.mubr.msk.f32.mxu1 %vm11666_vm2, %v15205_v21  ;;  %v8020_v31 = vpop.permute.xlu1 %8019 }
 0x940   :  { %11189 = vmatprep.subr.mxu1 %v15205_v21  ;;  %v6660_v56 = vmul.f32 %v11536_v48, %v13977_v9 }
 0x942   :  { %11148 = vmatmul.mubr.msk.f32.gmra.mxu1 %vm2976_vm5, %v6660_v56 }
 0x943   :  { %11190 = vmatpush3.xpose.msk.msra.mxu1 %vm2325_vm3, %v13945_v1  ;;  %11150 = vmatprep.mubr.msk.f32.mxu1 %vm11666_vm2, %v15205_v21  ;;  %v8010_v50 = vpop.permute.xlu1 %8009 }
 0x944   :  { %11191 = vmatprep.subr.mxu1 %v15205_v21 }
 0x947   :  { %11192 = vmatpush3.xpose.msk.msra.mxu1 %vm2325_vm3, %v13947_v59 }
 0x948   :  { %11193 = vmatprep.subr.mxu1 %v15205_v21 }
 0x94b   :  { %11194 = vmatpush3.xpose.msk.msra.mxu1 %vm2325_vm3, %v13951_v43 }
 0x94c   :  { %11210 = vmatprep.subr.mxu1 %v15205_v21 }
 0x966   :  { %v6642_v9 = vpop.xlane.xlu0 %6641  ;;  %v6639_v1 = vpop.xlane.xlu1 %6638 }
 0x967   :  { %11537 = vrcp.f32 %v6639_v1  ;;  %v15265_v1 = vld [vmem:[#allocation10_spill] sm:$0xff] }
 0x968   :  { %11539 = vrcp.f32 %v6642_v9  ;;  %v15264_v9 = vld [vmem:[#allocation12_spill] sm:$0xff] }
 0x96a   :  { %v6555_v4 = vpop.xlane.xlu0 %6554  ;;  %v6558_v41 = vpop.xlane.xlu1 %6557 }
 0x96b   :  { %v6583_v47 = vsub.f32 %v13997_v61, %v6555_v4  ;;  %v6584_v59 = vsub.f32 %v13999_v18, %v6558_v41 }
 0x96d   :  { %v6593_v36 = vmul.f32 1.442695, %v6583_v47  ;;  %v6595_v12 = vmul.f32 1.442695, %v6584_v59 }
 0x96e   :  { %v6561_v27 = vpop.xlane.xlu0 %6560 }
 0x96f   :  { %11541 = vpow2.f32 %v6593_v36  ;;  %v6585_v43 = vsub.f32 %v14005_v49, %v6561_v27 }
 0x970   :  { %11543 = vpow2.f32 %v6595_v12 }
 0x971   :  { %v6597_v62 = vmul.f32 1.442695, %v6585_v43 }
 0x973   :  { %11545 = vpow2.f32 %v6597_v62 }
 0x974   :  { %v11538_v19 = vpop.eup %11537 }
 0x975   :  { %v6661_v13 = vmul.f32 %v11538_v19, %v13993_v35  ;;  %v11540_v42 = vpop.eup %11539 }
 0x976   :  { %v6662_v61 = vmul.f32 %v11540_v42, %v13995_v40 }
 0x977   :  { %11151 = vmatmul.mubr.msk.f32.gmra.mxu1 %vm2976_vm5, %v6661_v13 }
 0x978   :  { %11153 = vmatprep.mubr.msk.f32.mxu1 %vm11666_vm2, %v15205_v21 }
 0x97b   :  { %11154 = vmatmul.mubr.msk.f32.gmra.mxu1 %vm2976_vm5, %v6662_v61 }
 0x97c   :  { %v14070_v18 = vpop.eup %11541  ;;  %11195 = vmatprep.mubr.msk.f32.mxu1 %vm11666_vm2, %v15205_v21 }
 0x97d   :  { %v14073_v33 = vpop.eup %11543  ;;  %v6613_v49 = vsel %vm2976_vm5, %v14070_v18, 0.0 }
 0x97e   :  { %6614 = vadd.xlane.f32.xlu1 %v6613_v49  ;;  %v6616_v35 = vsel %vm2976_vm5, %v14073_v33, 0.0 }
 0x97f   :  { %6617 = vadd.xlane.f32.xlu0 %v6616_v35  ;;  %11196 = vmatmul.mubr.msk.f32.vlgmr.msra.gmra.mxu1 %vm2325_vm3, %v13955_v51  ;;  %v8012_v51 = vpop.permute.xlu0 %8011 }
 0x980   :  { %v14081_v52 = vpop.eup %11545  ;;  %11211 = vmatpush3.xpose.msk.msra.mxu1 %vm2325_vm3, %v13959_v39  ;;  %11198 = vmatprep.mubr.msk.f32.mxu1 %vm11666_vm2, %v15205_v21  ;;  %v8014_v39 = vpop.permute.xlu1 %8013 }
 0x981   :  { %v6619_v40 = vsel %vm2976_vm5, %v14081_v52, 0.0  ;;  %11212 = vmatprep.subr.mxu1 %v15205_v21 }
 0x983   :  { %6620 = vadd.xlane.f32.xlu0 %v6619_v40  ;;  %11199 = vmatmul.mubr.msk.f32.gmra.mxu1 %vm2325_vm3, %v13961_v38 }
 0x984   :  { %11213 = vmatpush3.xpose.msk.msra.mxu1 %vm2325_vm3, %v13965_v54  ;;  %11201 = vmatprep.mubr.msk.f32.mxu1 %vm11666_vm2, %v15205_v21  ;;  %v8016_v38 = vpop.permute.xlu1 %8015 }
 0x985   :  { %11214 = vmatprep.subr.mxu1 %v15205_v21 }
 0x987   :  { %11202 = vmatmul.mubr.msk.f32.gmra.mxu1 %vm2325_vm3, %v14027_v53 }
 0x988   :  { %11215 = vmatpush3.xpose.msk.msra.mxu1 %vm2325_vm3, %v13987_v57  ;;  %11204 = vmatprep.mubr.msk.f32.mxu1 %vm11666_vm2, %v15205_v21 }
 0x989   :  { %11216 = vmatprep.subr.mxu1 %v15205_v21 }
 0x98b   :  { %11205 = vmatmul.mubr.msk.f32.gmra.mxu1 %vm2325_vm3, %v13990_v26 }
 0x98c   :  { %11217 = vmatpush3.xpose.msk.msra.mxu1 %vm2325_vm3, %v14029_v5  ;;  %11207 = vmatprep.mubr.msk.f32.mxu1 %vm11666_vm2, %v15205_v21 }
 0x98d   :  { %11218 = vmatprep.subr.mxu1 %v15205_v21 }
 0x98f   :  { %11208 = vmatmul.mubr.msk.f32.gmra.mxu1 %vm2325_vm3, %v7888_v7 }
 0x990   :  { %11219 = vmatpush3.xpose.msk.msra.mxu1 %vm2325_vm3, %v8020_v31  ;;  %11220 = vmatprep.mubr.msk.f32.mxu1 %vm11666_vm2, %v15205_v21 }
 0x991   :  { %11260 = vmatprep.subr.mxu1 %v15205_v21 }
 0x993   :  { %11221 = vmatmul.mubr.msk.f32.vlgmr.msra.gmra.mxu1 %vm2325_vm3, %v8010_v50 }
 0x994   :  { %11223 = vmatprep.mubr.msk.f32.mxu1 %vm11666_vm2, %v15205_v21 }
 0x997   :  { %11224 = vmatmul.mubr.msk.f32.gmra.mxu1 %vm2325_vm3, %v8012_v51 }
 0x998   :  { %11226 = vmatprep.mubr.msk.f32.mxu1 %vm11666_vm2, %v15205_v21 }
 0x99b   :  { %11227 = vmatmul.mubr.msk.f32.gmra.mxu1 %vm2325_vm3, %v8014_v39 }
 0x99c   :  { %11229 = vmatprep.mubr.msk.f32.mxu1 %vm11666_vm2, %v15205_v21 }
 0x99f   :  { %11230 = vmatmul.mubr.msk.f32.gmra.mxu1 %vm2325_vm3, %v8016_v38 }
 0x9a0   :  { %11232 = vmatprep.mubr.msk.f32.mxu1 %vm11666_vm2, %v15205_v21 }
 0x9a3   :  { %v6567_v54 = vpop.xlane.xlu0 %6566  ;;  %v6564_v57 = vpop.xlane.xlu1 %6563 }
 0x9a4   :  { %v6587_v26 = vsub.f32 %v14021_v29, %v6567_v54  ;;  %v6586_v53 = vsub.f32 %v14019_v2, %v6564_v57 }
 0x9a6   :  { %v6601_v5 = vmul.f32 1.442695, %v6587_v26  ;;  %v6599_v48 = vmul.f32 1.442695, %v6586_v53 }
 0x9a7   :  { %v6672_v56 = vpop.permute.xlu0 %6671  ;;  %v8018_v31 = vpop.permute.xlu1 %8017 }
 0x9a8   :  { %11547 = vpow2.f32 %v6601_v5  ;;  %11107 = vmatpush3.msk.msra.mxu0 %vm3317_vm4, %v6672_v56  ;;  %11233 = vmatmul.mubr.msk.f32.gmra.mxu1 %vm2325_vm3, %v8018_v31 }
 0x9a9   :  { %11549 = vpow2.f32 %v6599_v48  ;;  %11108 = vmatprep.subr.mxu0 %v15205_v21  ;;  %11270 = vmatprep.mubr.msk.f32.mxu1 %vm11666_vm2, %v15205_v21 }
 0x9b5   :  { %v14137_v7 = vpop.eup %11547 }
 0x9b6   :  { %v14139_v29 = vpop.eup %11549  ;;  %v6625_v2 = vsel %vm2989_vm6, %v14137_v7, 0.0 }
 0x9b7   :  { %6626 = vadd.xlane.f32.xlu1 %v6625_v2  ;;  %v6622_v50 = vsel %vm2976_vm5, %v14139_v29, 0.0 }
 0x9b8   :  { %6623 = vadd.xlane.f32.xlu0 %v6622_v50 }
 0x9c8   :  { %6669 = vrot.lane.b32.xlu1 %v12826_v45, %s11669_s0 }
 0x9cc   :  { %8265 = vrot.lane.b32.xlu1 %v12826_v45, %s11670_s1 }
 0x9ce   :  { %6667 = vrot.lane.b32.xlu0 %v12840_v3, %s11669_s0 }
 0x9d0   :  { %8261 = vrot.lane.b32.xlu1 %v15264_v9, %s11670_s1 }
 0x9d2   :  { %6665 = vrot.lane.b32.xlu0 %v15264_v9, %s11669_s0 }
 0x9d6   :  { %6663 = vrot.lane.b32.xlu0 %v15265_v1, %s11669_s0 }
 0x9da   :  { %8267 = vrot.lane.b32.xlu0 %v12696_v16, %s11670_s1 }
 0x9de   :  { %8263 = vrot.lane.b32.xlu0 %v12840_v3, %s11670_s1 }
 0x9fa   :  { %v14161_v4 = vpop.f32.mrf.mxu1 }
 0x9fb   :  { %v7125_v45 = vcombine.high %v14161_v4, %v14161_v4 }
 0x9fc   :  { %v11143_v41 = vpop.f32.mrf.mxu1 }
 0x9fd   :  { %v14166_v47 = vrot.slane %v7125_v45, %v12098_v58 }
 0x9fe   :  { %v6886_v59 = vpop.f32.mrf.mxu1 }
 0x9ff   :  { %v7141_v36 = vcombine.high %v14166_v47, %v14166_v47  ;;  %v7174_v12 = vcombine.high %v6886_v59, %v6886_v59  ;;  %v7181_v27 = vrot.slane %v6886_v59, %v12098_v58 }
 0xa00   :  { %v11146_v16 = vpop.f32.mrf.mxu1 }
 0xa01   :  { %v14172_v43 = vrot.slane %v7141_v36, %v12098_v58  ;;  %v7188_v3 = vrot.slane %v7174_v12, %v12098_v58  ;;  %v7189_v62 = vcombine.high %v7181_v27, %v7181_v27  ;;  %v7197_v19 = vrot.slane %v7181_v27, %v12098_v58 }
 0xa02   :  { %v6891_v13 = vpop.f32.mrf.mxu1 }
 0xa03   :  { %v7173_v42 = vcombine.high %v14172_v43, %v14172_v43  ;;  %v7190_v61 = vcombine.high %v7188_v3, %v7188_v3  ;;  %v7204_v49 = vrot.slane %v7188_v3, %v12098_v58  ;;  %v7211_v35 = vrot.slane %v7189_v62, %v12098_v58 }
 0xa04   :  { %v7219_v40 = vcombine.high %v7197_v19, %v7197_v19  ;;  %v11149_v51 = vpop.f32.mrf.mxu1  ;;  %v7223_v38 = vcombine.high %v6891_v13, %v6891_v13  ;;  %v7230_v48 = vrot.slane %v6891_v13, %v12098_v58 }
 0xa05   :  { %v7580_v39 = vcombine.low %v7173_v42, %v7197_v19  ;;  %v7218_v54 = vrot.slane %v7190_v61, %v12098_v58  ;;  %v7220_v57 = vcombine.high %v7204_v49, %v7204_v49  ;;  %v7221_v26 = vcombine.high %v7211_v35, %v7211_v35 }
 0xa06   :  { %v7581_v53 = vcombine.low %v7211_v35, %v7219_v40  ;;  %v7237_v56 = vrot.slane %v7223_v38, %v12098_v58  ;;  %v7238_v45 = vcombine.high %v7230_v48, %v7230_v48  ;;  %v7246_v59 = vrot.slane %v7230_v48, %v12098_v58 }
 0xa07   :  { %v7590_v5 = vrot.slane %v7580_v39, %v12098_v58  ;;  %v7582_v31 = vcombine.low %v7221_v26, %v7204_v49  ;;  %v7583_v2 = vcombine.low %v7218_v54, %v7220_v57  ;;  %v7222_v9 = vcombine.high %v7218_v54, %v7218_v54 }
 0xa08   :  { %v7597_v50 = vrot.slane %v7581_v53, %v12098_v58  ;;  %v7239_v41 = vcombine.high %v7237_v56, %v7237_v56  ;;  %v7253_v36 = vrot.slane %v7237_v56, %v12098_v58  ;;  %v7260_v3 = vrot.slane %v7238_v45, %v12098_v58 }
 0xa09   :  { %v7604_v12 = vrot.slane %v7582_v31, %v12098_v58  ;;  %v7611_v27 = vrot.slane %v7583_v2, %v12098_v58  ;;  %v7268_v19 = vcombine.high %v7246_v59, %v7246_v59  ;;  %v7629_v42 = vcombine.low %v7222_v9, %v7246_v59  ;;  %v6618_v9 = vpop.xlane.xlu0 %6617 }
 0xa0a   :  { %v7612_v16 = vcombine.low %v7590_v5, %v7597_v50  ;;  %v7267_v62 = vrot.slane %v7239_v41, %v12098_v58  ;;  %v7269_v13 = vcombine.high %v7253_v36, %v7253_v36  ;;  %v7270_v49 = vcombine.high %v7260_v3, %v7260_v3  ;;  %v6615_v41 = vpop.xlane.xlu1 %6614 }
 0xa0b   :  { %v7613_v61 = vcombine.low %v7604_v12, %v7611_v27  ;;  %v7630_v35 = vcombine.low %v7260_v3, %v7268_v19  ;;  %v7639_v51 = vrot.slane %v7629_v42, %v12098_v58  ;;  %11551 = vrcp.f32 %v6615_v41 }
 0xa0c   :  { %v7632_v40 = vcombine.low %v7267_v62, %v7269_v13  ;;  %v7620_v39 = vrot.slane %v7612_v16, %v12098_v58  ;;  %v7631_v54 = vcombine.low %v7270_v49, %v7253_v36  ;;  %v7271_v19 = vcombine.high %v7267_v62, %v7267_v62 }
 0xa0d   :  { %v7627_v38 = vrot.slane %v7613_v61, %v12098_v58  ;;  %v7646_v57 = vrot.slane %v7630_v35, %v12098_v58  ;;  %v6621_v42 = vpop.xlane.xlu0 %6620  ;;  %11553 = vrcp.f32 %v6618_v9 }
 0xa0e   :  { %v7660_v26 = vrot.slane %v7632_v40, %v12098_v58  ;;  %v7653_v5 = vrot.slane %v7631_v54, %v12098_v58  ;;  %11555 = vrcp.f32 %v6621_v42 }
 0xa0f   :  { %v14196_v53 = vcombine.low %v7620_v39, %v7627_v38  ;;  %v7661_v48 = vcombine.low %v7639_v51, %v7646_v57 }
 0xa10   :  { %v7662_v56 = vcombine.low %v7653_v5, %v7660_v26 }
 0xa11   :  { %v7669_v31 = vrot.slane %v7661_v48, %v12098_v58 }
 0xa12   :  { %v7676_v2 = vrot.slane %v7662_v56, %v12098_v58 }
 0xa14   :  { %v14201_v50 = vcombine.low %v7669_v31, %v7676_v2 }
 0xa18   :  { %v11552_v42 = vpop.eup %11551 }
 0xa37   :  { %v6896_v45 = vpop.f32.mrf.mxu1 }
 0xa38   :  { %v7272_v59 = vcombine.high %v6896_v45, %v6896_v45  ;;  %v7279_v36 = vrot.slane %v6896_v45, %v12098_v58 }
 0xa39   :  { %v11152_v12 = vpop.f32.mrf.mxu1 }
 0xa3a   :  { %v7286_v27 = vrot.slane %v7272_v59, %v12098_v58  ;;  %v7287_v16 = vcombine.high %v7279_v36, %v7279_v36  ;;  %v7295_v3 = vrot.slane %v7279_v36, %v12098_v58 }
 0xa3b   :  { %v6901_v13 = vpop.f32.mrf.mxu1 }
 0xa3c   :  { %v7288_v61 = vcombine.high %v7286_v27, %v7286_v27  ;;  %v7302_v49 = vrot.slane %v7286_v27, %v12098_v58  ;;  %v7309_v35 = vrot.slane %v7287_v16, %v12098_v58  ;;  %v7317_v40 = vcombine.high %v7295_v3, %v7295_v3 }
 0xa3d   :  { %v7678_v51 = vcombine.low %v7271_v19, %v7295_v3  ;;  %v7327_v39 = vrot.slane %v6901_v13, %v12098_v58  ;;  %v11155_v38 = vpop.f32.mrf.mxu1 }
 0xa3e   :  { %v7316_v54 = vrot.slane %v7288_v61, %v12098_v58  ;;  %v7318_v57 = vcombine.high %v7302_v49, %v7302_v49  ;;  %v7319_v26 = vcombine.high %v7309_v35, %v7309_v35  ;;  %v7679_v5 = vcombine.low %v7309_v35, %v7317_v40 }
 0xa3f   :  { %v7688_v62 = vrot.slane %v7678_v51, %v12098_v58  ;;  %v7334_v48 = vrot.slane %v7327_v39, %v12098_v58  ;;  %v7985_v56 = vpop.f32.mrf.mxu1 }
 0xa40   :  { %v6627_v31 = vpop.xlane.xlu1 %6626  ;;  %v7680_v2 = vcombine.low %v7319_v26, %v7302_v49  ;;  %v7681_v45 = vcombine.low %v7316_v54, %v7318_v57  ;;  %v7695_v41 = vrot.slane %v7679_v5, %v12098_v58  ;;  %v7320_v59 = vcombine.high %v7316_v54, %v7316_v54 }
 0xa41   :  { %v6624_v36 = vpop.xlane.xlu0 %6623  ;;  %v14213_v12 = vmul.f32 0.35355338, %v7985_v56  ;;  %v11197_v27 = vpop.f32.mrf.mxu1 }
 0xa42   :  { %v7702_v16 = vrot.slane %v7680_v2, %v12098_v58  ;;  %v7709_v3 = vrot.slane %v7681_v45, %v12098_v58  ;;  %v7710_v9 = vcombine.low %v7688_v62, %v7695_v41  ;;  %v14217_v19 = vcombine.low %v7320_v59, %v7334_v48  ;;  %v11554_v41 = vpop.eup %11553 }
 0xa43   :  { %v7990_v13 = vpop.f32.mrf.mxu1  ;;  %v8149_v61 = vsel %vm2976_vm5, %v14213_v12, -inf  ;;  %11557 = vrcp.f32 %v6624_v36  ;;  %v6653_v59 = vmul.f32 %v11552_v42, %v14070_v18  ;;  %v6654_v18 = vmul.f32 %v11554_v41, %v14073_v33 }
 0xa44   :  { %v6670_v49 = vpop.permute.xlu1 %6669  ;;  %v7711_v35 = vcombine.low %v7702_v16, %v7709_v3  ;;  %v14221_v40 = vmul.f32 0.35355338, %v7990_v13  ;;  %8150 = vmax.xlane.f32.xlu0 %v8149_v61  ;;  %v7718_v38 = vrot.slane %v7710_v9, %v12098_v58  ;;  %11559 = vrcp.f32 %v6627_v31  ;;  %v11556_v31 = vpop.eup %11555 }
 0xa45   :  { %v6668_v51 = vpop.permute.xlu0 %6667  ;;  %11109 = vmatpush3.msra.mxu0 %v6670_v49  ;;  %v11200_v39 = vpop.f32.mrf.mxu1 }
 0xa46   :  { %11110 = vmatprep.subr.mxu0 %v15205_v21  ;;  %v7725_v54 = vrot.slane %v7711_v35, %v12098_v58  ;;  %v8152_v57 = vsel %vm2976_vm5, %v14221_v40, -inf }
 0xa47   :  { %11111 = vmatpush3.msra.mxu0 %v6668_v51  ;;  %8153 = vmax.xlane.f32.xlu1 %v8152_v57  ;;  %v7995_v26 = vpop.f32.mrf.mxu1  ;;  %v6655_v51 = vmul.f32 %v11556_v31, %v14081_v52 }
 0xa48   :  { %11112 = vmatprep.subr.mxu0 %v15205_v21  ;;  %v14229_v5 = vmul.f32 0.35355338, %v7995_v26  ;;  %v14231_v48 = vcombine.low %v7718_v38, %v7725_v54 }
 0xa49   :  { %v6666_v62 = vpop.permute.xlu0 %6665  ;;  %v11203_v56 = vpop.f32.mrf.mxu1 }
 0xa4a   :  { %11113 = vmatpush3.msra.mxu0 %v6666_v62  ;;  %v8155_v2 = vsel %vm2976_vm5, %v14229_v5, -inf }
 0xa4b   :  { %11114 = vmatprep.subr.mxu0 %v15205_v21  ;;  %v8000_v45 = vpop.f32.mrf.mxu1  ;;  %8156 = vmax.xlane.f32.xlu0 %v8155_v2 }
 0xa4c   :  { %v14237_v27 = vmul.f32 0.35355338, %v8000_v45 }
 0xa4d   :  { %v6664_v36 = vpop.permute.xlu0 %6663  ;;  %v11206_v16 = vpop.f32.mrf.mxu1 }
 0xa4e   :  { %11115 = vmatpush3.msra.mxu0 %v6664_v36  ;;  %v8158_v3 = vsel %vm2976_vm5, %v14237_v27, -inf }
 0xa4f   :  { %11117 = vmatmul.mubr.msk.f32.vlgmr.msra.gmra.mxu0 %vm2976_vm5, %v6653_v59  ;;  %11156 = vmatprep.subr.mxu0 %v15205_v21  ;;  %v8005_v9 = vpop.f32.mrf.mxu1 }
 0xa50   :  { %8159 = vmax.xlane.f32.xlu0 %v8158_v3  ;;  %11119 = vmatprep.mubr.msk.f32.mxu0 %vm11666_vm2, %v15205_v21  ;;  %v14245_v13 = vmul.f32 0.35355338, %v8005_v9  ;;  %v11558_v39 = vpop.eup %11557 }
 0xa51   :  { %v11209_v61 = vpop.f32.mrf.mxu1  ;;  %v6656_v33 = vmul.f32 %v11558_v39, %v14139_v29  ;;  %v11560_v57 = vpop.eup %11559 }
 0xa52   :  { %v8161_v49 = vsel %vm2989_vm6, %v14245_v13, -inf  ;;  %v6657_v62 = vmul.f32 %v11560_v57, %v14137_v7  ;;  %v99_v61 = vld [vmem:[%s15150_s5 + $0x10] sm:$0xff] }
 0xa53   :  { %11120 = vmatmul.mubr.msk.f32.gmra.mxu0 %vm2976_vm5, %v6654_v18  ;;  %v8115_v35 = vpop.f32.mrf.mxu1 }
 0xa54   :  { %8162 = vmax.xlane.f32.xlu0 %v8161_v49  ;;  %11122 = vmatprep.mubr.msk.f32.mxu0 %vm11666_vm2, %v15205_v21  ;;  %v14275_v7 = vmul.f32 0.35355338, %v8115_v35  ;;  %v14295_v49 = vpop.permute.xlu0 %8267  ;;  %v14297_v35 = vpop.permute.xlu1 %8265 }
 0xa55   :  { %v11222_v38 = vpop.f32.mrf.mxu1  ;;  %11157 = vmatpush3.msra.mxu0 %v99_v61 }
 0xa56   :  { %v8164_v3 = vsel %vm2976_vm5, %v14275_v7, -inf  ;;  %11235 = vmatprep.subr.mxu0 %v15205_v21 }
 0xa57   :  { %11123 = vmatmul.mubr.msk.f32.gmra.mxu0 %vm2976_vm5, %v6655_v51  ;;  %v8120_v54 = vpop.f32.mrf.mxu1 }
 0xa58   :  { %11125 = vmatprep.mubr.msk.f32.mxu0 %vm11666_vm2, %v15205_v21  ;;  %8259 = vrot.lane.b32.xlu1 %v15265_v1, %s11670_s1  ;;  %v14277_v16 = vmul.f32 0.35355338, %v8120_v54  ;;  %v14299_v51 = vpop.permute.xlu0 %8263 }
 0xa59   :  { %v11225_v26 = vpop.f32.mrf.mxu1 }
 0xa5a   :  { %v8167_v18 = vsel %vm2976_vm5, %v14277_v16, -inf }
 0xa5b   :  { %11126 = vmatmul.mubr.msk.f32.gmra.mxu0 %vm2976_vm5, %v6656_v33  ;;  %v8125_v42 = vpop.f32.mrf.mxu1 }
 0xa5c   :  { %11128 = vmatprep.mubr.msk.f32.mxu0 %vm11666_vm2, %v15205_v21  ;;  %v14263_v52 = vmul.f32 0.35355338, %v8125_v42 }
 0xa5d   :  { %v11228_v56 = vpop.f32.mrf.mxu1 }
 0xa5e   :  { %v8170_v1 = vsel %vm2976_vm5, %v14263_v52, -inf }
 0xa5f   :  { %11129 = vmatmul.mubr.msk.f32.gmra.mxu0 %vm2976_vm5, %v6657_v62  ;;  %v8130_v2 = vpop.f32.mrf.mxu1  ;;  %8171 = vmax.xlane.f32.xlu0 %v8170_v1 }
 0xa60   :  { %11158 = vmatprep.mubr.msk.f32.mxu0 %vm11666_vm2, %v15205_v21  ;;  %v14281_v9 = vmul.f32 0.35355338, %v8130_v2 }
 0xa61   :  { %v11231_v29 = vpop.f32.mrf.mxu1 }
 0xa62   :  { %v8173_v31 = vsel %vm2976_vm5, %v14281_v9, -inf }
 0xa68   :  { %v8135_v45 = vpop.f32.mrf.mxu1 }
 0xa69   :  { %v14271_v41 = vmul.f32 0.35355338, %v8135_v45 }
 0xa6a   :  { %v11234_v59 = vpop.f32.mrf.mxu1 }
 0xa6b   :  { %v8176_v36 = vsel %vm2989_vm6, %v14271_v41, -inf }
 0xa6c   :  { %8177 = vmax.xlane.f32.xlu0 %v8176_v36 }
 0xa7c   :  { %8165 = vmax.xlane.f32.xlu1 %v8164_v3 }
 0xa80   :  { %8168 = vmax.xlane.f32.xlu1 %v8167_v18 }
 0xa82   :  { %8388 = vrot.lane.b32.xlu0 %v12993_v34, %s11670_s1  ;;  %v14301_v34 = vpop.permute.xlu1 %8261 }
 0xa84   :  { %8174 = vmax.xlane.f32.xlu1 %v8173_v31 }
 0xa95   :  { %8386 = vrot.lane.b32.xlu1 %v12995_v23, %s11670_s1 }
 0xacd   :  { %v8151_v39 = vpop.xlane.xlu0 %8150 }
 0xace   :  { %v8179_v38 = vsub.f32 %v14213_v12, %v8151_v39 }
 0xad0   :  { %v8189_v54 = vmul.f32 1.442695, %v8179_v38  ;;  %v8154_v23 = vpop.xlane.xlu1 %8153 }
 0xad1   :  { %v8180_v33 = vsub.f32 %v14221_v40, %v8154_v23 }
 0xad2   :  { %11561 = vpow2.f32 %v8189_v54 }
 0xad3   :  { %v8191_v57 = vmul.f32 1.442695, %v8180_v33 }
 0xad4   :  { %v8157_v26 = vpop.xlane.xlu0 %8156 }
 0xad5   :  { %11563 = vpow2.f32 %v8191_v57  ;;  %v8181_v42 = vsub.f32 %v14229_v5, %v8157_v26  ;;  %v14335_v26 = vpop.permute.xlu1 %8259 }
 0xad7   :  { %v8193_v62 = vmul.f32 1.442695, %v8181_v42  ;;  %v7132_v42 = vrot.slane %v14161_v4, %v12098_v58 }
 0xad9   :  { %v8160_v56 = vpop.xlane.xlu0 %8159  ;;  %11565 = vpow2.f32 %v8193_v62 }
 0xada   :  { %v8182_v1 = vsub.f32 %v14237_v27, %v8160_v56 }
 0xadc   :  { %v8195_v2 = vmul.f32 1.442695, %v8182_v1  ;;  %v7140_v1 = vcombine.high %v7132_v42, %v7132_v42 }
 0xadd   :  { %v8163_v29 = vpop.xlane.xlu0 %8162 }
 0xade   :  { %11567 = vpow2.f32 %v8195_v2  ;;  %v8183_v12 = vsub.f32 %v14245_v13, %v8163_v29  ;;  %v14341_v29 = vrot.slane %v7132_v42, %v12098_v58 }
 0xadf   :  { %v14308_v45 = vpop.eup %11561 }
 0xae0   :  { %v8197_v59 = vmul.f32 1.442695, %v8183_v12  ;;  %v8209_v40 = vsel %vm2976_vm5, %v14308_v45, 0.0  ;;  %v7170_v4 = vcombine.high %v14341_v29, %v14341_v29 }
 0xae1   :  { %8210 = vadd.xlane.f32.xlu1 %v8209_v40  ;;  %v7162_v40 = vrot.slane %v7140_v1, %v12098_v58 }
 0xae2   :  { %11569 = vpow2.f32 %v8197_v59  ;;  %v14312_v36 = vpop.eup %11563 }
 0xae3   :  { %v8212_v5 = vsel %vm2976_vm5, %v14312_v36, 0.0 }
 0xae4   :  { %8213 = vadd.xlane.f32.xlu0 %v8212_v5 }
 0xae6   :  { %v14316_v27 = vpop.eup %11565 }
 0xae7   :  { %v8215_v3 = vsel %vm2976_vm5, %v14316_v27, 0.0 }
 0xae8   :  { %8216 = vadd.xlane.f32.xlu1 %v8215_v3  ;;  %v8172_v13 = vpop.xlane.xlu0 %8171 }
 0xae9   :  { %v8186_v18 = vsub.f32 %v14263_v52, %v8172_v13  ;;  %v7155_v13 = vrot.slane %v14166_v47, %v12098_v58  ;;  %v14352_v47 = vcombine.low %v7162_v40, %v7170_v4 }
 0xaeb   :  { %v14321_v31 = vpop.eup %11567  ;;  %v8203_v61 = vmul.f32 1.442695, %v8186_v18 }
 0xaec   :  { %v8218_v39 = vsel %vm2976_vm5, %v14321_v31, 0.0 }
 0xaed   :  { %8219 = vadd.xlane.f32.xlu0 %v8218_v39  ;;  %11571 = vpow2.f32 %v8203_v61 }
 0xaef   :  { %v14325_v38 = vpop.eup %11569 }
 0xaf0   :  { %v8221_v54 = vsel %vm2989_vm6, %v14325_v38, 0.0 }
 0xaf1   :  { %8222 = vadd.xlane.f32.xlu1 %v8221_v54  ;;  %v7172_v54 = vcombine.high %v7162_v40, %v7162_v40 }
 0xaf5   :  { %v8178_v23 = vpop.xlane.xlu0 %8177 }
 0xaf6   :  { %v8188_v1 = vsub.f32 %v14271_v41, %v8178_v23 }
 0xaf9   :  { %v8389_v33 = vpop.permute.xlu0 %8388 }
 0xafa   :  { %11261 = vmatpush3.msk.msra.mxu1 %vm3317_vm4, %v8389_v33  ;;  %v14330_v57 = vpop.eup %11571 }
 0xafb   :  { %11262 = vmatprep.subr.mxu1 %v15205_v21  ;;  %v8230_v52 = vsel %vm2976_vm5, %v14330_v57, 0.0 }
 0xafc   :  { %8231 = vadd.xlane.f32.xlu0 %v8230_v52 }
 0xb05   :  { %v8166_v62 = vpop.xlane.xlu1 %8165 }
 0xb06   :  { %v8184_v56 = vsub.f32 %v14275_v7, %v8166_v62 }
 0xb08   :  { %v8199_v12 = vmul.f32 1.442695, %v8184_v56  ;;  %v7171_v56 = vcombine.high %v7155_v13, %v7155_v13 }
 0xb09   :  { %v8169_v2 = vpop.xlane.xlu1 %8168 }
 0xb0a   :  { %v8185_v59 = vsub.f32 %v14277_v16, %v8169_v2  ;;  %11573 = vpow2.f32 %v8199_v12 }
 0xb0c   :  { %v8201_v5 = vmul.f32 1.442695, %v8185_v59 }
 0xb0d   :  { %v8175_v3 = vpop.xlane.xlu1 %8174 }
 0xb0e   :  { %v8187_v7 = vsub.f32 %v14281_v9, %v8175_v3  ;;  %11575 = vpow2.f32 %v8201_v5  ;;  %v14360_v3 = vcombine.low %v7172_v54, %v7155_v13 }
 0xb0f   :  { %v6760_v18 = vpop.f32.mrf.mxu0 }
 0xb10   :  { %v6915_v61 = vcombine.high %v6760_v18, %v6760_v18  ;;  %v6922_v39 = vrot.slane %v6760_v18, %v12098_v58  ;;  %v8205_v16 = vmul.f32 1.442695, %v8187_v7 }
 0xb11   :  { %v11118_v33 = vpop.f32.mrf.mxu0  ;;  %v8387_v62 = vpop.permute.xlu1 %8386 }
 0xb12   :  { %v6929_v52 = vrot.slane %v6915_v61, %v12098_v58  ;;  %v6930_v42 = vcombine.high %v6922_v39, %v6922_v39  ;;  %8384 = vrot.lane.b32.xlu0 %v13021_v55, %s11670_s1  ;;  %11263 = vmatpush3.msra.mxu1 %v8387_v62  ;;  %v6938_v12 = vrot.slane %v6922_v39, %v12098_v58  ;;  %11577 = vpow2.f32 %v8205_v16 }
 0xb13   :  { %v6765_v2 = vpop.f32.mrf.mxu0  ;;  %11264 = vmatprep.subr.mxu1 %v15205_v21  ;;  %v14367_v61 = vcombine.low %v14172_v43, %v7171_v56  ;;  %v8207_v39 = vmul.f32 1.442695, %v8188_v1 }
 0xb14   :  { %v6931_v9 = vcombine.high %v6929_v52, %v6929_v52  ;;  %v6952_v59 = vrot.slane %v6930_v42, %v12098_v58  ;;  %v6964_v5 = vcombine.high %v6765_v2, %v6765_v2  ;;  %v6945_v40 = vrot.slane %v6929_v52, %v12098_v58 }
 0xb15   :  { %v6971_v41 = vrot.slane %v6765_v2, %v12098_v58  ;;  %v11121_v23 = vpop.f32.mrf.mxu0  ;;  %11579 = vpow2.f32 %v8207_v39 }
 0xb16   :  { %v6959_v4 = vrot.slane %v6931_v9, %v12098_v58  ;;  %v7335_v55 = vcombine.low %v6938_v12, %v6952_v59  ;;  %v10341_v7 = vcombine.high %v6938_v12, %v6952_v59  ;;  %v6978_v18 = vrot.slane %v6964_v5, %v12098_v58 }
 0xb17   :  { %v6979_v33 = vcombine.high %v6971_v41, %v6971_v41  ;;  %v6987_v13 = vrot.slane %v6971_v41, %v12098_v58  ;;  %v6770_v54 = vpop.f32.mrf.mxu0  ;;  %v14379_v30 = vpop.eup %11573 }
 0xb18   :  { %v7337_v16 = vcombine.low %v6945_v40, %v6959_v4  ;;  %v10342_v42 = vcombine.high %v6945_v40, %v6959_v4  ;;  %v7345_v52 = vrot.slane %v7335_v55, %v12098_v58  ;;  %v7352_v62 = vrot.slane %v10341_v7, %v12098_v58 }
 0xb19   :  { %v6980_v2 = vcombine.high %v6978_v18, %v6978_v18  ;;  %v6994_v9 = vrot.slane %v6978_v18, %v12098_v58  ;;  %v7001_v12 = vrot.slane %v6979_v33, %v12098_v58  ;;  %v7013_v59 = vcombine.high %v6770_v54, %v6770_v54  ;;  %v11124_v5 = vpop.f32.mrf.mxu0 }
 0xb1a   :  { %v7359_v43 = vrot.slane %v7337_v16, %v12098_v58  ;;  %v7366_v56 = vrot.slane %v10342_v42, %v12098_v58  ;;  %v7367_v1 = vcombine.low %v7345_v52, %v7352_v62  ;;  %v7020_v41 = vrot.slane %v6770_v54, %v12098_v58 }
 0xb1b   :  { %v7008_v40 = vrot.slane %v6980_v2, %v12098_v58  ;;  %v7384_v23 = vcombine.low %v6987_v13, %v7001_v12  ;;  %v10343_v4 = vcombine.high %v6987_v13, %v7001_v12  ;;  %v7027_v55 = vrot.slane %v7013_v59, %v12098_v58  ;;  %v6775_v7 = vpop.f32.mrf.mxu0  ;;  %v14384_v62 = vpop.eup %11575 }
 0xb1c   :  { %v7368_v18 = vcombine.low %v7359_v43, %v7366_v56  ;;  %v7375_v33 = vrot.slane %v7367_v1, %v12098_v58  ;;  %v7028_v5 = vcombine.high %v7020_v41, %v7020_v41  ;;  %v7036_v54 = vrot.slane %v7020_v41, %v12098_v58 }
 0xb1d   :  { %v7386_v16 = vcombine.low %v6994_v9, %v7008_v40  ;;  %v10344_v17 = vcombine.high %v6994_v9, %v7008_v40  ;;  %v7394_v42 = vrot.slane %v7384_v23, %v12098_v58  ;;  %v11127_v52 = vpop.f32.mrf.mxu0  ;;  %v7401_v2 = vrot.slane %v10343_v4, %v12098_v58 }
 0xb1e   :  { %v7382_v13 = vrot.slane %v7368_v18, %v12098_v58  ;;  %v7029_v12 = vcombine.high %v7027_v55, %v7027_v55  ;;  %v7050_v39 = vrot.slane %v7028_v5, %v12098_v58  ;;  %v7043_v9 = vrot.slane %v7027_v55, %v12098_v58 }
 0xb1f   :  { %v7408_v59 = vrot.slane %v7386_v16, %v12098_v58  ;;  %v7415_v43 = vrot.slane %v10344_v17, %v12098_v58  ;;  %v8224_v56 = vsel %vm2976_vm5, %v14379_v30, 0.0  ;;  %v6780_v1 = vpop.f32.mrf.mxu0  ;;  %v7062_v4 = vcombine.high %v6775_v7, %v6775_v7  ;;  %v14399_v55 = vpop.eup %11577 }
 0xb20   :  { %v7383_v41 = vcombine.low %v7375_v33, %v7382_v13  ;;  %v7057_v40 = vrot.slane %v7029_v12, %v12098_v58  ;;  %v7433_v23 = vcombine.low %v7036_v54, %v7050_v39  ;;  %v10345_v18 = vcombine.high %v7036_v54, %v7050_v39  ;;  %8225 = vadd.xlane.f32.xlu1 %v8224_v56 }
 0xb21   :  { %v7069_v52 = vrot.slane %v6775_v7, %v12098_v58  ;;  %v8227_v5 = vsel %vm2976_vm5, %v14384_v62, 0.0  ;;  %v7117_v17 = vrot.slane %v6780_v1, %v12098_v58  ;;  %v11130_v16 = vpop.f32.mrf.mxu0  ;;  %v7416_v54 = vcombine.low %v7394_v42, %v7401_v2 }
 0xb22   :  { %v7435_v14 = vcombine.low %v7043_v9, %v7057_v40  ;;  %v10346_v25 = vcombine.high %v7043_v9, %v7057_v40  ;;  %v7443_v33 = vrot.slane %v7433_v23, %v12098_v58  ;;  %v7450_v13 = vrot.slane %v10345_v18, %v12098_v58  ;;  %11159 = vmatmul.mubr.msk.f32.vlgmr.msra.gmra.mxu0 %vm2325_vm3, %v7383_v41 }
 0xb23   :  { %v7076_v12 = vrot.slane %v7062_v4, %v12098_v58  ;;  %v7077_v7 = vcombine.high %v7069_v52, %v7069_v52  ;;  %v7124_v39 = vrot.slane %v7117_v17, %v12098_v58  ;;  %11236 = vmatpush3.msk.msra.mxu0 %vm3317_vm4, %v14295_v49  ;;  %v7085_v9 = vrot.slane %v7069_v52, %v12098_v58  ;;  %v14427_v17 = vpop.eup %11579 }
 0xb24   :  { %v7457_v56 = vrot.slane %v7435_v14, %v12098_v58  ;;  %v7464_v1 = vrot.slane %v10346_v25, %v12098_v58  ;;  %8228 = vadd.xlane.f32.xlu1 %v8227_v5  ;;  %11237 = vmatprep.subr.mxu0 %v15205_v21  ;;  %v7465_v40 = vcombine.low %v7443_v33, %v7450_v13  ;;  %v8233_v2 = vsel %vm2976_vm5, %v14399_v55, 0.0 }
 0xb25   :  { %v7078_v41 = vcombine.high %v7076_v12, %v7076_v12  ;;  %v7099_v42 = vrot.slane %v7077_v7, %v12098_v58  ;;  %11238 = vmatpush3.msra.mxu0 %v14297_v35  ;;  %v7531_v49 = vcombine.low %v7124_v39, %v14341_v29  ;;  %11161 = vmatprep.mubr.msk.f32.mxu0 %vm11666_vm2, %v15205_v21 }
 0xb26   :  { %11239 = vmatprep.subr.mxu0 %v15205_v21  ;;  %v7417_v14 = vcombine.low %v7408_v59, %v7415_v43  ;;  %v7466_v25 = vcombine.low %v7457_v56, %v7464_v1  ;;  %v7092_v23 = vrot.slane %v7076_v12, %v12098_v58  ;;  %v7424_v35 = vrot.slane %v7416_v54, %v12098_v58 }
 0xb27   :  { %v7106_v18 = vrot.slane %v7078_v41, %v12098_v58  ;;  %v7482_v4 = vcombine.low %v7085_v9, %v7099_v42  ;;  %v10347_v52 = vcombine.high %v7085_v9, %v7099_v42  ;;  %11240 = vmatpush3.msra.mxu0 %v14299_v51  ;;  %v7541_v51 = vrot.slane %v7531_v49, %v12098_v58 }
 0xb28   :  { %8234 = vadd.xlane.f32.xlu1 %v8233_v2  ;;  %v7431_v29 = vrot.slane %v7417_v14, %v12098_v58  ;;  %11241 = vmatprep.subr.mxu0 %v15205_v21  ;;  %v7480_v5 = vrot.slane %v7466_v25, %v12098_v58  ;;  %v7473_v54 = vrot.slane %v7465_v40, %v12098_v58  ;;  %v8236_v42 = vsel %vm2989_vm6, %v14427_v17, 0.0 }
 0xb29   :  { %v7484_v59 = vcombine.low %v7092_v23, %v7106_v18  ;;  %v10348_v43 = vcombine.high %v7092_v23, %v7106_v18  ;;  %v7492_v16 = vrot.slane %v7482_v4, %v12098_v58  ;;  %v7499_v33 = vrot.slane %v10347_v52, %v12098_v58  ;;  %11242 = vmatpush3.msra.mxu0 %v14301_v34 }
 0xb2a   :  { %v7432_v13 = vcombine.low %v7424_v35, %v7431_v29  ;;  %11243 = vmatprep.subr.mxu0 %v15205_v21  ;;  %v7548_v12 = vrot.slane %v14352_v47, %v12098_v58  ;;  %v7555_v34 = vrot.slane %v14360_v3, %v12098_v58  ;;  %v7562_v1 = vrot.slane %v14367_v61, %v12098_v58 }
 0xb2b   :  { %v7506_v7 = vrot.slane %v7484_v59, %v12098_v58  ;;  %v7513_v39 = vrot.slane %v10348_v43, %v12098_v58  ;;  %v7514_v56 = vcombine.low %v7492_v16, %v7499_v33  ;;  %11244 = vmatpush3.msra.mxu0 %v14335_v26  ;;  %v7481_v9 = vcombine.low %v7473_v54, %v7480_v5 }
 0xb2c   :  { %11162 = vmatmul.mubr.msk.f32.gmra.mxu0 %vm2325_vm3, %v7432_v13  ;;  %11285 = vmatprep.subr.mxu0 %v15205_v21  ;;  %v7563_v40 = vcombine.low %v7541_v51, %v7548_v12  ;;  %v7564_v3 = vcombine.low %v7555_v34, %v7562_v1 }
 0xb2d   :  { %11164 = vmatprep.mubr.msk.f32.mxu0 %vm11666_vm2, %v15205_v21  ;;  %v7515_v47 = vcombine.low %v7506_v7, %v7513_v39  ;;  %v7522_v41 = vrot.slane %v7514_v56, %v12098_v58 }
 0xb2e   :  { %v7571_v2 = vrot.slane %v7563_v40, %v12098_v58  ;;  %v7578_v49 = vrot.slane %v7564_v3, %v12098_v58 }
 0xb2f   :  { %v7529_v26 = vrot.slane %v7515_v47, %v12098_v58 }
 0xb30   :  { %11165 = vmatmul.mubr.msk.f32.gmra.mxu0 %vm2325_vm3, %v7481_v9  ;;  %v7579_v14 = vcombine.low %v7571_v2, %v7578_v49 }
 0xb31   :  { %11167 = vmatprep.mubr.msk.f32.mxu0 %vm11666_vm2, %v15205_v21  ;;  %v7530_v61 = vcombine.low %v7522_v41, %v7529_v26  ;;  %8237 = vadd.xlane.f32.xlu0 %v8236_v42  ;;  %v6250_v42 = vadd.f32 %v13878_v60, %v13937_v15  ;;  %v6265_v60 = vadd.f32 %v13896_v46, %v13953_v0  ;;  %v15269_v46 = vld [vmem:[#allocation16_spill] sm:$0xff] }
 0xb34   :  { %11168 = vmatmul.mubr.msk.f32.gmra.mxu0 %vm2325_vm3, %v7530_v61 }
 0xb35   :  { %11170 = vmatprep.mubr.msk.f32.mxu0 %vm11666_vm2, %v15205_v21 }
 0xb38   :  { %11171 = vmatmul.mubr.msk.f32.gmra.mxu0 %vm2325_vm3, %v7579_v14 }
 0xb39   :  { %8382 = vrot.lane.b32.xlu1 %v13031_v11, %s11670_s1  ;;  %11173 = vmatprep.mubr.msk.f32.mxu0 %vm11666_vm2, %v15205_v21  ;;  %v7734_v11 = vrot.slane %v14217_v19, %v12098_v58 }
 0xb3c   :  { %11174 = vmatmul.mubr.msk.f32.gmra.mxu0 %vm2325_vm3, %v14196_v53 }
 0xb3d   :  { %8380 = vrot.lane.b32.xlu1 %v13037_v24, %s11670_s1  ;;  %11176 = vmatprep.mubr.msk.f32.mxu0 %vm11666_vm2, %v15205_v21  ;;  %v7741_v24 = vrot.slane %v7734_v11, %v12098_v58 }
 0xb40   :  { %11177 = vmatmul.mubr.msk.f32.gmra.mxu0 %vm2325_vm3, %v14201_v50 }
 0xb41   :  { %11179 = vmatprep.mubr.msk.f32.mxu0 %vm11666_vm2, %v15205_v21 }
 0xb44   :  { %11180 = vmatmul.mubr.msk.f32.gmra.mxu0 %vm2325_vm3, %v14231_v48 }
 0xb45   :  { %11182 = vmatprep.mubr.msk.f32.mxu0 %vm11666_vm2, %v15205_v21 }
 0xb48   :  { %11183 = vmatmul.mubr.msk.f32.gmra.mxu0 %vm2325_vm3, %v7741_v24 }
 0xb49   :  { %11245 = vmatprep.mubr.msk.f32.mxu0 %vm11666_vm2, %v15205_v21 }
 0xb6a   :  { %v8211_v53 = vpop.xlane.xlu1 %8210 }
 0xb6b   :  { %11581 = vrcp.f32 %v8211_v53 }
 0xb6d   :  { %v8214_v50 = vpop.xlane.xlu0 %8213 }
 0xb6e   :  { %11583 = vrcp.f32 %v8214_v50 }
 0xb71   :  { %v8217_v25 = vpop.xlane.xlu1 %8216 }
 0xb72   :  { %11585 = vrcp.f32 %v8217_v25 }
 0xb76   :  { %v8220_v19 = vpop.xlane.xlu0 %8219 }
 0xb77   :  { %11587 = vrcp.f32 %v8220_v19 }
 0xb78   :  { %v11582_v23 = vpop.eup %11581 }
 0xb79   :  { %v8249_v48 = vmul.f32 %v11582_v23, %v14308_v45 }
 0xb7a   :  { %v8223_v18 = vpop.xlane.xlu1 %8222 }
 0xb7b   :  { %11589 = vrcp.f32 %v8223_v18  ;;  %v11584_v4 = vpop.eup %11583  ;;  %11246 = vmatmul.mubr.msk.f32.vlgmr.msra.gmra.mxu0 %vm2976_vm5, %v8249_v48  ;;  %v15266_v18 = vld [vmem:[#allocation14_spill] sm:$0xff] }
 0xb7c   :  { %11248 = vmatprep.mubr.msk.f32.mxu0 %vm11666_vm2, %v15205_v21  ;;  %v8250_v52 = vmul.f32 %v11584_v4, %v14312_v36 }
 0xb7f   :  { %v11586_v35 = vpop.eup %11585  ;;  %11249 = vmatmul.mubr.msk.f32.gmra.mxu0 %vm2976_vm5, %v8250_v52 }
 0xb80   :  { %11251 = vmatprep.mubr.msk.f32.mxu0 %vm11666_vm2, %v15205_v21  ;;  %v8251_v29 = vmul.f32 %v11586_v35, %v14316_v27 }
 0xb83   :  { %11252 = vmatmul.mubr.msk.f32.gmra.mxu0 %vm2976_vm5, %v8251_v29  ;;  %v15268_v29 = vld [vmem:[#allocation15_spill] sm:$0xff] }
 0xb84   :  { %v11588_v5 = vpop.eup %11587  ;;  %11254 = vmatprep.mubr.msk.f32.mxu0 %vm11666_vm2, %v15205_v21  ;;  %v6280_v0 = vadd.f32 %v15269_v46, %v15268_v29 }
 0xb85   :  { %v8252_v45 = vmul.f32 %v11588_v5, %v14321_v31  ;;  %v8232_v59 = vpop.xlane.xlu0 %8231 }
 0xb87   :  { %11255 = vmatmul.mubr.msk.f32.gmra.mxu0 %vm2976_vm5, %v8252_v45 }
 0xb88   :  { %v11590_v43 = vpop.eup %11589  ;;  %11257 = vmatprep.mubr.msk.f32.mxu0 %vm11666_vm2, %v15205_v21 }
 0xb89   :  { %v8253_v36 = vmul.f32 %v11590_v43, %v14325_v38  ;;  %v8385_v16 = vpop.permute.xlu0 %8384 }
 0xb8a   :  { %11265 = vmatpush3.msra.mxu1 %v8385_v16 }
 0xb8b   :  { %11258 = vmatmul.mubr.msk.f32.gmra.mxu0 %vm2976_vm5, %v8253_v36  ;;  %11266 = vmatprep.subr.mxu1 %v15205_v21 }
 0xb8c   :  { %11287 = vmatprep.mubr.msk.f32.mxu0 %vm11666_vm2, %v15205_v21 }
 0xba9   :  { %v8226_v27 = vpop.xlane.xlu1 %8225 }
 0xbaa   :  { %11591 = vrcp.f32 %v8226_v27 }
 0xbad   :  { %v8229_v31 = vpop.xlane.xlu1 %8228 }
 0xbae   :  { %11593 = vrcp.f32 %v8229_v31 }
 0xbaf   :  { %11595 = vrcp.f32 %v8232_v59 }
 0xbb1   :  { %v8235_v33 = vpop.xlane.xlu1 %8234 }
 0xbb2   :  { %11597 = vrcp.f32 %v8235_v33 }
 0xbb5   :  { %v8383_v51 = vpop.permute.xlu1 %8382 }
 0xbb6   :  { %11267 = vmatpush3.msra.mxu1 %v8383_v51 }
 0xbb7   :  { %v11592_v13 = vpop.eup %11591  ;;  %11268 = vmatprep.subr.mxu1 %v15205_v21 }
 0xbb8   :  { %v8254_v38 = vmul.f32 %v11592_v13, %v14379_v30 }
 0xbb9   :  { %v8381_v54 = vpop.permute.xlu1 %8380 }
 0xbba   :  { %11269 = vmatpush3.msra.mxu1 %v8381_v54  ;;  %v8238_v7 = vpop.xlane.xlu0 %8237 }
 0xbbb   :  { %v11594_v12 = vpop.eup %11593  ;;  %11271 = vmatmul.mubr.msk.f32.vlgmr.msra.gmra.mxu1 %vm2976_vm5, %v8254_v38  ;;  %11314 = vmatprep.subr.mxu1 %v15205_v21  ;;  %11599 = vrcp.f32 %v8238_v7 }
 0xbbc   :  { %11273 = vmatprep.mubr.msk.f32.mxu1 %vm11666_vm2, %v15205_v21  ;;  %v8255_v39 = vmul.f32 %v11594_v12, %v14384_v62  ;;  %v11596_v56 = vpop.eup %11595 }
 0xbbd   :  { %v8256_v30 = vmul.f32 %v11596_v56, %v14330_v57  ;;  %v100_v57 = vld [vmem:[%s15150_s5 + $0x18] sm:$0xff] }
 0xbbe   :  { %11286 = vmatpush3.msra.mxu0 %v100_v57 }
 0xbbf   :  { %11274 = vmatmul.mubr.msk.f32.gmra.mxu1 %vm2976_vm5, %v8255_v39  ;;  %v11598_v34 = vpop.eup %11597  ;;  %11349 = vmatprep.subr.mxu0 %v15205_v21 }
 0xbc0   :  { %11276 = vmatprep.mubr.msk.f32.mxu1 %vm11666_vm2, %v15205_v21  ;;  %v8257_v1 = vmul.f32 %v11598_v34, %v14399_v55  ;;  %v6240_v55 = vadd.f32 %v13871_v20, %v13927_v63  ;;  %v6255_v20 = vadd.f32 %v13884_v22, %v13939_v44  ;;  %v6270_v22 = vadd.f32 %v13902_v32, %v13957_v28 }
 0xbc3   :  { %11277 = vmatmul.mubr.msk.f32.gmra.mxu1 %vm2976_vm5, %v8256_v30 }
 0xbc4   :  { %11279 = vmatprep.mubr.msk.f32.mxu1 %vm11666_vm2, %v15205_v21 }
 0xbc7   :  { %11280 = vmatmul.mubr.msk.f32.gmra.mxu1 %vm2976_vm5, %v8257_v1 }
 0xbc8   :  { %11282 = vmatprep.mubr.msk.f32.mxu1 %vm11666_vm2, %v15205_v21  ;;  %v11600_v62 = vpop.eup %11599 }
 0xbc9   :  { %v8258_v9 = vmul.f32 %v11600_v62, %v14427_v17  ;;  %v6245_v17 = vadd.f32 %v13874_v10, %v13929_v37  ;;  %v6260_v10 = vadd.f32 %v13890_v6, %v13949_v8  ;;  %v15267_v6 = vld [vmem:[#allocation11_spill] sm:$0xff] }
 0xbca   :  { %v6275_v8 = vadd.f32 %v15267_v6, %v15266_v18 }
 0xbcb   :  { %11283 = vmatmul.mubr.msk.f32.gmra.mxu1 %vm2976_vm5, %v8258_v9 }
 0xbcc   :  { %11322 = vmatprep.mubr.msk.f32.mxu1 %vm11666_vm2, %v15205_v21 }
 0xbe2   :  { %v7826_v47 = vpop.f32.mrf.mxu0 }
 0xbe3   :  { %v14534_v40 = vadd.f32 %v7826_v47, %v6240_v55 }
 0xbe4   :  { %v11160_v41 = vpop.f32.mrf.mxu0 }
 0xbec   :  { %v7831_v26 = vpop.f32.mrf.mxu0 }
 0xbed   :  { %v14538_v3 = vadd.f32 %v7831_v26, %v6245_v17 }
 0xbee   :  { %v11163_v61 = vpop.f32.mrf.mxu0 }
 0xbf0   :  { %v7836_v2 = vpop.f32.mrf.mxu0 }
 0xbf1   :  { %v14542_v49 = vadd.f32 %v7836_v2, %v6250_v42 }
 0xbf2   :  { %v11166_v14 = vpop.f32.mrf.mxu0 }
 0xbf4   :  { %v7841_v63 = vpop.f32.mrf.mxu0 }
 0xbf5   :  { %v14546_v11 = vadd.f32 %v7841_v63, %v6255_v20 }
 0xbf6   :  { %v11169_v24 = vpop.f32.mrf.mxu0 }
 0xbf8   :  { %v7846_v37 = vpop.f32.mrf.mxu0 }
 0xbf9   :  { %v14550_v53 = vadd.f32 %v7846_v37, %v6260_v10 }
 0xbfa   :  { %v11172_v50 = vpop.f32.mrf.mxu0 }
 0xbfc   :  { %v7851_v15 = vpop.f32.mrf.mxu0 }
 0xbfd   :  { %v14554_v25 = vadd.f32 %v7851_v15, %v6265_v60 }
 0xbfe   :  { %v11175_v19 = vpop.f32.mrf.mxu0 }
 0xc00   :  { %v7856_v44 = vpop.f32.mrf.mxu0 }
 0xc01   :  { %v14558_v23 = vadd.f32 %v7856_v44, %v6270_v22 }
 0xc02   :  { %v11178_v48 = vpop.f32.mrf.mxu0 }
 0xc04   :  { %v7861_v4 = vpop.f32.mrf.mxu0 }
 0xc05   :  { %v14562_v52 = vadd.f32 %v7861_v4, %v6275_v8 }
 0xc06   :  { %v11181_v35 = vpop.f32.mrf.mxu0 }
 0xc08   :  { %v7866_v5 = vpop.f32.mrf.mxu0 }
 0xc09   :  { %v14566_v45 = vadd.f32 %v7866_v5, %v6280_v0 }
 0xc0a   :  { %v11184_v59 = vpop.f32.mrf.mxu0 }
 0xc3b   :  { %v8356_v43 = vpop.f32.mrf.mxu0 }
 0xc3c   :  { %v8511_v32 = vcombine.high %v8356_v43, %v8356_v43  ;;  %v8518_v28 = vrot.slane %v8356_v43, %v12098_v58 }
 0xc3d   :  { %v11247_v36 = vpop.f32.mrf.mxu0 }
 0xc3e   :  { %v8525_v16 = vrot.slane %v8511_v32, %v12098_v58  ;;  %v8526_v27 = vcombine.high %v8518_v28, %v8518_v28  ;;  %v8534_v51 = vrot.slane %v8518_v28, %v12098_v58 }
 0xc3f   :  { %v8361_v31 = vpop.f32.mrf.mxu0 }
 0xc40   :  { %v8527_v33 = vcombine.high %v8525_v16, %v8525_v16  ;;  %v8548_v13 = vrot.slane %v8526_v27, %v12098_v58  ;;  %v8560_v38 = vcombine.high %v8361_v31, %v8361_v31  ;;  %v8541_v54 = vrot.slane %v8525_v16, %v12098_v58 }
 0xc41   :  { %v8567_v12 = vrot.slane %v8361_v31, %v12098_v58  ;;  %v11250_v7 = vpop.f32.mrf.mxu0 }
 0xc42   :  { %v8555_v39 = vrot.slane %v8527_v33, %v12098_v58  ;;  %v8931_v56 = vcombine.low %v8534_v51, %v8548_v13  ;;  %v10390_v30 = vcombine.high %v8534_v51, %v8548_v13  ;;  %v8574_v34 = vrot.slane %v8560_v38, %v12098_v58 }
 0xc43   :  { %v8575_v1 = vcombine.high %v8567_v12, %v8567_v12  ;;  %v8583_v62 = vrot.slane %v8567_v12, %v12098_v58  ;;  %v8366_v9 = vpop.f32.mrf.mxu0 }
 0xc44   :  { %v8933_v57 = vcombine.low %v8541_v54, %v8555_v39  ;;  %v10391_v55 = vcombine.high %v8541_v54, %v8555_v39  ;;  %v8941_v47 = vrot.slane %v8931_v56, %v12098_v58  ;;  %v8948_v41 = vrot.slane %v10390_v30, %v12098_v58 }
 0xc45   :  { %v8576_v17 = vcombine.high %v8574_v34, %v8574_v34  ;;  %v8590_v26 = vrot.slane %v8574_v34, %v12098_v58  ;;  %v8597_v61 = vrot.slane %v8575_v1, %v12098_v58  ;;  %v8609_v42 = vcombine.high %v8366_v9, %v8366_v9  ;;  %v11253_v2 = vpop.f32.mrf.mxu0 }
 0xc46   :  { %v8955_v14 = vrot.slane %v8933_v57, %v12098_v58  ;;  %v8962_v20 = vrot.slane %v10391_v55, %v12098_v58  ;;  %v8963_v63 = vcombine.low %v8941_v47, %v8948_v41  ;;  %v8616_v24 = vrot.slane %v8366_v9, %v12098_v58 }
 0xc47   :  { %v8604_v10 = vrot.slane %v8576_v17, %v12098_v58  ;;  %v8980_v37 = vcombine.low %v8583_v62, %v8597_v61  ;;  %v10392_v50 = vcombine.high %v8583_v62, %v8597_v61  ;;  %v8623_v60 = vrot.slane %v8609_v42, %v12098_v58  ;;  %v8371_v15 = vpop.f32.mrf.mxu0 }
 0xc48   :  { %v8964_v19 = vcombine.low %v8955_v14, %v8962_v20  ;;  %v8971_v22 = vrot.slane %v8963_v63, %v12098_v58  ;;  %v8624_v44 = vcombine.high %v8616_v24, %v8616_v24  ;;  %v8632_v48 = vrot.slane %v8616_v24, %v12098_v58 }
 0xc49   :  { %v8982_v18 = vcombine.low %v8590_v26, %v8604_v10  ;;  %v10393_v6 = vcombine.high %v8590_v26, %v8604_v10  ;;  %v8990_v8 = vrot.slane %v8980_v37, %v12098_v58  ;;  %v8997_v4 = vrot.slane %v10392_v50, %v12098_v58  ;;  %v11256_v35 = vpop.f32.mrf.mxu0 }
 0xc4a   :  { %v8978_v29 = vrot.slane %v8964_v19, %v12098_v58  ;;  %v8625_v46 = vcombine.high %v8623_v60, %v8623_v60  ;;  %v8639_v0 = vrot.slane %v8623_v60, %v12098_v58  ;;  %v8646_v5 = vrot.slane %v8624_v44, %v12098_v58 }
 0xc4b   :  { %v9004_v59 = vrot.slane %v8982_v18, %v12098_v58  ;;  %v9011_v43 = vrot.slane %v10393_v6, %v12098_v58  ;;  %v9012_v32 = vcombine.low %v8990_v8, %v8997_v4  ;;  %v8658_v28 = vcombine.high %v8371_v15, %v8371_v15  ;;  %v8376_v36 = vpop.f32.mrf.mxu0 }
 0xc4c   :  { %v8979_v16 = vcombine.low %v8971_v22, %v8978_v29  ;;  %v8653_v27 = vrot.slane %v8625_v46, %v12098_v58  ;;  %v9029_v31 = vcombine.low %v8632_v48, %v8646_v5  ;;  %v10394_v33 = vcombine.high %v8632_v48, %v8646_v5 }
 0xc4d   :  { %v9013_v51 = vcombine.low %v9004_v59, %v9011_v43  ;;  %v8665_v13 = vrot.slane %v8371_v15, %v12098_v58  ;;  %v8672_v38 = vrot.slane %v8658_v28, %v12098_v58  ;;  %v11259_v54 = vpop.f32.mrf.mxu0  ;;  %v9020_v30 = vrot.slane %v9012_v32, %v12098_v58 }
 0xc4e   :  { %v9031_v12 = vcombine.low %v8639_v0, %v8653_v27  ;;  %v10395_v7 = vcombine.high %v8639_v0, %v8653_v27  ;;  %v9039_v39 = vrot.slane %v9029_v31, %v12098_v58  ;;  %v9046_v56 = vrot.slane %v10394_v33, %v12098_v58  ;;  %11288 = vmatmul.mubr.msk.f32.vlgmr.msra.gmra.mxu0 %vm2325_vm3, %v8979_v16 }
 0xc4f   :  { %v9027_v34 = vrot.slane %v9013_v51, %v12098_v58  ;;  %v8673_v1 = vcombine.high %v8665_v13, %v8665_v13  ;;  %v8674_v62 = vcombine.high %v8672_v38, %v8672_v38  ;;  %11290 = vmatprep.mubr.msk.f32.mxu0 %vm11666_vm2, %v15205_v21  ;;  %v8681_v47 = vrot.slane %v8665_v13, %v12098_v58 }
 0xc50   :  { %v9053_v9 = vrot.slane %v9031_v12, %v12098_v58  ;;  %v9060_v57 = vrot.slane %v10395_v7, %v12098_v58  ;;  %v9061_v55 = vcombine.low %v9039_v39, %v9046_v56  ;;  %v8688_v41 = vrot.slane %v8672_v38, %v12098_v58 }
 0xc51   :  { %v8695_v17 = vrot.slane %v8673_v1, %v12098_v58  ;;  %v8702_v26 = vrot.slane %v8674_v62, %v12098_v58  ;;  %v9028_v61 = vcombine.low %v9020_v30, %v9027_v34  ;;  %v8713_v8 = vrot.slane %v8376_v36, %v12098_v58 }
 0xc52   :  { %v9062_v42 = vcombine.low %v9053_v9, %v9060_v57  ;;  %v9069_v24 = vrot.slane %v9061_v55, %v12098_v58 }
 0xc53   :  { %v9078_v2 = vcombine.low %v8681_v47, %v8695_v17  ;;  %v10396_v14 = vcombine.high %v8681_v47, %v8695_v17  ;;  %v9080_v20 = vcombine.low %v8688_v41, %v8702_v26  ;;  %v10397_v63 = vcombine.high %v8688_v41, %v8702_v26  ;;  %11291 = vmatmul.mubr.msk.f32.gmra.mxu0 %vm2325_vm3, %v9028_v61 }
 0xc54   :  { %v9076_v10 = vrot.slane %v9062_v42, %v12098_v58  ;;  %11293 = vmatprep.mubr.msk.f32.mxu0 %vm11666_vm2, %v15205_v21  ;;  %v8720_v43 = vrot.slane %v8713_v8, %v12098_v58 }
 0xc55   :  { %v9088_v37 = vrot.slane %v9078_v2, %v12098_v58  ;;  %v9095_v50 = vrot.slane %v10396_v14, %v12098_v58  ;;  %v9102_v60 = vrot.slane %v9080_v20, %v12098_v58  ;;  %v9109_v15 = vrot.slane %v10397_v63, %v12098_v58 }
 0xc56   :  { %v9077_v19 = vcombine.low %v9069_v24, %v9076_v10 }
 0xc57   :  { %v9110_v22 = vcombine.low %v9088_v37, %v9095_v50  ;;  %v9111_v44 = vcombine.low %v9102_v60, %v9109_v15 }
 0xc58   :  { %11294 = vmatmul.mubr.msk.f32.gmra.mxu0 %vm2325_vm3, %v9077_v19 }
 0xc59   :  { %v9118_v48 = vrot.slane %v9110_v22, %v12098_v58  ;;  %v9125_v18 = vrot.slane %v9111_v44, %v12098_v58  ;;  %11296 = vmatprep.mubr.msk.f32.mxu0 %vm11666_vm2, %v15205_v21 }
 0xc5b   :  { %v9126_v6 = vcombine.low %v9118_v48, %v9125_v18 }
 0xc5d   :  { %11297 = vmatmul.mubr.msk.f32.gmra.mxu0 %vm2325_vm3, %v9126_v6 }
 0xc5e   :  { %11299 = vmatprep.mubr.msk.f32.mxu0 %vm11666_vm2, %v15205_v21 }
 0xc7b   :  { %v8477_v4 = vpop.f32.mrf.mxu1 }
 0xc7c   :  { %v8721_v35 = vcombine.high %v8477_v4, %v8477_v4  ;;  %v8728_v29 = vrot.slane %v8477_v4, %v12098_v58 }
 0xc7d   :  { %v11272_v46 = vpop.f32.mrf.mxu1 }
 0xc7e   :  { %v8735_v0 = vrot.slane %v8721_v35, %v12098_v58  ;;  %v8736_v5 = vcombine.high %v8728_v29, %v8728_v29  ;;  %v8744_v59 = vrot.slane %v8728_v29, %v12098_v58 }
 0xc7f   :  { %v8482_v32 = vpop.f32.mrf.mxu1 }
 0xc80   :  { %v8737_v28 = vcombine.high %v8735_v0, %v8735_v0  ;;  %v8751_v16 = vrot.slane %v8735_v0, %v12098_v58  ;;  %v8758_v27 = vrot.slane %v8736_v5, %v12098_v58  ;;  %v8766_v31 = vcombine.high %v8744_v59, %v8744_v59 }
 0xc81   :  { %v9127_v36 = vcombine.low %v8720_v43, %v8744_v59  ;;  %v8770_v33 = vcombine.high %v8482_v32, %v8482_v32  ;;  %v8777_v51 = vrot.slane %v8482_v32, %v12098_v58  ;;  %v11275_v13 = vpop.f32.mrf.mxu1 }
 0xc82   :  { %v8765_v38 = vrot.slane %v8737_v28, %v12098_v58  ;;  %v8767_v54 = vcombine.high %v8751_v16, %v8751_v16  ;;  %v8768_v12 = vcombine.high %v8758_v27, %v8758_v27  ;;  %v9128_v7 = vcombine.low %v8758_v27, %v8766_v31 }
 0xc83   :  { %v9137_v39 = vrot.slane %v9127_v36, %v12098_v58  ;;  %v8784_v56 = vrot.slane %v8770_v33, %v12098_v58  ;;  %v8785_v30 = vcombine.high %v8777_v51, %v8777_v51  ;;  %v8793_v34 = vrot.slane %v8777_v51, %v12098_v58  ;;  %v8487_v1 = vpop.f32.mrf.mxu1 }
 0xc84   :  { %v9129_v62 = vcombine.low %v8768_v12, %v8751_v16  ;;  %v9130_v9 = vcombine.low %v8765_v38, %v8767_v54  ;;  %v9144_v57 = vrot.slane %v9128_v7, %v12098_v58  ;;  %v8769_v55 = vcombine.high %v8765_v38, %v8765_v38 }
 0xc85   :  { %v8786_v47 = vcombine.high %v8784_v56, %v8784_v56  ;;  %v8800_v41 = vrot.slane %v8784_v56, %v12098_v58  ;;  %v8807_v17 = vrot.slane %v8785_v30, %v12098_v58  ;;  %v8815_v26 = vcombine.high %v8793_v34, %v8793_v34  ;;  %v11278_v61 = vpop.f32.mrf.mxu1 }
 0xc86   :  { %v9151_v42 = vrot.slane %v9129_v62, %v12098_v58  ;;  %v9158_v2 = vrot.slane %v9130_v9, %v12098_v58  ;;  %v9159_v14 = vcombine.low %v9137_v39, %v9144_v57  ;;  %v9176_v20 = vcombine.low %v8769_v55, %v8793_v34 }
 0xc87   :  { %v8814_v63 = vrot.slane %v8786_v47, %v12098_v58  ;;  %v8816_v24 = vcombine.high %v8800_v41, %v8800_v41  ;;  %v8817_v10 = vcombine.high %v8807_v17, %v8807_v17  ;;  %v9177_v37 = vcombine.low %v8807_v17, %v8815_v26  ;;  %v8492_v50 = vpop.f32.mrf.mxu1 }
 0xc88   :  { %v9160_v60 = vcombine.low %v9151_v42, %v9158_v2  ;;  %v9167_v15 = vrot.slane %v9159_v14, %v12098_v58  ;;  %v8819_v19 = vcombine.high %v8487_v1, %v8487_v1  ;;  %v9186_v48 = vrot.slane %v9176_v20, %v12098_v58 }
 0xc89   :  { %v9178_v22 = vcombine.low %v8817_v10, %v8800_v41  ;;  %v9179_v44 = vcombine.low %v8814_v63, %v8816_v24  ;;  %v9193_v18 = vrot.slane %v9177_v37, %v12098_v58  ;;  %v11281_v6 = vpop.f32.mrf.mxu1  ;;  %v8818_v8 = vcombine.high %v8814_v63, %v8814_v63 }
 0xc8a   :  { %v8826_v4 = vrot.slane %v8487_v1, %v12098_v58  ;;  %v8833_v35 = vrot.slane %v8819_v19, %v12098_v58  ;;  %v8868_v29 = vcombine.high %v8492_v50, %v8492_v50  ;;  %v9174_v46 = vrot.slane %v9160_v60, %v12098_v58 }
 0xc8b   :  { %v9200_v0 = vrot.slane %v9178_v22, %v12098_v58  ;;  %v9207_v5 = vrot.slane %v9179_v44, %v12098_v58  ;;  %v8875_v59 = vrot.slane %v8492_v50, %v12098_v58  ;;  %v8497_v27 = vpop.f32.mrf.mxu1  ;;  %v9208_v31 = vcombine.low %v9186_v48, %v9193_v18 }
 0xc8c   :  { %v8834_v43 = vcombine.high %v8826_v4, %v8826_v4  ;;  %v8835_v32 = vcombine.high %v8833_v35, %v8833_v35  ;;  %v8842_v28 = vrot.slane %v8826_v4, %v12098_v58  ;;  %v8849_v16 = vrot.slane %v8833_v35, %v12098_v58 }
 0xc8d   :  { %v9209_v36 = vcombine.low %v9200_v0, %v9207_v5  ;;  %v8882_v33 = vrot.slane %v8868_v29, %v12098_v58  ;;  %v8883_v51 = vcombine.high %v8875_v59, %v8875_v59  ;;  %v11284_v7 = vpop.f32.mrf.mxu1  ;;  %v8891_v34 = vrot.slane %v8875_v59, %v12098_v58 }
 0xc8e   :  { %v8856_v13 = vrot.slane %v8834_v43, %v12098_v58  ;;  %v8863_v38 = vrot.slane %v8835_v32, %v12098_v58  ;;  %v8864_v54 = vcombine.high %v8842_v28, %v8842_v28  ;;  %v8865_v12 = vcombine.high %v8849_v16, %v8849_v16  ;;  %v11656_v7 = vld [vmem:[%s15145_s9] sm:$0xff] }
 0xc8f   :  { %v9223_v39 = vrot.slane %v9209_v36, %v12098_v58  ;;  %v9225_v56 = vcombine.low %v8818_v8, %v8842_v28  ;;  %v8884_v30 = vcombine.high %v8882_v33, %v8882_v33  ;;  %v8898_v47 = vrot.slane %v8882_v33, %v12098_v58  ;;  %v15270_v33 = vld [vmem:[#allocation2_spill] sm:$0xff] }
 0xc90   :  { %v8866_v1 = vcombine.high %v8856_v13, %v8856_v13  ;;  %v9226_v62 = vcombine.low %v8856_v13, %v8864_v54  ;;  %v9228_v9 = vcombine.low %v8863_v38, %v8865_v12  ;;  %v8867_v57 = vcombine.high %v8863_v38, %v8863_v38  ;;  %v14702_v54 = vld [vmem:[%s15147_s8] sm:$0xff] }
 0xc91   :  { %v9235_v55 = vrot.slane %v9225_v56, %v12098_v58  ;;  %v8905_v41 = vrot.slane %v8883_v51, %v12098_v58  ;;  %v8912_v17 = vrot.slane %v8884_v30, %v12098_v58  ;;  %v8913_v2 = vcombine.high %v8891_v34, %v8891_v34 }
 0xc92   :  { %v9227_v26 = vcombine.low %v8866_v1, %v8849_v16  ;;  %v9242_v61 = vrot.slane %v9226_v62, %v12098_v58  ;;  %v9256_v42 = vrot.slane %v9228_v9, %v12098_v58  ;;  %v8914_v14 = vcombine.high %v8898_v47, %v8898_v47  ;;  %v11657_v62 = vld [vmem:[%s15145_s9 + $0x8] sm:$0xff] }
 0xc93   :  { %v8915_v20 = vcombine.high %v8905_v41, %v8905_v41  ;;  %v9274_v63 = vcombine.low %v8867_v57, %v8891_v34  ;;  %v9175_v24 = vcombine.low %v9167_v15, %v9174_v46  ;;  %v9216_v10 = vrot.slane %v9208_v31, %v12098_v58 }
 0xc94   :  { %v9249_v37 = vrot.slane %v9227_v26, %v12098_v58  ;;  %v9257_v50 = vcombine.low %v9235_v55, %v9242_v61  ;;  %v9275_v60 = vcombine.low %v8905_v41, %v8913_v2  ;;  %v9277_v22 = vcombine.low %v8912_v17, %v8914_v14 }
 0xc95   :  { %v9276_v19 = vcombine.low %v8915_v20, %v8898_v47  ;;  %v9284_v44 = vrot.slane %v9274_v63, %v12098_v58  ;;  %11300 = vmatmul.mubr.msk.f32.gmra.mxu0 %vm2325_vm3, %v9175_v24  ;;  %v8923_v48 = vrot.slane %v8497_v27, %v12098_v58  ;;  %v9224_v15 = vcombine.low %v9216_v10, %v9223_v39  ;;  %v11659_v20 = vld [vmem:[%s15145_s9 + $0x18] sm:$0xff] }
 0xc96   :  { %v9258_v18 = vcombine.low %v9249_v37, %v9256_v42  ;;  %v9291_v6 = vrot.slane %v9275_v60, %v12098_v58  ;;  %11302 = vmatprep.mubr.msk.f32.mxu0 %vm11666_vm2, %v15205_v21  ;;  %v9305_v4 = vrot.slane %v9277_v22, %v12098_v58  ;;  %v8916_v35 = vcombine.high %v8912_v17, %v8912_v17  ;;  %v11658_v17 = vld [vmem:[%s15145_s9 + $0x10] sm:$0xff]  ;;  %v11660_v60 = vld [vmem:[%s15145_s9 + $0x20] sm:$0xff] }
 0xc97   :  { %v9298_v8 = vrot.slane %v9276_v19, %v12098_v58  ;;  %v8930_v29 = vrot.slane %v8923_v48, %v12098_v58  ;;  %v9265_v46 = vrot.slane %v9257_v50, %v12098_v58  ;;  %v9486_v51 = vsub.s32 5, %v15270_v33 }
 0xc98   :  { %v9272_v0 = vrot.slane %v9258_v18, %v12098_v58  ;;  %v9306_v5 = vcombine.low %v9284_v44, %v9291_v6  ;;  %v11661_v6 = vld [vmem:[%s15145_s9 + $0x28] sm:$0xff] }
 0xc99   :  { %v9307_v59 = vcombine.low %v9298_v8, %v9305_v4  ;;  %v9323_v43 = vcombine.low %v8916_v35, %v8930_v29  ;;  %11303 = vmatmul.mubr.msk.f32.gmra.mxu0 %vm2325_vm3, %v9224_v15 }
 0xc9a   :  { %11305 = vmatprep.mubr.msk.f32.mxu0 %vm11666_vm2, %v15205_v21  ;;  %v9273_v32 = vcombine.low %v9265_v46, %v9272_v0  ;;  %v9314_v28 = vrot.slane %v9306_v5, %v12098_v58 }
 0xc9b   :  { %v9321_v16 = vrot.slane %v9307_v59, %v12098_v58  ;;  %v9330_v27 = vrot.slane %v9323_v43, %v12098_v58 }
 0xc9d   :  { %11306 = vmatmul.mubr.msk.f32.gmra.mxu0 %vm2325_vm3, %v9273_v32  ;;  %v9322_v31 = vcombine.low %v9314_v28, %v9321_v16  ;;  %v9337_v36 = vrot.slane %v9330_v27, %v12098_v58  ;;  %v14705_v58 = vrot.slane %v14702_v54, %v9486_v51 }
 0xc9e   :  { %11308 = vmatprep.mubr.msk.f32.mxu0 %vm11666_vm2, %v15205_v21 }
 0xca1   :  { %11309 = vmatmul.mubr.msk.f32.gmra.mxu0 %vm2325_vm3, %v9322_v31 }
 0xca2   :  { %11311 = vmatprep.mubr.msk.f32.mxu0 %vm11666_vm2, %v15205_v21 }
 0xca5   :  { %11312 = vmatmul.mubr.msk.f32.gmra.mxu0 %vm2325_vm3, %v9337_v36 }
 0xca6   :  { %11381 = vmatprep.mubr.msk.f32.mxu0 %vm11666_vm2, %v15205_v21 }
 0xd0e   :  { %v9422_v13 = vpop.f32.mrf.mxu0 }
 0xd0f   :  { %v9466_v38 = vadd.f32 %v9422_v13, %v14534_v40 }
 0xd10   :  { %v11289_v12 = vpop.f32.mrf.mxu0 }
 0xd11   :  { %v9475_v39 = vadd.f32 %v11656_v7, %v9466_v38 }
 0xd13   :  { %v14711_v56 = vadd.f32 %v14705_v58, %v9475_v39  ;;  %v9427_v30 = vpop.f32.mrf.mxu0 }
 0xd14   :  { %v9467_v40 = vadd.f32 %v9427_v30, %v14538_v3 }
 0xd15   :  { %v11292_v34 = vpop.f32.mrf.mxu0  ;;  %v9497_v1 = vsel %vm63_vm0, %v14711_v56, 0.0 }
 0xd16   :  { %v9476_v9 = vadd.f32 %v11657_v62, %v9467_v40  ;;  %9498 = vadd.xlane.f32.xlu1 %v9497_v1 }
 0xd18   :  { %v14720_v57 = vadd.f32 %v14705_v58, %v9476_v9  ;;  %v9432_v55 = vpop.f32.mrf.mxu0 }
 0xd19   :  { %v9468_v47 = vadd.f32 %v9432_v55, %v14542_v49 }
 0xd1a   :  { %v11295_v41 = vpop.f32.mrf.mxu0  ;;  %v9500_v3 = vsel %vm63_vm0, %v14720_v57, 0.0 }
 0xd1b   :  { %v9477_v26 = vadd.f32 %v11658_v17, %v9468_v47  ;;  %9501 = vadd.xlane.f32.xlu0 %v9500_v3 }
 0xd1d   :  { %v14729_v61 = vadd.f32 %v14705_v58, %v9477_v26  ;;  %v9437_v42 = vpop.f32.mrf.mxu0 }
 0xd1e   :  { %v9469_v2 = vadd.f32 %v9437_v42, %v14546_v11 }
 0xd1f   :  { %v11298_v14 = vpop.f32.mrf.mxu0  ;;  %v9503_v49 = vsel %vm63_vm0, %v14729_v61, 0.0 }
 0xd20   :  { %v9478_v63 = vadd.f32 %v11659_v20, %v9469_v2  ;;  %9504 = vadd.xlane.f32.xlu0 %v9503_v49 }
 0xd22   :  { %v14738_v24 = vadd.f32 %v14705_v58, %v9478_v63  ;;  %v104_v63 = vld [vmem:[%s15151_s6 + $0x18] sm:$0xff] }
 0xd23   :  { %11315 = vmatpush3.msra.mxu1 %v104_v63 }
 0xd24   :  { %v9506_v10 = vsel %vm63_vm0, %v14738_v24, 0.0  ;;  %11316 = vmatprep.subr.mxu1 %v15205_v21 }
 0xd25   :  { %9507 = vadd.xlane.f32.xlu0 %v9506_v10  ;;  %v103_v10 = vld [vmem:[%s15151_s6 + $0x10] sm:$0xff] }
 0xd26   :  { %11317 = vmatpush3.msra.mxu1 %v103_v10 }
 0xd27   :  { %11318 = vmatprep.subr.mxu1 %v15205_v21 }
 0xd55   :  { %v9442_v37 = vpop.f32.mrf.mxu0 }
 0xd56   :  { %v9470_v11 = vadd.f32 %v9442_v37, %v14550_v53  ;;  %v102_v37 = vld [vmem:[%s15151_s6 + $0x8] sm:$0xff] }
 0xd57   :  { %v11301_v50 = vpop.f32.mrf.mxu0  ;;  %11319 = vmatpush3.msra.mxu1 %v102_v37 }
 0xd58   :  { %v9479_v19 = vadd.f32 %v11660_v60, %v9470_v11  ;;  %v101_v11 = vld [vmem:[%s15151_s6] sm:$0xff]  ;;  %11320 = vmatprep.subr.mxu1 %v15205_v21 }
 0xd59   :  { %v9447_v22 = vpop.f32.mrf.mxu0  ;;  %11321 = vmatpush3.msra.mxu1 %v101_v11 }
 0xd5a   :  { %v14747_v44 = vadd.f32 %v14705_v58, %v9479_v19  ;;  %v9471_v48 = vadd.f32 %v9447_v22, %v14554_v25  ;;  %v11662_v25 = vld [vmem:[%s15145_s9 + $0x30] sm:$0xff] }
 0xd5b   :  { %v11304_v18 = vpop.f32.mrf.mxu0 }
 0xd5c   :  { %v9480_v15 = vadd.f32 %v11661_v6, %v9471_v48  ;;  %v9509_v53 = vsel %vm63_vm0, %v14747_v44, 0.0 }
 0xd5d   :  { %9510 = vadd.xlane.f32.xlu0 %v9509_v53  ;;  %v9452_v8 = vpop.f32.mrf.mxu0 }
 0xd5e   :  { %v14756_v4 = vadd.f32 %v14705_v58, %v9480_v15  ;;  %v9472_v35 = vadd.f32 %v9452_v8, %v14558_v23  ;;  %v11663_v23 = vld [vmem:[%s15145_s9 + $0x38] sm:$0xff] }
 0xd5f   :  { %v11307_v29 = vpop.f32.mrf.mxu0 }
 0xd60   :  { %v9481_v46 = vadd.f32 %v11662_v25, %v9472_v35  ;;  %v9512_v0 = vsel %vm63_vm0, %v14756_v4, 0.0 }
 0xd61   :  { %9513 = vadd.xlane.f32.xlu0 %v9512_v0  ;;  %v9457_v5 = vpop.f32.mrf.mxu0 }
 0xd62   :  { %v14765_v59 = vadd.f32 %v14705_v58, %v9481_v46  ;;  %v9473_v43 = vadd.f32 %v9457_v5, %v14562_v52  ;;  %v11664_v52 = vld [vmem:[%s15145_s9 + $0x40] sm:$0x3] }
 0xd63   :  { %v11310_v32 = vpop.f32.mrf.mxu0 }
 0xd64   :  { %v9482_v28 = vadd.f32 %v11663_v23, %v9473_v43  ;;  %v9515_v16 = vsel %vm63_vm0, %v14765_v59, 0.0 }
 0xd65   :  { %9516 = vadd.xlane.f32.xlu1 %v9515_v16  ;;  %v9462_v27 = vpop.f32.mrf.mxu0 }
 0xd66   :  { %v14774_v31 = vadd.f32 %v14705_v58, %v9482_v28  ;;  %v9474_v36 = vadd.f32 %v9462_v27, %v14566_v45 }
 0xd67   :  { %v11313_v51 = vpop.f32.mrf.mxu0 }
 0xd68   :  { %v9483_v13 = vadd.f32 %v11664_v52, %v9474_v36  ;;  %v9518_v38 = vsel %vm63_vm0, %v14774_v31, 0.0 }
 0xd69   :  { %9519 = vadd.xlane.f32.xlu0 %v9518_v38 }
 0xd6a   :  { %v14783_v12 = vadd.f32 %v14705_v58, %v9483_v13 }
 0xd6c   :  { %v9521_v7 = vsel %vm72_vm1, %v14783_v12, 0.0 }
 0xd6d   :  { %9522 = vadd.xlane.f32.xlu1 %v9521_v7 }
 0xd9f   :  { %v9499_v39 = vpop.xlane.xlu1 %9498 }
 0xda0   :  { %v9524_v30 = vmul.f32 0.03125, %v9499_v39 }
 0xda2   :  { %v14788_v45 = vsub.f32 %v14711_v56, %v9524_v30 }
 0xda4   :  { %v9502_v40 = vpop.xlane.xlu0 %9501  ;;  %v9542_v34 = vmul.f32 %v14788_v45, %v14788_v45 }
 0xda5   :  { %v9525_v1 = vmul.f32 0.03125, %v9502_v40 }
 0xda6   :  { %v9551_v62 = vsel %vm63_vm0, %v9542_v34, 0.0 }
 0xda7   :  { %v14794_v9 = vsub.f32 %v14720_v57, %v9525_v1  ;;  %9552 = vadd.xlane.f32.xlu0 %v9551_v62  ;;  %v9616_v62 = vsub.s32 6, %v15270_v33 }
 0xda9   :  { %v9505_v58 = vpop.xlane.xlu0 %9504  ;;  %v9543_v55 = vmul.f32 %v14794_v9, %v14794_v9 }
 0xdaa   :  { %v9526_v47 = vmul.f32 0.03125, %v9505_v58 }
 0xdab   :  { %v9554_v41 = vsel %vm63_vm0, %v9543_v55, 0.0  ;;  %v9629_v55 = vsub.s32 7, %v15270_v33 }
 0xdac   :  { %v14800_v3 = vsub.f32 %v14729_v61, %v9526_v47  ;;  %9555 = vadd.xlane.f32.xlu1 %v9554_v41 }
 0xdae   :  { %v9508_v17 = vpop.xlane.xlu0 %9507  ;;  %v9544_v26 = vmul.f32 %v14800_v3, %v14800_v3 }
 0xdaf   :  { %v9527_v42 = vmul.f32 0.03125, %v9508_v17  ;;  %v14859_v17 = vrot.slane %v14702_v54, %v9616_v62 }
 0xdb0   :  { %v9557_v2 = vsel %vm63_vm0, %v9544_v26, 0.0 }
 0xdb1   :  { %v14806_v14 = vsub.f32 %v14738_v24, %v9527_v42  ;;  %9558 = vadd.xlane.f32.xlu0 %v9557_v2  ;;  %v14862_v2 = vrot.slane %v14702_v54, %v9629_v55 }
 0xdb3   :  { %v9545_v49 = vmul.f32 %v14806_v14, %v14806_v14 }
 0xdb5   :  { %v9560_v20 = vsel %vm63_vm0, %v9545_v49, 0.0 }
 0xdb6   :  { %9561 = vadd.xlane.f32.xlu1 %v9560_v20 }
 0xde6   :  { %v9511_v50 = vpop.xlane.xlu0 %9510 }
 0xde7   :  { %v9528_v60 = vmul.f32 0.03125, %v9511_v50 }
 0xde9   :  { %v14827_v19 = vsub.f32 %v14747_v44, %v9528_v60 }
 0xdea   :  { %v9514_v22 = vpop.xlane.xlu0 %9513 }
 0xdeb   :  { %v9529_v48 = vmul.f32 0.03125, %v9514_v22  ;;  %v9546_v18 = vmul.f32 %v14827_v19, %v14827_v19 }
 0xded   :  { %v14832_v6 = vsub.f32 %v14756_v4, %v9529_v48  ;;  %v9563_v15 = vsel %vm63_vm0, %v9546_v18, 0.0 }
 0xdee   :  { %9564 = vadd.xlane.f32.xlu0 %v9563_v15  ;;  %v9517_v53 = vpop.xlane.xlu1 %9516 }
 0xdef   :  { %v9530_v8 = vmul.f32 0.03125, %v9517_v53  ;;  %v9547_v35 = vmul.f32 %v14832_v6, %v14832_v6 }
 0xdf1   :  { %v14838_v29 = vsub.f32 %v14765_v59, %v9530_v8  ;;  %v9566_v25 = vsel %vm63_vm0, %v9547_v35, 0.0 }
 0xdf2   :  { %v9520_v46 = vpop.xlane.xlu0 %9519  ;;  %9567 = vadd.xlane.f32.xlu1 %v9566_v25 }
 0xdf3   :  { %v9531_v0 = vmul.f32 0.03125, %v9520_v46  ;;  %v9548_v5 = vmul.f32 %v14838_v29, %v14838_v29 }
 0xdf5   :  { %v14844_v43 = vsub.f32 %v14774_v31, %v9531_v0  ;;  %v9569_v32 = vsel %vm63_vm0, %v9548_v5, 0.0 }
 0xdf6   :  { %9570 = vadd.xlane.f32.xlu0 %v9569_v32  ;;  %v9523_v23 = vpop.xlane.xlu1 %9522 }
 0xdf7   :  { %v9532_v28 = vmul.f32 0.03125, %v9523_v23  ;;  %v9549_v16 = vmul.f32 %v14844_v43, %v14844_v43 }
 0xdf9   :  { %v14850_v27 = vsub.f32 %v14783_v12, %v9532_v28  ;;  %v9572_v36 = vsel %vm63_vm0, %v9549_v16, 0.0 }
 0xdfa   :  { %9573 = vadd.xlane.f32.xlu1 %v9572_v36 }
 0xdfb   :  { %v9550_v51 = vmul.f32 %v14850_v27, %v14850_v27 }
 0xdfd   :  { %v9575_v52 = vsel %vm72_vm1, %v9550_v51, 0.0 }
 0xdfe   :  { %9576 = vadd.xlane.f32.xlu0 %v9575_v52 }
 0xe30   :  { %v9553_v13 = vpop.xlane.xlu0 %9552 }
 0xe31   :  { %v9578_v38 = vmul.f32 0.03125, %v9553_v13 }
 0xe33   :  { %v9587_v7 = vadd.f32 1e-05, %v9578_v38 }
 0xe35   :  { %11601 = vrsqrt.f32 %v9587_v7  ;;  %v9556_v39 = vpop.xlane.xlu1 %9555 }
 0xe36   :  { %v9579_v30 = vmul.f32 0.03125, %v9556_v39 }
 0xe38   :  { %v9588_v40 = vadd.f32 1e-05, %v9579_v30 }
 0xe3a   :  { %11603 = vrsqrt.f32 %v9588_v40  ;;  %v9559_v34 = vpop.xlane.xlu0 %9558 }
 0xe3b   :  { %v9580_v1 = vmul.f32 0.03125, %v9559_v34 }
 0xe3d   :  { %v9589_v58 = vadd.f32 1e-05, %v9580_v1 }
 0xe3f   :  { %11605 = vrsqrt.f32 %v9589_v58  ;;  %v9562_v47 = vpop.xlane.xlu1 %9561 }
 0xe40   :  { %v9581_v41 = vmul.f32 0.03125, %v9562_v47 }
 0xe42   :  { %v11602_v26 = vpop.eup %11601  ;;  %v9590_v42 = vadd.f32 1e-05, %v9581_v41 }
 0xe43   :  { %v9605_v49 = vmul.f32 %v11602_v26, %v14788_v45 }
 0xe44   :  { %11607 = vrsqrt.f32 %v9590_v42 }
 0xe45   :  { %v9618_v20 = vmul.f32 %v14859_v17, %v9605_v49  ;;  %v120_v49 = vld [vmem:[%s15152_s7 + $0x78] sm:$0xff] }
 0xe46   :  { %11350 = vmatpush3.msra.mxu0 %v120_v49 }
 0xe47   :  { %v11604_v63 = vpop.eup %11603  ;;  %v9631_v10 = vadd.f32 %v14862_v2, %v9618_v20  ;;  %11351 = vmatprep.subr.mxu0 %v15205_v21  ;;  %v116_v20 = vld [vmem:[%s15152_s7 + $0x58] sm:$0xff] }
 0xe48   :  { %v9606_v37 = vmul.f32 %v11604_v63, %v14794_v9  ;;  %v115_v63 = vld [vmem:[%s15152_s7 + $0x50] sm:$0xff] }
 0xe49   :  { %11323 = vmatmul.mubr.msk.f32.vlgmr.msra.gmra.mxu1 %vm63_vm0, %v9631_v10  ;;  %v114_v10 = vld [vmem:[%s15152_s7 + $0x48] sm:$0xff] }
 0xe4a   :  { %11325 = vmatprep.mubr.msk.f32.mxu1 %vm11666_vm2, %v15205_v21  ;;  %v9619_v11 = vmul.f32 %v14859_v17, %v9606_v37  ;;  %v113_v37 = vld [vmem:[%s15152_s7 + $0x40] sm:$0xff] }
 0xe4c   :  { %v11606_v50 = vpop.eup %11605  ;;  %v9632_v54 = vadd.f32 %v14862_v2, %v9619_v11  ;;  %v112_v11 = vld [vmem:[%s15152_s7 + $0x38] sm:$0xff] }
 0xe4d   :  { %v9607_v45 = vmul.f32 %v11606_v50, %v14800_v3  ;;  %v111_v50 = vld [vmem:[%s15152_s7 + $0x30] sm:$0xff] }
 0xe4e   :  { %11326 = vmatmul.mubr.msk.f32.gmra.mxu1 %vm63_vm0, %v9632_v54  ;;  %v110_v54 = vld [vmem:[%s15152_s7 + $0x28] sm:$0xff] }
 0xe4f   :  { %11328 = vmatprep.mubr.msk.f32.mxu1 %vm11666_vm2, %v15205_v21  ;;  %v9620_v60 = vmul.f32 %v14859_v17, %v9607_v45  ;;  %v109_v45 = vld [vmem:[%s15152_s7 + $0x20] sm:$0xff] }
 0xe51   :  { %v11608_v9 = vpop.eup %11607  ;;  %v9633_v22 = vadd.f32 %v14862_v2, %v9620_v60  ;;  %v108_v60 = vld [vmem:[%s15152_s7 + $0x18] sm:$0xff] }
 0xe52   :  { %v9608_v48 = vmul.f32 %v11608_v9, %v14806_v14  ;;  %v107_v9 = vld [vmem:[%s15152_s7 + $0x10] sm:$0xff] }
 0xe53   :  { %11329 = vmatmul.mubr.msk.f32.gmra.mxu1 %vm63_vm0, %v9633_v22  ;;  %v106_v22 = vld [vmem:[%s15152_s7 + $0x8] sm:$0xff] }
 0xe54   :  { %11331 = vmatprep.mubr.msk.f32.mxu1 %vm11666_vm2, %v15205_v21  ;;  %v9621_v18 = vmul.f32 %v14859_v17, %v9608_v48  ;;  %v105_v48 = vld [vmem:[%s15152_s7] sm:$0xff] }
 0xe56   :  { %v9634_v3 = vadd.f32 %v14862_v2, %v9621_v18  ;;  %v14982_v18 = vld [vmem:[%s15147_s8 + $0x8] sm:$0x3] }
 0xe58   :  { %11332 = vmatmul.mubr.msk.f32.gmra.mxu1 %vm63_vm0, %v9634_v3  ;;  %v15271_v3 = vsub.s32 0, %v15270_v33 }
 0xe59   :  { %11334 = vmatprep.mubr.msk.f32.mxu1 %vm11666_vm2, %v15205_v21 }
 0xe77   :  { %v9565_v15 = vpop.xlane.xlu0 %9564 }
 0xe78   :  { %v9582_v53 = vmul.f32 0.03125, %v9565_v15  ;;  %v14987_v15 = vrot.slane %v14982_v18, %v15271_v3 }
 0xe7a   :  { %v9591_v8 = vadd.f32 1e-05, %v9582_v53 }
 0xe7b   :  { %v9568_v35 = vpop.xlane.xlu1 %9567 }
 0xe7c   :  { %11609 = vrsqrt.f32 %v9591_v8  ;;  %v9583_v14 = vmul.f32 0.03125, %v9568_v35 }
 0xe7e   :  { %v9592_v25 = vadd.f32 1e-05, %v9583_v14 }
 0xe7f   :  { %v9571_v46 = vpop.xlane.xlu0 %9570 }
 0xe80   :  { %11611 = vrsqrt.f32 %v9592_v25  ;;  %v9584_v0 = vmul.f32 0.03125, %v9571_v46 }
 0xe82   :  { %v9593_v5 = vadd.f32 1e-05, %v9584_v0 }
 0xe83   :  { %v9574_v32 = vpop.xlane.xlu1 %9573 }
 0xe84   :  { %11613 = vrsqrt.f32 %v9593_v5  ;;  %v9585_v23 = vmul.f32 0.03125, %v9574_v32 }
 0xe86   :  { %v9594_v28 = vadd.f32 1e-05, %v9585_v23 }
 0xe87   :  { %v9577_v16 = vpop.xlane.xlu0 %9576 }
 0xe88   :  { %11615 = vrsqrt.f32 %v9594_v28  ;;  %v9586_v36 = vmul.f32 0.03125, %v9577_v16 }
 0xe89   :  { %v11610_v51 = vpop.eup %11609 }
 0xe8a   :  { %v9609_v52 = vmul.f32 %v11610_v51, %v14827_v19  ;;  %v9595_v13 = vadd.f32 1e-05, %v9586_v36 }
 0xe8c   :  { %11617 = vrsqrt.f32 %v9595_v13  ;;  %v9622_v38 = vmul.f32 %v14859_v17, %v9609_v52 }
 0xe8d   :  { %v11612_v7 = vpop.eup %11611 }
 0xe8e   :  { %v9610_v39 = vmul.f32 %v11612_v7, %v14832_v6  ;;  %v9635_v30 = vadd.f32 %v14862_v2, %v9622_v38 }
 0xe90   :  { %11335 = vmatmul.mubr.msk.f32.gmra.mxu1 %vm63_vm0, %v9635_v30  ;;  %v9623_v40 = vmul.f32 %v14859_v17, %v9610_v39 }
 0xe91   :  { %v11614_v34 = vpop.eup %11613  ;;  %11337 = vmatprep.mubr.msk.f32.mxu1 %vm11666_vm2, %v15205_v21 }
 0xe92   :  { %v9611_v1 = vmul.f32 %v11614_v34, %v14838_v29  ;;  %v9636_v19 = vadd.f32 %v14862_v2, %v9623_v40 }
 0xe94   :  { %11338 = vmatmul.mubr.msk.f32.gmra.mxu1 %vm63_vm0, %v9636_v19  ;;  %v9624_v62 = vmul.f32 %v14859_v17, %v9611_v1 }
 0xe95   :  { %v11616_v58 = vpop.eup %11615  ;;  %11340 = vmatprep.mubr.msk.f32.mxu1 %vm11666_vm2, %v15205_v21 }
 0xe96   :  { %v9612_v6 = vmul.f32 %v11616_v58, %v14844_v43  ;;  %v9637_v55 = vadd.f32 %v14862_v2, %v9624_v62 }
 0xe98   :  { %11341 = vmatmul.mubr.msk.f32.gmra.mxu1 %vm63_vm0, %v9637_v55  ;;  %v9625_v47 = vmul.f32 %v14859_v17, %v9612_v6 }
 0xe99   :  { %v11618_v41 = vpop.eup %11617  ;;  %11343 = vmatprep.mubr.msk.f32.mxu1 %vm11666_vm2, %v15205_v21 }
 0xe9a   :  { %v9613_v29 = vmul.f32 %v11618_v41, %v14850_v27  ;;  %v9638_v26 = vadd.f32 %v14862_v2, %v9625_v47  ;;  %v119_v27 = vld [vmem:[%s15152_s7 + $0x70] sm:$0xff] }
 0xe9b   :  { %11352 = vmatpush3.msra.mxu0 %v119_v27 }
 0xe9c   :  { %11344 = vmatmul.mubr.msk.f32.gmra.mxu1 %vm63_vm0, %v9638_v26  ;;  %v9626_v42 = vmul.f32 %v14859_v17, %v9613_v29  ;;  %v118_v17 = vld [vmem:[%s15152_s7 + $0x68] sm:$0xff]  ;;  %11353 = vmatprep.subr.mxu0 %v15205_v21 }
 0xe9d   :  { %11346 = vmatprep.mubr.msk.f32.mxu1 %vm11666_vm2, %v15205_v21  ;;  %11354 = vmatpush3.msra.mxu0 %v118_v17 }
 0xe9e   :  { %v9639_v43 = vadd.f32 %v14862_v2, %v9626_v42  ;;  %v117_v2 = vld [vmem:[%s15152_s7 + $0x60] sm:$0xff]  ;;  %11355 = vmatprep.subr.mxu0 %v15205_v21 }
 0xe9f   :  { %11356 = vmatpush3.msra.mxu0 %v117_v2 }
 0xea0   :  { %11347 = vmatmul.mubr.msk.f32.gmra.mxu1 %vm63_vm0, %v9639_v43  ;;  %11357 = vmatprep.subr.mxu0 %v15205_v21 }
 0xea1   :  { %11358 = vmatpush3.msra.mxu0 %v116_v20 }
 0xea2   :  { %11359 = vmatprep.subr.mxu0 %v15205_v21 }
 0xea3   :  { %11360 = vmatpush3.msra.mxu0 %v115_v63 }
 0xea4   :  { %11361 = vmatprep.subr.mxu0 %v15205_v21 }
 0xea5   :  { %11362 = vmatpush3.msra.mxu0 %v114_v10 }
 0xea6   :  { %11363 = vmatprep.subr.mxu0 %v15205_v21 }
 0xea7   :  { %11364 = vmatpush3.msra.mxu0 %v113_v37 }
 0xea8   :  { %11365 = vmatprep.subr.mxu0 %v15205_v21 }
 0xea9   :  { %11366 = vmatpush3.msra.mxu0 %v112_v11 }
 0xeaa   :  { %11367 = vmatprep.subr.mxu0 %v15205_v21 }
 0xeab   :  { %11368 = vmatpush3.msra.mxu0 %v111_v50 }
 0xeac   :  { %11369 = vmatprep.subr.mxu0 %v15205_v21 }
 0xead   :  { %11370 = vmatpush3.msra.mxu0 %v110_v54 }
 0xeae   :  { %11371 = vmatprep.subr.mxu0 %v15205_v21 }
 0xeaf   :  { %11372 = vmatpush3.msra.mxu0 %v109_v45 }
 0xeb0   :  { %11373 = vmatprep.subr.mxu0 %v15205_v21 }
 0xeb1   :  { %11374 = vmatpush3.msra.mxu0 %v108_v60 }
 0xeb2   :  { %11375 = vmatprep.subr.mxu0 %v15205_v21 }
 0xeb3   :  { %11376 = vmatpush3.msra.mxu0 %v107_v9 }
 0xeb4   :  { %11377 = vmatprep.subr.mxu0 %v15205_v21 }
 0xeb5   :  { %11378 = vmatpush3.msra.mxu0 %v106_v22 }
 0xeb6   :  { %11379 = vmatprep.subr.mxu0 %v15205_v21 }
 0xeb7   :  { %11380 = vmatpush3.msra.mxu0 %v105_v48 }
 0xf09   :  { %v9737_v53 = vpop.f32.mrf.mxu1 }
 0xf0a   :  { %v14990_v8 = vadd.f32 %v9737_v53, %v14987_v15 }
 0xf0b   :  { %v11324_v35 = vpop.f32.mrf.mxu1 }
 0xf0c   :  { %v14993_v14 = vmul.f32 0.70710677, %v14990_v8 }
 0xf0e   :  { %v9817_v25 = vand.u32 2147483647, %v14993_v14  ;;  %v9742_v46 = vpop.f32.mrf.mxu1  ;;  %vm9799_vm7 = vcmp.ge.f32.partialorder %v14993_v14, 0.0  ;;  %v9781_v14 = vmul.f32 0.5, %v14990_v8 }
 0xf0f   :  { %v14997_v0 = vadd.f32 %v9742_v46, %v14987_v15 }
 0xf10   :  { %v9826_v5 = vmul.f32 0.3275911, %v9817_v25  ;;  %v11327_v32 = vpop.f32.mrf.mxu1  ;;  %v9943_v34 = vsub.f32 0.0, %v9817_v25 }
 0xf11   :  { %v15000_v23 = vmul.f32 0.70710677, %v14997_v0 }
 0xf12   :  { %v9835_v28 = vadd.f32 1.0, %v9826_v5  ;;  %v9952_v55 = vmul.f32 %v9943_v34, %v9817_v25 }
 0xf13   :  { %v9818_v16 = vand.u32 2147483647, %v15000_v23  ;;  %v9747_v36 = vpop.f32.mrf.mxu1  ;;  %vm9800_vm8 = vcmp.ge.f32.partialorder %v15000_v23, 0.0  ;;  %v9782_v23 = vmul.f32 0.5, %v14997_v0 }
 0xf14   :  { %11619 = vrcp.f32 %v9835_v28  ;;  %v15004_v51 = vadd.f32 %v9747_v36, %v14987_v15  ;;  %v9961_v43 = vmul.f32 1.442695, %v9952_v55 }
 0xf15   :  { %v9827_v52 = vmul.f32 0.3275911, %v9818_v16  ;;  %v11330_v13 = vpop.f32.mrf.mxu1  ;;  %v9944_v47 = vsub.f32 0.0, %v9818_v16 }
 0xf16   :  { %v15007_v38 = vmul.f32 0.70710677, %v15004_v51 }
 0xf17   :  { %v9836_v7 = vadd.f32 1.0, %v9827_v52  ;;  %v9953_v49 = vmul.f32 %v9944_v47, %v9818_v16 }
 0xf18   :  { %v9819_v39 = vand.u32 2147483647, %v15007_v38  ;;  %v9752_v30 = vpop.f32.mrf.mxu1  ;;  %vm9801_vm9 = vcmp.ge.f32.partialorder %v15007_v38, 0.0  ;;  %v9783_v38 = vmul.f32 0.5, %v15004_v51 }
 0xf19   :  { %11621 = vrcp.f32 %v9836_v7  ;;  %v15011_v40 = vadd.f32 %v9752_v30, %v14987_v15  ;;  %v9963_v10 = vmul.f32 1.442695, %v9953_v49 }
 0xf1a   :  { %v9828_v1 = vmul.f32 0.3275911, %v9819_v39  ;;  %v11333_v19 = vpop.f32.mrf.mxu1  ;;  %v9945_v17 = vsub.f32 0.0, %v9819_v39 }
 0xf1b   :  { %v15014_v62 = vmul.f32 0.70710677, %v15011_v40 }
 0xf1c   :  { %v9837_v58 = vadd.f32 1.0, %v9828_v1  ;;  %v9954_v11 = vmul.f32 %v9945_v17, %v9819_v39 }
 0xf1d   :  { %v9820_v6 = vand.u32 2147483647, %v15014_v62  ;;  %vm9802_vm10 = vcmp.ge.f32.partialorder %v15014_v62, 0.0 }
 0xf1e   :  { %11623 = vrcp.f32 %v9837_v58  ;;  %v9965_v3 = vmul.f32 1.442695, %v9954_v11 }
 0xf1f   :  { %v9829_v41 = vmul.f32 0.3275911, %v9820_v6  ;;  %v9946_v54 = vsub.f32 0.0, %v9820_v6 }
 0xf21   :  { %v11620_v29 = vpop.eup %11619  ;;  %v9838_v26 = vadd.f32 1.0, %v9829_v41  ;;  %v9955_v35 = vmul.f32 %v9946_v54, %v9820_v6 }
 0xf22   :  { %v9862_v42 = vmul.f32 1.0614054, %v11620_v29 }
 0xf23   :  { %11625 = vrcp.f32 %v9838_v26  ;;  %v9967_v13 = vmul.f32 1.442695, %v9955_v35  ;;  %v11671_v26 = vmov -1.0  }
 0xf24   :  { %v9871_v27 = vadd.f32 -1.4531521, %v9862_v42  ;;  %11627 = vpow2.f32 %v9961_v43  ;;  %v9808_v42 = vsel %vm9799_vm7, 1.0, %v11671_v26 }
 0xf25   :  { %11629 = vpow2.f32 %v9963_v10 }
 0xf26   :  { %v11622_v2 = vpop.eup %11621  ;;  %v9880_v20 = vmul.f32 %v11620_v29, %v9871_v27  ;;  %11631 = vpow2.f32 %v9965_v3 }
 0xf27   :  { %v9863_v63 = vmul.f32 1.0614054, %v11622_v2  ;;  %11633 = vpow2.f32 %v9967_v13  ;;  %v9811_v13 = vsel %vm9802_vm10, 1.0, %v11671_v26 }
 0xf28   :  { %v9889_v37 = vadd.f32 1.4214138, %v9880_v20 }
 0xf29   :  { %v9872_v50 = vadd.f32 -1.4531521, %v9863_v63 }
 0xf2a   :  { %v9898_v45 = vmul.f32 %v11620_v29, %v9889_v37 }
 0xf2b   :  { %v11624_v60 = vpop.eup %11623  ;;  %v9881_v9 = vmul.f32 %v11622_v2, %v9872_v50 }
 0xf2c   :  { %v9907_v22 = vadd.f32 -0.28449672, %v9898_v45  ;;  %v9864_v48 = vmul.f32 1.0614054, %v11624_v60  ;;  %v9809_v45 = vsel %vm9800_vm8, 1.0, %v11671_v26 }
 0xf2d   :  { %v9890_v53 = vadd.f32 1.4214138, %v9881_v9 }
 0xf2e   :  { %v9916_v25 = vmul.f32 %v11620_v29, %v9907_v22  ;;  %v9873_v46 = vadd.f32 -1.4531521, %v9864_v48 }
 0xf2f   :  { %v9899_v5 = vmul.f32 %v11622_v2, %v9890_v53 }
 0xf30   :  { %v11626_v32 = vpop.eup %11625  ;;  %v9925_v28 = vadd.f32 0.2548296, %v9916_v25  ;;  %v9882_v16 = vmul.f32 %v11624_v60, %v9873_v46  ;;  %v9810_v46 = vsel %vm9801_vm9, 1.0, %v11671_v26 }
 0xf31   :  { %v9908_v36 = vadd.f32 -0.28449672, %v9899_v5  ;;  %v9865_v52 = vmul.f32 1.0614054, %v11626_v32  ;;  %v11628_v30 = vpop.eup %11627 }
 0xf32   :  { %v9934_v7 = vmul.f32 %v11620_v29, %v9925_v28  ;;  %v9891_v39 = vadd.f32 1.4214138, %v9882_v16  ;;  %v11630_v27 = vpop.eup %11629 }
 0xf33   :  { %v9917_v34 = vmul.f32 %v11622_v2, %v9908_v36  ;;  %v9874_v1 = vadd.f32 -1.4531521, %v9865_v52  ;;  %v11632_v22 = vpop.eup %11631 }
 0xf34   :  { %v9979_v19 = vmul.f32 %v11628_v30, %v9934_v7  ;;  %v9900_v58 = vmul.f32 %v11624_v60, %v9891_v39 }
 0xf35   :  { %v9926_v6 = vadd.f32 0.2548296, %v9917_v34  ;;  %v9883_v55 = vmul.f32 %v11626_v32, %v9874_v1 }
 0xf36   :  { %v9988_v47 = vsub.f32 1.0, %v9979_v19  ;;  %v9909_v41 = vadd.f32 -0.28449672, %v9900_v58 }
 0xf37   :  { %v9935_v43 = vmul.f32 %v11622_v2, %v9926_v6  ;;  %v9892_v49 = vadd.f32 1.4214138, %v9883_v55 }
 0xf38   :  { %v9997_v29 = vmul.f32 %v9988_v47, %v9808_v42  ;;  %v9918_v17 = vmul.f32 %v11624_v60, %v9909_v41 }
 0xf39   :  { %v9980_v20 = vmul.f32 %v11630_v27, %v9935_v43  ;;  %v9901_v63 = vmul.f32 %v11626_v32, %v9892_v49 }
 0xf3a   :  { %v10006_v10 = vadd.f32 1.0, %v9997_v29  ;;  %v9927_v37 = vadd.f32 0.2548296, %v9918_v17 }
 0xf3b   :  { %v9989_v11 = vsub.f32 1.0, %v9980_v20  ;;  %v9910_v50 = vadd.f32 -0.28449672, %v9901_v63 }
 0xf3c   :  { %v10015_v54 = vmul.f32 %v10006_v10, %v9781_v14  ;;  %v9936_v9 = vmul.f32 %v11624_v60, %v9927_v37  ;;  %v11634_v60 = vpop.eup %11633 }
 0xf3d   :  { %v9998_v2 = vmul.f32 %v9989_v11, %v9809_v45  ;;  %v9919_v48 = vmul.f32 %v11626_v32, %v9910_v50 }
 0xf3e   :  { %v9981_v3 = vmul.f32 %v11632_v22, %v9936_v9  ;;  %11382 = vmatmul.mubr.f32.vlgmr.msra.gmra.mxu0 %v10015_v54 }
 0xf3f   :  { %v10007_v53 = vadd.f32 1.0, %v9998_v2  ;;  %v9928_v35 = vadd.f32 0.2548296, %v9919_v48  ;;  %11384 = vmatprep.mubr.msk.f32.mxu0 %vm11666_vm2, %v15205_v21 }
 0xf40   :  { %v9990_v8 = vsub.f32 1.0, %v9981_v3 }
 0xf41   :  { %v10016_v25 = vmul.f32 %v10007_v53, %v9782_v23  ;;  %v9937_v5 = vmul.f32 %v11626_v32, %v9928_v35  ;;  %v9784_v32 = vmul.f32 0.5, %v15011_v40 }
 0xf42   :  { %v9999_v28 = vmul.f32 %v9990_v8, %v9810_v46 }
 0xf43   :  { %v9982_v16 = vmul.f32 %v11634_v60, %v9937_v5  ;;  %11385 = vmatmul.mubr.f32.gmra.mxu0 %v10016_v25 }
 0xf44   :  { %v10008_v36 = vadd.f32 1.0, %v9999_v28  ;;  %11387 = vmatprep.mubr.msk.f32.mxu0 %vm11666_vm2, %v15205_v21 }
 0xf45   :  { %v9991_v0 = vsub.f32 1.0, %v9982_v16 }
 0xf46   :  { %v10017_v52 = vmul.f32 %v10008_v36, %v9783_v38 }
 0xf47   :  { %v10000_v7 = vmul.f32 %v9991_v0, %v9811_v13 }
 0xf48   :  { %11388 = vmatmul.mubr.f32.gmra.mxu0 %v10017_v52 }
 0xf49   :  { %v10009_v39 = vadd.f32 1.0, %v10000_v7  ;;  %11390 = vmatprep.mubr.msk.f32.mxu0 %vm11666_vm2, %v15205_v21 }
 0xf4b   :  { %v10018_v62 = vmul.f32 %v10009_v39, %v9784_v32 }
 0xf4d   :  { %11391 = vmatmul.mubr.f32.gmra.mxu0 %v10018_v62 }
 0xf4e   :  { %11393 = vmatprep.mubr.msk.f32.mxu0 %vm11666_vm2, %v15205_v21 }
 0xf50   :  { %v9757_v51 = vpop.f32.mrf.mxu1 }
 0xf51   :  { %v15038_v30 = vadd.f32 %v9757_v51, %v14987_v15 }
 0xf52   :  { %v11336_v34 = vpop.f32.mrf.mxu1 }
 0xf53   :  { %v15041_v1 = vmul.f32 0.70710677, %v15038_v30 }
 0xf54   :  { %v9762_v19 = vpop.f32.mrf.mxu1 }
 0xf55   :  { %v9821_v40 = vand.u32 2147483647, %v15041_v1  ;;  %v15045_v58 = vadd.f32 %v9762_v19, %v14987_v15  ;;  %vm9803_vm11 = vcmp.ge.f32.partialorder %v15041_v1, 0.0 }
 0xf56   :  { %v11339_v6 = vpop.f32.mrf.mxu1 }
 0xf57   :  { %v9830_v55 = vmul.f32 0.3275911, %v9821_v40  ;;  %v15048_v47 = vmul.f32 0.70710677, %v15045_v58  ;;  %v9947_v45 = vsub.f32 0.0, %v9821_v40 }
 0xf58   :  { %v9767_v41 = vpop.f32.mrf.mxu1 }
 0xf59   :  { %v9839_v42 = vadd.f32 1.0, %v9830_v55  ;;  %v9822_v43 = vand.u32 2147483647, %v15048_v47  ;;  %v15052_v49 = vadd.f32 %v9767_v41, %v14987_v15  ;;  %v9956_v53 = vmul.f32 %v9947_v45, %v9821_v40 }
 0xf5a   :  { %v11342_v27 = vpop.f32.mrf.mxu1  ;;  %vm9804_vm12 = vcmp.ge.f32.partialorder %v15048_v47, 0.0 }
 0xf5b   :  { %11635 = vrcp.f32 %v9839_v42  ;;  %v9831_v29 = vmul.f32 0.3275911, %v9822_v43  ;;  %v15055_v17 = vmul.f32 0.70710677, %v15052_v49  ;;  %v9948_v35 = vsub.f32 0.0, %v9822_v43 }
 0xf5c   :  { %v9772_v20 = vpop.f32.mrf.mxu1 }
 0xf5d   :  { %v9840_v63 = vadd.f32 1.0, %v9831_v29  ;;  %v15058_v14 = vadd.f32 %v9772_v20, %v14987_v15  ;;  %v9823_v10 = vand.u32 2147483647, %v15055_v17  ;;  %v9957_v28 = vmul.f32 %v9948_v35, %v9822_v43 }
 0xf5e   :  { %v11345_v37 = vpop.f32.mrf.mxu1  ;;  %vm9805_vm13 = vcmp.ge.f32.partialorder %v15055_v17, 0.0 }
 0xf5f   :  { %11637 = vrcp.f32 %v9840_v63  ;;  %v9832_v11 = vmul.f32 0.3275911, %v9823_v10  ;;  %v15062_v50 = vmul.f32 0.70710677, %v15058_v14  ;;  %v9949_v38 = vsub.f32 0.0, %v9823_v10 }
 0xf60   :  { %v9777_v54 = vpop.f32.mrf.mxu1  ;;  %v9971_v7 = vmul.f32 1.442695, %v9957_v28 }
 0xf61   :  { %v15065_v9 = vadd.f32 %v9777_v54, %v14987_v15  ;;  %v9841_v22 = vadd.f32 1.0, %v9832_v11  ;;  %v9824_v2 = vand.u32 2147483647, %v15062_v50  ;;  %v9969_v15 = vmul.f32 1.442695, %v9956_v53 }
 0xf62   :  { %v11348_v48 = vpop.f32.mrf.mxu1  ;;  %v9958_v32 = vmul.f32 %v9949_v38, %v9823_v10  ;;  %vm9806_vm14 = vcmp.ge.f32.partialorder %v15062_v50, 0.0  ;;  %v9788_v50 = vmul.f32 0.5, %v15058_v14  ;;  %v15272_v14 = vsub.s32 1, %v15270_v33 }
 0xf63   :  { %v15069_v3 = vmul.f32 0.70710677, %v15065_v9  ;;  %11639 = vrcp.f32 %v9841_v22  ;;  %v9833_v23 = vmul.f32 0.3275911, %v9824_v2  ;;  %v9950_v39 = vsub.f32 0.0, %v9824_v2 }
 0xf64   :  { %v9973_v41 = vmul.f32 1.442695, %v9958_v32 }
 0xf65   :  { %v9825_v8 = vand.u32 2147483647, %v15069_v3  ;;  %v9842_v25 = vadd.f32 1.0, %v9833_v23  ;;  %v9959_v42 = vmul.f32 %v9950_v39, %v9824_v2  ;;  %vm9807_vm15 = vcmp.ge.f32.partialorder %v15069_v3, 0.0 }
 0xf67   :  { %v9834_v46 = vmul.f32 0.3275911, %v9825_v8  ;;  %11641 = vrcp.f32 %v9842_v25  ;;  %v9951_v6 = vsub.f32 0.0, %v9825_v8  ;;  %v9975_v45 = vmul.f32 1.442695, %v9959_v42 }
 0xf68   :  { %v11636_v5 = vpop.eup %11635  ;;  %v9785_v42 = vmul.f32 0.5, %v15038_v30 }
 0xf69   :  { %v9866_v60 = vmul.f32 1.0614054, %v11636_v5  ;;  %v9843_v16 = vadd.f32 1.0, %v9834_v46  ;;  %v9960_v11 = vmul.f32 %v9951_v6, %v9825_v8 }
 0xf6b   :  { %v9875_v36 = vadd.f32 -1.4531521, %v9866_v60  ;;  %11643 = vrcp.f32 %v9843_v16  ;;  %v9977_v2 = vmul.f32 1.442695, %v9960_v11 }
 0xf6c   :  { %v11638_v0 = vpop.eup %11637  ;;  %11645 = vpow2.f32 %v9969_v15 }
 0xf6d   :  { %v9884_v52 = vmul.f32 %v11636_v5, %v9875_v36  ;;  %v9867_v13 = vmul.f32 1.0614054, %v11638_v0  ;;  %11647 = vpow2.f32 %v9971_v7 }
 0xf6e   :  { %11649 = vpow2.f32 %v9973_v41 }
 0xf6f   :  { %v9893_v62 = vadd.f32 1.4214138, %v9884_v52  ;;  %v9876_v51 = vadd.f32 -1.4531521, %v9867_v13  ;;  %11651 = vpow2.f32 %v9975_v45 }
 0xf70   :  { %v11640_v34 = vpop.eup %11639  ;;  %11653 = vpow2.f32 %v9977_v2 }
 0xf71   :  { %v9902_v19 = vmul.f32 %v11636_v5, %v9893_v62  ;;  %v9885_v40 = vmul.f32 %v11638_v0, %v9876_v51  ;;  %v9868_v55 = vmul.f32 1.0614054, %v11640_v34 }
 0xf73   :  { %v9911_v43 = vadd.f32 -0.28449672, %v9902_v19  ;;  %v9894_v27 = vadd.f32 1.4214138, %v9885_v40  ;;  %v9877_v29 = vadd.f32 -1.4531521, %v9868_v55 }
 0xf74   :  { %v11642_v20 = vpop.eup %11641 }
 0xf75   :  { %v9920_v63 = vmul.f32 %v11636_v5, %v9911_v43  ;;  %v9903_v37 = vmul.f32 %v11638_v0, %v9894_v27  ;;  %v9886_v54 = vmul.f32 %v11640_v34, %v9877_v29  ;;  %v9869_v10 = vmul.f32 1.0614054, %v11642_v20 }
 0xf77   :  { %v9929_v22 = vadd.f32 0.2548296, %v9920_v63  ;;  %v9912_v48 = vadd.f32 -0.28449672, %v9903_v37  ;;  %v9895_v53 = vadd.f32 1.4214138, %v9886_v54 }
 0xf78   :  { %v11644_v23 = vpop.eup %11643  ;;  %v9878_v35 = vadd.f32 -1.4531521, %v9869_v10 }
 0xf79   :  { %v9938_v25 = vmul.f32 %v11636_v5, %v9929_v22  ;;  %v9921_v46 = vmul.f32 %v11638_v0, %v9912_v48  ;;  %v9870_v60 = vmul.f32 1.0614054, %v11644_v23  ;;  %v11646_v15 = vpop.eup %11645  ;;  %v9904_v28 = vmul.f32 %v11640_v34, %v9895_v53 }
 0xf7a   :  { %v9887_v16 = vmul.f32 %v11642_v20, %v9878_v35  ;;  %v11648_v62 = vpop.eup %11647  ;;  %v9812_v5 = vsel %vm9803_vm11, 1.0, %v11671_v26  ;;  %v9786_v48 = vmul.f32 0.5, %v15045_v58 }
 0xf7b   :  { %v9983_v8 = vmul.f32 %v11646_v15, %v9938_v25  ;;  %v9930_v38 = vadd.f32 0.2548296, %v9921_v46  ;;  %v9879_v36 = vadd.f32 -1.4531521, %v9870_v60  ;;  %v9913_v52 = vadd.f32 -0.28449672, %v9904_v28  ;;  %v11650_v11 = vpop.eup %11649 }
 0xf7c   :  { %v9896_v13 = vadd.f32 1.4214138, %v9887_v16  ;;  %v9814_v60 = vsel %vm9805_vm13, 1.0, %v11671_v26  ;;  %v9787_v16 = vmul.f32 0.5, %v15052_v49 }
 0xf7d   :  { %v9992_v7 = vsub.f32 1.0, %v9983_v8  ;;  %v9939_v32 = vmul.f32 %v11638_v0, %v9930_v38  ;;  %v9888_v39 = vmul.f32 %v11644_v23, %v9879_v36  ;;  %v9922_v51 = vmul.f32 %v11640_v34, %v9913_v52 }
 0xf7e   :  { %v9905_v19 = vmul.f32 %v11642_v20, %v9896_v13  ;;  %v9813_v0 = vsel %vm9804_vm12, 1.0, %v11671_v26 }
 0xf7f   :  { %v10001_v40 = vmul.f32 %v9992_v7, %v9812_v5  ;;  %v9984_v6 = vmul.f32 %v11648_v62, %v9939_v32  ;;  %v9897_v55 = vadd.f32 1.4214138, %v9888_v39  ;;  %v9931_v1 = vadd.f32 0.2548296, %v9922_v51 }
 0xf80   :  { %v9914_v41 = vadd.f32 -0.28449672, %v9905_v19  ;;  %v9816_v32 = vsel %vm9807_vm15, 1.0, %v11671_v26  ;;  %v9789_v62 = vmul.f32 0.5, %v15065_v9  ;;  %v10027_v51 = vrot.slane %v14982_v18, %v15272_v14 }
 0xf81   :  { %v10010_v43 = vadd.f32 1.0, %v10001_v40  ;;  %v9993_v27 = vsub.f32 1.0, %v9984_v6  ;;  %v9906_v29 = vmul.f32 %v11644_v23, %v9897_v55  ;;  %v9940_v63 = vmul.f32 %v11640_v34, %v9931_v1  ;;  %v11652_v34 = vpop.eup %11651 }
 0xf82   :  { %v9923_v37 = vmul.f32 %v11642_v20, %v9914_v41  ;;  %v11654_v58 = vpop.eup %11653 }
 0xf83   :  { %v10019_v54 = vmul.f32 %v10010_v43, %v9785_v42  ;;  %v10002_v10 = vmul.f32 %v9993_v27, %v9813_v0  ;;  %v9915_v45 = vadd.f32 -0.28449672, %v9906_v29  ;;  %v9985_v47 = vmul.f32 %v11650_v11, %v9940_v63 }
 0xf84   :  { %v9932_v22 = vadd.f32 0.2548296, %v9923_v37 }
 0xf85   :  { %v10011_v53 = vadd.f32 1.0, %v10002_v10  ;;  %v9924_v35 = vmul.f32 %v11644_v23, %v9915_v45  ;;  %11394 = vmatmul.mubr.f32.gmra.mxu0 %v10019_v54  ;;  %v9994_v30 = vsub.f32 1.0, %v9985_v47 }
 0xf86   :  { %v9941_v25 = vmul.f32 %v11642_v20, %v9932_v22  ;;  %11396 = vmatprep.mubr.msk.f32.mxu0 %vm11666_vm2, %v15205_v21  ;;  %v9815_v20 = vsel %vm9806_vm14, 1.0, %v11671_v26 }
 0xf87   :  { %v10020_v46 = vmul.f32 %v10011_v53, %v9786_v48  ;;  %v9933_v2 = vadd.f32 0.2548296, %v9924_v35  ;;  %v10003_v15 = vmul.f32 %v9994_v30, %v9814_v60 }
 0xf88   :  { %v9986_v17 = vmul.f32 %v11652_v34, %v9941_v25 }
 0xf89   :  { %v9942_v28 = vmul.f32 %v11644_v23, %v9933_v2  ;;  %11397 = vmatmul.mubr.f32.gmra.mxu0 %v10020_v46  ;;  %v10012_v8 = vadd.f32 1.0, %v10003_v15 }
 0xf8a   :  { %v9995_v38 = vsub.f32 1.0, %v9986_v17  ;;  %11399 = vmatprep.mubr.msk.f32.mxu0 %vm11666_vm2, %v15205_v21 }
 0xf8b   :  { %v9987_v36 = vmul.f32 %v11654_v58, %v9942_v28  ;;  %v10021_v52 = vmul.f32 %v10012_v8, %v9787_v16 }
 0xf8c   :  { %v10004_v13 = vmul.f32 %v9995_v38, %v9815_v20 }
 0xf8d   :  { %v9996_v7 = vsub.f32 1.0, %v9987_v36  ;;  %11400 = vmatmul.mubr.f32.gmra.mxu0 %v10021_v52 }
 0xf8e   :  { %v10013_v23 = vadd.f32 1.0, %v10004_v13  ;;  %11402 = vmatprep.mubr.msk.f32.mxu0 %vm11666_vm2, %v15205_v21 }
 0xf8f   :  { %v10005_v49 = vmul.f32 %v9996_v7, %v9816_v32 }
 0xf90   :  { %v10022_v39 = vmul.f32 %v10013_v23, %v9788_v50 }
 0xf91   :  { %v10014_v5 = vadd.f32 1.0, %v10005_v49 }
 0xf92   :  { %11403 = vmatmul.mubr.f32.gmra.mxu0 %v10022_v39 }
 0xf93   :  { %v10023_v3 = vmul.f32 %v10014_v5, %v9789_v62  ;;  %11405 = vmatprep.mubr.msk.f32.mxu0 %vm11666_vm2, %v15205_v21 }
 0xf96   :  { %11406 = vmatmul.mubr.f32.gmra.mxu0 %v10023_v3 }
 0xffe   :  { %v10094_v26 = vpop.f32.mrf.mxu0 }
 0xfff   :  { %v10095_v19 = vadd.f32 %v10094_v26, %v10027_v51 }
0x1000   :  { %v11383_v40 = vpop.f32.mrf.mxu0 }
0x1001   :  { %v10138_v6 = vadd.f32 %v10095_v19, %v14711_v56 }
0x1003   :  { %10147 = vst.msk [vmem:[%s15145_s9] sm:$0xff] %vm63_vm0, %v10138_v6  ;;  %v10099_v9 = vpop.f32.mrf.mxu0 }
0x1004   :  { %v10100_v55 = vadd.f32 %v10099_v9, %v10027_v51 }
0x1005   :  { %v11386_v1 = vpop.f32.mrf.mxu0 }
0x1006   :  { %v10139_v21 = vadd.f32 %v10100_v55, %v14720_v57 }
0x1008   :  { %10148 = vst.msk [vmem:[%s15145_s9 + $0x8] sm:$0xff] %vm63_vm0, %v10139_v21  ;;  %v10104_v33 = vpop.f32.mrf.mxu0 }
0x1009   :  { %v10105_v18 = vadd.f32 %v10104_v33, %v10027_v51 }
0x100a   :  { %v11389_v41 = vpop.f32.mrf.mxu0 }
0x100b   :  { %v10140_v56 = vadd.f32 %v10105_v18, %v14729_v61 }
0x100d   :  { %10149 = vst.msk [vmem:[%s15145_s9 + $0x10] sm:$0xff] %vm63_vm0, %v10140_v56  ;;  %v10109_v42 = vpop.f32.mrf.mxu0 }
0x100e   :  { %v10110_v43 = vadd.f32 %v10109_v42, %v10027_v51 }
0x100f   :  { %v11392_v27 = vpop.f32.mrf.mxu0 }
0x1010   :  { %v10141_v57 = vadd.f32 %v10110_v43, %v14738_v24 }
0x1012   :  { %10150 = vst.msk [vmem:[%s15145_s9 + $0x18] sm:$0xff] %vm63_vm0, %v10141_v57 }
0x1045   :  { %v10114_v29 = vpop.f32.mrf.mxu0 }
0x1046   :  { %v10115_v0 = vadd.f32 %v10114_v29, %v10027_v51 }
0x1047   :  { %v11395_v63 = vpop.f32.mrf.mxu0 }
0x1048   :  { %v10142_v61 = vadd.f32 %v10115_v0, %v14747_v44 }
0x1049   :  { %v10119_v37 = vpop.f32.mrf.mxu0 }
0x104a   :  { %10151 = vst.msk [vmem:[%s15145_s9 + $0x20] sm:$0xff] %vm63_vm0, %v10142_v61  ;;  %v10120_v11 = vadd.f32 %v10119_v37, %v10027_v51 }
0x104b   :  { %v11398_v54 = vpop.f32.mrf.mxu0 }
0x104c   :  { %v10143_v24 = vadd.f32 %v10120_v11, %v14756_v4 }
0x104d   :  { %v10124_v10 = vpop.f32.mrf.mxu0 }
0x104e   :  { %10152 = vst.msk [vmem:[%s15145_s9 + $0x28] sm:$0xff] %vm63_vm0, %v10143_v24  ;;  %v10125_v45 = vadd.f32 %v10124_v10, %v10027_v51 }
0x104f   :  { %v11401_v47 = vpop.f32.mrf.mxu0 }
0x1050   :  { %v10144_v44 = vadd.f32 %v10125_v45, %v14765_v59 }
0x1052   :  { %v10129_v22 = vpop.f32.mrf.mxu0  ;;  %10153 = vst.msk [vmem:[%s15145_s9 + $0x30] sm:$0xff] %vm63_vm0, %v10144_v44 }
0x1053   :  { %v10130_v48 = vadd.f32 %v10129_v22, %v10027_v51 }
0x1054   :  { %v11404_v53 = vpop.f32.mrf.mxu0 }
0x1055   :  { %v10145_v4 = vadd.f32 %v10130_v48, %v14774_v31 }
0x1056   :  { %v10134_v35 = vpop.f32.mrf.mxu0 }
0x1057   :  { %10154 = vst.msk [vmem:[%s15145_s9 + $0x38] sm:$0xff] %vm63_vm0, %v10145_v4  ;;  %v10135_v30 = vadd.f32 %v10134_v35, %v10027_v51 }
0x1058   :  { %v11407_v25 = vpop.f32.mrf.mxu0 }
0x1059   :  { %v10146_v59 = vadd.f32 %v10135_v30, %v14783_v12 }
0x105b   :  { %10155 = vst.msk [vmem:[%s15145_s9 + $0x40] sm:$0x3] %vm72_vm1, %v10146_v59 }

</bundles_post_ra>
